<compile_context>
chip_gen: v5e
topology: v5e:2x2
jax: 0.10.0
libtpu: 0.0.40
codegen_flags: <defaults>
</compile_context>

<pallas_src>
import functools

import jax
import jax.numpy as jnp
from jax import lax
from jax.experimental import pallas as pl
from jax.experimental.pallas import tpu as pltpu

EPS = 1e-5  # PyTorch BatchNorm2d default


def _vspec():
    # whole array resident in VMEM (shapes here are tiny)
    return pl.BlockSpec(memory_space=pltpu.MemorySpace.VMEM)


def _bn_relu(xf, gamma, beta):
    """Training-mode BatchNorm (batch mean, biased variance) + ReLU on (N, C), f32."""
    inv_n = 1.0 / float(xf.shape[0])
    s = jnp.sum(xf, axis=0, keepdims=True)
    ss = jnp.sum(xf * xf, axis=0, keepdims=True)
    mu = s * inv_n
    var = jnp.maximum(ss * inv_n - mu * mu, 0.0)      # clamp cancellation
    return jnp.maximum((xf - mu) * lax.rsqrt(var + EPS) * gamma + beta, 0.0)


def _fused_kernel(x_ref, wse1_ref, wse2_ref, g1_ref, b1_ref, wc1_ref,
                  g2_ref, b2_ref, w2_ref, g3_ref, b3_ref, wc3_ref, wsc_ref,
                  out_ref, a2p_ref, *, stride, has_shortcut):
    B, H, W, C = x_ref.shape
    _, _, _, P = a2p_ref.shape                        # P == planes
    _, HoWo, Cout = out_ref.shape
    N = B * H * W
    Ho = (H - 1) // stride + 1
    Wo = (W - 1) // stride + 1
    No = B * Ho * Wo
    bf16 = jnp.bfloat16

    # ---------------- single load of x (bf16 in HBM/VMEM, f32 working copy) --
    xf32 = x_ref[...].astype(jnp.float32)             # (B, H, W, C)

    # ---------------- SE branch: 4x4 adaptive pool -> single fc1 matmul ------
    # pool(1)/pool(2) are folded into wse1 on the host (H, W divisible by 4).
    h4, w4 = H // 4, W // 4
    inv_area = 1.0 / float(h4 * w4)
    regs = []
    for i in range(4):
        band = jnp.sum(xf32[:, i * h4:(i + 1) * h4, :, :], axis=1)        # (B, W, C)
        for j in range(4):
            regs.append(jnp.sum(band[:, j * w4:(j + 1) * w4, :], axis=1))  # (B, C)
    y16 = jnp.concatenate(regs, axis=-1) * inv_area                        # (B, 16C)
    hse = jnp.maximum(jnp.dot(y16.astype(bf16), wse1_ref[...],
                              preferred_element_type=jnp.float32), 0.0)    # (B, hid)
    pse = jax.nn.sigmoid(jnp.dot(hse.astype(bf16), wse2_ref[...],
                                 preferred_element_type=jnp.float32))      # (B, Cout)

    # ---------------- bn1 + relu ---------------------------------------------
    xf = xf32.reshape(N, C)
    out1 = _bn_relu(xf, g1_ref[...], b1_ref[...])                          # (N, C)

    # ---------------- shortcut -----------------------------------------------
    if has_shortcut:
        if stride == 1:
            sc_in = out1
        else:
            sc_in = out1.reshape(B, H, W, C)[:, ::stride, ::stride, :].reshape(No, C)
        sc = jnp.dot(sc_in.astype(bf16), wsc_ref[...],
                     preferred_element_type=jnp.float32)                   # (No, Cout)
    else:
        sc = xf        # identity path (implies stride == 1 and C == Cout)

    # ---------------- conv1 (1x1) + bn2 + relu -------------------------------
    h1 = jnp.dot(out1.astype(bf16), wc1_ref[...],
                 preferred_element_type=jnp.float32)                       # (N, P)
    a2 = _bn_relu(h1, g2_ref[...], b2_ref[...])

    # ---------------- conv2 (3x3, pad=1, stride) via bf16 padded scratch -----
    # Halo-only zeroing: one aligned row-strip store for the interior (with the
    # W halo concatenated in-value) + two zero halo rows.  No full zero fill.
    zc = jnp.zeros((B, H, 1, P), jnp.float32)
    a2w = jnp.concatenate([zc, a2.reshape(B, H, W, P), zc], axis=2).astype(bf16)
    a2p_ref[:, 1:H + 1, :, :] = a2w                                        # (B,H,W+2,P)
    zr = jnp.zeros((B, 1, W + 2, P), bf16)
    a2p_ref[:, 0:1, :, :] = zr
    a2p_ref[:, H + 1:H + 2, :, :] = zr

    # Taps fused along the contraction dim (K = 9P) into one MXU matmul.
    if stride == 1:
        taps = []
        for dy in range(3):
            rows = a2p_ref[:, dy:dy + Ho, :, :]                            # (B,Ho,W+2,P)
            for dx in range(3):
                taps.append(rows[:, :, dx:dx + Wo, :])                     # (B,Ho,Wo,P)
        tap_cat = jnp.concatenate(taps, axis=-1).reshape(No, 9 * P)        # bf16
        acc = jnp.dot(tap_cat, w2_ref[...],
                      preferred_element_type=jnp.float32)                  # (No, P)
    else:
        # TODO(synk): hoist a single W decimation per dy (or pack pairs via
        # bitcast) if the strided path becomes hot.
        acc = jnp.zeros((No, P), jnp.float32)
        for dy in range(3):
            rows = a2p_ref[:, pl.ds(dy, Ho, stride), :, :]                 # (B,Ho,W+2,P)
            taps = [lax.slice(rows, (0, 0, dx, 0),
                              (B, Ho, dx + (Wo - 1) * stride + 1, P),
                              (1, 1, stride, 1)) for dx in range(3)]
            tap_cat = jnp.concatenate(taps, axis=-1).reshape(No, 3 * P)
            acc = acc + jnp.dot(tap_cat, w2_ref[dy * 3 * P:(dy * 3 + 3) * P, :],
                                preferred_element_type=jnp.float32)

    # ---------------- bn3 + relu + conv3 (1x1) -------------------------------
    h3 = _bn_relu(acc, g3_ref[...], b3_ref[...])
    o = jnp.dot(h3.astype(bf16), wc3_ref[...],
                preferred_element_type=jnp.float32)                        # (No, Cout)

    # ---------------- SE gate + residual -------------------------------------
    o = o.reshape(B, HoWo, Cout) * pse.reshape(B, 1, Cout)
    o = o + sc.reshape(B, HoWo, Cout)
    out_ref[...] = o


def psppse_preact_bottleneck(x_nchw, params, *, stride=1):
    B, C, H, W = x_nchw.shape
    # NCHW -> NHWC and bf16 cast fused into one XLA pass at the HBM boundary.
    x = jnp.transpose(x_nchw, (0, 2, 3, 1)).astype(jnp.bfloat16)
    planes = params["wc1"].shape[1]
    cout = params["wc3"].shape[1]
    has_shortcut = (stride != 1) or (C != cout)
    Ho = (H - 1) // stride + 1
    Wo = (W - 1) // stride + 1
    # TODO(synk): PyTorch AdaptiveAvgPool2d uneven-bin behavior (H or W not
    # divisible by 4) is not implemented.
    assert H % 4 == 0 and W % 4 == 0

    # Fold pool(1)/pool(2) into the pool(4) rows of the SE fc1 weight
    # (pure host-side parameter plumbing; PyTorch flatten order is c*k*k+i*k+j).
    wfc1 = params["wfc1"].astype(jnp.float32)                              # (21C, hid)
    hid = wfc1.shape[1]
    w1a = wfc1[:C]                                                         # (C, hid)
    w1b = jnp.transpose(wfc1[C:5 * C].reshape(C, 2, 2, hid), (1, 2, 0, 3))  # (2,2,C,hid)
    w1c = jnp.transpose(wfc1[5 * C:].reshape(C, 4, 4, hid), (1, 2, 0, 3))   # (4,4,C,hid)
    w1b_up = jnp.repeat(jnp.repeat(w1b, 2, axis=0), 2, axis=1)             # (4,4,C,hid)
    w_eff = (w1c + 0.25 * w1b_up + (1.0 / 16.0) * w1a[None, None]).reshape(16 * C, hid)

    bf16 = jnp.bfloat16
    kernel = functools.partial(_fused_kernel, stride=stride, has_shortcut=has_shortcut)
    out = pl.pallas_call(
        kernel,
        out_shape=jax.ShapeDtypeStruct((B, Ho * Wo, cout), jnp.float32),
        in_specs=[_vspec()] * 13,
        out_specs=_vspec(),
        scratch_shapes=[
            pltpu.VMEM((B, H + 2, W + 2, planes), jnp.bfloat16),  # padded conv2 input
        ],
        compiler_params=pltpu.CompilerParams(vmem_limit_bytes=32 * 1024 * 1024),
    )(x,
      w_eff.astype(bf16), params["wfc2"].astype(bf16),
      params["g1"].reshape(1, C), params["b1"].reshape(1, C),
      params["wc1"].astype(bf16),
      params["g2"].reshape(1, planes), params["b2"].reshape(1, planes),
      params["wconv2"].reshape(9 * planes, planes).astype(bf16),
      params["g3"].reshape(1, planes), params["b3"].reshape(1, planes),
      params["wc3"].astype(bf16),
      params["wsc"].astype(bf16))

    return jnp.transpose(out.reshape(B, Ho, Wo, cout), (0, 3, 1, 2))       # back to NCHW


def init_params(key, in_planes, planes, reduction):
    cout = 4 * planes
    hidden = in_planes // reduction
    ks = jax.random.split(key, 12)
    n = lambda k, s, scale=0.1: (scale * jax.random.normal(k, s)).astype(jnp.float32)
    return dict(
        g1=(1.0 + n(ks[0], (in_planes,))).astype(jnp.float32),
        b1=n(ks[1], (in_planes,)),
        wc1=n(ks[2], (in_planes, planes), 0.2),            # conv1 1x1 (Cin, Cout)
        g2=(1.0 + n(ks[3], (planes,))).astype(jnp.float32),
        b2=n(ks[4], (planes,)),
        wconv2=n(ks[5], (3, 3, planes, planes), 0.2),      # conv2 3x3 (kh, kw, Cin, Cout)
        g3=(1.0 + n(ks[6], (planes,))).astype(jnp.float32),  # bn3 = BatchNorm2d(planes)
        b3=n(ks[7], (planes,)),
        wc3=n(ks[8], (planes, cout), 0.2),                 # conv3 1x1
        wsc=n(ks[9], (in_planes, cout), 0.2),              # shortcut 1x1
        wfc1=n(ks[10], (21 * in_planes, hidden), 0.2),     # SE fc1 (in=21C, out=hidden)
        wfc2=n(ks[11], (hidden, cout), 0.2),               # SE fc2
    )


def reference_forward(x_nchw, params, *, stride=1):
    """Plain-JAX f32 port of the PyTorch module (independent of the kernel)."""
    x = jnp.transpose(x_nchw, (0, 2, 3, 1)).astype(jnp.float32)
    B, H, W, C = x.shape
    planes = params["wc1"].shape[1]
    cout = params["wc3"].shape[1]

    def bn_relu(t, g, b):
        axes = tuple(range(t.ndim - 1))
        mu = jnp.mean(t, axis=axes, keepdims=True)
        var = jnp.mean((t - mu) ** 2, axis=axes, keepdims=True)
        return jnp.maximum((t - mu) * lax.rsqrt(var + EPS) * g + b, 0.0)

    def adaptive_pool_flat(t, k):
        r = t.reshape(B, k, H // k, k, W // k, C).mean(axis=(2, 4))        # (B,k,k,C)
        return jnp.transpose(r, (0, 3, 1, 2)).reshape(B, k * k * C)        # torch flatten

    y = jnp.concatenate([x.mean(axis=(1, 2)),
                         adaptive_pool_flat(x, 2),
                         adaptive_pool_flat(x, 4)], axis=1)
    pse = jax.nn.sigmoid(jnp.maximum(y @ params["wfc1"], 0.0) @ params["wfc2"])

    out1 = bn_relu(x, params["g1"], params["b1"])
    has_shortcut = (stride != 1) or (C != cout)
    sc = out1[:, ::stride, ::stride, :] @ params["wsc"] if has_shortcut else x
    a2 = bn_relu(out1 @ params["wc1"], params["g2"], params["b2"])
    a2p = jnp.pad(a2, ((0, 0), (1, 1), (1, 1), (0, 0)))
    Ho = (H - 1) // stride + 1
    Wo = (W - 1) // stride + 1
    acc = jnp.zeros((B, Ho, Wo, planes), jnp.float32)
    for dy in range(3):
        for dx in range(3):
            tap = a2p[:, dy:dy + (Ho - 1) * stride + 1:stride,
                         dx:dx + (Wo - 1) * stride + 1:stride, :]
            acc = acc + tap @ params["wconv2"][dy, dx]
    o = bn_relu(acc, params["g3"], params["b3"]) @ params["wc3"]
    o = o * pse[:, None, None, :] + sc
    return jnp.transpose(o, (0, 3, 1, 2))


if __name__ == "__main__":
    key = jax.random.PRNGKey(0)
    kx1, kp1, kx2, kp2 = jax.random.split(key, 4)

    # Config 1: projection-shortcut path (in_planes != 4*planes), stride=1.
    B, in_planes, H, W = 2, 16, 16, 16
    planes, stride, reduction = 8, 1, 4
    x1 = jax.random.normal(kx1, (B, in_planes, H, W), dtype=jnp.float32)
    p1 = init_params(kp1, in_planes, planes, reduction)
    out1 = jax.block_until_ready(psppse_preact_bottleneck(x1, p1, stride=stride))
    assert out1.shape == (B, 4 * planes, H, W), out1.shape
    assert bool(jnp.all(jnp.isfinite(out1)))
    err1 = float(jnp.max(jnp.abs(out1 - reference_forward(x1, p1, stride=stride))))
    assert err1 < 5e-2, f"mismatch vs reference: {err1}"

    # Config 2: identity-shortcut path (in_planes == 4*planes, stride=1).
    in_planes2, planes2 = 32, 8
    x2 = jax.random.normal(kx2, (B, in_planes2, H, W), dtype=jnp.float32)
    p2 = init_params(kp2, in_planes2, planes2, reduction)
    out2 = jax.block_until_ready(psppse_preact_bottleneck(x2, p2, stride=1))
    assert out2.shape == (B, 4 * planes2, H, W), out2.shape
    err2 = float(jnp.max(jnp.abs(out2 - reference_forward(x2, p2, stride=1))))
    assert err2 < 5e-2, f"mismatch vs reference: {err2}"

    print("KERNEL_OK")
</pallas_src>

<mosaic_0001>
module attributes {stable_mosaic.version = 11 : i64} {
  func.func @_fused_kernel(%arg0: memref<2x16x16x16xbf16, #tpu.memory_space<vmem>>, %arg1: memref<256x4xbf16, #tpu.memory_space<vmem>>, %arg2: memref<4x32xbf16, #tpu.memory_space<vmem>>, %arg3: memref<1x16xf32, #tpu.memory_space<vmem>>, %arg4: memref<1x16xf32, #tpu.memory_space<vmem>>, %arg5: memref<16x8xbf16, #tpu.memory_space<vmem>>, %arg6: memref<1x8xf32, #tpu.memory_space<vmem>>, %arg7: memref<1x8xf32, #tpu.memory_space<vmem>>, %arg8: memref<72x8xbf16, #tpu.memory_space<vmem>>, %arg9: memref<1x8xf32, #tpu.memory_space<vmem>>, %arg10: memref<1x8xf32, #tpu.memory_space<vmem>>, %arg11: memref<8x32xbf16, #tpu.memory_space<vmem>>, %arg12: memref<16x32xbf16, #tpu.memory_space<vmem>>, %arg13: memref<2x256x32xf32, #tpu.memory_space<vmem>>, %arg14: memref<2x18x18x8xbf16, #tpu.memory_space<vmem>>) attributes {dimension_semantics = [], scalar_prefetch = 0 : i64, scratch_operands = 1 : i64, tpu.core_type = #tpu.core_type<tc>} {
    %c0 = arith.constant 0 : index
    %c0_0 = arith.constant 0 : index
    %c0_1 = arith.constant 0 : index
    %c0_2 = arith.constant 0 : index
    %0 = vector.load %arg0[%c0, %c0_0, %c0_1, %c0_2] : memref<2x16x16x16xbf16, #tpu.memory_space<vmem>>, vector<2x16x16x16xbf16>
    %1 = arith.extf %0 : vector<2x16x16x16xbf16> to vector<2x16x16x16xf32>
    %2 = vector.extract_strided_slice %1 {offsets = [0, 0, 0, 0], sizes = [2, 4, 16, 16], strides = [1, 1, 1, 1]} : vector<2x16x16x16xf32> to vector<2x4x16x16xf32>
    %cst = arith.constant dense<0.000000e+00> : vector<2x16x16xf32>
    %3 = vector.multi_reduction <add>, %2, %cst [1] : vector<2x4x16x16xf32> to vector<2x16x16xf32>
    %4 = vector.extract_strided_slice %3 {offsets = [0, 0, 0], sizes = [2, 4, 16], strides = [1, 1, 1]} : vector<2x16x16xf32> to vector<2x4x16xf32>
    %cst_3 = arith.constant dense<0.000000e+00> : vector<2x16xf32>
    %5 = vector.multi_reduction <add>, %4, %cst_3 [1] : vector<2x4x16xf32> to vector<2x16xf32>
    %6 = vector.extract_strided_slice %3 {offsets = [0, 4, 0], sizes = [2, 4, 16], strides = [1, 1, 1]} : vector<2x16x16xf32> to vector<2x4x16xf32>
    %cst_4 = arith.constant dense<0.000000e+00> : vector<2x16xf32>
    %7 = vector.multi_reduction <add>, %6, %cst_4 [1] : vector<2x4x16xf32> to vector<2x16xf32>
    %8 = vector.extract_strided_slice %3 {offsets = [0, 8, 0], sizes = [2, 4, 16], strides = [1, 1, 1]} : vector<2x16x16xf32> to vector<2x4x16xf32>
    %cst_5 = arith.constant dense<0.000000e+00> : vector<2x16xf32>
    %9 = vector.multi_reduction <add>, %8, %cst_5 [1] : vector<2x4x16xf32> to vector<2x16xf32>
    %10 = vector.extract_strided_slice %3 {offsets = [0, 12, 0], sizes = [2, 4, 16], strides = [1, 1, 1]} : vector<2x16x16xf32> to vector<2x4x16xf32>
    %cst_6 = arith.constant dense<0.000000e+00> : vector<2x16xf32>
    %11 = vector.multi_reduction <add>, %10, %cst_6 [1] : vector<2x4x16xf32> to vector<2x16xf32>
    %12 = vector.extract_strided_slice %1 {offsets = [0, 4, 0, 0], sizes = [2, 4, 16, 16], strides = [1, 1, 1, 1]} : vector<2x16x16x16xf32> to vector<2x4x16x16xf32>
    %cst_7 = arith.constant dense<0.000000e+00> : vector<2x16x16xf32>
    %13 = vector.multi_reduction <add>, %12, %cst_7 [1] : vector<2x4x16x16xf32> to vector<2x16x16xf32>
    %14 = vector.extract_strided_slice %13 {offsets = [0, 0, 0], sizes = [2, 4, 16], strides = [1, 1, 1]} : vector<2x16x16xf32> to vector<2x4x16xf32>
    %cst_8 = arith.constant dense<0.000000e+00> : vector<2x16xf32>
    %15 = vector.multi_reduction <add>, %14, %cst_8 [1] : vector<2x4x16xf32> to vector<2x16xf32>
    %16 = vector.extract_strided_slice %13 {offsets = [0, 4, 0], sizes = [2, 4, 16], strides = [1, 1, 1]} : vector<2x16x16xf32> to vector<2x4x16xf32>
    %cst_9 = arith.constant dense<0.000000e+00> : vector<2x16xf32>
    %17 = vector.multi_reduction <add>, %16, %cst_9 [1] : vector<2x4x16xf32> to vector<2x16xf32>
    %18 = vector.extract_strided_slice %13 {offsets = [0, 8, 0], sizes = [2, 4, 16], strides = [1, 1, 1]} : vector<2x16x16xf32> to vector<2x4x16xf32>
    %cst_10 = arith.constant dense<0.000000e+00> : vector<2x16xf32>
    %19 = vector.multi_reduction <add>, %18, %cst_10 [1] : vector<2x4x16xf32> to vector<2x16xf32>
    %20 = vector.extract_strided_slice %13 {offsets = [0, 12, 0], sizes = [2, 4, 16], strides = [1, 1, 1]} : vector<2x16x16xf32> to vector<2x4x16xf32>
    %cst_11 = arith.constant dense<0.000000e+00> : vector<2x16xf32>
    %21 = vector.multi_reduction <add>, %20, %cst_11 [1] : vector<2x4x16xf32> to vector<2x16xf32>
    %22 = vector.extract_strided_slice %1 {offsets = [0, 8, 0, 0], sizes = [2, 4, 16, 16], strides = [1, 1, 1, 1]} : vector<2x16x16x16xf32> to vector<2x4x16x16xf32>
    %cst_12 = arith.constant dense<0.000000e+00> : vector<2x16x16xf32>
    %23 = vector.multi_reduction <add>, %22, %cst_12 [1] : vector<2x4x16x16xf32> to vector<2x16x16xf32>
    %24 = vector.extract_strided_slice %23 {offsets = [0, 0, 0], sizes = [2, 4, 16], strides = [1, 1, 1]} : vector<2x16x16xf32> to vector<2x4x16xf32>
    %cst_13 = arith.constant dense<0.000000e+00> : vector<2x16xf32>
    %25 = vector.multi_reduction <add>, %24, %cst_13 [1] : vector<2x4x16xf32> to vector<2x16xf32>
    %26 = vector.extract_strided_slice %23 {offsets = [0, 4, 0], sizes = [2, 4, 16], strides = [1, 1, 1]} : vector<2x16x16xf32> to vector<2x4x16xf32>
    %cst_14 = arith.constant dense<0.000000e+00> : vector<2x16xf32>
    %27 = vector.multi_reduction <add>, %26, %cst_14 [1] : vector<2x4x16xf32> to vector<2x16xf32>
    %28 = vector.extract_strided_slice %23 {offsets = [0, 8, 0], sizes = [2, 4, 16], strides = [1, 1, 1]} : vector<2x16x16xf32> to vector<2x4x16xf32>
    %cst_15 = arith.constant dense<0.000000e+00> : vector<2x16xf32>
    %29 = vector.multi_reduction <add>, %28, %cst_15 [1] : vector<2x4x16xf32> to vector<2x16xf32>
    %30 = vector.extract_strided_slice %23 {offsets = [0, 12, 0], sizes = [2, 4, 16], strides = [1, 1, 1]} : vector<2x16x16xf32> to vector<2x4x16xf32>
    %cst_16 = arith.constant dense<0.000000e+00> : vector<2x16xf32>
    %31 = vector.multi_reduction <add>, %30, %cst_16 [1] : vector<2x4x16xf32> to vector<2x16xf32>
    %32 = vector.extract_strided_slice %1 {offsets = [0, 12, 0, 0], sizes = [2, 4, 16, 16], strides = [1, 1, 1, 1]} : vector<2x16x16x16xf32> to vector<2x4x16x16xf32>
    %cst_17 = arith.constant dense<0.000000e+00> : vector<2x16x16xf32>
    %33 = vector.multi_reduction <add>, %32, %cst_17 [1] : vector<2x4x16x16xf32> to vector<2x16x16xf32>
    %34 = vector.extract_strided_slice %33 {offsets = [0, 0, 0], sizes = [2, 4, 16], strides = [1, 1, 1]} : vector<2x16x16xf32> to vector<2x4x16xf32>
    %cst_18 = arith.constant dense<0.000000e+00> : vector<2x16xf32>
    %35 = vector.multi_reduction <add>, %34, %cst_18 [1] : vector<2x4x16xf32> to vector<2x16xf32>
    %36 = vector.extract_strided_slice %33 {offsets = [0, 4, 0], sizes = [2, 4, 16], strides = [1, 1, 1]} : vector<2x16x16xf32> to vector<2x4x16xf32>
    %cst_19 = arith.constant dense<0.000000e+00> : vector<2x16xf32>
    %37 = vector.multi_reduction <add>, %36, %cst_19 [1] : vector<2x4x16xf32> to vector<2x16xf32>
    %38 = vector.extract_strided_slice %33 {offsets = [0, 8, 0], sizes = [2, 4, 16], strides = [1, 1, 1]} : vector<2x16x16xf32> to vector<2x4x16xf32>
    %cst_20 = arith.constant dense<0.000000e+00> : vector<2x16xf32>
    %39 = vector.multi_reduction <add>, %38, %cst_20 [1] : vector<2x4x16xf32> to vector<2x16xf32>
    %40 = vector.extract_strided_slice %33 {offsets = [0, 12, 0], sizes = [2, 4, 16], strides = [1, 1, 1]} : vector<2x16x16xf32> to vector<2x4x16xf32>
    %cst_21 = arith.constant dense<0.000000e+00> : vector<2x16xf32>
    %41 = vector.multi_reduction <add>, %40, %cst_21 [1] : vector<2x4x16xf32> to vector<2x16xf32>
    %42 = tpu.concatenate %5, %7, %9, %11, %15, %17, %19, %21, %25, %27, %29, %31, %35, %37, %39, %41 in 1 : vector<2x16xf32>, vector<2x16xf32>, vector<2x16xf32>, vector<2x16xf32>, vector<2x16xf32>, vector<2x16xf32>, vector<2x16xf32>, vector<2x16xf32>, vector<2x16xf32>, vector<2x16xf32>, vector<2x16xf32>, vector<2x16xf32>, vector<2x16xf32>, vector<2x16xf32>, vector<2x16xf32>, vector<2x16xf32> -> vector<2x256xf32>
    %cst_22 = arith.constant 6.250000e-02 : f32
    %43 = vector.broadcast %cst_22 : f32 to vector<2x256xf32>
    %44 = arith.mulf %42, %43 : vector<2x256xf32>
    %45 = arith.truncf %44 : vector<2x256xf32> to vector<2x256xbf16>
    %c0_23 = arith.constant 0 : index
    %c0_24 = arith.constant 0 : index
    %46 = vector.load %arg1[%c0_23, %c0_24] : memref<256x4xbf16, #tpu.memory_space<vmem>>, vector<256x4xbf16>
    %cst_25 = arith.constant dense<0.000000e+00> : vector<2x4xf32>
    %47 = tpu.matmul %45, %46, %cst_25 {dimension_numbers = #tpu.dot_dimension_numbers<[1], [0], [0], [1], [0, 0, 1, 1], [], []>} : vector<2x256xbf16>, vector<256x4xbf16>, vector<2x4xf32> -> vector<2x4xf32>
    %cst_26 = arith.constant 0.000000e+00 : f32
    %48 = vector.broadcast %cst_26 : f32 to vector<2x4xf32>
    %49 = arith.maximumf %47, %48 : vector<2x4xf32>
    %50 = arith.truncf %49 : vector<2x4xf32> to vector<2x4xbf16>
    %c0_27 = arith.constant 0 : index
    %c0_28 = arith.constant 0 : index
    %51 = vector.load %arg2[%c0_27, %c0_28] : memref<4x32xbf16, #tpu.memory_space<vmem>>, vector<4x32xbf16>
    %cst_29 = arith.constant dense<0.000000e+00> : vector<2x32xf32>
    %52 = tpu.matmul %50, %51, %cst_29 {dimension_numbers = #tpu.dot_dimension_numbers<[1], [0], [0], [1], [0, 0, 1, 1], [], []>} : vector<2x4xbf16>, vector<4x32xbf16>, vector<2x32xf32> -> vector<2x32xf32>
    %53 = arith.negf %52 : vector<2x32xf32>
    %54 = math.exp %53 : vector<2x32xf32>
    %cst_30 = arith.constant 1.000000e+00 : f32
    %55 = vector.broadcast %cst_30 : f32 to vector<2x32xf32>
    %56 = arith.addf %55, %54 : vector<2x32xf32>
    %57 = arith.divf %55, %56 : vector<2x32xf32>
    %58 = vector.shape_cast %1 : vector<2x16x16x16xf32> to vector<512x16xf32>
    %c0_31 = arith.constant 0 : index
    %c0_32 = arith.constant 0 : index
    %59 = vector.load %arg3[%c0_31, %c0_32] : memref<1x16xf32, #tpu.memory_space<vmem>>, vector<1x16xf32>
    %c0_33 = arith.constant 0 : index
    %c0_34 = arith.constant 0 : index
    %60 = vector.load %arg4[%c0_33, %c0_34] : memref<1x16xf32, #tpu.memory_space<vmem>>, vector<1x16xf32>
    %cst_35 = arith.constant dense<0.000000e+00> : vector<16xf32>
    %61 = vector.multi_reduction <add>, %58, %cst_35 [0] : vector<512x16xf32> to vector<16xf32>
    %62 = vector.shape_cast %61 : vector<16xf32> to vector<1x16xf32>
    %63 = arith.mulf %58, %58 : vector<512x16xf32>
    %cst_36 = arith.constant dense<0.000000e+00> : vector<16xf32>
    %64 = vector.multi_reduction <add>, %63, %cst_36 [0] : vector<512x16xf32> to vector<16xf32>
    %65 = vector.shape_cast %64 : vector<16xf32> to vector<1x16xf32>
    %cst_37 = arith.constant 0.001953125 : f32
    %66 = vector.broadcast %cst_37 : f32 to vector<1x16xf32>
    %67 = arith.mulf %62, %66 : vector<1x16xf32>
    %cst_38 = arith.constant 0.001953125 : f32
    %68 = vector.broadcast %cst_38 : f32 to vector<1x16xf32>
    %69 = arith.mulf %65, %68 : vector<1x16xf32>
    %70 = arith.mulf %67, %67 : vector<1x16xf32>
    %71 = arith.subf %69, %70 : vector<1x16xf32>
    %cst_39 = arith.constant 0.000000e+00 : f32
    %72 = vector.broadcast %cst_39 : f32 to vector<1x16xf32>
    %73 = arith.maximumf %71, %72 : vector<1x16xf32>
    %74 = vector.broadcast %67 : vector<1x16xf32> to vector<512x16xf32>
    %75 = arith.subf %58, %74 : vector<512x16xf32>
    %cst_40 = arith.constant 9.99999974E-6 : f32
    %76 = vector.broadcast %cst_40 : f32 to vector<1x16xf32>
    %77 = arith.addf %73, %76 : vector<1x16xf32>
    %78 = math.rsqrt %77 : vector<1x16xf32>
    %79 = vector.broadcast %78 : vector<1x16xf32> to vector<512x16xf32>
    %80 = arith.mulf %75, %79 : vector<512x16xf32>
    %81 = vector.broadcast %59 : vector<1x16xf32> to vector<512x16xf32>
    %82 = arith.mulf %80, %81 : vector<512x16xf32>
    %83 = vector.broadcast %60 : vector<1x16xf32> to vector<512x16xf32>
    %84 = arith.addf %82, %83 : vector<512x16xf32>
    %cst_41 = arith.constant 0.000000e+00 : f32
    %85 = vector.broadcast %cst_41 : f32 to vector<512x16xf32>
    %86 = arith.maximumf %84, %85 : vector<512x16xf32>
    %87 = arith.truncf %86 : vector<512x16xf32> to vector<512x16xbf16>
    %c0_42 = arith.constant 0 : index
    %c0_43 = arith.constant 0 : index
    %88 = vector.load %arg12[%c0_42, %c0_43] : memref<16x32xbf16, #tpu.memory_space<vmem>>, vector<16x32xbf16>
    %cst_44 = arith.constant dense<0.000000e+00> : vector<512x32xf32>
    %89 = tpu.matmul %87, %88, %cst_44 {dimension_numbers = #tpu.dot_dimension_numbers<[1], [0], [0], [1], [0, 0, 1, 1], [], []>} : vector<512x16xbf16>, vector<16x32xbf16>, vector<512x32xf32> -> vector<512x32xf32>
    %90 = arith.truncf %86 : vector<512x16xf32> to vector<512x16xbf16>
    %c0_45 = arith.constant 0 : index
    %c0_46 = arith.constant 0 : index
    %91 = vector.load %arg5[%c0_45, %c0_46] : memref<16x8xbf16, #tpu.memory_space<vmem>>, vector<16x8xbf16>
    %cst_47 = arith.constant dense<0.000000e+00> : vector<512x8xf32>
    %92 = tpu.matmul %90, %91, %cst_47 {dimension_numbers = #tpu.dot_dimension_numbers<[1], [0], [0], [1], [0, 0, 1, 1], [], []>} : vector<512x16xbf16>, vector<16x8xbf16>, vector<512x8xf32> -> vector<512x8xf32>
    %c0_48 = arith.constant 0 : index
    %c0_49 = arith.constant 0 : index
    %93 = vector.load %arg6[%c0_48, %c0_49] : memref<1x8xf32, #tpu.memory_space<vmem>>, vector<1x8xf32>
    %c0_50 = arith.constant 0 : index
    %c0_51 = arith.constant 0 : index
    %94 = vector.load %arg7[%c0_50, %c0_51] : memref<1x8xf32, #tpu.memory_space<vmem>>, vector<1x8xf32>
    %cst_52 = arith.constant dense<0.000000e+00> : vector<8xf32>
    %95 = vector.multi_reduction <add>, %92, %cst_52 [0] : vector<512x8xf32> to vector<8xf32>
    %96 = vector.shape_cast %95 : vector<8xf32> to vector<1x8xf32>
    %97 = arith.mulf %92, %92 : vector<512x8xf32>
    %cst_53 = arith.constant dense<0.000000e+00> : vector<8xf32>
    %98 = vector.multi_reduction <add>, %97, %cst_53 [0] : vector<512x8xf32> to vector<8xf32>
    %99 = vector.shape_cast %98 : vector<8xf32> to vector<1x8xf32>
    %cst_54 = arith.constant 0.001953125 : f32
    %100 = vector.broadcast %cst_54 : f32 to vector<1x8xf32>
    %101 = arith.mulf %96, %100 : vector<1x8xf32>
    %cst_55 = arith.constant 0.001953125 : f32
    %102 = vector.broadcast %cst_55 : f32 to vector<1x8xf32>
    %103 = arith.mulf %99, %102 : vector<1x8xf32>
    %104 = arith.mulf %101, %101 : vector<1x8xf32>
    %105 = arith.subf %103, %104 : vector<1x8xf32>
    %cst_56 = arith.constant 0.000000e+00 : f32
    %106 = vector.broadcast %cst_56 : f32 to vector<1x8xf32>
    %107 = arith.maximumf %105, %106 : vector<1x8xf32>
    %108 = vector.broadcast %101 : vector<1x8xf32> to vector<512x8xf32>
    %109 = arith.subf %92, %108 : vector<512x8xf32>
    %cst_57 = arith.constant 9.99999974E-6 : f32
    %110 = vector.broadcast %cst_57 : f32 to vector<1x8xf32>
    %111 = arith.addf %107, %110 : vector<1x8xf32>
    %112 = math.rsqrt %111 : vector<1x8xf32>
    %113 = vector.broadcast %112 : vector<1x8xf32> to vector<512x8xf32>
    %114 = arith.mulf %109, %113 : vector<512x8xf32>
    %115 = vector.broadcast %93 : vector<1x8xf32> to vector<512x8xf32>
    %116 = arith.mulf %114, %115 : vector<512x8xf32>
    %117 = vector.broadcast %94 : vector<1x8xf32> to vector<512x8xf32>
    %118 = arith.addf %116, %117 : vector<512x8xf32>
    %cst_58 = arith.constant 0.000000e+00 : f32
    %119 = vector.broadcast %cst_58 : f32 to vector<512x8xf32>
    %120 = arith.maximumf %118, %119 : vector<512x8xf32>
    %cst_59 = arith.constant 0.000000e+00 : f32
    %121 = vector.broadcast %cst_59 : f32 to vector<2x16x1x8xf32>
    %122 = vector.shape_cast %120 : vector<512x8xf32> to vector<2x16x16x8xf32>
    %123 = tpu.concatenate %121, %122, %121 in 2 : vector<2x16x1x8xf32>, vector<2x16x16x8xf32>, vector<2x16x1x8xf32> -> vector<2x16x18x8xf32>
    %124 = arith.truncf %123 : vector<2x16x18x8xf32> to vector<2x16x18x8xbf16>
    %c0_60 = arith.constant 0 : index
    %c1 = arith.constant 1 : index
    %c0_61 = arith.constant 0 : index
    %c0_62 = arith.constant 0 : index
    %125 = vector.load %arg14[%c0_60, %c1, %c0_61, %c0_62] : memref<2x18x18x8xbf16, #tpu.memory_space<vmem>>, vector<2x16x18x8xbf16>
    tpu.vector_store %arg14[%c0_60, %c1, %c0_61, %c0_62], %124 {strides = array<i32>} : memref<2x18x18x8xbf16, #tpu.memory_space<vmem>>, vector<2x16x18x8xbf16>,
    %cst_63 = arith.constant 0.000000e+00 : bf16
    %126 = vector.broadcast %cst_63 : bf16 to vector<2x1x18x8xbf16>
    %c0_64 = arith.constant 0 : index
    %c0_65 = arith.constant 0 : index
    %c0_66 = arith.constant 0 : index
    %c0_67 = arith.constant 0 : index
    %127 = vector.load %arg14[%c0_64, %c0_65, %c0_66, %c0_67] : memref<2x18x18x8xbf16, #tpu.memory_space<vmem>>, vector<2x1x18x8xbf16>
    tpu.vector_store %arg14[%c0_64, %c0_65, %c0_66, %c0_67], %126 {strides = array<i32>} : memref<2x18x18x8xbf16, #tpu.memory_space<vmem>>, vector<2x1x18x8xbf16>,
    %c0_68 = arith.constant 0 : index
    %c17 = arith.constant 17 : index
    %c0_69 = arith.constant 0 : index
    %c0_70 = arith.constant 0 : index
    %128 = vector.load %arg14[%c0_68, %c17, %c0_69, %c0_70] : memref<2x18x18x8xbf16, #tpu.memory_space<vmem>>, vector<2x1x18x8xbf16>
    tpu.vector_store %arg14[%c0_68, %c17, %c0_69, %c0_70], %126 {strides = array<i32>} : memref<2x18x18x8xbf16, #tpu.memory_space<vmem>>, vector<2x1x18x8xbf16>,
    %c0_71 = arith.constant 0 : index
    %c0_72 = arith.constant 0 : index
    %c0_73 = arith.constant 0 : index
    %c0_74 = arith.constant 0 : index
    %129 = vector.load %arg14[%c0_71, %c0_72, %c0_73, %c0_74] : memref<2x18x18x8xbf16, #tpu.memory_space<vmem>>, vector<2x16x18x8xbf16>
    %130 = vector.extract_strided_slice %129 {offsets = [0, 0, 0, 0], sizes = [2, 16, 16, 8], strides = [1, 1, 1, 1]} : vector<2x16x18x8xbf16> to vector<2x16x16x8xbf16>
    %131 = vector.extract_strided_slice %129 {offsets = [0, 0, 1, 0], sizes = [2, 16, 16, 8], strides = [1, 1, 1, 1]} : vector<2x16x18x8xbf16> to vector<2x16x16x8xbf16>
    %132 = vector.extract_strided_slice %129 {offsets = [0, 0, 2, 0], sizes = [2, 16, 16, 8], strides = [1, 1, 1, 1]} : vector<2x16x18x8xbf16> to vector<2x16x16x8xbf16>
    %c0_75 = arith.constant 0 : index
    %c1_76 = arith.constant 1 : index
    %c0_77 = arith.constant 0 : index
    %c0_78 = arith.constant 0 : index
    %133 = vector.load %arg14[%c0_75, %c1_76, %c0_77, %c0_78] : memref<2x18x18x8xbf16, #tpu.memory_space<vmem>>, vector<2x16x18x8xbf16>
    %134 = vector.extract_strided_slice %133 {offsets = [0, 0, 0, 0], sizes = [2, 16, 16, 8], strides = [1, 1, 1, 1]} : vector<2x16x18x8xbf16> to vector<2x16x16x8xbf16>
    %135 = vector.extract_strided_slice %133 {offsets = [0, 0, 1, 0], sizes = [2, 16, 16, 8], strides = [1, 1, 1, 1]} : vector<2x16x18x8xbf16> to vector<2x16x16x8xbf16>
    %136 = vector.extract_strided_slice %133 {offsets = [0, 0, 2, 0], sizes = [2, 16, 16, 8], strides = [1, 1, 1, 1]} : vector<2x16x18x8xbf16> to vector<2x16x16x8xbf16>
    %c0_79 = arith.constant 0 : index
    %c2 = arith.constant 2 : index
    %c0_80 = arith.constant 0 : index
    %c0_81 = arith.constant 0 : index
    %137 = vector.load %arg14[%c0_79, %c2, %c0_80, %c0_81] : memref<2x18x18x8xbf16, #tpu.memory_space<vmem>>, vector<2x16x18x8xbf16>
    %138 = vector.extract_strided_slice %137 {offsets = [0, 0, 0, 0], sizes = [2, 16, 16, 8], strides = [1, 1, 1, 1]} : vector<2x16x18x8xbf16> to vector<2x16x16x8xbf16>
    %139 = vector.extract_strided_slice %137 {offsets = [0, 0, 1, 0], sizes = [2, 16, 16, 8], strides = [1, 1, 1, 1]} : vector<2x16x18x8xbf16> to vector<2x16x16x8xbf16>
    %140 = vector.extract_strided_slice %137 {offsets = [0, 0, 2, 0], sizes = [2, 16, 16, 8], strides = [1, 1, 1, 1]} : vector<2x16x18x8xbf16> to vector<2x16x16x8xbf16>
    %141 = tpu.concatenate %130, %131, %132, %134, %135, %136, %138, %139, %140 in 3 : vector<2x16x16x8xbf16>, vector<2x16x16x8xbf16>, vector<2x16x16x8xbf16>, vector<2x16x16x8xbf16>, vector<2x16x16x8xbf16>, vector<2x16x16x8xbf16>, vector<2x16x16x8xbf16>, vector<2x16x16x8xbf16>, vector<2x16x16x8xbf16> -> vector<2x16x16x72xbf16>
    %142 = vector.shape_cast %141 : vector<2x16x16x72xbf16> to vector<512x72xbf16>
    %c0_82 = arith.constant 0 : index
    %c0_83 = arith.constant 0 : index
    %143 = vector.load %arg8[%c0_82, %c0_83] : memref<72x8xbf16, #tpu.memory_space<vmem>>, vector<72x8xbf16>
    %cst_84 = arith.constant dense<0.000000e+00> : vector<512x8xf32>
    %144 = tpu.matmul %142, %143, %cst_84 {dimension_numbers = #tpu.dot_dimension_numbers<[1], [0], [0], [1], [0, 0, 1, 1], [], []>} : vector<512x72xbf16>, vector<72x8xbf16>, vector<512x8xf32> -> vector<512x8xf32>
    %c0_85 = arith.constant 0 : index
    %c0_86 = arith.constant 0 : index
    %145 = vector.load %arg9[%c0_85, %c0_86] : memref<1x8xf32, #tpu.memory_space<vmem>>, vector<1x8xf32>
    %c0_87 = arith.constant 0 : index
    %c0_88 = arith.constant 0 : index
    %146 = vector.load %arg10[%c0_87, %c0_88] : memref<1x8xf32, #tpu.memory_space<vmem>>, vector<1x8xf32>
    %cst_89 = arith.constant dense<0.000000e+00> : vector<8xf32>
    %147 = vector.multi_reduction <add>, %144, %cst_89 [0] : vector<512x8xf32> to vector<8xf32>
    %148 = vector.shape_cast %147 : vector<8xf32> to vector<1x8xf32>
    %149 = arith.mulf %144, %144 : vector<512x8xf32>
    %cst_90 = arith.constant dense<0.000000e+00> : vector<8xf32>
    %150 = vector.multi_reduction <add>, %149, %cst_90 [0] : vector<512x8xf32> to vector<8xf32>
    %151 = vector.shape_cast %150 : vector<8xf32> to vector<1x8xf32>
    %cst_91 = arith.constant 0.001953125 : f32
    %152 = vector.broadcast %cst_91 : f32 to vector<1x8xf32>
    %153 = arith.mulf %148, %152 : vector<1x8xf32>
    %cst_92 = arith.constant 0.001953125 : f32
    %154 = vector.broadcast %cst_92 : f32 to vector<1x8xf32>
    %155 = arith.mulf %151, %154 : vector<1x8xf32>
    %156 = arith.mulf %153, %153 : vector<1x8xf32>
    %157 = arith.subf %155, %156 : vector<1x8xf32>
    %cst_93 = arith.constant 0.000000e+00 : f32
    %158 = vector.broadcast %cst_93 : f32 to vector<1x8xf32>
    %159 = arith.maximumf %157, %158 : vector<1x8xf32>
    %160 = vector.broadcast %153 : vector<1x8xf32> to vector<512x8xf32>
    %161 = arith.subf %144, %160 : vector<512x8xf32>
    %cst_94 = arith.constant 9.99999974E-6 : f32
    %162 = vector.broadcast %cst_94 : f32 to vector<1x8xf32>
    %163 = arith.addf %159, %162 : vector<1x8xf32>
    %164 = math.rsqrt %163 : vector<1x8xf32>
    %165 = vector.broadcast %164 : vector<1x8xf32> to vector<512x8xf32>
    %166 = arith.mulf %161, %165 : vector<512x8xf32>
    %167 = vector.broadcast %145 : vector<1x8xf32> to vector<512x8xf32>
    %168 = arith.mulf %166, %167 : vector<512x8xf32>
    %169 = vector.broadcast %146 : vector<1x8xf32> to vector<512x8xf32>
    %170 = arith.addf %168, %169 : vector<512x8xf32>
    %cst_95 = arith.constant 0.000000e+00 : f32
    %171 = vector.broadcast %cst_95 : f32 to vector<512x8xf32>
    %172 = arith.maximumf %170, %171 : vector<512x8xf32>
    %173 = arith.truncf %172 : vector<512x8xf32> to vector<512x8xbf16>
    %c0_96 = arith.constant 0 : index
    %c0_97 = arith.constant 0 : index
    %174 = vector.load %arg11[%c0_96, %c0_97] : memref<8x32xbf16, #tpu.memory_space<vmem>>, vector<8x32xbf16>
    %cst_98 = arith.constant dense<0.000000e+00> : vector<512x32xf32>
    %175 = tpu.matmul %173, %174, %cst_98 {dimension_numbers = #tpu.dot_dimension_numbers<[1], [0], [0], [1], [0, 0, 1, 1], [], []>} : vector<512x8xbf16>, vector<8x32xbf16>, vector<512x32xf32> -> vector<512x32xf32>
    %176 = vector.shape_cast %175 : vector<512x32xf32> to vector<2x256x32xf32>
    %177 = vector.shape_cast %57 : vector<2x32xf32> to vector<2x1x32xf32>
    %178 = vector.broadcast %177 : vector<2x1x32xf32> to vector<2x256x32xf32>
    %179 = arith.mulf %176, %178 : vector<2x256x32xf32>
    %180 = vector.shape_cast %89 : vector<512x32xf32> to vector<2x256x32xf32>
    %181 = arith.addf %179, %180 : vector<2x256x32xf32>
    %c0_99 = arith.constant 0 : index
    %c0_100 = arith.constant 0 : index
    %c0_101 = arith.constant 0 : index
    %182 = vector.load %arg13[%c0_99, %c0_100, %c0_101] : memref<2x256x32xf32, #tpu.memory_space<vmem>>, vector<2x256x32xf32>
    tpu.vector_store %arg13[%c0_99, %c0_100, %c0_101], %181 {strides = array<i32>} : memref<2x256x32xf32, #tpu.memory_space<vmem>>, vector<2x256x32xf32>,
    return
  }
}

</mosaic_0001>

<bundles_post_ra>
// kernel: tpu_custom_call.1
= control target key start
LH: loop header
LB: loop body
LE: loop exit
PB: predicated region body
PF: predicated region fallthrough
CT: control target
= control target key end

     0   :  { %18 = vsyncpa [#allocation4], 0  ;;  %s9171_s28 = smov [#allocation3]   ;;  %s9172_s30 = smov 64   ;;  %s16608_s0 = inlined_call_operand.hbm [shape: bf16[2,16,16,16], index: 0, kind: input, shape index: {}]   ;;  %s16609_s1 = inlined_call_operand.vmem [shape: bf16[256,4], index: 1, kind: input, shape index: {}]   ;;  %s16610_s2 = inlined_call_operand.vmem [shape: bf16[4,32], index: 2, kind: input, shape index: {}]   ;;  %s16611_s3 = inlined_call_operand.vmem [shape: f32[1,16], index: 3, kind: input, shape index: {}]   ;;  %s16612_s4 = inlined_call_operand.vmem [shape: f32[1,16], index: 4, kind: input, shape index: {}]   ;;  %s16613_s5 = inlined_call_operand.vmem [shape: bf16[16,8], index: 5, kind: input, shape index: {}]   ;;  %s16614_s6 = inlined_call_operand.vmem [shape: f32[1,8], index: 6, kind: input, shape index: {}]   ;;  %s16615_s7 = inlined_call_operand.vmem [shape: f32[1,8], index: 7, kind: input, shape index: {}]   ;;  %s16616_s8 = inlined_call_operand.vmem [shape: bf16[72,8], index: 8, kind: input, shape index: {}]   ;;  %s16617_s9 = inlined_call_operand.vmem [shape: f32[1,8], index: 9, kind: input, shape index: {}]   ;;  %s16618_s10 = inlined_call_operand.vmem [shape: f32[1,8], index: 10, kind: input, shape index: {}]   ;;  %s16619_s11 = inlined_call_operand.vmem [shape: bf16[8,32], index: 11, kind: input, shape index: {}]   ;;  %s16620_s12 = inlined_call_operand.vmem [shape: bf16[16,32], index: 12, kind: input, shape index: {}]   ;;  %s16621_s13 = inlined_call_operand.vmem [shape: f32[2,256,32], index: 13, kind: output, shape index: {}]  }
   0x1   :  { %s23_s27 = sshll.u32 %s16608_s0, 4  ;;  %s25_s29 = sshll.u32 %s9171_s28, 4  ;;  %s24_s27 = int_to_ptr.hbm [resolvable:$true] %s23_s27  ;;  %s26_s29 = int_to_ptr.vmem [resolvable:$true] %s25_s29 }
   0x2   :  { %s9173_s14 = smov 4  }
   0x3   :  { %31 = dma.hbm_to_vmem [thread:$0]  %s24_s27, 4096, %s26_s29, [#allocation4], %s9172_s30, %s9172_s30, %s9173_s14  }
   0x4   :  { %9169 = dma.done.wait [#allocation4], 4096  }
   0x5   :  { %9170 = vsyncadd [#allocation4], 4294963200  ;;  %v9260_v0 = vld [vmem:[#allocation3 + $0x20] sm:$0xff]   ;;  %v9262_v1 = vld [vmem:[#allocation3 + $0x28] sm:$0xff]   ;;  %vm189_vm0 = vcmask 130048   ;;  %vm218_vm1 = vcmask 125952  }
   0x6   :  { %v9264_v2 = vld [vmem:[#allocation3 + $0x30] sm:$0xff]   ;;  %v9267_v3 = vunpack.c.l.bf16 %v9260_v0  ;;  %v9270_v4 = vunpack.c.l.bf16 %v9262_v1  ;;  %v9272_v5 = vld [vmem:[#allocation3 + $0x38] sm:$0xff]   ;;  %v9274_v6 = vld [vmem:[#allocation3 + $0xa0] sm:$0xff]   ;;  %vm577_vm2 = vcmask 1041409   ;;  %s9174_s0 = smov 32   ;;  %s9175_s15 = smov 16  }
   0x7   :  { %v9276_v7 = vld [vmem:[#allocation3 + $0xa8] sm:$0xff]   ;;  %v9279_v8 = vunpack.c.l.bf16 %v9264_v2  ;;  %v9281_v9 = vld [vmem:[#allocation3 + $0xb0] sm:$0xff]   ;;  %v9283_v10 = vld [vmem:[#allocation3 + $0xb8] sm:$0xff]   ;;  %v9286_v11 = vunpack.c.l.bf16 %v9272_v5  ;;  %v9289_v12 = vunpack.c.l.bf16 %v9274_v6  ;;  %s9176_s16 = smov 48   ;;  %s9177_s17 = smov 96   ;;  %vm669_vm3 = vcmask 261120  }
   0x8   :  { %16951 = vst [vmem:[#allocation6_spill] sm:$0xff] %v9267_v3  ;;  %v9292_v13 = vunpack.c.l.bf16 %v9276_v7  ;;  %v9295_v14 = vunpack.c.l.bf16 %v9281_v9  ;;  %v9298_v15 = vunpack.c.l.bf16 %v9283_v10  ;;  %v9302_v16 = vsel %vm189_vm0, %v9267_v3, 0.0  ;;  %v8884_v37 = vld [vmem:[#allocation3] sm:$0xff]   ;;  %v9011_v38 = vld [vmem:[#allocation3 + $0x8] sm:$0xff]   ;;  %v9012_v40 = vld [vmem:[#allocation3 + $0x10] sm:$0xff]   ;;  %s9178_s18 = smov 80  }
   0x9   :  { %16952 = vst [vmem:[#allocation7_spill] sm:$0xff] %v9270_v4  ;;  %v9306_v17 = vsel %vm189_vm0, %v9270_v4, 0.0  ;;  %v9310_v18 = vsel %vm189_vm0, %v9279_v8, 0.0  ;;  %v9316_v20 = vsel %vm189_vm0, %v9289_v12, 0.0  ;;  %v9328_v23 = vsel %vm189_vm0, %v9286_v11, 0.0  ;;  %v9348_v41 = vld [vmem:[#allocation3 + $0x80] sm:$0xff]  }
   0xa   :  { %16953 = vst [vmem:[#allocation8_spill] sm:$0xff] %v9279_v8  ;;  %v289_v19 = vadd.f32 %v9306_v17, %v9302_v16  ;;  %v9320_v21 = vsel %vm189_vm0, %v9292_v13, 0.0  ;;  %v9324_v22 = vsel %vm189_vm0, %v9295_v14, 0.0  ;;  %v9334_v25 = vsel %vm189_vm0, %v9298_v15, 0.0  ;;  %v9013_v43 = vld [vmem:[#allocation3 + $0x18] sm:$0xff]   ;;  %v9350_v44 = vld [vmem:[#allocation3 + $0x88] sm:$0xff]  }
   0xb   :  { %16954 = vst [vmem:[#allocation9_spill] sm:$0xff] %v9286_v11  ;;  %v303_v24 = vadd.f32 %v9320_v21, %v9316_v20  ;;  %v9352_v45 = vld [vmem:[#allocation3 + $0x90] sm:$0xff]   ;;  %v9354_v47 = vunpack.c.h.bf16 %v8884_v37  ;;  %v9356_v48 = vunpack.c.h.bf16 %v9011_v38  ;;  %v9358_v50 = vunpack.c.h.bf16 %v9012_v40  ;;  %v9363_v52 = vld [vmem:[#allocation3 + $0x98] sm:$0xff]   ;;  %s9179_s19 = smov 112   ;;  %s9182_s14 = smov 24  }
   0xc   :  { %16955 = vst [vmem:[#allocation10_spill] sm:$0xff] %v9289_v12  ;;  %v291_v26 = vadd.f32 %v9310_v18, %v289_v19  ;;  %v9361_v51 = vunpack.c.h.bf16 %v9348_v41  ;;  %v9365_v54 = vunpack.c.h.bf16 %v9013_v43  ;;  %v9368_v55 = vunpack.c.h.bf16 %v9350_v44 }
   0xd   :  { %16956 = vst [vmem:[#allocation11_spill] sm:$0xff] %v9292_v13  ;;  %v305_v27 = vadd.f32 %v9324_v22, %v303_v24  ;;  %v9371_v56 = vunpack.c.h.bf16 %v9352_v45  ;;  %v9374_v59 = vunpack.c.h.bf16 %v9363_v52  ;;  %v197_v60 = vsel %vm189_vm0, %v9354_v47, 0.0 }
   0xe   :  { %16957 = vst [vmem:[#allocation12_spill] sm:$0xff] %v9295_v14  ;;  %v9339_v28 = vadd.f32 %v9328_v23, %v291_v26  ;;  %v9380_v61 = vsel %vm189_vm0, %v9356_v48, 0.0  ;;  %v9385_v63 = vsel %vm189_vm0, %v9358_v50, 0.0  ;;  %v9389_v19 = vsel %vm189_vm0, %v9361_v51, 0.0 }
   0xf   :  { %16958 = vst [vmem:[#allocation13_spill] sm:$0xff] %v9298_v15  ;;  %v9342_v29 = vadd.f32 %v9334_v25, %v305_v27  ;;  %v199_v62 = vadd.f32 %v9380_v61, %v197_v60  ;;  %v9394_v26 = vsel %vm189_vm0, %v9365_v54, 0.0  ;;  %v9398_v27 = vsel %vm189_vm0, %v9368_v55, 0.0 }
  0x10   :  { %16959 = vst [vmem:[#allocation14_spill] sm:$0xff] %v9316_v20  ;;  %v315_v30 = vsel %vm218_vm1, %v9339_v28, 0.0  ;;  %v9443_v15 = vunpack.c.l.bf16 %v8884_v37  ;;  %v965_v14 = vmul.f32 %v9358_v50, %v9358_v50  ;;  %vm671_vm4 = vcmask 392192  }
  0x11   :  { %16960 = vst [vmem:[#allocation15_spill] sm:$0xff] %v9320_v21  ;;  %v316_v31 = vrot.slane %v315_v30, 4  ;;  %v322_v32 = vsel %vm218_vm1, %v9342_v29, 0.0  ;;  %vm673_vm5 = vcmask 523264   ;;  %vm675_vm6 = vcmask 654336  }
  0x12   :  { %16961 = vst [vmem:[#allocation16_spill] sm:$0xff] %v9324_v22  ;;  %v323_v33 = vrot.slane %v322_v32, 4  ;;  %v9460_v13 = vsel %vm189_vm0, %v9443_v15, 0.0  ;;  %v960_v12 = vmul.f32 %v9443_v15, %v9443_v15  ;;  %vm677_vm7 = vcmask 785408  }
  0x13   :  { %16962 = vst [vmem:[#allocation17_spill] sm:$0xff] %v9334_v25  ;;  %v317_v34 = vadd.f32 %v316_v31, %v315_v30  ;;  %v9402_v30 = vsel %vm189_vm0, %v9371_v56, 0.0  ;;  %v201_v31 = vadd.f32 %v9385_v63, %v199_v62  ;;  %v961_v62 = vmul.f32 %v9354_v47, %v9354_v47 }
  0x14   :  { %v324_v35 = vadd.f32 %v323_v33, %v322_v32  ;;  %16963 = vst [vmem:[#allocation18_spill] sm:$0xff] %v9354_v47  ;;  %v213_v32 = vadd.f32 %v9398_v27, %v9389_v19  ;;  %v9410_v33 = vsel %vm189_vm0, %v9374_v59, 0.0  ;;  %v963_v47 = vmul.f32 %v9356_v48, %v9356_v48 }
  0x15   :  { %v318_v36 = vrot.slane %v317_v34, 2  ;;  %16964 = vst [vmem:[#allocation19_spill] sm:$0xff] %v9356_v48  ;;  %v1024_v25 = vsel %vm189_vm0, %v960_v12, 0.0  ;;  %vm679_vm8 = vcmask 916480   ;;  %vm853_vm9 = vcmask 1041408  }
  0x16   :  { %v325_v39 = vrot.slane %v324_v35, 2  ;;  %16965 = vst [vmem:[#allocation20_spill] sm:$0xff] %v9358_v50  ;;  %v1029_v22 = vsel %vm189_vm0, %v963_v47, 0.0  ;;  %vm849_vm13 = vcmask 31744   ;;  %vm1983_vm14 = vcmask 64512  }
  0x17   :  { %v319_v42 = vadd.f32 %v318_v36, %v317_v34  ;;  %16966 = vst [vmem:[#allocation21_spill] sm:$0xff] %v9361_v51  ;;  %v9413_v34 = vadd.f32 %v9394_v26, %v201_v31  ;;  %vm3074_vm15 = vcmask 60416  }
  0x18   :  { %v326_v46 = vadd.f32 %v325_v39, %v324_v35  ;;  %16967 = vst [vmem:[#allocation22_spill] sm:$0xff] %v9365_v54  ;;  %v215_v35 = vadd.f32 %v9402_v30, %v213_v32  ;;  %v9429_v32 = vunpack.c.l.bf16 %v9013_v43  ;;  %v9445_v43 = vld [vmem:[#allocation3 + $0x40] sm:$0xff]  }
  0x19   :  { %v320_v49 = vrot.slane %v319_v42, 1  ;;  %16968 = vst [vmem:[#allocation23_spill] sm:$0xff] %v9368_v55  ;;  %v253_v39 = vsel %vm218_vm1, %v9413_v34, 0.0  ;;  %v9478_v55 = vld [vmem:[#allocation3 + $0xd0] sm:$0xff]  }
  0x1a   :  { %v327_v53 = vrot.slane %v326_v46, 1  ;;  %16969 = vst [vmem:[#allocation24_spill] sm:$0xff] %v9371_v56  ;;  %v9417_v36 = vadd.f32 %v9410_v33, %v215_v35  ;;  %v9469_v56 = vunpack.c.h.bf16 %v9445_v43  ;;  %v9498_v12 = vunpack.c.h.bf16 %v9478_v55 }
  0x1b   :  { %v321_v57 = vadd.f32 %v320_v49, %v319_v42  ;;  %16970 = vst [vmem:[#allocation25_spill] sm:$0xff] %v9374_v59  ;;  %v254_v42 = vrot.slane %v253_v39, 4  ;;  %v9423_v49 = vunpack.c.l.bf16 %v9012_v40  ;;  %v891_v59 = vadd.f32 %v197_v60, %v9460_v13  ;;  %v9484_v60 = vld [vmem:[#allocation3 + $0xd8] sm:$0xff]  }
  0x1c   :  { %v328_v58 = vadd.f32 %v327_v53, %v326_v46  ;;  %16971 = vst [vmem:[#allocation26_spill] sm:$0xff] %v9389_v19  ;;  %v9421_v46 = vunpack.c.l.bf16 %v9011_v38  ;;  %v260_v53 = vsel %vm218_vm1, %v9417_v36, 0.0 }
  0x1d   :  { %16972 = vst [vmem:[#allocation27_spill] sm:$0xff] %v9398_v27  ;;  %v9437_v38 = vsel %vm189_vm0, %v9423_v49, 0.0 }
  0x1e   :  { %v600_v24 = vsel %vm577_vm2, %v328_v58, %v321_v57  ;;  %16973 = vst [vmem:[#allocation28_spill] sm:$0xff] %v9402_v30  ;;  %v255_v57 = vadd.f32 %v254_v42, %v253_v39  ;;  %v261_v58 = vrot.slane %v260_v53, 4  ;;  %v9433_v35 = vsel %vm189_vm0, %v9421_v46, 0.0 }
  0x1f   :  { %601 = vrot.lane.b32.xlu0 %v600_v24, %s9172_s30  ;;  %16974 = vst [vmem:[#allocation29_spill] sm:$0xff] %v9410_v33  ;;  %v962_v40 = vmul.f32 %v9421_v46, %v9421_v46  ;;  %v892_v21 = vadd.f32 %v891_v59, %v9433_v35 }
  0x20   :  { %16975 = vst [vmem:[#allocation30_spill] sm:$0xff] %v9421_v46  ;;  %v256_v24 = vrot.slane %v255_v57, 2  ;;  %v262_v31 = vadd.f32 %v261_v58, %v260_v53  ;;  %v9447_v53 = vld [vmem:[#allocation3 + $0x48] sm:$0xff]   ;;  %v964_v58 = vmul.f32 %v9423_v49, %v9423_v49  ;;  %v966_v46 = vmul.f32 %v9429_v32, %v9429_v32 }
  0x21   :  { %16976 = vst [vmem:[#allocation31_spill] sm:$0xff] %v9423_v49  ;;  %v9464_v49 = vld [vmem:[#allocation3 + $0x58] sm:$0xff]   ;;  %v1027_v50 = vsel %vm189_vm0, %v962_v40, 0.0  ;;  %v893_v47 = vadd.f32 %v892_v21, %v9380_v61  ;;  %v1033_v21 = vsel %vm189_vm0, %v965_v14, 0.0 }
  0x22   :  { %16977 = vst [vmem:[#allocation32_spill] sm:$0xff] %v9429_v32  ;;  %v257_v39 = vadd.f32 %v256_v24, %v255_v57  ;;  %v263_v42 = vrot.slane %v262_v31, 2  ;;  %v1025_v57 = vsel %vm189_vm0, %v961_v62, 0.0  ;;  %v9456_v24 = vld [vmem:[#allocation3 + $0x50] sm:$0xff]   ;;  %v9472_v62 = vunpack.c.h.bf16 %v9447_v53 }
  0x23   :  { %16978 = vst [vmem:[#allocation33_spill] sm:$0xff] %v9443_v15  ;;  %v9482_v40 = vunpack.c.h.bf16 %v9456_v24  ;;  %v1026_v20 = vadd.f32 %v1025_v57, %v1024_v25  ;;  %v9489_v33 = vunpack.c.h.bf16 %v9464_v49  ;;  %v9503_v25 = vunpack.c.h.bf16 %v9484_v60 }
  0x24   :  { %v258_v48 = vrot.slane %v257_v39, 1  ;;  %v264_v37 = vadd.f32 %v263_v42, %v262_v31  ;;  %16979 = vst [vmem:[#allocation34_spill] sm:$0xff] %v9469_v56  ;;  %v9474_v31 = vld [vmem:[#allocation3 + $0xc0] sm:$0xff]   ;;  %v9476_v42 = vld [vmem:[#allocation3 + $0xc8] sm:$0xff]   ;;  %v9512_v57 = vsel %vm189_vm0, %v9472_v62, 0.0 }
  0x25   :  { %16980 = vst [vmem:[#allocation35_spill] sm:$0xff] %v9472_v62  ;;  %v9492_v27 = vunpack.c.h.bf16 %v9474_v31  ;;  %v1028_v19 = vadd.f32 %v1027_v50, %v1026_v20  ;;  %v894_v20 = vadd.f32 %v893_v47, %v9437_v38  ;;  %v9525_v61 = vsel %vm189_vm0, %v9489_v33, 0.0 }
  0x26   :  { %v259_v51 = vadd.f32 %v258_v48, %v257_v39  ;;  %v265_v15 = vrot.slane %v264_v37, 1  ;;  %16981 = vst [vmem:[#allocation36_spill] sm:$0xff] %v9482_v40  ;;  %v9495_v48 = vunpack.c.h.bf16 %v9476_v42  ;;  %v1031_v39 = vsel %vm189_vm0, %v964_v58, 0.0 }
  0x27   :  { %16982 = vst [vmem:[#allocation37_spill] sm:$0xff] %v9489_v33  ;;  %v1030_v50 = vadd.f32 %v1029_v22, %v1028_v19  ;;  %v9537_v58 = vsel %vm189_vm0, %v9498_v12, 0.0  ;;  %v895_v22 = vadd.f32 %v894_v20, %v9385_v63  ;;  %v967_v20 = vmul.f32 %v9365_v54, %v9365_v54 }
  0x28   :  { %v266_v30 = vadd.f32 %v265_v15, %v264_v37  ;;  %16983 = vst [vmem:[#allocation38_spill] sm:$0xff] %v9492_v27  ;;  %v9508_v15 = vsel %vm189_vm0, %v9469_v56, 0.0  ;;  %v9516_v37 = vsel %vm189_vm0, %v9482_v40, 0.0  ;;  %v9533_v14 = vsel %vm189_vm0, %v9495_v48, 0.0 }
  0x29   :  { %16984 = vst [vmem:[#allocation39_spill] sm:$0xff] %v9495_v48  ;;  %v1032_v19 = vadd.f32 %v1031_v39, %v1030_v50  ;;  %v9549_v48 = vsel %vm189_vm0, %v9503_v25, 0.0  ;;  %v9557_v39 = vunpack.c.h.bf16 %v9260_v0  ;;  %v1035_v50 = vsel %vm189_vm0, %v966_v46, 0.0 }
  0x2a   :  { %16985 = vst [vmem:[#allocation40_spill] sm:$0xff] %v9498_v12  ;;  %v588_v59 = vsel %vm577_vm2, %v266_v30, %v259_v51  ;;  %v392_v51 = vadd.f32 %v9512_v57, %v9508_v15  ;;  %v9529_v30 = vsel %vm189_vm0, %v9492_v27, 0.0  ;;  %v9545_v27 = vsel %vm189_vm0, %v9429_v32, 0.0 }
  0x2b   :  { %16986 = vst [vmem:[#allocation41_spill] sm:$0xff] %v9503_v25  ;;  %589 = vrot.lane.b32.xlu1 %v588_v59, %s9174_s0  ;;  %v406_v59 = vadd.f32 %v9533_v14, %v9529_v30  ;;  %v896_v33 = vadd.f32 %v895_v22, %v9545_v27  ;;  %v1034_v12 = vadd.f32 %v1033_v21, %v1032_v19  ;;  %v9569_v22 = vunpack.c.h.bf16 %v9262_v1 }
  0x2c   :  { %16987 = vst [vmem:[#allocation42_spill] sm:$0xff] %v9529_v30  ;;  %v394_v47 = vadd.f32 %v9516_v37, %v392_v51  ;;  %v968_v0 = vmul.f32 %v9267_v3, %v9267_v3  ;;  %v9583_v3 = vunpack.c.h.bf16 %v9264_v2 }
  0x2d   :  { %16988 = vst [vmem:[#allocation43_spill] sm:$0xff] %v9533_v14  ;;  %v408_v63 = vadd.f32 %v9537_v58, %v406_v59  ;;  %v897_v51 = vadd.f32 %v896_v33, %v9394_v26  ;;  %v1036_v59 = vadd.f32 %v1035_v50, %v1034_v12  ;;  %v9578_v26 = vsel %vm189_vm0, %v9557_v39, 0.0 }
  0x2e   :  { %16989 = vst [vmem:[#allocation44_spill] sm:$0xff] %v9537_v58  ;;  %v9553_v40 = vadd.f32 %v9525_v61, %v394_v47  ;;  %v1037_v33 = vsel %vm189_vm0, %v967_v20, 0.0  ;;  %v9591_v20 = vsel %vm189_vm0, %v9569_v22, 0.0 }
  0x2f   :  { %16990 = vst [vmem:[#allocation45_spill] sm:$0xff] %v9549_v48  ;;  %v9564_v32 = vadd.f32 %v9549_v48, %v408_v63  ;;  %v898_v47 = vadd.f32 %v897_v51, %v9302_v16  ;;  %v969_v16 = vmul.f32 %v9557_v39, %v9557_v39  ;;  %v1038_v50 = vadd.f32 %v1037_v33, %v1036_v59 }
  0x30   :  { %16991 = vst [vmem:[#allocation46_spill] sm:$0xff] %v9557_v39  ;;  %v445_v21 = vsel %vm218_vm1, %v9553_v40, 0.0  ;;  %v1039_v51 = vsel %vm189_vm0, %v968_v0, 0.0  ;;  %v9604_v33 = vunpack.c.l.bf16 %v9352_v45  ;;  %v192_v45 = vadd.f32 %v9433_v35, %v9460_v13 }
  0x31   :  { %16992 = vst [vmem:[#allocation47_spill] sm:$0xff] %v9569_v22  ;;  %v446_v19 = vrot.slane %v445_v21, 4  ;;  %v452_v46 = vsel %vm218_vm1, %v9564_v32, 0.0  ;;  %v899_v1 = vadd.f32 %v898_v47, %v9578_v26  ;;  %v9597_v47 = vunpack.c.l.bf16 %v9348_v41 }
  0x32   :  { %v453_v54 = vrot.slane %v452_v46, 4  ;;  %16993 = vst [vmem:[#allocation48_spill] sm:$0xff] %v9583_v3  ;;  %v1041_v0 = vsel %vm189_vm0, %v969_v16, 0.0  ;;  %v9612_v41 = vsel %vm189_vm0, %v9583_v3, 0.0 }
  0x33   :  { %v447_v63 = vadd.f32 %v446_v19, %v445_v21  ;;  %v900_v12 = vadd.f32 %v899_v1, %v9306_v17  ;;  %16994 = vst [vmem:[#allocation49_spill] sm:$0xff] %v9597_v47  ;;  %v9608_v1 = vunpack.c.l.bf16 %v9363_v52 }
  0x34   :  { %v454_v48 = vadd.f32 %v453_v54, %v452_v46  ;;  %v970_v54 = vmul.f32 %v9270_v4, %v9270_v4  ;;  %v9600_v46 = vunpack.c.l.bf16 %v9350_v44  ;;  %16996 = vst [vmem:[#allocation51_spill] sm:$0xff] %v9604_v33 }
  0x35   :  { %v448_v25 = vrot.slane %v447_v63, 2  ;;  %v901_v2 = vadd.f32 %v900_v12, %v9591_v20  ;;  %16997 = vst [vmem:[#allocation52_spill] sm:$0xff] %v9608_v1 }
  0x36   :  { %v455_v19 = vrot.slane %v454_v48, 2  ;;  %16995 = vst [vmem:[#allocation50_spill] sm:$0xff] %v9600_v46  ;;  %v9625_v52 = vsel %vm189_vm0, %v9600_v46, 0.0  ;;  %v1043_v13 = vsel %vm189_vm0, %v970_v54, 0.0  ;;  %v972_v54 = vmul.f32 %v9279_v8, %v9279_v8 }
  0x37   :  { %v449_v21 = vadd.f32 %v448_v25, %v447_v63  ;;  %v902_v25 = vadd.f32 %v901_v2, %v9310_v18  ;;  %v1040_v63 = vadd.f32 %v1039_v51, %v1038_v50  ;;  %v9621_v18 = vsel %vm189_vm0, %v9597_v47, 0.0 }
  0x38   :  { %v456_v59 = vadd.f32 %v455_v19, %v454_v48  ;;  %v971_v48 = vmul.f32 %v9569_v22, %v9569_v22  ;;  %v9634_v2 = vsel %vm189_vm0, %v9604_v33, 0.0  ;;  %v9686_v22 = vunpack.c.h.bf16 %v9281_v9 }
  0x39   :  { %v450_v17 = vrot.slane %v449_v21, 1  ;;  %v903_v16 = vadd.f32 %v902_v25, %v9612_v41  ;;  %v1042_v51 = vadd.f32 %v1041_v0, %v1040_v63 }
  0x3a   :  { %v457_v44 = vrot.slane %v456_v59, 1  ;;  %17005 = vst [vmem:[#allocation60_spill] sm:$0xff] %v9686_v22 }
  0x3b   :  { %v451_v12 = vadd.f32 %v450_v17, %v449_v21  ;;  %v9628_v50 = vadd.f32 %v903_v16, %v9328_v23  ;;  %v206_v21 = vadd.f32 %v9625_v52, %v9621_v18  ;;  %v194_v17 = vadd.f32 %v9437_v38, %v192_v45 }
  0x3c   :  { %v458_v19 = vadd.f32 %v457_v44, %v456_v59  ;;  %v9641_v59 = vsel %vm189_vm0, %v9608_v1, 0.0  ;;  %v1044_v25 = vadd.f32 %v1043_v13, %v1042_v51  ;;  %v1045_v38 = vsel %vm189_vm0, %v971_v48, 0.0  ;;  %v9671_v13 = vld [vmem:[#allocation3 + $0x70] sm:$0xff]  }
  0x3d   :  { %16998 = vst [vmem:[#allocation53_spill] sm:$0xff] %v9641_v59  ;;  %v208_v23 = vadd.f32 %v9634_v2, %v206_v21  ;;  %v9646_v0 = vadd.f32 %v9545_v27, %v194_v17  ;;  %v9656_v44 = vunpack.c.h.bf16 %v9272_v5  ;;  %v9662_v27 = vunpack.c.h.bf16 %v9274_v6  ;;  %v9669_v21 = vld [vmem:[#allocation3 + $0x68] sm:$0xff]   ;;  %v9040_v1 = vld [vmem:[#allocation3 + $0xf0] sm:$0xff]  }
  0x3e   :  { %v634_v35 = vsel %vm577_vm2, %v458_v19, %v451_v12  ;;  %v9659_v19 = vld [vmem:[#allocation3 + $0x60] sm:$0xff]   ;;  %v973_v45 = vmul.f32 %v9583_v3, %v9583_v3  ;;  %v974_v51 = vmul.f32 %v9286_v11, %v9286_v11  ;;  %v1047_v3 = vsel %vm189_vm0, %v972_v54, 0.0 }
  0x3f   :  { %635 = vrot.lane.b32.xlu1 %v634_v35, %s9174_s0  ;;  %16999 = vst [vmem:[#allocation54_spill] sm:$0xff] %v9646_v0  ;;  %v9649_v63 = vadd.f32 %v9641_v59, %v208_v23  ;;  %v235_v12 = vrot.slane %v9646_v0, 4  ;;  %v975_v5 = vmul.f32 %v9656_v44, %v9656_v44  ;;  %v1046_v35 = vadd.f32 %v1045_v38, %v1044_v25 }
  0x40   :  { %17001 = vst [vmem:[#allocation56_spill] sm:$0xff] %v9656_v44  ;;  %v9677_v23 = vunpack.c.h.bf16 %v9276_v7  ;;  %v9681_v11 = vunpack.c.l.bf16 %v9659_v19  ;;  %v9689_v25 = vunpack.c.l.bf16 %v9669_v21  ;;  %v9692_v38 = vunpack.c.l.bf16 %v9671_v13  ;;  %v9038_v7 = vld [vmem:[#allocation3 + $0xe0] sm:$0xff]  }
  0x41   :  { %17000 = vst [vmem:[#allocation55_spill] sm:$0xff] %v9649_v63  ;;  %v236_v16 = vrot.slane %v9649_v63, 4  ;;  %v239_v48 = vsel %vm218_vm1, %v235_v12, 0.0  ;;  %v9683_v12 = vld [vmem:[#allocation3 + $0x78] sm:$0xff]   ;;  %v9695_v54 = vunpack.c.h.bf16 %v9283_v10  ;;  %v1049_v39 = vsel %vm189_vm0, %v973_v45, 0.0 }
  0x42   :  { %17002 = vst [vmem:[#allocation57_spill] sm:$0xff] %v9662_v27  ;;  %v240_v17 = vrot.slane %v239_v48, 4  ;;  %v1051_v0 = vsel %vm189_vm0, %v974_v51, 0.0  ;;  %v1053_v9 = vsel %vm189_vm0, %v975_v5, 0.0  ;;  %v9701_v33 = vunpack.c.l.bf16 %v9683_v12  ;;  %v9041_v10 = vld [vmem:[#allocation3 + $0xf8] sm:$0xff]  }
  0x43   :  { %v246_v6 = vsel %vm218_vm1, %v236_v16, 0.0  ;;  %17003 = vst [vmem:[#allocation58_spill] sm:$0xff] %v9677_v23  ;;  %v9039_v16 = vld [vmem:[#allocation3 + $0xe8] sm:$0xff]   ;;  %v9703_v47 = vunpack.c.l.bf16 %v9038_v7  ;;  %v9709_v45 = vsel %vm189_vm0, %v9681_v11, 0.0  ;;  %v9719_v5 = vsel %vm189_vm0, %v9692_v38, 0.0 }
  0x44   :  { %v247_v8 = vrot.slane %v246_v6, 4  ;;  %17004 = vst [vmem:[#allocation59_spill] sm:$0xff] %v9681_v11  ;;  %v241_v4 = vadd.f32 %v240_v17, %v239_v48  ;;  %v1048_v48 = vadd.f32 %v1047_v3, %v1046_v35  ;;  %v9705_v58 = vunpack.c.l.bf16 %v9039_v16 }
  0x45   :  { %17006 = vst [vmem:[#allocation61_spill] sm:$0xff] %v9689_v25  ;;  %v9715_v3 = vsel %vm189_vm0, %v9689_v25, 0.0  ;;  %v9722_v35 = vunpack.c.l.bf16 %v9445_v43  ;;  %v9729_v30 = vunpack.c.l.bf16 %v9041_v10  ;;  %v9733_v25 = vsel %vm189_vm0, %v9701_v33, 0.0 }
  0x46   :  { %17007 = vst [vmem:[#allocation62_spill] sm:$0xff] %v9692_v38  ;;  %v248_v63 = vadd.f32 %v247_v8, %v246_v6  ;;  %v242_v17 = vrot.slane %v241_v4, 2  ;;  %v9711_v8 = vunpack.c.l.bf16 %v9040_v1  ;;  %v9725_v6 = vunpack.c.l.bf16 %v9447_v53 }
  0x47   :  { %17008 = vst [vmem:[#allocation63_spill] sm:$0xff] %v9695_v54  ;;  %v9736_v38 = vunpack.c.l.bf16 %v9456_v24  ;;  %v9741_v53 = vsel %vm189_vm0, %v9703_v47, 0.0  ;;  %v9754_v24 = vunpack.c.l.bf16 %v9464_v49  ;;  %v9772_v49 = vunpack.c.l.bf16 %v9478_v55 }
  0x48   :  { %17009 = vst [vmem:[#allocation64_spill] sm:$0xff] %v9701_v33  ;;  %v249_v46 = vrot.slane %v248_v63, 2  ;;  %v243_v51 = vadd.f32 %v242_v17, %v241_v4  ;;  %v481_v4 = vadd.f32 %v9715_v3, %v9709_v45  ;;  %v1050_v17 = vadd.f32 %v1049_v39, %v1048_v48 }
  0x49   :  { %17010 = vst [vmem:[#allocation65_spill] sm:$0xff] %v9703_v47  ;;  %v976_v39 = vmul.f32 %v9722_v35, %v9722_v35  ;;  %v9751_v48 = vsel %vm189_vm0, %v9711_v8, 0.0 }
  0x4a   :  { %17011 = vst [vmem:[#allocation66_spill] sm:$0xff] %v9705_v58  ;;  %v250_v14 = vadd.f32 %v249_v46, %v248_v63  ;;  %v244_v11 = vrot.slane %v243_v51, 1  ;;  %v483_v62 = vadd.f32 %v9719_v5, %v481_v4  ;;  %v9747_v63 = vsel %vm189_vm0, %v9705_v58, 0.0 }
  0x4b   :  { %17012 = vst [vmem:[#allocation67_spill] sm:$0xff] %v9711_v8  ;;  %v495_v47 = vadd.f32 %v9747_v63, %v9741_v53  ;;  %v1052_v59 = vadd.f32 %v1051_v0, %v1050_v17  ;;  %v9769_v8 = vsel %vm189_vm0, %v9729_v30, 0.0  ;;  %v9786_v17 = vsel %vm189_vm0, %v976_v39, 0.0 }
  0x4c   :  { %17013 = vst [vmem:[#allocation68_spill] sm:$0xff] %v9722_v35  ;;  %v251_v43 = vrot.slane %v250_v14, 1  ;;  %v245_v46 = vadd.f32 %v244_v11, %v243_v51  ;;  %v9757_v33 = vadd.f32 %v9733_v25, %v483_v62  ;;  %v9762_v11 = vunpack.c.l.bf16 %v9474_v31 }
  0x4d   :  { %17014 = vst [vmem:[#allocation69_spill] sm:$0xff] %v9729_v30  ;;  %v9765_v51 = vunpack.c.l.bf16 %v9476_v42  ;;  %v9779_v31 = vunpack.c.l.bf16 %v9484_v60  ;;  %v9783_v42 = vmul.f32 %v9469_v56, %v9469_v56  ;;  %v9796_v60 = vunpack.c.h.bf16 %v9671_v13 }
  0x4e   :  { %17015 = vst [vmem:[#allocation70_spill] sm:$0xff] %v9736_v38  ;;  %v252_v4 = vadd.f32 %v251_v43, %v250_v14  ;;  %v497_v14 = vadd.f32 %v9751_v48, %v495_v47  ;;  %v507_v0 = vsel %vm218_vm1, %v9757_v33, 0.0  ;;  %v9790_v43 = vunpack.c.h.bf16 %v9659_v19 }
  0x4f   :  { %17016 = vst [vmem:[#allocation71_spill] sm:$0xff] %v9741_v53  ;;  %v508_v55 = vrot.slane %v507_v0, 4  ;;  %v9793_v47 = vunpack.c.h.bf16 %v9669_v21  ;;  %v9804_v39 = vunpack.c.h.bf16 %v9683_v12  ;;  %v9806_v56 = vunpack.c.h.bf16 %v9038_v7 }
  0x50   :  { %17017 = vst [vmem:[#allocation72_spill] sm:$0xff] %v9747_v63  ;;  %v582_v62 = vsel %vm577_vm2, %v252_v4, %v245_v46  ;;  %v9799_v46 = vadd.f32 %v9769_v8, %v497_v14  ;;  %v9801_v4 = vadd.f32 %v1053_v9, %v1052_v59  ;;  %v9808_v30 = vunpack.c.h.bf16 %v9039_v16 }
  0x51   :  { %17018 = vst [vmem:[#allocation73_spill] sm:$0xff] %v9751_v48  ;;  %583 = vrot.lane.b32.xlu0 %v582_v62, %s9175_s15  ;;  %v509_v62 = vadd.f32 %v508_v55, %v507_v0  ;;  %v9810_v19 = vunpack.c.h.bf16 %v9040_v1  ;;  %v9812_v21 = vunpack.c.h.bf16 %v9041_v10  ;;  %v299_v14 = vsel %vm189_vm0, %v9656_v44, 0.0 }
  0x52   :  { %17019 = vst [vmem:[#allocation74_spill] sm:$0xff] %v9754_v24  ;;  %v514_v13 = vsel %vm218_vm1, %v9799_v46, 0.0  ;;  %v9820_v59 = vsel %vm189_vm0, %v9662_v27, 0.0  ;;  %v9824_v16 = vsel %vm189_vm0, %v9677_v23, 0.0  ;;  %v9828_v1 = vsel %vm189_vm0, %v9686_v22, 0.0 }
  0x53   :  { %17020 = vst [vmem:[#allocation75_spill] sm:$0xff] %v9762_v11  ;;  %v510_v12 = vrot.slane %v509_v62, 2  ;;  %v515_v7 = vrot.slane %v514_v13, 4  ;;  %v9832_v9 = vsel %vm189_vm0, %v9695_v54, 0.0  ;;  %v383_v10 = vsel %vm189_vm0, %v9722_v35, 0.0 }
  0x54   :  { %17021 = vst [vmem:[#allocation76_spill] sm:$0xff] %v9765_v51  ;;  %v384_v0 = vsel %vm189_vm0, %v9725_v6, 0.0  ;;  %v386_v55 = vsel %vm189_vm0, %v9736_v38, 0.0  ;;  %v9842_v48 = vsel %vm189_vm0, %v9754_v24, 0.0  ;;  %v9846_v63 = vsel %vm189_vm0, %v9762_v11, 0.0 }
  0x55   :  { %17022 = vst [vmem:[#allocation77_spill] sm:$0xff] %v9769_v8  ;;  %v511_v44 = vadd.f32 %v510_v12, %v509_v62  ;;  %v516_v8 = vadd.f32 %v515_v7, %v514_v13  ;;  %v9850_v58 = vsel %vm189_vm0, %v9765_v51, 0.0  ;;  %v9854_v35 = vsel %vm189_vm0, %v9772_v49, 0.0 }
  0x56   :  { %17023 = vst [vmem:[#allocation78_spill] sm:$0xff] %v9772_v49  ;;  %v9858_v62 = vsel %vm189_vm0, %v9779_v31, 0.0  ;;  %v9862_v13 = vsel %vm189_vm0, %v9790_v43, 0.0  ;;  %v9866_v11 = vsel %vm189_vm0, %v9793_v47, 0.0  ;;  %v9870_v51 = vsel %vm189_vm0, %v9796_v60, 0.0 }
  0x57   :  { %17024 = vst [vmem:[#allocation79_spill] sm:$0xff] %v9779_v31  ;;  %v512_v12 = vrot.slane %v511_v44, 1  ;;  %v517_v7 = vrot.slane %v516_v8, 2  ;;  %v9874_v49 = vsel %vm189_vm0, %v9804_v39, 0.0  ;;  %v9878_v31 = vsel %vm189_vm0, %v9806_v56, 0.0 }
  0x58   :  { %17025 = vst [vmem:[#allocation80_spill] sm:$0xff] %v9790_v43  ;;  %v9882_v54 = vsel %vm189_vm0, %v9808_v30, 0.0  ;;  %v9886_v22 = vsel %vm189_vm0, %v9810_v19, 0.0  ;;  %v9890_v23 = vsel %vm189_vm0, %v9812_v21, 0.0  ;;  %v270_v43 = vrot.slane %v9417_v36, 4 }
  0x59   :  { %17026 = vst [vmem:[#allocation81_spill] sm:$0xff] %v9793_v47  ;;  %v518_v27 = vadd.f32 %v517_v7, %v516_v8  ;;  %v513_v53 = vadd.f32 %v512_v12, %v511_v44  ;;  %v310_v44 = vadd.f32 %v9824_v16, %v9820_v59 }
  0x5a   :  { %17027 = vst [vmem:[#allocation82_spill] sm:$0xff] %v9796_v60  ;;  %v385_v60 = vadd.f32 %v384_v0, %v383_v10  ;;  %v280_v12 = vsel %vm218_vm1, %v270_v43, 0.0 }
  0x5b   :  { %17028 = vst [vmem:[#allocation83_spill] sm:$0xff] %v9804_v39  ;;  %v905_v39 = vadd.f32 %v9628_v50, %v299_v14  ;;  %v519_v47 = vrot.slane %v518_v27, 1 }
  0x5c   :  { %17029 = vst [vmem:[#allocation84_spill] sm:$0xff] %v9806_v56  ;;  %v399_v56 = vadd.f32 %v9850_v58, %v9846_v63  ;;  %v387_v38 = vadd.f32 %v386_v55, %v385_v60  ;;  %v281_v60 = vrot.slane %v280_v12, 4 }
  0x5d   :  { %17030 = vst [vmem:[#allocation85_spill] sm:$0xff] %v9808_v30  ;;  %v269_v30 = vrot.slane %v9413_v34, 4  ;;  %v906_v24 = vadd.f32 %v905_v39, %v383_v10  ;;  %v520_v50 = vadd.f32 %v519_v47, %v518_v27  ;;  %v523_v47 = vrot.slane %v9757_v33, 4 }
  0x5e   :  { %17031 = vst [vmem:[#allocation86_spill] sm:$0xff] %v9810_v19  ;;  %v296_v19 = vadd.f32 %v9591_v20, %v9578_v26  ;;  %v9907_v36 = vadd.f32 %v9842_v48, %v387_v38 }
  0x5f   :  { %17032 = vst [vmem:[#allocation87_spill] sm:$0xff] %v9812_v21  ;;  %v401_v21 = vadd.f32 %v9854_v35, %v399_v56  ;;  %v273_v8 = vsel %vm218_vm1, %v269_v30, 0.0  ;;  %v907_v34 = vadd.f32 %v906_v24, %v9508_v15  ;;  %v646_v56 = vsel %vm577_vm2, %v520_v50, %v513_v53 }
  0x60   :  { %17033 = vst [vmem:[#allocation88_spill] sm:$0xff] %v9854_v35  ;;  %v298_v7 = vadd.f32 %v9612_v41, %v296_v19  ;;  %v274_v20 = vrot.slane %v273_v8, 4  ;;  %v312_v30 = vadd.f32 %v9828_v1, %v310_v44  ;;  %647 = vrot.lane.b32.xlu1 %v646_v56, %s9172_s30  ;;  %v427_v41 = vrot.slane %v9907_v36, 4 }
  0x61   :  { %17034 = vst [vmem:[#allocation89_spill] sm:$0xff] %v9858_v62  ;;  %v9910_v26 = vadd.f32 %v9858_v62, %v401_v21  ;;  %v908_v27 = vadd.f32 %v907_v34, %v384_v0  ;;  %v282_v24 = vadd.f32 %v281_v60, %v280_v12 }
  0x62   :  { %17035 = vst [vmem:[#allocation90_spill] sm:$0xff] %v9907_v36  ;;  %v9913_v39 = vadd.f32 %v299_v14, %v298_v7  ;;  %v275_v38 = vadd.f32 %v274_v20, %v273_v8  ;;  %v9920_v43 = vadd.f32 %v9832_v9, %v312_v30  ;;  %v431_v21 = vsel %vm218_vm1, %v427_v41, 0.0 }
  0x63   :  { %17036 = vst [vmem:[#allocation91_spill] sm:$0xff] %v9910_v26  ;;  %v428_v15 = vrot.slane %v9910_v26, 4  ;;  %v909_v19 = vadd.f32 %v908_v27, %v9512_v57  ;;  %v432_v0 = vrot.slane %v431_v21, 4  ;;  %v283_v50 = vrot.slane %v282_v24, 2 }
  0x64   :  { %v349_v53 = vsel %vm218_vm1, %v9913_v39, 0.0  ;;  %v276_v10 = vrot.slane %v275_v38, 2  ;;  %v356_v34 = vsel %vm218_vm1, %v9920_v43, 0.0  ;;  %v524_v20 = vrot.slane %v9799_v46, 4 }
  0x65   :  { %v438_v14 = vsel %vm218_vm1, %v428_v15, 0.0  ;;  %v350_v8 = vrot.slane %v349_v53, 4  ;;  %v910_v12 = vadd.f32 %v909_v19, %v386_v55  ;;  %v433_v56 = vadd.f32 %v432_v0, %v431_v21 }
  0x66   :  { %v439_v44 = vrot.slane %v438_v14, 4  ;;  %v277_v7 = vadd.f32 %v276_v10, %v275_v38  ;;  %v284_v60 = vadd.f32 %v283_v50, %v282_v24  ;;  %v357_v41 = vrot.slane %v356_v34, 4 }
  0x67   :  { %v351_v57 = vadd.f32 %v350_v8, %v349_v53  ;;  %v911_v30 = vadd.f32 %v910_v12, %v9516_v37  ;;  %v527_v15 = vsel %vm218_vm1, %v523_v47, 0.0  ;;  %v434_v26 = vrot.slane %v433_v56, 2 }
  0x68   :  { %v440_v33 = vadd.f32 %v439_v44, %v438_v14  ;;  %v278_v27 = vrot.slane %v277_v7, 1  ;;  %v285_v62 = vrot.slane %v284_v60, 1  ;;  %v358_v10 = vadd.f32 %v357_v41, %v356_v34 }
  0x69   :  { %v352_v55 = vrot.slane %v351_v57, 2  ;;  %v912_v38 = vadd.f32 %v911_v30, %v9842_v48  ;;  %v528_v35 = vrot.slane %v527_v15, 4  ;;  %v435_v46 = vadd.f32 %v434_v26, %v433_v56 }
  0x6a   :  { %v441_v36 = vrot.slane %v440_v33, 2  ;;  %v279_v19 = vadd.f32 %v278_v27, %v277_v7  ;;  %v286_v14 = vadd.f32 %v285_v62, %v284_v60  ;;  %v359_v37 = vrot.slane %v358_v10, 2 }
  0x6b   :  { %v353_v24 = vadd.f32 %v352_v55, %v351_v57  ;;  %v913_v53 = vadd.f32 %v912_v38, %v9525_v61  ;;  %v529_v0 = vadd.f32 %v528_v35, %v527_v15  ;;  %v534_v44 = vsel %vm218_vm1, %v524_v20, 0.0 }
  0x6c   :  { %v442_v21 = vadd.f32 %v441_v36, %v440_v33  ;;  %v436_v47 = vrot.slane %v435_v46, 1  ;;  %v594_v8 = vsel %vm577_vm2, %v286_v14, %v279_v19  ;;  %v360_v26 = vadd.f32 %v359_v37, %v358_v10 }
  0x6d   :  { %v354_v12 = vrot.slane %v353_v24, 1  ;;  %v914_v48 = vadd.f32 %v913_v53, %v9709_v45  ;;  %595 = vrot.lane.b32.xlu2 %v594_v8, %s9176_s16  ;;  %v530_v36 = vrot.slane %v529_v0, 2  ;;  %v535_v62 = vrot.slane %v534_v44, 4 }
  0x6e   :  { %v443_v50 = vrot.slane %v442_v21, 1  ;;  %v437_v7 = vadd.f32 %v436_v47, %v435_v46  ;;  %v461_v35 = vrot.slane %v9553_v40, 4  ;;  %v361_v56 = vrot.slane %v360_v26, 1 }
  0x6f   :  { %v355_v61 = vadd.f32 %v354_v12, %v353_v24  ;;  %v915_v20 = vadd.f32 %v914_v48, %v9862_v13  ;;  %v531_v33 = vadd.f32 %v530_v36, %v529_v0  ;;  %v536_v60 = vadd.f32 %v535_v62, %v534_v44 }
  0x70   :  { %v444_v34 = vadd.f32 %v443_v50, %v442_v21  ;;  %v462_v45 = vrot.slane %v9564_v32, 4  ;;  %v465_v30 = vsel %vm218_vm1, %v461_v35, 0.0  ;;  %v488_v27 = vadd.f32 %v9866_v11, %v9862_v13 }
  0x71   :  { %v916_v41 = vadd.f32 %v915_v20, %v9715_v3  ;;  %v362_v15 = vadd.f32 %v361_v56, %v360_v26  ;;  %v532_v40 = vrot.slane %v531_v33, 1  ;;  %v537_v55 = vrot.slane %v536_v60, 2 }
  0x72   :  { %v628_v57 = vsel %vm577_vm2, %v444_v34, %v437_v7  ;;  %v466_v38 = vrot.slane %v465_v30, 4  ;;  %v472_v19 = vsel %vm218_vm1, %v462_v45, 0.0  ;;  %v490_v10 = vadd.f32 %v9870_v51, %v488_v27 }
  0x73   :  { %629 = vrot.lane.b32.xlu0 %v628_v57, %s9175_s15  ;;  %v502_v32 = vadd.f32 %v9882_v54, %v9878_v31  ;;  %v917_v46 = vadd.f32 %v916_v41, %v9866_v11  ;;  %v612_v21 = vsel %vm577_vm2, %v362_v15, %v355_v61  ;;  %v533_v13 = vadd.f32 %v532_v40, %v531_v33 }
  0x74   :  { %v538_v14 = vadd.f32 %v537_v55, %v536_v60  ;;  %613 = vrot.lane.b32.xlu1 %v612_v21, %s9177_s17  ;;  %v467_v3 = vadd.f32 %v466_v38, %v465_v30  ;;  %v473_v24 = vrot.slane %v472_v19, 4  ;;  %v492_v53 = vadd.f32 %v9874_v49, %v490_v10 }
  0x75   :  { %v504_v37 = vadd.f32 %v9886_v22, %v502_v32  ;;  %v918_v0 = vadd.f32 %v917_v46, %v9719_v5  ;;  %v365_v47 = vrot.slane %v9913_v39, 4  ;;  %v366_v11 = vrot.slane %v9920_v43, 4 }
  0x76   :  { %v539_v44 = vrot.slane %v538_v14, 1  ;;  %v468_v50 = vrot.slane %v467_v3, 2  ;;  %v474_v8 = vadd.f32 %v473_v24, %v472_v19  ;;  %v557_v48 = vrot.slane %v492_v53, 4 }
  0x77   :  { %v9961_v12 = vadd.f32 %v9890_v23, %v504_v37  ;;  %v919_v26 = vadd.f32 %v918_v0, %v9870_v51  ;;  %v369_v62 = vsel %vm218_vm1, %v365_v47, 0.0  ;;  %v376_v7 = vsel %vm218_vm1, %v366_v11, 0.0 }
  0x78   :  { %v540_v36 = vadd.f32 %v539_v44, %v538_v14  ;;  %v469_v34 = vadd.f32 %v468_v50, %v467_v3  ;;  %v475_v5 = vrot.slane %v474_v8, 2  ;;  %v561_v39 = vsel %vm218_vm1, %v557_v48, 0.0 }
  0x79   :  { %v558_v61 = vrot.slane %v9961_v12, 4  ;;  %v920_v43 = vadd.f32 %v919_v26, %v9733_v25  ;;  %v562_v20 = vrot.slane %v561_v39, 4  ;;  %v370_v56 = vrot.slane %v369_v62, 4 }
  0x7a   :  { %v652_v35 = vsel %vm577_vm2, %v540_v36, %v533_v13  ;;  %v470_v51 = vrot.slane %v469_v34, 1  ;;  %v476_v33 = vadd.f32 %v475_v5, %v474_v8  ;;  %v377_v57 = vrot.slane %v376_v7, 4 }
  0x7b   :  { %653 = vrot.lane.b32.xlu0 %v652_v35, %s9178_s18  ;;  %v568_v60 = vsel %vm218_vm1, %v558_v61, 0.0  ;;  %v921_v45 = vadd.f32 %v920_v43, %v9874_v49  ;;  %v563_v30 = vadd.f32 %v562_v20, %v561_v39  ;;  %v371_v41 = vadd.f32 %v370_v56, %v369_v62  ;;  %v17037_v49 = vld [vmem:[#allocation26_spill] sm:$0xff] }
  0x7c   :  { %v569_v27 = vrot.slane %v568_v60, 4  ;;  %v471_v15 = vadd.f32 %v470_v51, %v469_v34  ;;  %v477_v40 = vrot.slane %v476_v33, 1  ;;  %v378_v25 = vadd.f32 %v377_v57, %v376_v7  ;;  %v17038_v7 = vld [vmem:[#allocation27_spill] sm:$0xff] }
  0x7d   :  { %v331_v55 = vrot.slane %v9339_v28, 4  ;;  %v922_v38 = vadd.f32 %v921_v45, %v9621_v18  ;;  %v564_v19 = vrot.slane %v563_v30, 2  ;;  %v372_v32 = vrot.slane %v371_v41, 2 }
  0x7e   :  { %v570_v10 = vadd.f32 %v569_v27, %v568_v60  ;;  %v478_v46 = vadd.f32 %v477_v40, %v476_v33  ;;  %v379_v21 = vrot.slane %v378_v25, 2  ;;  %v332_v13 = vrot.slane %v9342_v29, 4 }
  0x7f   :  { %v335_v14 = vsel %vm218_vm1, %v331_v55, 0.0  ;;  %v923_v3 = vadd.f32 %v922_v38, %v17037_v49  ;;  %v565_v24 = vadd.f32 %v564_v19, %v563_v30  ;;  %v373_v0 = vadd.f32 %v372_v32, %v371_v41  ;;  %v17039_v41 = vld [vmem:[#allocation28_spill] sm:$0xff]  ;;  %v17040_v19 = vld [vmem:[#allocation53_spill] sm:$0xff] }
  0x80   :  { %v571_v37 = vrot.slane %v570_v10, 2  ;;  %v640_v44 = vsel %vm577_vm2, %v478_v46, %v471_v15  ;;  %v380_v47 = vadd.f32 %v379_v21, %v378_v25  ;;  %v336_v28 = vrot.slane %v335_v14, 4 }
  0x81   :  { %v342_v18 = vsel %vm218_vm1, %v332_v13, 0.0  ;;  %v924_v11 = vadd.f32 %v923_v3, %v9625_v52  ;;  %641 = vrot.lane.b32.xlu2 %v640_v44, %s9176_s16  ;;  %v566_v50 = vrot.slane %v565_v24, 1  ;;  %v374_v29 = vrot.slane %v373_v0, 1  ;;  %v17041_v13 = vld [vmem:[#allocation29_spill] sm:$0xff]  ;;  %v17042_v3 = vld [vmem:[#allocation35_spill] sm:$0xff]  ;;  %v17043_v44 = vld [vmem:[#allocation14_spill] sm:$0xff] }
  0x82   :  { %v572_v8 = vadd.f32 %v571_v37, %v570_v10  ;;  %v381_v48 = vrot.slane %v380_v47, 1  ;;  %v337_v26 = vadd.f32 %v336_v28, %v335_v14  ;;  %v343_v36 = vrot.slane %v342_v18, 4 }
  0x83   :  { %v541_v62 = vsel %vm218_vm1, %v492_v53, 0.0  ;;  %v925_v34 = vadd.f32 %v924_v11, %v17038_v7  ;;  %v567_v5 = vadd.f32 %v566_v50, %v565_v24  ;;  %v375_v39 = vadd.f32 %v374_v29, %v373_v0  ;;  %v17044_v29 = vld [vmem:[#allocation70_spill] sm:$0xff] }
  0x84   :  { %v573_v61 = vrot.slane %v572_v8, 1  ;;  %v382_v43 = vadd.f32 %v381_v48, %v380_v47  ;;  %v338_v35 = vrot.slane %v337_v26, 2  ;;  %v344_v20 = vadd.f32 %v343_v36, %v342_v18 }
  0x85   :  { %v542_v56 = vrot.slane %v541_v62, 4  ;;  %v978_v52 = vmul.f32 %v9725_v6, %v9725_v6  ;;  %v926_v51 = vadd.f32 %v925_v34, %v9634_v2  ;;  %v548_v60 = vsel %vm218_vm1, %v9961_v12, 0.0 }
  0x86   :  { %v574_v33 = vadd.f32 %v573_v61, %v572_v8  ;;  %v618_v53 = vsel %vm577_vm2, %v382_v43, %v375_v39  ;;  %v339_v57 = vadd.f32 %v338_v35, %v337_v26  ;;  %v345_v45 = vrot.slane %v344_v20, 2  ;;  %v17046_v39 = vld [vmem:[#allocation36_spill] sm:$0xff] }
  0x87   :  { %v543_v30 = vadd.f32 %v542_v56, %v541_v62  ;;  %v1056_v27 = vadd.f32 %v9786_v17, %v9801_v4  ;;  %v927_v15 = vadd.f32 %v926_v51, %v17039_v41  ;;  %619 = vrot.lane.b32.xlu0 %v618_v53, %s9179_s19  ;;  %v549_v25 = vrot.slane %v548_v60, 4  ;;  %v17045_v62 = vld [vmem:[#allocation15_spill] sm:$0xff] }
  0x88   :  { %v664_v40 = vsel %vm577_vm2, %v574_v33, %v567_v5  ;;  %v1057_v2 = vsel %vm189_vm0, %v9783_v42, 0.0  ;;  %v340_v12 = vrot.slane %v339_v57, 1  ;;  %v346_v55 = vadd.f32 %v345_v45, %v344_v20  ;;  %v17047_v20 = vld [vmem:[#allocation16_spill] sm:$0xff]  ;;  %v17048_v33 = vld [vmem:[#allocation74_spill] sm:$0xff] }
  0x89   :  { %665 = vrot.lane.b32.xlu1 %v664_v40, %s9179_s19  ;;  %v544_v38 = vrot.slane %v543_v30, 2  ;;  %v928_v10 = vadd.f32 %v927_v15, %v17040_v19  ;;  %v550_v32 = vadd.f32 %v549_v25, %v548_v60  ;;  %v1058_v4 = vadd.f32 %v1057_v2, %v1056_v27  ;;  %v17050_v27 = vld [vmem:[#allocation37_spill] sm:$0xff]  ;;  %v17051_v25 = vld [vmem:[#allocation42_spill] sm:$0xff] }
  0x8a   :  { %v341_v46 = vadd.f32 %v340_v12, %v339_v57  ;;  %v347_v21 = vrot.slane %v346_v55, 1  ;;  %v979_v24 = vmul.f32 %v17042_v3, %v17042_v3  ;;  %v1059_v37 = vsel %vm189_vm0, %v978_v52, 0.0 }
  0x8b   :  { %v545_v17 = vadd.f32 %v544_v38, %v543_v30  ;;  %v929_v14 = vadd.f32 %v928_v10, %v17041_v13  ;;  %v551_v49 = vrot.slane %v550_v32, 2  ;;  %v1060_v11 = vadd.f32 %v1059_v37, %v1058_v4  ;;  %v17053_v10 = vld [vmem:[#allocation80_spill] sm:$0xff] }
  0x8c   :  { %v348_v42 = vadd.f32 %v347_v21, %v346_v55  ;;  %v980_v48 = vmul.f32 %v17044_v29, %v17044_v29  ;;  %v1061_v26 = vsel %vm189_vm0, %v979_v24, 0.0  ;;  %v981_v43 = vmul.f32 %v17046_v39, %v17046_v39  ;;  %v17052_v55 = vld [vmem:[#allocation59_spill] sm:$0xff]  ;;  %v17056_v13 = vld [vmem:[#allocation88_spill] sm:$0xff] }
  0x8d   :  { %v546_v0 = vrot.slane %v545_v17, 1  ;;  %v930_v47 = vadd.f32 %v929_v14, %v17043_v44  ;;  %v552_v28 = vadd.f32 %v551_v49, %v550_v32  ;;  %v1062_v5 = vadd.f32 %v1061_v26, %v1060_v11  ;;  %v17057_v49 = vld [vmem:[#allocation81_spill] sm:$0xff]  ;;  %v17059_v44 = vld [vmem:[#allocation62_spill] sm:$0xff] }
  0x8e   :  { %v606_v18 = vsel %vm577_vm2, %v348_v42, %v341_v46  ;;  %v982_v60 = vmul.f32 %v17048_v33, %v17048_v33  ;;  %v1065_v53 = vsel %vm189_vm0, %v981_v43, 0.0  ;;  %v983_v41 = vmul.f32 %v17050_v27, %v17050_v27  ;;  %v17054_v46 = vld [vmem:[#allocation43_spill] sm:$0xff]  ;;  %v17058_v42 = vld [vmem:[#allocation44_spill] sm:$0xff] }
  0x8f   :  { %v931_v50 = vadd.f32 %v930_v47, %v9820_v59  ;;  %607 = vrot.lane.b32.xlu2 %v606_v18, %s9178_s18  ;;  %v553_v8 = vrot.slane %v552_v28, 1  ;;  %v547_v36 = vadd.f32 %v546_v0, %v545_v17  ;;  %v1063_v59 = vsel %vm189_vm0, %v980_v48, 0.0  ;;  %v17055_v17 = vld [vmem:[#allocation61_spill] sm:$0xff]  ;;  %v17064_v43 = vld [vmem:[#allocation71_spill] sm:$0xff]  ;;  %s9184_s18 = smov 56  }
  0x90   :  { %v1064_v52 = vadd.f32 %v1063_v59, %v1062_v5  ;;  %v1067_v15 = vsel %vm189_vm0, %v982_v60, 0.0  ;;  %v1069_v12 = vsel %vm189_vm0, %v983_v41, 0.0  ;;  %v984_v38 = vmul.f32 %v17052_v55, %v17052_v55  ;;  %v17060_v18 = vld [vmem:[#allocation89_spill] sm:$0xff] }
  0x91   :  { %v932_v7 = vadd.f32 %v931_v50, %v17045_v62  ;;  %v554_v34 = vadd.f32 %v553_v8, %v552_v28  ;;  %v986_v4 = vmul.f32 %v17055_v17, %v17055_v17  ;;  %v987_v24 = vmul.f32 %v17057_v49, %v17057_v49  ;;  %v17061_v8 = vld [vmem:[#allocation82_spill] sm:$0xff] }
  0x92   :  { %v1066_v45 = vadd.f32 %v1065_v53, %v1064_v52  ;;  %v988_v47 = vmul.f32 %v17059_v44, %v17059_v44  ;;  %v989_v48 = vmul.f32 %v17061_v8, %v17061_v8 }
  0x93   :  { %v933_v61 = vadd.f32 %v932_v7, %v9824_v16  ;;  %v658_v35 = vsel %vm577_vm2, %v554_v34, %v547_v36  ;;  %v17049_v16 = vld [vmem:[#allocation17_spill] sm:$0xff]  ;;  %v1075_v28 = vsel %vm189_vm0, %v986_v4, 0.0  ;;  %v1077_v26 = vsel %vm189_vm0, %v987_v24, 0.0  ;;  %v17063_v34 = vld [vmem:[#allocation64_spill] sm:$0xff]  ;;  %v17070_v4 = vld [vmem:[#allocation51_spill] sm:$0xff] }
  0x94   :  { %v17062_v36 = vld [vmem:[#allocation45_spill] sm:$0xff]  ;;  %v990_v5 = vmul.f32 %v17063_v34, %v17063_v34  ;;  %v1081_v52 = vsel %vm189_vm0, %v989_v48, 0.0  ;;  %v8780_v24 = vld [vmem:[%s16609_s1 + $0x78] sm:$0xff] }
  0x95   :  { %v934_v56 = vadd.f32 %v933_v61, %v17047_v20  ;;  %v1079_v61 = vsel %vm189_vm0, %v988_v47, 0.0  ;;  %v17065_v20 = vld [vmem:[#allocation83_spill] sm:$0xff]  ;;  %833 = vmatpush.bf16.msra.mxu1 %v8780_v24  ;;  %v8771_v47 = vld [vmem:[%s16609_s1 + $0x30] sm:$0xff] }
  0x96   :  { %v1083_v53 = vsel %vm189_vm0, %v990_v5, 0.0 }
  0x97   :  { %v935_v51 = vadd.f32 %v934_v56, %v9828_v1  ;;  %659 = vrot.lane.b32.xlu2 %v658_v35, %s9177_s17  ;;  %v1068_v1 = vadd.f32 %v1067_v15, %v1066_v45  ;;  %v991_v56 = vmul.f32 %v17065_v20, %v17065_v20  ;;  %v17067_v15 = vld [vmem:[#allocation21_spill] sm:$0xff]  ;;  %s9183_s17 = smov 40  }
  0x99   :  { %v936_v57 = vadd.f32 %v935_v51, %v17049_v16  ;;  %v1070_v32 = vadd.f32 %v1069_v12, %v1068_v1  ;;  %v17066_v16 = vld [vmem:[#allocation49_spill] sm:$0xff]  ;;  %v17068_v12 = vld [vmem:[#allocation50_spill] sm:$0xff] }
  0x9b   :  { %v937_v30 = vadd.f32 %v936_v57, %v9832_v9  ;;  %v985_v9 = vmul.f32 %v17053_v10, %v17053_v10  ;;  %v992_v57 = vmul.f32 %v17066_v16, %v17066_v16 }
  0x9d   :  { %v938_v40 = vadd.f32 %v937_v30, %v9846_v63  ;;  %v1071_v63 = vsel %vm189_vm0, %v984_v38, 0.0  ;;  %v1073_v37 = vsel %vm189_vm0, %v985_v9, 0.0  ;;  %v1085_v30 = vsel %vm189_vm0, %v991_v56, 0.0  ;;  %v17069_v9 = vld [vmem:[#allocation23_spill] sm:$0xff] }
  0x9e   :  { %v1072_v0 = vadd.f32 %v1071_v63, %v1070_v32  ;;  %v1087_v1 = vsel %vm189_vm0, %v992_v57, 0.0  ;;  %v995_v32 = vmul.f32 %v17069_v9, %v17069_v9  ;;  %v996_v63 = vmul.f32 %v17070_v4, %v17070_v4 }
  0x9f   :  { %v939_v2 = vadd.f32 %v938_v40, %v17051_v25  ;;  %v993_v40 = vmul.f32 %v17067_v15, %v17067_v15 }
  0xa0   :  { %v1074_v50 = vadd.f32 %v1073_v37, %v1072_v0  ;;  %v1095_v0 = vsel %vm189_vm0, %v996_v63, 0.0  ;;  %v8776_v63 = vld [vmem:[%s16609_s1 + $0x58] sm:$0xff] }
  0xa1   :  { %v940_v19 = vadd.f32 %v939_v2, %v9850_v58  ;;  %v1089_v38 = vsel %vm189_vm0, %v993_v40, 0.0  ;;  %v17078_v40 = vld [vmem:[#allocation10_spill] sm:$0xff] }
  0xa2   :  { %v1076_v7 = vadd.f32 %v1075_v28, %v1074_v50  ;;  %v8779_v28 = vld [vmem:[%s16609_s1 + $0x70] sm:$0xff] }
  0xa3   :  { %v941_v21 = vadd.f32 %v940_v19, %v17054_v46  ;;  %834 = vmatpush.bf16.msra.mxu1 %v8779_v28 }
  0xa4   :  { %v1078_v35 = vadd.f32 %v1077_v26, %v1076_v7  ;;  %v8770_v26 = vld [vmem:[%s16609_s1 + $0x28] sm:$0xff] }
  0xa5   :  { %v942_v14 = vadd.f32 %v941_v21, %v17056_v13  ;;  %v1093_v13 = vsel %vm189_vm0, %v995_v32, 0.0  ;;  %v17073_v7 = vld [vmem:[#allocation25_spill] sm:$0xff] }
  0xa6   :  { %v1080_v60 = vadd.f32 %v1079_v61, %v1078_v35  ;;  %v999_v5 = vmul.f32 %v17073_v7, %v17073_v7  ;;  %v17075_v35 = vld [vmem:[#allocation54_spill] sm:$0xff] }
  0xa7   :  { %v943_v58 = vadd.f32 %v942_v14, %v17058_v42  ;;  %v8772_v14 = vld [vmem:[%s16609_s1 + $0x38] sm:$0xff]  ;;  %v17071_v42 = vld [vmem:[#allocation24_spill] sm:$0xff]  ;;  %v219_v56 = vsel %vm218_vm1, %v17075_v35, 0.0  ;;  %v8766_v35 = vld [vmem:[%s16609_s1 + $0x8] sm:$0xff] }
  0xa8   :  { %v1082_v45 = vadd.f32 %v1081_v52, %v1080_v60  ;;  %820 = vmatpush.bf16.msra.mxu0 %v8772_v14  ;;  %v8769_v52 = vld [vmem:[%s16609_s1 + $0x20] sm:$0xff]  ;;  %v17079_v14 = vld [vmem:[#allocation57_spill] sm:$0xff] }
  0xa9   :  { %v944_v11 = vadd.f32 %v943_v58, %v17060_v18  ;;  %v997_v58 = vmul.f32 %v17071_v42, %v17071_v42  ;;  %v8777_v60 = vld [vmem:[%s16609_s1 + $0x60] sm:$0xff]  ;;  %v1001_v24 = vmul.f32 %v17079_v14, %v17079_v14 }
  0xaa   :  { %v1084_v41 = vadd.f32 %v1083_v53, %v1082_v45  ;;  %v17076_v53 = vld [vmem:[#allocation90_spill] sm:$0xff]  ;;  %v17077_v45 = vld [vmem:[#allocation91_spill] sm:$0xff] }
  0xab   :  { %v945_v62 = vadd.f32 %v944_v11, %v17062_v36  ;;  %v17072_v11 = vld [vmem:[#allocation52_spill] sm:$0xff]  ;;  %v1097_v48 = vsel %vm189_vm0, %v997_v58, 0.0  ;;  %v8778_v36 = vld [vmem:[%s16609_s1 + $0x68] sm:$0xff]  ;;  %v411_v57 = vsel %vm218_vm1, %v17076_v53, 0.0 }
  0xac   :  { %v1086_v25 = vadd.f32 %v1085_v30, %v1084_v41  ;;  %821 = vmatpush.bf16.msra.mxu0 %v8771_v47  ;;  %v998_v50 = vmul.f32 %v17072_v11, %v17072_v11  ;;  %835 = vmatpush.bf16.msra.mxu1 %v8778_v36  ;;  %v418_v30 = vsel %vm218_vm1, %v17077_v45, 0.0  ;;  %v412_v32 = vrot.slane %v411_v57, 4  ;;  %v17081_v45 = vld [vmem:[#allocation58_spill] sm:$0xff] }
  0xad   :  { %v946_v59 = vadd.f32 %v945_v62, %v17064_v43  ;;  %v17074_v43 = vld [vmem:[#allocation55_spill] sm:$0xff] }
  0xae   :  { %v1088_v2 = vadd.f32 %v1087_v1, %v1086_v25  ;;  %v1099_v61 = vsel %vm189_vm0, %v998_v50, 0.0  ;;  %v1000_v1 = vmul.f32 %v17078_v40, %v17078_v40  ;;  %v1101_v25 = vsel %vm189_vm0, %v999_v5, 0.0  ;;  %v8775_v50 = vld [vmem:[%s16609_s1 + $0x50] sm:$0xff] }
  0xaf   :  { %v10058_v51 = vadd.f32 %v946_v59, %v9878_v31  ;;  %v994_v31 = vmul.f32 %v17068_v12, %v17068_v12  ;;  %v226_v59 = vsel %vm218_vm1, %v17074_v43, 0.0  ;;  %v413_v47 = vadd.f32 %v412_v32, %v411_v57  ;;  %v8765_v32 = vld [vmem:[%s16609_s1] sm:$0xff] }
  0xb0   :  { %v1090_v19 = vadd.f32 %v1089_v38, %v1088_v2  ;;  %822 = vmatpush.bf16.msra.mxu0 %v8770_v26  ;;  %836 = vmatpush.bf16.msra.mxu1 %v8777_v60  ;;  %v10120_v2 = vpop.permute.xlu0 %601  ;;  %v220_v38 = vrot.slane %v219_v56, 4  ;;  %v17080_v26 = vld [vmem:[#allocation11_spill] sm:$0xff]  ;;  %vm3077_vm1 = vcmask 57344  }
  0xb1   :  { %v1091_v46 = vsel %vm189_vm0, %v994_v31, 0.0  ;;  %v227_v31 = vrot.slane %v226_v59, 4  ;;  %v1002_v36 = vmul.f32 %v17080_v26, %v17080_v26  ;;  %v414_v43 = vrot.slane %v413_v47, 2 }
  0xb2   :  { %v1092_v21 = vadd.f32 %v1091_v46, %v1090_v19  ;;  %v10122_v19 = vpop.permute.xlu1 %589  ;;  %v419_v46 = vrot.slane %v418_v30, 4 }
  0xb3   :  { %v228_v58 = vadd.f32 %v227_v31, %v226_v59  ;;  %v415_v31 = vadd.f32 %v414_v43, %v413_v47 }
  0xb4   :  { %v1094_v37 = vadd.f32 %v1093_v13, %v1092_v21  ;;  %823 = vmatpush.bf16.msra.mxu0 %v8769_v52  ;;  %v8768_v21 = vld [vmem:[%s16609_s1 + $0x18] sm:$0xff]  ;;  %837 = vmatpush.bf16.msra.mxu1 %v8776_v63  ;;  %v420_v28 = vadd.f32 %v419_v46, %v418_v30  ;;  %v1003_v30 = vmul.f32 %v17081_v45, %v17081_v45  ;;  %v8773_v46 = vld [vmem:[%s16609_s1 + $0x40] sm:$0xff] }
  0xb5   :  { %v229_v5 = vrot.slane %v228_v58, 2  ;;  %v17082_v63 = vld [vmem:[#allocation12_spill] sm:$0xff] }
  0xb6   :  { %v1096_v18 = vadd.f32 %v1095_v0, %v1094_v37  ;;  %v1103_v37 = vsel %vm189_vm0, %v1000_v1, 0.0  ;;  %v221_v0 = vadd.f32 %v220_v38, %v219_v56  ;;  %v421_v59 = vrot.slane %v420_v28, 2  ;;  %v8774_v56 = vld [vmem:[%s16609_s1 + $0x48] sm:$0xff] }
  0xb7   :  { %v230_v1 = vadd.f32 %v229_v5, %v228_v58 }
  0xb8   :  { %v1098_v62 = vadd.f32 %v1097_v48, %v1096_v18  ;;  %824 = vmatpush.bf16.msra.mxu0 %v8768_v21  ;;  %v8767_v18 = vld [vmem:[%s16609_s1 + $0x10] sm:$0xff]  ;;  %838 = vmatpush.bf16.msra.mxu1 %v8775_v50  ;;  %v422_v38 = vadd.f32 %v421_v59, %v420_v28 }
  0xba   :  { %v1100_v41 = vadd.f32 %v1099_v61, %v1098_v62  ;;  %v1105_v62 = vsel %vm189_vm0, %v1001_v24, 0.0  ;;  %v222_v61 = vrot.slane %v221_v0, 2  ;;  %v636_v57 = vpop.permute.xlu1 %635  ;;  %v1109_v24 = vsel %vm189_vm0, %v1003_v30, 0.0 }
  0xbb   :  { %v423_v47 = vrot.slane %v422_v38, 1 }
  0xbc   :  { %v1102_v13 = vadd.f32 %v1101_v25, %v1100_v41  ;;  %825 = vmatpush.bf16.msra.mxu0 %v8767_v18  ;;  %839 = vmatpush.bf16.msra.mxu1 %v8774_v56  ;;  %v1107_v41 = vsel %vm189_vm0, %v1002_v36, 0.0  ;;  %v223_v25 = vadd.f32 %v222_v61, %v221_v0  ;;  %v416_v0 = vrot.slane %v415_v31, 1  ;;  %v17083_v18 = vld [vmem:[#allocation60_spill] sm:$0xff] }
  0xbd   :  { %v1005_v50 = vmul.f32 %v17083_v18, %v17083_v18 }
  0xbe   :  { %v1104_v48 = vadd.f32 %v1103_v37, %v1102_v13  ;;  %v1004_v13 = vmul.f32 %v17082_v63, %v17082_v63  ;;  %v231_v37 = vrot.slane %v230_v1, 1  ;;  %v224_v58 = vrot.slane %v223_v25, 1 }
  0xbf   :  { %v417_v59 = vadd.f32 %v416_v0, %v415_v31 }
  0xc0   :  { %v1106_v53 = vadd.f32 %v1105_v62, %v1104_v48  ;;  %826 = vmatpush.bf16.msra.mxu0 %v8766_v35  ;;  %840 = vmatpush.bf16.msra.mxu1 %v8773_v46  ;;  %v1111_v48 = vsel %vm189_vm0, %v1004_v13, 0.0  ;;  %v232_v62 = vadd.f32 %v231_v37, %v230_v1  ;;  %v225_v5 = vadd.f32 %v224_v58, %v223_v25  ;;  %v17085_v1 = vld [vmem:[#allocation63_spill] sm:$0xff] }
  0xc1   :  { %v424_v35 = vadd.f32 %v423_v47, %v422_v38  ;;  %v1007_v25 = vmul.f32 %v17085_v1, %v17085_v1 }
  0xc2   :  { %v1108_v21 = vadd.f32 %v1107_v41, %v1106_v53  ;;  %v17084_v53 = vld [vmem:[#allocation13_spill] sm:$0xff]  ;;  %v1113_v41 = vsel %vm189_vm0, %v1005_v50, 0.0 }
  0xc3   :  { %v584_v60 = vpop.permute.xlu0 %583  ;;  %v1006_v30 = vmul.f32 %v17084_v53, %v17084_v53  ;;  %v624_v46 = vsel %vm577_vm2, %v424_v35, %v417_v59  ;;  %v1117_v50 = vsel %vm189_vm0, %v1007_v25, 0.0  ;;  %v17087_v59 = vld [vmem:[#allocation38_spill] sm:$0xff] }
  0xc4   :  { %827 = vmatpush.bf16.msra.mxu0 %v8765_v32  ;;  %v1110_v28 = vadd.f32 %v1109_v24, %v1108_v21  ;;  %v578_v32 = vsel %vm577_vm2, %v232_v62, %v225_v5 }
  0xc5   :  { %v668_v13 = vsel %vm189_vm0, %v578_v32, %v584_v60  ;;  %v1115_v31 = vsel %vm189_vm0, %v1006_v30, 0.0  ;;  %v17086_v60 = vld [vmem:[#allocation75_spill] sm:$0xff] }
  0xc6   :  { %v1112_v56 = vadd.f32 %v1111_v48, %v1110_v28  ;;  %v670_v24 = vsel %vm669_vm3, %v668_v13, %v10122_v19  ;;  %v1008_v48 = vmul.f32 %v17086_v60, %v17086_v60  ;;  %v1009_v19 = vmul.f32 %v17087_v59, %v17087_v59 }
  0xc7   :  { %v596_v52 = vpop.permute.xlu2 %595 }
  0xc8   :  { %v1114_v21 = vadd.f32 %v1113_v41, %v1112_v56  ;;  %v672_v62 = vsel %vm671_vm4, %v670_v24, %v596_v52  ;;  %v1119_v35 = vsel %vm189_vm0, %v1008_v48, 0.0 }
  0xca   :  { %v1116_v0 = vadd.f32 %v1115_v31, %v1114_v21  ;;  %v1121_v21 = vsel %vm189_vm0, %v1009_v19, 0.0 }
  0xd2   :  { %v648_v43 = vpop.permute.xlu1 %647 }
  0xdb   :  { %v642_v36 = vpop.permute.xlu2 %641 }
  0xe5   :  { %v630_v61 = vpop.permute.xlu0 %629 }
  0xe6   :  { %v681_v38 = vsel %vm189_vm0, %v624_v46, %v630_v61  ;;  %v614_v28 = vpop.permute.xlu1 %613  ;;  %v1118_v61 = vadd.f32 %v1117_v50, %v1116_v0  ;;  %v17088_v46 = vld [vmem:[#allocation76_spill] sm:$0xff] }
  0xe7   :  { %v682_v47 = vsel %vm669_vm3, %v681_v38, %v636_v57  ;;  %v674_v57 = vsel %vm673_vm5, %v672_v62, %v10120_v2 }
  0xe8   :  { %v683_v5 = vsel %vm671_vm4, %v682_v47, %v642_v36  ;;  %v1120_v32 = vadd.f32 %v1119_v35, %v1118_v61  ;;  %v1010_v36 = vmul.f32 %v17088_v46, %v17088_v46  ;;  %v17090_v61 = vld [vmem:[#allocation78_spill] sm:$0xff] }
  0xe9   :  { %v608_v37 = vpop.permute.xlu2 %607  ;;  %v684_v56 = vsel %vm673_vm5, %v683_v5, %v648_v43  ;;  %v17089_v43 = vld [vmem:[#allocation39_spill] sm:$0xff] }
  0xea   :  { %v676_v52 = vsel %vm675_vm6, %v674_v57, %v608_v37  ;;  %v1122_v47 = vadd.f32 %v1121_v21, %v1120_v32  ;;  %v1123_v48 = vsel %vm189_vm0, %v1010_v36, 0.0  ;;  %v17091_v57 = vld [vmem:[#allocation40_spill] sm:$0xff]  ;;  %v17092_v32 = vld [vmem:[#allocation79_spill] sm:$0xff] }
  0xeb   :  { %v678_v13 = vsel %vm677_vm7, %v676_v52, %v614_v28  ;;  %v1012_v28 = vmul.f32 %v17090_v61, %v17090_v61  ;;  %v1014_v52 = vmul.f32 %v17092_v32, %v17092_v32 }
  0xec   :  { %v1124_v5 = vadd.f32 %v1123_v48, %v1122_v47 }
  0xed   :  { %v654_v58 = vpop.permute.xlu0 %653 }
  0xee   :  { %v685_v30 = vsel %vm675_vm6, %v684_v56, %v654_v58  ;;  %v1011_v58 = vmul.f32 %v17089_v43, %v17089_v43  ;;  %v1013_v56 = vmul.f32 %v17091_v57, %v17091_v57 }
  0xf0   :  { %v1125_v19 = vsel %vm189_vm0, %v1011_v58, 0.0  ;;  %v1129_v36 = vsel %vm189_vm0, %v1013_v56, 0.0 }
  0xf1   :  { %v660_v41 = vpop.permute.xlu2 %659  ;;  %v1126_v35 = vadd.f32 %v1125_v19, %v1124_v5  ;;  %v17097_v19 = vld [vmem:[#allocation72_spill] sm:$0xff] }
  0xf2   :  { %v686_v31 = vsel %vm677_vm7, %v685_v30, %v660_v41  ;;  %v1127_v30 = vsel %vm189_vm0, %v1012_v28, 0.0 }
  0xf3   :  { %v1128_v41 = vadd.f32 %v1127_v30, %v1126_v35  ;;  %v948_v35 = vadd.f32 %v10058_v51, %v17097_v19  ;;  %v17098_v30 = vld [vmem:[#allocation85_spill] sm:$0xff] }
  0xf5   :  { %v1130_v21 = vadd.f32 %v1129_v36, %v1128_v41  ;;  %v1019_v41 = vmul.f32 %v17098_v30, %v17098_v30  ;;  %v949_v36 = vadd.f32 %v948_v35, %v9882_v54  ;;  %v17103_v35 = vld [vmem:[#allocation77_spill] sm:$0xff] }
  0xf9   :  { %v620_v25 = vpop.permute.xlu0 %619 }
  0xfa   :  { %v680_v24 = vsel %vm679_vm8, %v678_v13, %v620_v25  ;;  %v17093_v13 = vld [vmem:[#allocation41_spill] sm:$0xff] }
  0xfb   :  { %v666_v38 = vpop.permute.xlu1 %665  ;;  %v688_v2 = vmul.f32 0.0625, %v680_v24  ;;  %v1015_v25 = vmul.f32 %v17093_v13, %v17093_v13 }
  0xfc   :  { %v687_v0 = vsel %vm679_vm8, %v686_v31, %v666_v38  ;;  %v1131_v31 = vsel %vm189_vm0, %v1014_v52, 0.0  ;;  %vm2720_vm8 = vcmask 1040384  }
  0xfd   :  { %v689_v50 = vmul.f32 0.0625, %v687_v0  ;;  %v690_v37 = vpack.c.bf16 %v688_v2, %v688_v2  ;;  %v1132_v38 = vadd.f32 %v1131_v31, %v1130_v21  ;;  %v1133_v24 = vsel %vm189_vm0, %v1015_v25, 0.0  ;;  %v17094_v0 = vld [vmem:[#allocation65_spill] sm:$0xff]  ;;  %v17099_v25 = vld [vmem:[#allocation67_spill] sm:$0xff] }
  0xfe   :  { %v1016_v2 = vmul.f32 %v17094_v0, %v17094_v0  ;;  %v1020_v31 = vmul.f32 %v17099_v25, %v17099_v25 }
  0xff   :  { %v691_v62 = vpack.c.bf16 %v689_v50, %v689_v50  ;;  %828 = vmatmul.bf16.vlgmr.msra.gmra.mxu0 %v690_v37  ;;  %v1134_v47 = vadd.f32 %v1133_v24, %v1132_v38  ;;  %v17095_v50 = vld [vmem:[#allocation84_spill] sm:$0xff]  ;;  %v1141_v38 = vsel %vm189_vm0, %v1019_v41, 0.0  ;;  %v17100_v24 = vld [vmem:[#allocation73_spill] sm:$0xff]  ;;  %v17104_v41 = vld [vmem:[#allocation87_spill] sm:$0xff] }
 0x100   :  { %v1017_v58 = vmul.f32 %v17095_v50, %v17095_v50  ;;  %v1135_v48 = vsel %vm189_vm0, %v1016_v2, 0.0  ;;  %v950_v2 = vadd.f32 %v949_v36, %v17100_v24  ;;  %v1023_v36 = vmul.f32 %v17104_v41, %v17104_v41 }
 0x101   :  { %841 = vmatmul.bf16.vlgmr.msra.gmra.mxu1 %v691_v62  ;;  %v1136_v37 = vadd.f32 %v1135_v48, %v1134_v47  ;;  %v17096_v62 = vld [vmem:[#allocation66_spill] sm:$0xff]  ;;  %v1143_v48 = vsel %vm189_vm0, %v1020_v31, 0.0 }
 0x102   :  { %v1018_v5 = vmul.f32 %v17096_v62, %v17096_v62  ;;  %v1137_v28 = vsel %vm189_vm0, %v1017_v58, 0.0  ;;  %v17101_v58 = vld [vmem:[#allocation86_spill] sm:$0xff]  ;;  %v1149_v31 = vsel %vm189_vm0, %v1023_v36, 0.0 }
 0x103   :  { %v1138_v56 = vadd.f32 %v1137_v28, %v1136_v37  ;;  %v1021_v51 = vmul.f32 %v17101_v58, %v17101_v58  ;;  %v951_v37 = vadd.f32 %v950_v2, %v9886_v22 }
 0x104   :  { %v1139_v52 = vsel %vm189_vm0, %v1018_v5, 0.0  ;;  %v17102_v5 = vld [vmem:[#allocation69_spill] sm:$0xff] }
 0x105   :  { %v1140_v21 = vadd.f32 %v1139_v52, %v1138_v56  ;;  %v1022_v54 = vmul.f32 %v17102_v5, %v17102_v5  ;;  %v1145_v19 = vsel %vm189_vm0, %v1021_v51, 0.0  ;;  %v952_v56 = vadd.f32 %v951_v37, %v17103_v35 }
 0x107   :  { %v1142_v47 = vadd.f32 %v1141_v38, %v1140_v21  ;;  %v1147_v21 = vsel %vm189_vm0, %v1022_v54, 0.0  ;;  %v953_v38 = vadd.f32 %v952_v56, %v9890_v23 }
 0x109   :  { %v1144_v28 = vadd.f32 %v1143_v48, %v1142_v47  ;;  %v954_v22 = vrot.slane %v953_v38, 4 }
 0x10b   :  { %v1146_v52 = vadd.f32 %v1145_v19, %v1144_v28  ;;  %v955_v47 = vadd.f32 %v954_v22, %v953_v38 }
 0x10d   :  { %v1148_v24 = vadd.f32 %v1147_v21, %v1146_v52  ;;  %v956_v5 = vrot.slane %v955_v47, 2 }
 0x10f   :  { %v1150_v2 = vadd.f32 %v1149_v31, %v1148_v24  ;;  %v957_v51 = vadd.f32 %v956_v5, %v955_v47  ;;  %v848_v5 = vld [vmem:[%s16610_s2] sm:$0x3]  ;;  %v17105_v47 = vld [vmem:[#allocation33_spill] sm:$0xff] }
 0x110   :  { %v855_v21 = vsel %vm853_vm9, %v848_v5, 0  ;;  %vm3730_vm9 = vsmask.f32 7424 }
 0x111   :  { %v1151_v48 = vrot.slane %v1150_v2, 4  ;;  %v958_v37 = vrot.slane %v957_v51, 1  ;;  %864 = vmatpush.bf16.msra.mxu2 %v855_v21 }
 0x113   :  { %v1152_v58 = vadd.f32 %v1151_v48, %v1150_v2  ;;  %v959_v19 = vadd.f32 %v958_v37, %v957_v51  ;;  %v17106_v51 = vld [vmem:[#allocation18_spill] sm:$0xff] }
 0x115   :  { %v1153_v25 = vrot.slane %v1152_v58, 2  ;;  %v10237_v30 = vmul.f32 0.001953125, %v959_v19 }
 0x117   :  { %v1154_v28 = vadd.f32 %v1153_v25, %v1152_v58  ;;  %v1159_v23 = vmul.f32 %v10237_v30, %v10237_v30  ;;  %v8782_v25 = vld [vmem:[%s16613_s5] sm:$0xff]  ;;  %v1162_v48 = vsub.f32 %v17105_v47, %v10237_v30  ;;  %v1163_v37 = vsub.f32 %v17106_v51, %v10237_v30 }
 0x118   :  { %1819 = vmatpush.bf16.msrb.mxu2 %v8782_v25 }
 0x119   :  { %v1155_v35 = vrot.slane %v1154_v28, 1 }
 0x11b   :  { %v1156_v41 = vadd.f32 %v1155_v35, %v1154_v28 }
 0x11d   :  { %v1158_v54 = vmul.f32 0.001953125, %v1156_v41 }
 0x11f   :  { %v1160_v56 = vsub.f32 %v1158_v54, %v1159_v23 }
 0x121   :  { %v1161_v52 = vmax.f32 %v1160_v56, 0.0 }
 0x123   :  { %v1226_v36 = vadd.f32 1e-05, %v1161_v52  ;;  %v10258_v52 = vld [vmem:[%s16611_s3] ss:$0 sm:$0xff] }
 0x125   :  { %9068 = vrsqrt.f32 %v1226_v36  ;;  %vm1233_vm10 = vweird.f32 %v1226_v36 }
 0x12b   :  { %v9069_v58 = vpop.eup %9068 }
 0x12c   :  { %v1228_v41 = vmul.f32 %v9069_v58, %v1226_v36  ;;  %vm1234_vm11 = vweird.f32 %v9069_v58 }
 0x12d   :  { %vm1235_vm12 = vmor %vm1233_vm10, %vm1234_vm11  ;;  %vm4179_vm10 = vcmask 1046528   ;;  %vm6812_vm11 = vcmask 1043456  }
 0x12e   :  { %v1229_v38 = vmul.f32 %v9069_v58, %v1228_v41 }
 0x130   :  { %v1230_v24 = vmul.f32 0.5, %v1229_v38 }
 0x132   :  { %v1231_v31 = vsub.f32 1.5, %v1230_v24 }
 0x134   :  { %v1232_v22 = vmul.f32 %v9069_v58, %v1231_v31 }
 0x136   :  { %v10251_v28 = vsel %vm1235_vm12, %v9069_v58, %v1232_v22  ;;  %v10265_v58 = vld [vmem:[%s16612_s4] ss:$0 sm:$0xff]  ;;  %vm6324_vm12 = vcmask 195584  }
 0x137   :  { %v1237_v23 = vmul.f32 %v10251_v28, %v1162_v48  ;;  %v1238_v56 = vmul.f32 %v10251_v28, %v1163_v37  ;;  %v17108_v48 = vld [vmem:[#allocation19_spill] sm:$0xff] }
 0x138   :  { %v1165_v51 = vsub.f32 %v17108_v48, %v10237_v30 }
 0x139   :  { %v1304_v21 = vmul.f32 %v10258_v52, %v1237_v23  ;;  %v1305_v25 = vmul.f32 %v10258_v52, %v1238_v56 }
 0x13b   :  { %v1371_v38 = vadd.f32 %v10265_v58, %v1304_v21  ;;  %v1372_v24 = vadd.f32 %v10265_v58, %v1305_v25  ;;  %v17110_v25 = vld [vmem:[#allocation31_spill] sm:$0xff] }
 0x13d   :  { %v1435_v31 = vmax.f32 %v1371_v38, 0.0  ;;  %v1436_v22 = vmax.f32 %v1372_v24, 0.0  ;;  %v17111_v38 = vld [vmem:[#allocation20_spill] sm:$0xff] }
 0x13e   :  { %v1167_v24 = vsub.f32 %v17111_v38, %v10237_v30 }
 0x13f   :  { %v10273_v37 = vpack.c.bf16 %v1436_v22, %v1435_v31 }
 0x141   :  { %17109 = vst [vmem:[#allocation26_spill] sm:$0xff] %v10273_v37 }
 0x17c   :  { %v829_v2 = vpop.f32.mrf.mxu0 }
 0x17e   :  { %v842_v19 = vpop.f32.mrf.mxu1 }
 0x17f   :  { %v843_v35 = vadd.f32 %v842_v19, %v829_v2  ;;  %v17107_v2 = vld [vmem:[#allocation30_spill] sm:$0xff] }
 0x180   :  { %v1164_v47 = vsub.f32 %v17107_v2, %v10237_v30  ;;  %v1242_v2 = vmul.f32 %v10251_v28, %v1167_v24 }
 0x181   :  { %v846_v54 = vmax.f32 %v843_v35, 0.0  ;;  %v1240_v35 = vmul.f32 %v10251_v28, %v1165_v51 }
 0x182   :  { %v1239_v19 = vmul.f32 %v10251_v28, %v1164_v47  ;;  %v1309_v48 = vmul.f32 %v10258_v52, %v1242_v2 }
 0x183   :  { %v847_v36 = vpack.c.bf16 %v846_v54, %v846_v54  ;;  %v1307_v23 = vmul.f32 %v10258_v52, %v1240_v35 }
 0x184   :  { %v831_v5 = vpop.f32.mrf.mxu0  ;;  %v1306_v54 = vmul.f32 %v10258_v52, %v1239_v19  ;;  %v1376_v19 = vadd.f32 %v10265_v58, %v1309_v48 }
 0x185   :  { %8227 = vmatmul.msk.bf16.vlgmr.msra.gmra.mxu2 %vm849_vm13, %v847_v36  ;;  %v1374_v36 = vadd.f32 %v10265_v58, %v1307_v23  ;;  %v17113_v23 = vld [vmem:[#allocation32_spill] sm:$0xff]  ;;  %vm6453_vm13 = vcmask 326656  }
 0x186   :  { %v844_v41 = vpop.f32.mrf.mxu1  ;;  %v1373_v56 = vadd.f32 %v10265_v58, %v1306_v54  ;;  %v1440_v54 = vmax.f32 %v1376_v19, 0.0 }
 0x187   :  { %v1438_v21 = vmax.f32 %v1374_v36, 0.0  ;;  %v1166_v41 = vsub.f32 %v17110_v25, %v10237_v30  ;;  %v17114_v36 = vld [vmem:[#allocation22_spill] sm:$0xff] }
 0x188   :  { %v1437_v5 = vmax.f32 %v1373_v56, 0.0  ;;  %v1168_v56 = vsub.f32 %v17113_v23, %v10237_v30 }
 0x189   :  { %v1241_v22 = vmul.f32 %v10251_v28, %v1166_v41 }
 0x18a   :  { %v10287_v31 = vpack.c.bf16 %v1438_v21, %v1437_v5  ;;  %v1169_v5 = vsub.f32 %v17114_v36, %v10237_v30  ;;  %v1243_v25 = vmul.f32 %v10251_v28, %v1168_v56 }
 0x18b   :  { %v1308_v47 = vmul.f32 %v10258_v52, %v1241_v22 }
 0x18c   :  { %17112 = vst [vmem:[#allocation27_spill] sm:$0xff] %v10287_v31  ;;  %v1244_v41 = vmul.f32 %v10251_v28, %v1169_v5  ;;  %v1310_v38 = vmul.f32 %v10258_v52, %v1243_v25 }
 0x18d   :  { %v1375_v51 = vadd.f32 %v10265_v58, %v1308_v47 }
 0x18e   :  { %v1311_v24 = vmul.f32 %v10258_v52, %v1244_v41  ;;  %v1377_v22 = vadd.f32 %v10265_v58, %v1310_v38 }
 0x18f   :  { %v1439_v35 = vmax.f32 %v1375_v51, 0.0  ;;  %v17116_v51 = vld [vmem:[#allocation6_spill] sm:$0xff] }
 0x190   :  { %v1378_v2 = vadd.f32 %v10265_v58, %v1311_v24  ;;  %v1441_v47 = vmax.f32 %v1377_v22, 0.0  ;;  %v1170_v19 = vsub.f32 %v17116_v51, %v10237_v30 }
 0x191   :  { %v10301_v21 = vpack.c.bf16 %v1440_v54, %v1439_v35  ;;  %v17117_v35 = vld [vmem:[#allocation46_spill] sm:$0xff] }
 0x192   :  { %v1442_v48 = vmax.f32 %v1378_v2, 0.0  ;;  %v1171_v54 = vsub.f32 %v17117_v35, %v10237_v30  ;;  %v1245_v56 = vmul.f32 %v10251_v28, %v1170_v19  ;;  %v17119_v2 = vld [vmem:[#allocation7_spill] sm:$0xff] }
 0x193   :  { %17115 = vst [vmem:[#allocation28_spill] sm:$0xff] %v10301_v21 }
 0x194   :  { %v10315_v23 = vpack.c.bf16 %v1442_v48, %v1441_v47  ;;  %v1246_v36 = vmul.f32 %v10251_v28, %v1171_v54  ;;  %v1312_v5 = vmul.f32 %v10258_v52, %v1245_v56  ;;  %v1172_v47 = vsub.f32 %v17119_v2, %v10237_v30  ;;  %v17120_v48 = vld [vmem:[#allocation47_spill] sm:$0xff]  ;;  %v17123_v2 = vld [vmem:[#allocation48_spill] sm:$0xff] }
 0x195   :  { %8269 = vmatmul.msk.bf16.vlgmr.msrb.gmra.mxu2 %vm189_vm0, %v10273_v37  ;;  %v1173_v51 = vsub.f32 %v17120_v48, %v10237_v30 }
 0x196   :  { %17118 = vst [vmem:[#allocation53_spill] sm:$0xff] %v10315_v23  ;;  %v1313_v25 = vmul.f32 %v10258_v52, %v1246_v36  ;;  %v1379_v41 = vadd.f32 %v10265_v58, %v1312_v5  ;;  %v1247_v35 = vmul.f32 %v10251_v28, %v1172_v47  ;;  %v1175_v47 = vsub.f32 %v17123_v2, %v10237_v30 }
 0x197   :  { %v1248_v54 = vmul.f32 %v10251_v28, %v1173_v51 }
 0x198   :  { %v1380_v38 = vadd.f32 %v10265_v58, %v1313_v25  ;;  %v1443_v24 = vmax.f32 %v1379_v41, 0.0  ;;  %v1314_v56 = vmul.f32 %v10258_v52, %v1247_v35  ;;  %v1250_v35 = vmul.f32 %v10251_v28, %v1175_v47 }
 0x199   :  { %v1315_v36 = vmul.f32 %v10258_v52, %v1248_v54 }
 0x19a   :  { %v1444_v22 = vmax.f32 %v1380_v38, 0.0  ;;  %v1381_v5 = vadd.f32 %v10265_v58, %v1314_v56  ;;  %v1317_v56 = vmul.f32 %v10258_v52, %v1250_v35 }
 0x19b   :  { %v1382_v25 = vadd.f32 %v10265_v58, %v1315_v36 }
 0x19c   :  { %v10329_v19 = vpack.c.bf16 %v1444_v22, %v1443_v24  ;;  %v1445_v41 = vmax.f32 %v1381_v5, 0.0  ;;  %v17122_v24 = vld [vmem:[#allocation8_spill] sm:$0xff]  ;;  %v1384_v5 = vadd.f32 %v10265_v58, %v1317_v56 }
 0x19d   :  { %v1446_v38 = vmax.f32 %v1382_v25, 0.0  ;;  %v1174_v22 = vsub.f32 %v17122_v24, %v10237_v30 }
 0x19e   :  { %17121 = vst [vmem:[#allocation29_spill] sm:$0xff] %v10329_v19  ;;  %v1448_v24 = vmax.f32 %v1384_v5, 0.0 }
 0x19f   :  { %v10343_v48 = vpack.c.bf16 %v1446_v38, %v1445_v41  ;;  %v1249_v51 = vmul.f32 %v10251_v28, %v1174_v22  ;;  %v17125_v41 = vld [vmem:[#allocation9_spill] sm:$0xff]  ;;  %v17126_v22 = vld [vmem:[#allocation56_spill] sm:$0xff] }
 0x1a0   :  { %v1176_v38 = vsub.f32 %v17125_v41, %v10237_v30  ;;  %v1177_v2 = vsub.f32 %v17126_v22, %v10237_v30 }
 0x1a1   :  { %17124 = vst [vmem:[#allocation35_spill] sm:$0xff] %v10343_v48  ;;  %v1316_v54 = vmul.f32 %v10258_v52, %v1249_v51 }
 0x1a2   :  { %v1252_v51 = vmul.f32 %v10251_v28, %v1177_v2 }
 0x1a3   :  { %v1383_v36 = vadd.f32 %v10265_v58, %v1316_v54 }
 0x1a4   :  { %v1319_v54 = vmul.f32 %v10258_v52, %v1252_v51 }
 0x1a5   :  { %8270 = vmatmul.msk.bf16.gmra.mxu2 %vm189_vm0, %v10287_v31  ;;  %v1447_v25 = vmax.f32 %v1383_v36, 0.0 }
 0x1a6   :  { %v1386_v36 = vadd.f32 %v10265_v58, %v1319_v54 }
 0x1a7   :  { %v10357_v47 = vpack.c.bf16 %v1448_v24, %v1447_v25  ;;  %v17128_v25 = vld [vmem:[#allocation68_spill] sm:$0xff] }
 0x1a8   :  { %v1450_v41 = vmax.f32 %v1386_v36, 0.0  ;;  %v1178_v24 = vsub.f32 %v17128_v25, %v10237_v30 }
 0x1a9   :  { %17127 = vst [vmem:[#allocation14_spill] sm:$0xff] %v10357_v47 }
 0x1b5   :  { %8271 = vmatmul.msk.bf16.gmra.mxu2 %vm189_vm0, %v10301_v21 }
 0x1c5   :  { %8272 = vmatmul.msk.bf16.gmra.mxu2 %vm189_vm0, %v10315_v23 }
 0x1d5   :  { %8273 = vmatmul.msk.bf16.gmra.mxu2 %vm189_vm0, %v10329_v19 }
 0x1e5   :  { %8274 = vmatmul.msk.bf16.gmra.mxu2 %vm189_vm0, %v10343_v48  ;;  %v1251_v48 = vmul.f32 %v10251_v28, %v1176_v38  ;;  %v17129_v38 = vld [vmem:[#allocation34_spill] sm:$0xff] }
 0x1e6   :  { %v1179_v22 = vsub.f32 %v17129_v38, %v10237_v30 }
 0x1e7   :  { %v1318_v35 = vmul.f32 %v10258_v52, %v1251_v48 }
 0x1e8   :  { %v1254_v48 = vmul.f32 %v10251_v28, %v1179_v22 }
 0x1e9   :  { %v1385_v56 = vadd.f32 %v10265_v58, %v1318_v35 }
 0x1ea   :  { %v1321_v35 = vmul.f32 %v10258_v52, %v1254_v48 }
 0x1eb   :  { %v1449_v5 = vmax.f32 %v1385_v56, 0.0 }
 0x1ec   :  { %v1388_v36 = vadd.f32 %v10265_v58, %v1321_v35 }
 0x1ed   :  { %v10371_v2 = vpack.c.bf16 %v1450_v41, %v1449_v5  ;;  %v1180_v41 = vsub.f32 %v9725_v6, %v10237_v30 }
 0x1ee   :  { %v1452_v5 = vmax.f32 %v1388_v36, 0.0 }
 0x1ef   :  { %17130 = vst [vmem:[#allocation70_spill] sm:$0xff] %v10371_v2 }
 0x1f5   :  { %8275 = vmatmul.msk.bf16.gmra.mxu2 %vm189_vm0, %v10357_v47  ;;  %v1253_v47 = vmul.f32 %v10251_v28, %v1178_v24  ;;  %v1181_v24 = vsub.f32 %v17042_v3, %v10237_v30 }
 0x1f7   :  { %v1320_v51 = vmul.f32 %v10258_v52, %v1253_v47  ;;  %v1255_v47 = vmul.f32 %v10251_v28, %v1180_v41  ;;  %v1256_v48 = vmul.f32 %v10251_v28, %v1181_v24  ;;  %v1183_v41 = vsub.f32 %v17046_v39, %v10237_v30 }
 0x1f9   :  { %v1387_v56 = vadd.f32 %v10265_v58, %v1320_v51  ;;  %v1322_v51 = vmul.f32 %v10258_v52, %v1255_v47  ;;  %v1323_v35 = vmul.f32 %v10258_v52, %v1256_v48  ;;  %v1258_v48 = vmul.f32 %v10251_v28, %v1183_v41 }
 0x1fb   :  { %v1451_v25 = vmax.f32 %v1387_v56, 0.0  ;;  %v1389_v6 = vadd.f32 %v10265_v58, %v1322_v51  ;;  %v1390_v3 = vadd.f32 %v10265_v58, %v1323_v35  ;;  %v1325_v35 = vmul.f32 %v10258_v52, %v1258_v48 }
 0x1fd   :  { %v10387_v22 = vpack.c.bf16 %v1452_v5, %v1451_v25  ;;  %v1453_v36 = vmax.f32 %v1389_v6, 0.0  ;;  %v1454_v25 = vmax.f32 %v1390_v3, 0.0  ;;  %v1182_v5 = vsub.f32 %v17044_v29, %v10237_v30 }
 0x1fe   :  { %v1392_v39 = vadd.f32 %v10265_v58, %v1325_v35 }
 0x1ff   :  { %17132 = vst [vmem:[#allocation36_spill] sm:$0xff] %v10387_v22  ;;  %v1257_v47 = vmul.f32 %v10251_v28, %v1182_v5  ;;  %v1185_v5 = vsub.f32 %v17050_v27, %v10237_v30 }
 0x201   :  { %v1324_v51 = vmul.f32 %v10258_v52, %v1257_v47  ;;  %v1260_v48 = vmul.f32 %v10251_v28, %v1185_v5 }
 0x203   :  { %v1391_v29 = vadd.f32 %v10265_v58, %v1324_v51  ;;  %v1327_v35 = vmul.f32 %v10258_v52, %v1260_v48 }
 0x205   :  { %8276 = vmatmul.msk.bf16.gmra.mxu2 %vm189_vm0, %v10371_v2  ;;  %v1455_v3 = vmax.f32 %v1391_v29, 0.0  ;;  %v1394_v27 = vadd.f32 %v10265_v58, %v1327_v35 }
 0x208   :  { %v10379_v54 = vpop.f32.mrf.mxu2 }
 0x209   :  { %17131 = vst [vmem:[#allocation15_spill] sm:$0xff] %v10379_v54 }
 0x210   :  { %v868_v38 = vpop.f32.mrf.mxu2 }
 0x211   :  { %v10405_v38 = vpack.c.bf16 %v1454_v25, %v1453_v36  ;;  %v1456_v36 = vmax.f32 %v1392_v39, 0.0  ;;  %v1184_v25 = vsub.f32 %v17048_v33, %v10237_v30 }
 0x213   :  { %17133 = vst [vmem:[#allocation16_spill] sm:$0xff] %v10405_v38  ;;  %v10423_v54 = vpack.c.bf16 %v1456_v36, %v1455_v3  ;;  %v1259_v47 = vmul.f32 %v10251_v28, %v1184_v25  ;;  %v1458_v3 = vmax.f32 %v1394_v27, 0.0  ;;  %v1186_v36 = vsub.f32 %v17052_v55, %v10237_v30 }
 0x214   :  { %v1187_v25 = vsub.f32 %v17053_v10, %v10237_v30 }
 0x215   :  { %8277 = vmatmul.msk.bf16.gmra.mxu2 %vm189_vm0, %v10387_v22  ;;  %17136 = vst [vmem:[#allocation37_spill] sm:$0xff] %v10423_v54  ;;  %v1326_v51 = vmul.f32 %v10258_v52, %v1259_v47  ;;  %v1261_v47 = vmul.f32 %v10251_v28, %v1186_v36  ;;  %v1189_v36 = vsub.f32 %v17057_v49, %v10237_v30 }
 0x216   :  { %v1262_v48 = vmul.f32 %v10251_v28, %v1187_v25 }
 0x217   :  { %v1393_v33 = vadd.f32 %v10265_v58, %v1326_v51  ;;  %v1328_v51 = vmul.f32 %v10258_v52, %v1261_v47 }
 0x218   :  { %v10395_v56 = vpop.f32.mrf.mxu2  ;;  %v1329_v35 = vmul.f32 %v10258_v52, %v1262_v48  ;;  %v1264_v48 = vmul.f32 %v10251_v28, %v1189_v36 }
 0x219   :  { %v1457_v39 = vmax.f32 %v1393_v33, 0.0  ;;  %v1395_v55 = vadd.f32 %v10265_v58, %v1328_v51 }
 0x21a   :  { %v1396_v10 = vadd.f32 %v10265_v58, %v1329_v35  ;;  %v1331_v35 = vmul.f32 %v10258_v52, %v1264_v48 }
 0x21b   :  { %v1459_v27 = vmax.f32 %v1395_v55, 0.0 }
 0x21c   :  { %v1398_v49 = vadd.f32 %v10265_v58, %v1331_v35 }
 0x220   :  { %v10403_v24 = vpop.f32.mrf.mxu2 }
 0x225   :  { %8278 = vmatmul.msk.bf16.gmra.mxu2 %vm189_vm0, %v10405_v38 }
 0x228   :  { %v10413_v6 = vpop.f32.mrf.mxu2 }
 0x229   :  { %17134 = vst [vmem:[#allocation74_spill] sm:$0xff] %v10413_v6 }
 0x230   :  { %v10421_v41 = vpop.f32.mrf.mxu2 }
 0x231   :  { %17135 = vst [vmem:[#allocation17_spill] sm:$0xff] %v10421_v41 }
 0x235   :  { %8279 = vmatmul.msk.bf16.gmra.mxu2 %vm189_vm0, %v10423_v54  ;;  %v10441_v54 = vpack.c.bf16 %v1458_v3, %v1457_v39  ;;  %v1460_v39 = vmax.f32 %v1396_v10, 0.0  ;;  %v1188_v3 = vsub.f32 %v17055_v17, %v10237_v30 }
 0x237   :  { %17138 = vst [vmem:[#allocation59_spill] sm:$0xff] %v10441_v54  ;;  %v1263_v47 = vmul.f32 %v10251_v28, %v1188_v3  ;;  %v1191_v3 = vsub.f32 %v17061_v8, %v10237_v30 }
 0x238   :  { %v10431_v29 = vpop.f32.mrf.mxu2 }
 0x239   :  { %17137 = vst [vmem:[#allocation42_spill] sm:$0xff] %v10431_v29  ;;  %v1330_v51 = vmul.f32 %v10258_v52, %v1263_v47  ;;  %v1266_v48 = vmul.f32 %v10251_v28, %v1191_v3 }
 0x23b   :  { %v1397_v17 = vadd.f32 %v10265_v58, %v1330_v51  ;;  %v1333_v35 = vmul.f32 %v10258_v52, %v1266_v48 }
 0x23d   :  { %v1461_v10 = vmax.f32 %v1397_v17, 0.0  ;;  %v1400_v8 = vadd.f32 %v10265_v58, %v1333_v35 }
 0x240   :  { %v10439_v5 = vpop.f32.mrf.mxu2 }
 0x245   :  { %8280 = vmatmul.msk.bf16.gmra.mxu2 %vm189_vm0, %v10441_v54  ;;  %v10459_v54 = vpack.c.bf16 %v1460_v39, %v1459_v27  ;;  %v1462_v27 = vmax.f32 %v1398_v49, 0.0  ;;  %v1190_v39 = vsub.f32 %v17059_v44, %v10237_v30 }
 0x247   :  { %17139 = vst [vmem:[#allocation80_spill] sm:$0xff] %v10459_v54  ;;  %v1265_v47 = vmul.f32 %v10251_v28, %v1190_v39  ;;  %v1193_v39 = vsub.f32 %v17065_v20, %v10237_v30 }
 0x248   :  { %v10449_v33 = vpop.f32.mrf.mxu2 }
 0x249   :  { %v1332_v51 = vmul.f32 %v10258_v52, %v1265_v47  ;;  %v1268_v48 = vmul.f32 %v10251_v28, %v1193_v39 }
 0x24b   :  { %v1399_v44 = vadd.f32 %v10265_v58, %v1332_v51  ;;  %v1335_v35 = vmul.f32 %v10258_v52, %v1268_v48 }
 0x24d   :  { %v1463_v49 = vmax.f32 %v1399_v44, 0.0  ;;  %v1402_v20 = vadd.f32 %v10265_v58, %v1335_v35 }
 0x250   :  { %v10457_v25 = vpop.f32.mrf.mxu2 }
 0x255   :  { %8281 = vmatmul.msk.bf16.gmra.mxu2 %vm189_vm0, %v10459_v54  ;;  %v10477_v54 = vpack.c.bf16 %v1462_v27, %v1461_v10  ;;  %v1464_v10 = vmax.f32 %v1400_v8, 0.0  ;;  %v1192_v27 = vsub.f32 %v17063_v34, %v10237_v30 }
 0x257   :  { %17141 = vst [vmem:[#allocation61_spill] sm:$0xff] %v10477_v54  ;;  %v1267_v47 = vmul.f32 %v10251_v28, %v1192_v27  ;;  %v1195_v27 = vsub.f32 %v17067_v15, %v10237_v30 }
 0x258   :  { %v10467_v55 = vpop.f32.mrf.mxu2 }
 0x259   :  { %17140 = vst [vmem:[#allocation43_spill] sm:$0xff] %v10467_v55  ;;  %v1334_v51 = vmul.f32 %v10258_v52, %v1267_v47  ;;  %v1270_v48 = vmul.f32 %v10251_v28, %v1195_v27 }
 0x25b   :  { %v1401_v34 = vadd.f32 %v10265_v58, %v1334_v51  ;;  %v1337_v35 = vmul.f32 %v10258_v52, %v1270_v48 }
 0x25d   :  { %v1465_v8 = vmax.f32 %v1401_v34, 0.0  ;;  %v1404_v15 = vadd.f32 %v10265_v58, %v1337_v35 }
 0x260   :  { %v10475_v36 = vpop.f32.mrf.mxu2 }
 0x265   :  { %8282 = vmatmul.msk.bf16.gmra.mxu2 %vm189_vm0, %v10477_v54  ;;  %v10495_v54 = vpack.c.bf16 %v1464_v10, %v1463_v49  ;;  %v1466_v49 = vmax.f32 %v1402_v20, 0.0  ;;  %v1194_v10 = vsub.f32 %v17066_v16, %v10237_v30 }
 0x267   :  { %17142 = vst [vmem:[#allocation88_spill] sm:$0xff] %v10495_v54  ;;  %v1269_v47 = vmul.f32 %v10251_v28, %v1194_v10  ;;  %v1197_v10 = vsub.f32 %v17069_v9, %v10237_v30 }
 0x268   :  { %v10485_v17 = vpop.f32.mrf.mxu2 }
 0x269   :  { %v1336_v51 = vmul.f32 %v10258_v52, %v1269_v47  ;;  %v1272_v48 = vmul.f32 %v10251_v28, %v1197_v10 }
 0x26b   :  { %v1403_v16 = vadd.f32 %v10265_v58, %v1336_v51  ;;  %v1339_v35 = vmul.f32 %v10258_v52, %v1272_v48 }
 0x26d   :  { %v1467_v20 = vmax.f32 %v1403_v16, 0.0  ;;  %v1406_v9 = vadd.f32 %v10265_v58, %v1339_v35 }
 0x270   :  { %v10493_v3 = vpop.f32.mrf.mxu2 }
 0x275   :  { %8283 = vmatmul.msk.bf16.gmra.mxu2 %vm189_vm0, %v10495_v54  ;;  %v10513_v54 = vpack.c.bf16 %v1466_v49, %v1465_v8  ;;  %v1468_v8 = vmax.f32 %v1404_v15, 0.0  ;;  %v1196_v49 = vsub.f32 %v17068_v12, %v10237_v30 }
 0x277   :  { %17144 = vst [vmem:[#allocation44_spill] sm:$0xff] %v10513_v54  ;;  %v1271_v47 = vmul.f32 %v10251_v28, %v1196_v49  ;;  %v1199_v49 = vsub.f32 %v17071_v42, %v10237_v30 }
 0x278   :  { %v10503_v44 = vpop.f32.mrf.mxu2 }
 0x279   :  { %17143 = vst [vmem:[#allocation81_spill] sm:$0xff] %v10503_v44  ;;  %v1338_v51 = vmul.f32 %v10258_v52, %v1271_v47  ;;  %v1274_v48 = vmul.f32 %v10251_v28, %v1199_v49 }
 0x27b   :  { %v1405_v12 = vadd.f32 %v10265_v58, %v1338_v51  ;;  %v1341_v35 = vmul.f32 %v10258_v52, %v1274_v48 }
 0x27d   :  { %v1469_v15 = vmax.f32 %v1405_v12, 0.0  ;;  %v1408_v42 = vadd.f32 %v10265_v58, %v1341_v35 }
 0x280   :  { %v10511_v39 = vpop.f32.mrf.mxu2 }
 0x285   :  { %8284 = vmatmul.msk.bf16.gmra.mxu2 %vm189_vm0, %v10513_v54  ;;  %v10531_v54 = vpack.c.bf16 %v1468_v8, %v1467_v20  ;;  %v1470_v20 = vmax.f32 %v1406_v9, 0.0  ;;  %v1198_v8 = vsub.f32 %v17070_v4, %v10237_v30 }
 0x287   :  { %17145 = vst [vmem:[#allocation62_spill] sm:$0xff] %v10531_v54  ;;  %v1273_v47 = vmul.f32 %v10251_v28, %v1198_v8  ;;  %v1201_v8 = vsub.f32 %v17073_v7, %v10237_v30 }
 0x288   :  { %v10521_v34 = vpop.f32.mrf.mxu2 }
 0x289   :  { %v1340_v51 = vmul.f32 %v10258_v52, %v1273_v47  ;;  %v1276_v48 = vmul.f32 %v10251_v28, %v1201_v8 }
 0x28b   :  { %v1407_v4 = vadd.f32 %v10265_v58, %v1340_v51  ;;  %v1343_v35 = vmul.f32 %v10258_v52, %v1276_v48 }
 0x28d   :  { %v1471_v9 = vmax.f32 %v1407_v4, 0.0  ;;  %v1410_v7 = vadd.f32 %v10265_v58, %v1343_v35 }
 0x290   :  { %v10529_v27 = vpop.f32.mrf.mxu2 }
 0x295   :  { %8285 = vmatmul.msk.bf16.gmra.mxu2 %vm189_vm0, %v10531_v54  ;;  %v10549_v54 = vpack.c.bf16 %v1470_v20, %v1469_v15  ;;  %v1472_v15 = vmax.f32 %v1408_v42, 0.0  ;;  %v1200_v20 = vsub.f32 %v17072_v11, %v10237_v30 }
 0x297   :  { %17147 = vst [vmem:[#allocation82_spill] sm:$0xff] %v10549_v54  ;;  %v1275_v47 = vmul.f32 %v10251_v28, %v1200_v20  ;;  %v1203_v20 = vsub.f32 %v17079_v14, %v10237_v30 }
 0x298   :  { %v10539_v16 = vpop.f32.mrf.mxu2 }
 0x299   :  { %17146 = vst [vmem:[#allocation89_spill] sm:$0xff] %v10539_v16  ;;  %v1342_v51 = vmul.f32 %v10258_v52, %v1275_v47  ;;  %v1278_v48 = vmul.f32 %v10251_v28, %v1203_v20 }
 0x29b   :  { %v1409_v11 = vadd.f32 %v10265_v58, %v1342_v51  ;;  %v1345_v35 = vmul.f32 %v10258_v52, %v1278_v48 }
 0x29d   :  { %v1473_v42 = vmax.f32 %v1409_v11, 0.0  ;;  %v1412_v14 = vadd.f32 %v10265_v58, %v1345_v35 }
 0x2a0   :  { %v10547_v10 = vpop.f32.mrf.mxu2 }
 0x2a5   :  { %8286 = vmatmul.msk.bf16.gmra.mxu2 %vm189_vm0, %v10549_v54  ;;  %v10567_v54 = vpack.c.bf16 %v1472_v15, %v1471_v9  ;;  %v1474_v9 = vmax.f32 %v1410_v7, 0.0  ;;  %v1202_v15 = vsub.f32 %v17078_v40, %v10237_v30 }
 0x2a7   :  { %17148 = vst [vmem:[#allocation45_spill] sm:$0xff] %v10567_v54  ;;  %v1277_v47 = vmul.f32 %v10251_v28, %v1202_v15  ;;  %v1205_v15 = vsub.f32 %v17081_v45, %v10237_v30 }
 0x2a8   :  { %v10557_v12 = vpop.f32.mrf.mxu2 }
 0x2a9   :  { %v1344_v51 = vmul.f32 %v10258_v52, %v1277_v47  ;;  %v1280_v48 = vmul.f32 %v10251_v28, %v1205_v15 }
 0x2ab   :  { %v1411_v40 = vadd.f32 %v10265_v58, %v1344_v51  ;;  %v1347_v35 = vmul.f32 %v10258_v52, %v1280_v48 }
 0x2ad   :  { %v1475_v7 = vmax.f32 %v1411_v40, 0.0  ;;  %v1414_v45 = vadd.f32 %v10265_v58, %v1347_v35 }
 0x2b0   :  { %v10565_v49 = vpop.f32.mrf.mxu2 }
 0x2b5   :  { %8287 = vmatmul.msk.bf16.gmra.mxu2 %vm189_vm0, %v10567_v54  ;;  %v10585_v54 = vpack.c.bf16 %v1474_v9, %v1473_v42  ;;  %v1476_v42 = vmax.f32 %v1412_v14, 0.0  ;;  %v1204_v9 = vsub.f32 %v17080_v26, %v10237_v30 }
 0x2b7   :  { %17150 = vst [vmem:[#allocation71_spill] sm:$0xff] %v10585_v54  ;;  %v1279_v47 = vmul.f32 %v10251_v28, %v1204_v9  ;;  %v1207_v9 = vsub.f32 %v17083_v18, %v10237_v30 }
 0x2b8   :  { %v10575_v4 = vpop.f32.mrf.mxu2 }
 0x2b9   :  { %17149 = vst [vmem:[#allocation64_spill] sm:$0xff] %v10575_v4  ;;  %v1346_v51 = vmul.f32 %v10258_v52, %v1279_v47  ;;  %v1282_v48 = vmul.f32 %v10251_v28, %v1207_v9 }
 0x2bb   :  { %v1413_v26 = vadd.f32 %v10265_v58, %v1346_v51  ;;  %v1349_v35 = vmul.f32 %v10258_v52, %v1282_v48 }
 0x2bd   :  { %v1477_v14 = vmax.f32 %v1413_v26, 0.0  ;;  %v1416_v18 = vadd.f32 %v10265_v58, %v1349_v35 }
 0x2c0   :  { %v10583_v8 = vpop.f32.mrf.mxu2 }
 0x2c5   :  { %8288 = vmatmul.msk.bf16.gmra.mxu2 %vm189_vm0, %v10585_v54  ;;  %v10603_v54 = vpack.c.bf16 %v1476_v42, %v1475_v7  ;;  %v1478_v7 = vmax.f32 %v1414_v45, 0.0  ;;  %v1206_v42 = vsub.f32 %v17082_v63, %v10237_v30 }
 0x2c7   :  { %17151 = vst [vmem:[#allocation83_spill] sm:$0xff] %v10603_v54  ;;  %v1281_v47 = vmul.f32 %v10251_v28, %v1206_v42  ;;  %v1209_v42 = vsub.f32 %v17085_v1, %v10237_v30 }
 0x2c8   :  { %v10593_v11 = vpop.f32.mrf.mxu2 }
 0x2c9   :  { %v1348_v51 = vmul.f32 %v10258_v52, %v1281_v47  ;;  %v1284_v48 = vmul.f32 %v10251_v28, %v1209_v42 }
 0x2cb   :  { %v1415_v63 = vadd.f32 %v10265_v58, %v1348_v51  ;;  %v1351_v35 = vmul.f32 %v10258_v52, %v1284_v48 }
 0x2cd   :  { %v1479_v45 = vmax.f32 %v1415_v63, 0.0  ;;  %v1418_v1 = vadd.f32 %v10265_v58, %v1351_v35 }
 0x2d0   :  { %v10601_v20 = vpop.f32.mrf.mxu2 }
 0x2d5   :  { %8289 = vmatmul.msk.bf16.gmra.mxu2 %vm189_vm0, %v10603_v54  ;;  %v10621_v54 = vpack.c.bf16 %v1478_v7, %v1477_v14  ;;  %v1480_v14 = vmax.f32 %v1416_v18, 0.0  ;;  %v1208_v7 = vsub.f32 %v17084_v53, %v10237_v30 }
 0x2d7   :  { %17153 = vst [vmem:[#allocation21_spill] sm:$0xff] %v10621_v54  ;;  %v1283_v47 = vmul.f32 %v10251_v28, %v1208_v7  ;;  %v1211_v7 = vsub.f32 %v17087_v59, %v10237_v30 }
 0x2d8   :  { %v10611_v40 = vpop.f32.mrf.mxu2 }
 0x2d9   :  { %17152 = vst [vmem:[#allocation49_spill] sm:$0xff] %v10611_v40  ;;  %v1350_v51 = vmul.f32 %v10258_v52, %v1283_v47  ;;  %v1286_v48 = vmul.f32 %v10251_v28, %v1211_v7 }
 0x2db   :  { %v1417_v53 = vadd.f32 %v10265_v58, %v1350_v51  ;;  %v1353_v35 = vmul.f32 %v10258_v52, %v1286_v48 }
 0x2dd   :  { %v1481_v18 = vmax.f32 %v1417_v53, 0.0  ;;  %v1420_v59 = vadd.f32 %v10265_v58, %v1353_v35 }
 0x2e0   :  { %v10619_v15 = vpop.f32.mrf.mxu2 }
 0x2e5   :  { %8290 = vmatmul.msk.bf16.gmra.mxu2 %vm189_vm0, %v10621_v54  ;;  %v10639_v54 = vpack.c.bf16 %v1480_v14, %v1479_v45  ;;  %v1482_v45 = vmax.f32 %v1418_v1, 0.0  ;;  %v1210_v14 = vsub.f32 %v17086_v60, %v10237_v30 }
 0x2e7   :  { %17154 = vst [vmem:[#allocation50_spill] sm:$0xff] %v10639_v54  ;;  %v1285_v47 = vmul.f32 %v10251_v28, %v1210_v14  ;;  %v1213_v14 = vsub.f32 %v17089_v43, %v10237_v30 }
 0x2e8   :  { %v10629_v26 = vpop.f32.mrf.mxu2 }
 0x2e9   :  { %v1352_v51 = vmul.f32 %v10258_v52, %v1285_v47  ;;  %v1288_v48 = vmul.f32 %v10251_v28, %v1213_v14 }
 0x2eb   :  { %v1419_v60 = vadd.f32 %v10265_v58, %v1352_v51  ;;  %v1355_v35 = vmul.f32 %v10258_v52, %v1288_v48 }
 0x2ed   :  { %v1483_v1 = vmax.f32 %v1419_v60, 0.0  ;;  %v1422_v43 = vadd.f32 %v10265_v58, %v1355_v35 }
 0x2f0   :  { %v10637_v9 = vpop.f32.mrf.mxu2 }
 0x2f5   :  { %8291 = vmatmul.msk.bf16.gmra.mxu2 %vm189_vm0, %v10639_v54  ;;  %v10657_v54 = vpack.c.bf16 %v1482_v45, %v1481_v18  ;;  %v1484_v18 = vmax.f32 %v1420_v59, 0.0  ;;  %v1212_v45 = vsub.f32 %v17088_v46, %v10237_v30 }
 0x2f7   :  { %17156 = vst [vmem:[#allocation51_spill] sm:$0xff] %v10657_v54  ;;  %v1287_v47 = vmul.f32 %v10251_v28, %v1212_v45  ;;  %v1215_v45 = vsub.f32 %v17091_v57, %v10237_v30 }
 0x2f8   :  { %v10647_v63 = vpop.f32.mrf.mxu2 }
 0x2f9   :  { %17155 = vst [vmem:[#allocation23_spill] sm:$0xff] %v10647_v63  ;;  %v1354_v51 = vmul.f32 %v10258_v52, %v1287_v47  ;;  %v1290_v48 = vmul.f32 %v10251_v28, %v1215_v45 }
 0x2fb   :  { %v1421_v46 = vadd.f32 %v10265_v58, %v1354_v51  ;;  %v1357_v35 = vmul.f32 %v10258_v52, %v1290_v48 }
 0x2fd   :  { %v1485_v59 = vmax.f32 %v1421_v46, 0.0  ;;  %v1424_v57 = vadd.f32 %v10265_v58, %v1357_v35 }
 0x300   :  { %v10655_v42 = vpop.f32.mrf.mxu2 }
 0x305   :  { %8292 = vmatmul.msk.bf16.gmra.mxu2 %vm189_vm0, %v10657_v54  ;;  %v10675_v54 = vpack.c.bf16 %v1484_v18, %v1483_v1  ;;  %v1486_v1 = vmax.f32 %v1422_v43, 0.0  ;;  %v1214_v18 = vsub.f32 %v17090_v61, %v10237_v30 }
 0x307   :  { %17157 = vst [vmem:[#allocation24_spill] sm:$0xff] %v10675_v54  ;;  %v1289_v47 = vmul.f32 %v10251_v28, %v1214_v18  ;;  %v1217_v18 = vsub.f32 %v17093_v13, %v10237_v30 }
 0x308   :  { %v10665_v53 = vpop.f32.mrf.mxu2 }
 0x309   :  { %v1356_v51 = vmul.f32 %v10258_v52, %v1289_v47  ;;  %v1292_v48 = vmul.f32 %v10251_v28, %v1217_v18 }
 0x30b   :  { %v1423_v61 = vadd.f32 %v10265_v58, %v1356_v51  ;;  %v1359_v35 = vmul.f32 %v10258_v52, %v1292_v48 }
 0x30d   :  { %v1487_v43 = vmax.f32 %v1423_v61, 0.0  ;;  %v1426_v13 = vadd.f32 %v10265_v58, %v1359_v35 }
 0x310   :  { %v10673_v7 = vpop.f32.mrf.mxu2 }
 0x315   :  { %8293 = vmatmul.msk.bf16.gmra.mxu2 %vm189_vm0, %v10675_v54  ;;  %v10693_v54 = vpack.c.bf16 %v1486_v1, %v1485_v59  ;;  %v1488_v59 = vmax.f32 %v1424_v57, 0.0  ;;  %v1216_v1 = vsub.f32 %v17092_v32, %v10237_v30 }
 0x317   :  { %17159 = vst [vmem:[#allocation25_spill] sm:$0xff] %v10693_v54  ;;  %v1291_v47 = vmul.f32 %v10251_v28, %v1216_v1  ;;  %v1219_v1 = vsub.f32 %v17095_v50, %v10237_v30 }
 0x318   :  { %v10683_v60 = vpop.f32.mrf.mxu2 }
 0x319   :  { %17158 = vst [vmem:[#allocation52_spill] sm:$0xff] %v10683_v60  ;;  %v1358_v51 = vmul.f32 %v10258_v52, %v1291_v47  ;;  %v1294_v48 = vmul.f32 %v10251_v28, %v1219_v1 }
 0x31b   :  { %v1425_v32 = vadd.f32 %v10265_v58, %v1358_v51  ;;  %v1361_v35 = vmul.f32 %v10258_v52, %v1294_v48 }
 0x31d   :  { %v1489_v57 = vmax.f32 %v1425_v32, 0.0  ;;  %v1428_v50 = vadd.f32 %v10265_v58, %v1361_v35 }
 0x320   :  { %v10691_v14 = vpop.f32.mrf.mxu2 }
 0x325   :  { %8294 = vmatmul.msk.bf16.gmra.mxu2 %vm189_vm0, %v10693_v54  ;;  %v10711_v54 = vpack.c.bf16 %v1488_v59, %v1487_v43  ;;  %v1490_v43 = vmax.f32 %v1426_v13, 0.0  ;;  %v1218_v59 = vsub.f32 %v17094_v0, %v10237_v30 }
 0x327   :  { %17160 = vst [vmem:[#allocation55_spill] sm:$0xff] %v10711_v54  ;;  %v1293_v47 = vmul.f32 %v10251_v28, %v1218_v59  ;;  %v17163_v59 = vld [vmem:[#allocation85_spill] sm:$0xff] }
 0x328   :  { %v10701_v46 = vpop.f32.mrf.mxu2  ;;  %v1221_v1 = vsub.f32 %v17163_v59, %v10237_v30 }
 0x329   :  { %v1360_v51 = vmul.f32 %v10258_v52, %v1293_v47 }
 0x32a   :  { %v1296_v48 = vmul.f32 %v10251_v28, %v1221_v1  ;;  %v17167_v1 = vld [vmem:[#allocation86_spill] sm:$0xff] }
 0x32b   :  { %v1427_v0 = vadd.f32 %v10265_v58, %v1360_v51  ;;  %v1223_v22 = vsub.f32 %v17167_v1, %v10237_v30 }
 0x32c   :  { %v1363_v35 = vmul.f32 %v10258_v52, %v1296_v48 }
 0x32d   :  { %v1491_v13 = vmax.f32 %v1427_v0, 0.0  ;;  %v1298_v48 = vmul.f32 %v10251_v28, %v1223_v22  ;;  %v17170_v22 = vld [vmem:[#allocation87_spill] sm:$0xff] }
 0x32e   :  { %v1225_v19 = vsub.f32 %v17170_v22, %v10237_v30  ;;  %v1985_v22 = vsel %vm1983_vm14, %v10403_v24, 0.0 }
 0x330   :  { %v10709_v45 = vpop.f32.mrf.mxu2 }
 0x335   :  { %8295 = vmatmul.msk.bf16.gmra.mxu2 %vm189_vm0, %v10711_v54  ;;  %v10729_v54 = vpack.c.bf16 %v1490_v43, %v1489_v57  ;;  %v1492_v57 = vmax.f32 %v1428_v50, 0.0  ;;  %v1220_v43 = vsub.f32 %v17096_v62, %v10237_v30  ;;  %v1430_v50 = vadd.f32 %v10265_v58, %v1363_v35 }
 0x336   :  { %v1365_v35 = vmul.f32 %v10258_v52, %v1298_v48  ;;  %v1300_v48 = vmul.f32 %v10251_v28, %v1225_v19 }
 0x337   :  { %17162 = vst [vmem:[#allocation90_spill] sm:$0xff] %v10729_v54  ;;  %v1295_v47 = vmul.f32 %v10251_v28, %v1220_v43 }
 0x338   :  { %v10719_v61 = vpop.f32.mrf.mxu2 }
 0x339   :  { %17161 = vst [vmem:[#allocation54_spill] sm:$0xff] %v10719_v61  ;;  %v1362_v51 = vmul.f32 %v10258_v52, %v1295_v47 }
 0x33b   :  { %v1429_v62 = vadd.f32 %v10265_v58, %v1362_v51 }
 0x33d   :  { %v1493_v59 = vmax.f32 %v1429_v62, 0.0 }
 0x340   :  { %v10727_v18 = vpop.f32.mrf.mxu2 }
 0x345   :  { %8296 = vmatmul.msk.bf16.gmra.mxu2 %vm189_vm0, %v10729_v54  ;;  %v10747_v54 = vpack.c.bf16 %v1492_v57, %v1491_v13  ;;  %v1494_v13 = vmax.f32 %v1430_v50, 0.0  ;;  %v17166_v57 = vld [vmem:[#allocation67_spill] sm:$0xff] }
 0x346   :  { %v1222_v43 = vsub.f32 %v17166_v57, %v10237_v30  ;;  %v1432_v57 = vadd.f32 %v10265_v58, %v1365_v35  ;;  %v1367_v35 = vmul.f32 %v10258_v52, %v1300_v48  ;;  %v1984_v48 = vsel %vm1983_vm14, %v10395_v56, 0.0 }
 0x347   :  { %17164 = vst [vmem:[#allocation91_spill] sm:$0xff] %v10747_v54 }
 0x348   :  { %v10737_v32 = vpop.f32.mrf.mxu2  ;;  %v1297_v47 = vmul.f32 %v10251_v28, %v1222_v43 }
 0x34a   :  { %v1364_v51 = vmul.f32 %v10258_v52, %v1297_v47 }
 0x34c   :  { %v1431_v50 = vadd.f32 %v10265_v58, %v1364_v51 }
 0x34e   :  { %v1495_v1 = vmax.f32 %v1431_v50, 0.0 }
 0x350   :  { %v10745_v38 = vpop.f32.mrf.mxu2 }
 0x355   :  { %8297 = vmatmul.msk.bf16.gmra.mxu2 %vm189_vm0, %v10747_v54  ;;  %v10765_v54 = vpack.c.bf16 %v1494_v13, %v1493_v59  ;;  %v1496_v59 = vmax.f32 %v1432_v57, 0.0  ;;  %v17169_v13 = vld [vmem:[#allocation69_spill] sm:$0xff] }
 0x356   :  { %v1224_v43 = vsub.f32 %v17169_v13, %v10237_v30  ;;  %v1434_v30 = vadd.f32 %v10265_v58, %v1367_v35  ;;  %v1987_v35 = vsel %vm1983_vm14, %v10413_v6, 0.0 }
 0x357   :  { %17168 = vst [vmem:[#allocation57_spill] sm:$0xff] %v10765_v54 }
 0x358   :  { %v10755_v0 = vpop.f32.mrf.mxu2  ;;  %v1299_v47 = vmul.f32 %v10251_v28, %v1224_v43 }
 0x359   :  { %17165 = vst [vmem:[#allocation10_spill] sm:$0xff] %v10755_v0 }
 0x35a   :  { %v1366_v51 = vmul.f32 %v10258_v52, %v1299_v47  ;;  %v2118_v52 = vmul.f32 %v10403_v24, %v10403_v24  ;;  %v2119_v47 = vmul.f32 %v10413_v6, %v10413_v6  ;;  %v1991_v6 = vsel %vm1983_vm14, %v10431_v29, 0.0 }
 0x35c   :  { %v1433_v57 = vadd.f32 %v10265_v58, %v1366_v51  ;;  %v2117_v58 = vmul.f32 %v10395_v56, %v10395_v56  ;;  %v2182_v51 = vsel %vm1983_vm14, %v2118_v52, 0.0 }
 0x35e   :  { %v1497_v13 = vmax.f32 %v1433_v57, 0.0  ;;  %v2120_v57 = vmul.f32 %v10421_v41, %v10421_v41 }
 0x360   :  { %v10763_v2 = vpop.f32.mrf.mxu2  ;;  %v2186_v37 = vsel %vm1983_vm14, %v2120_v57, 0.0 }
 0x365   :  { %8298 = vmatmul.msk.bf16.gmra.mxu2 %vm189_vm0, %v10765_v54  ;;  %v10783_v54 = vpack.c.bf16 %v1496_v59, %v1495_v1  ;;  %v1498_v1 = vmax.f32 %v1434_v30, 0.0  ;;  %v1986_v30 = vadd.f32 %v1985_v22, %v1984_v48 }
 0x367   :  { %17171 = vst [vmem:[#allocation11_spill] sm:$0xff] %v10783_v54  ;;  %v10797_v43 = vpack.c.bf16 %v1498_v1, %v1497_v13  ;;  %v2181_v13 = vsel %vm1983_vm14, %v2117_v58, 0.0  ;;  %v2184_v1 = vsel %vm1983_vm14, %v2119_v47, 0.0  ;;  %v1988_v31 = vadd.f32 %v1987_v35, %v1986_v30 }
 0x368   :  { %v10773_v62 = vpop.f32.mrf.mxu2  ;;  %v2183_v21 = vadd.f32 %v2182_v51, %v2181_v13  ;;  %v2122_v58 = vmul.f32 %v10439_v5, %v10439_v5  ;;  %v2123_v51 = vmul.f32 %v10449_v33, %v10449_v33  ;;  %v1995_v13 = vsel %vm1983_vm14, %v10449_v33, 0.0 }
 0x369   :  { %17174 = vst [vmem:[#allocation60_spill] sm:$0xff] %v10797_v43 }
 0x36a   :  { %v2185_v22 = vadd.f32 %v2184_v1, %v2183_v21  ;;  %v2190_v57 = vsel %vm1983_vm14, %v2122_v58, 0.0  ;;  %v2125_v1 = vmul.f32 %v10467_v55, %v10467_v55 }
 0x36c   :  { %v2187_v35 = vadd.f32 %v2186_v37, %v2185_v22 }
 0x370   :  { %v10781_v23 = vpop.f32.mrf.mxu2 }
 0x375   :  { %8299 = vmatmul.msk.bf16.gmra.mxu2 %vm189_vm0, %v10783_v54  ;;  %v2121_v54 = vmul.f32 %v10431_v29, %v10431_v29  ;;  %v2124_v29 = vmul.f32 %v10457_v25, %v10457_v25 }
 0x377   :  { %v2188_v48 = vsel %vm1983_vm14, %v2121_v54, 0.0  ;;  %v2192_v54 = vsel %vm1983_vm14, %v2123_v51, 0.0  ;;  %v2194_v58 = vsel %vm1983_vm14, %v2124_v29, 0.0 }
 0x378   :  { %v10791_v50 = vpop.f32.mrf.mxu2  ;;  %v2189_v21 = vadd.f32 %v2188_v48, %v2187_v35  ;;  %v2196_v35 = vsel %vm1983_vm14, %v2125_v1, 0.0 }
 0x379   :  { %17172 = vst [vmem:[#allocation58_spill] sm:$0xff] %v10791_v50 }
 0x37a   :  { %v2191_v37 = vadd.f32 %v2190_v57, %v2189_v21  ;;  %v2127_v57 = vmul.f32 %v10485_v17, %v10485_v17 }
 0x37c   :  { %v2193_v48 = vadd.f32 %v2192_v54, %v2191_v37  ;;  %v2200_v1 = vsel %vm1983_vm14, %v2127_v57, 0.0  ;;  %v2005_v37 = vsel %vm1983_vm14, %v10493_v3, 0.0 }
 0x380   :  { %v10795_v59 = vpop.f32.mrf.mxu2 }
 0x381   :  { %17173 = vst [vmem:[#allocation12_spill] sm:$0xff] %v10795_v59 }
 0x385   :  { %8300 = vmatmul.msk.bf16.gmra.mxu2 %vm189_vm0, %v10797_v43  ;;  %v1989_v43 = vsel %vm1983_vm14, %v10421_v41, 0.0  ;;  %v1993_v41 = vsel %vm1983_vm14, %v10439_v5, 0.0 }
 0x386   :  { %v1990_v47 = vadd.f32 %v1989_v43, %v1988_v31  ;;  %v1997_v43 = vsel %vm1983_vm14, %v10457_v25, 0.0 }
 0x388   :  { %v10801_v28 = vpop.f32.mrf.mxu2  ;;  %v1992_v30 = vadd.f32 %v1991_v6, %v1990_v47  ;;  %v1999_v47 = vsel %vm1983_vm14, %v10467_v55, 0.0  ;;  %v2128_v55 = vmul.f32 %v10493_v3, %v10493_v3 }
 0x389   :  { %17175 = vst [vmem:[#allocation13_spill] sm:$0xff] %v10801_v28 }
 0x38a   :  { %v1994_v31 = vadd.f32 %v1993_v41, %v1992_v30  ;;  %v2126_v41 = vmul.f32 %v10475_v36, %v10475_v36  ;;  %v2001_v30 = vsel %vm1983_vm14, %v10475_v36, 0.0 }
 0x38c   :  { %v1996_v6 = vadd.f32 %v1995_v13, %v1994_v31  ;;  %v2195_v13 = vadd.f32 %v2194_v58, %v2193_v48  ;;  %v2198_v29 = vsel %vm1983_vm14, %v2126_v41, 0.0  ;;  %v2003_v31 = vsel %vm1983_vm14, %v10485_v17, 0.0 }
 0x38d   :  { %v2202_v41 = vsel %vm1983_vm14, %v2128_v55, 0.0 }
 0x38e   :  { %v1998_v51 = vadd.f32 %v1997_v43, %v1996_v6  ;;  %v2197_v54 = vadd.f32 %v2196_v35, %v2195_v13  ;;  %v2129_v6 = vmul.f32 %v10503_v44, %v10503_v44  ;;  %v2130_v35 = vmul.f32 %v10511_v39, %v10511_v39 }
 0x390   :  { %v10803_v19 = vpop.f32.mrf.mxu2  ;;  %v2000_v21 = vadd.f32 %v1999_v47, %v1998_v51  ;;  %v2199_v58 = vadd.f32 %v2198_v29, %v2197_v54  ;;  %v2007_v51 = vsel %vm1983_vm14, %v10503_v44, 0.0  ;;  %v2204_v13 = vsel %vm1983_vm14, %v2129_v6, 0.0 }
 0x391   :  { %v2131_v29 = vmul.f32 %v10521_v34, %v10521_v34  ;;  %v2206_v55 = vsel %vm1983_vm14, %v2130_v35, 0.0  ;;  %v2132_v44 = vmul.f32 %v10529_v27, %v10529_v27 }
 0x392   :  { %v2002_v43 = vadd.f32 %v2001_v30, %v2000_v21  ;;  %v2201_v30 = vadd.f32 %v2200_v1, %v2199_v58  ;;  %v2009_v21 = vsel %vm1983_vm14, %v10511_v39, 0.0  ;;  %v2013_v58 = vsel %vm1983_vm14, %v10529_v27, 0.0 }
 0x393   :  { %v2208_v6 = vsel %vm1983_vm14, %v2131_v29, 0.0  ;;  %v2210_v35 = vsel %vm1983_vm14, %v2132_v44, 0.0 }
 0x394   :  { %v2004_v47 = vadd.f32 %v2003_v31, %v2002_v43  ;;  %v2203_v31 = vadd.f32 %v2202_v41, %v2201_v30  ;;  %v2011_v43 = vsel %vm1983_vm14, %v10521_v34, 0.0 }
 0x396   :  { %v2006_v57 = vadd.f32 %v2005_v37, %v2004_v47  ;;  %v2205_v1 = vadd.f32 %v2204_v13, %v2203_v31  ;;  %v2133_v47 = vmul.f32 %v10539_v16, %v10539_v16  ;;  %v2134_v13 = vmul.f32 %v10547_v10, %v10547_v10 }
 0x398   :  { %v10826_v52 = vpop.f32.mrf.mxu2  ;;  %v2008_v54 = vadd.f32 %v2007_v51, %v2006_v57  ;;  %v2207_v41 = vadd.f32 %v2206_v55, %v2205_v1  ;;  %v2015_v57 = vsel %vm1983_vm14, %v10539_v16, 0.0  ;;  %v2212_v31 = vsel %vm1983_vm14, %v2133_v47, 0.0 }
 0x399   :  { %17176 = vst [vmem:[#allocation63_spill] sm:$0xff] %v10826_v52  ;;  %v2135_v55 = vmul.f32 %v10557_v12, %v10557_v12  ;;  %v2214_v44 = vsel %vm1983_vm14, %v2134_v13, 0.0  ;;  %v2136_v16 = vmul.f32 %v10565_v49, %v10565_v49 }
 0x39a   :  { %v2010_v37 = vadd.f32 %v2009_v21, %v2008_v54  ;;  %v2209_v21 = vadd.f32 %v2208_v6, %v2207_v41  ;;  %v2017_v54 = vsel %vm1983_vm14, %v10547_v10, 0.0  ;;  %v2021_v41 = vsel %vm1983_vm14, %v10565_v49, 0.0 }
 0x39b   :  { %v2216_v47 = vsel %vm1983_vm14, %v2135_v55, 0.0  ;;  %v2218_v13 = vsel %vm1983_vm14, %v2136_v16, 0.0 }
 0x39c   :  { %v2012_v51 = vadd.f32 %v2011_v43, %v2010_v37  ;;  %v2211_v43 = vadd.f32 %v2210_v35, %v2209_v21  ;;  %v2019_v37 = vsel %vm1983_vm14, %v10557_v12, 0.0 }
 0x39e   :  { %v2014_v29 = vadd.f32 %v2013_v58, %v2012_v51  ;;  %v2213_v6 = vadd.f32 %v2212_v31, %v2211_v43  ;;  %v2137_v51 = vmul.f32 %v10575_v4, %v10575_v4  ;;  %v2138_v31 = vmul.f32 %v10583_v8, %v10583_v8 }
 0x3a0   :  { %v10848_v22 = vpop.f32.mrf.mxu2  ;;  %v2016_v1 = vadd.f32 %v2015_v57, %v2014_v29  ;;  %v2215_v35 = vadd.f32 %v2214_v44, %v2213_v6  ;;  %v2023_v29 = vsel %vm1983_vm14, %v10575_v4, 0.0  ;;  %v2220_v43 = vsel %vm1983_vm14, %v2137_v51, 0.0 }
 0x3a1   :  { %17177 = vst [vmem:[#allocation75_spill] sm:$0xff] %v10848_v22  ;;  %v2139_v44 = vmul.f32 %v10593_v11, %v10593_v11  ;;  %v2222_v16 = vsel %vm1983_vm14, %v2138_v31, 0.0  ;;  %v2140_v4 = vmul.f32 %v10601_v20, %v10601_v20 }
 0x3a2   :  { %v2018_v58 = vadd.f32 %v2017_v54, %v2016_v1  ;;  %v2217_v54 = vadd.f32 %v2216_v47, %v2215_v35  ;;  %v2025_v1 = vsel %vm1983_vm14, %v10583_v8, 0.0  ;;  %v2029_v35 = vsel %vm1983_vm14, %v10601_v20, 0.0 }
 0x3a3   :  { %v2224_v51 = vsel %vm1983_vm14, %v2139_v44, 0.0  ;;  %v2226_v31 = vsel %vm1983_vm14, %v2140_v4, 0.0 }
 0x3a4   :  { %v2020_v57 = vadd.f32 %v2019_v37, %v2018_v58  ;;  %v2219_v37 = vadd.f32 %v2218_v13, %v2217_v54  ;;  %v2027_v58 = vsel %vm1983_vm14, %v10593_v11, 0.0 }
 0x3a6   :  { %v2022_v55 = vadd.f32 %v2021_v41, %v2020_v57  ;;  %v2221_v47 = vadd.f32 %v2220_v43, %v2219_v37  ;;  %v2141_v57 = vmul.f32 %v10611_v40, %v10611_v40  ;;  %v2142_v43 = vmul.f32 %v10619_v15, %v10619_v15 }
 0x3a8   :  { %v10870_v48 = vpop.f32.mrf.mxu2  ;;  %v2024_v6 = vadd.f32 %v2023_v29, %v2022_v55  ;;  %v2223_v13 = vadd.f32 %v2222_v16, %v2221_v47  ;;  %v2031_v55 = vsel %vm1983_vm14, %v10611_v40, 0.0  ;;  %v2228_v37 = vsel %vm1983_vm14, %v2141_v57, 0.0 }
 0x3a9   :  { %17178 = vst [vmem:[#allocation38_spill] sm:$0xff] %v10870_v48  ;;  %v2143_v16 = vmul.f32 %v10629_v26, %v10629_v26  ;;  %v2230_v4 = vsel %vm1983_vm14, %v2142_v43, 0.0  ;;  %v2144_v40 = vmul.f32 %v10637_v9, %v10637_v9 }
 0x3aa   :  { %v2026_v41 = vadd.f32 %v2025_v1, %v2024_v6  ;;  %v2225_v1 = vadd.f32 %v2224_v51, %v2223_v13  ;;  %v2033_v6 = vsel %vm1983_vm14, %v10619_v15, 0.0  ;;  %v2037_v13 = vsel %vm1983_vm14, %v10637_v9, 0.0 }
 0x3ab   :  { %v2232_v57 = vsel %vm1983_vm14, %v2143_v16, 0.0  ;;  %v2234_v43 = vsel %vm1983_vm14, %v2144_v40, 0.0 }
 0x3ac   :  { %v2028_v29 = vadd.f32 %v2027_v58, %v2026_v41  ;;  %v2227_v58 = vadd.f32 %v2226_v31, %v2225_v1  ;;  %v2035_v41 = vsel %vm1983_vm14, %v10629_v26, 0.0 }
 0x3ae   :  { %v2030_v44 = vadd.f32 %v2029_v35, %v2028_v29  ;;  %v2229_v51 = vadd.f32 %v2228_v37, %v2227_v58  ;;  %v2145_v29 = vmul.f32 %v10647_v63, %v10647_v63  ;;  %v2146_v37 = vmul.f32 %v10655_v42, %v10655_v42 }
 0x3b0   :  { %v10892_v30 = vpop.f32.mrf.mxu2  ;;  %v2032_v47 = vadd.f32 %v2031_v55, %v2030_v44  ;;  %v2231_v31 = vadd.f32 %v2230_v4, %v2229_v51  ;;  %v2039_v44 = vsel %vm1983_vm14, %v10647_v63, 0.0  ;;  %v2236_v58 = vsel %vm1983_vm14, %v2145_v29, 0.0 }
 0x3b1   :  { %17179 = vst [vmem:[#allocation76_spill] sm:$0xff] %v10892_v30  ;;  %v2147_v4 = vmul.f32 %v10665_v53, %v10665_v53  ;;  %v2238_v40 = vsel %vm1983_vm14, %v2146_v37, 0.0  ;;  %v2148_v63 = vmul.f32 %v10673_v7, %v10673_v7 }
 0x3b2   :  { %v2034_v35 = vadd.f32 %v2033_v6, %v2032_v47  ;;  %v2233_v6 = vadd.f32 %v2232_v57, %v2231_v31  ;;  %v2041_v47 = vsel %vm1983_vm14, %v10655_v42, 0.0  ;;  %v2045_v31 = vsel %vm1983_vm14, %v10673_v7, 0.0 }
 0x3b3   :  { %v2240_v29 = vsel %vm1983_vm14, %v2147_v4, 0.0  ;;  %v2242_v37 = vsel %vm1983_vm14, %v2148_v63, 0.0 }
 0x3b4   :  { %v2036_v55 = vadd.f32 %v2035_v41, %v2034_v35  ;;  %v2235_v51 = vadd.f32 %v2234_v43, %v2233_v6  ;;  %v2043_v35 = vsel %vm1983_vm14, %v10665_v53, 0.0 }
 0x3b6   :  { %v2038_v16 = vadd.f32 %v2037_v13, %v2036_v55  ;;  %v2237_v57 = vadd.f32 %v2236_v58, %v2235_v51  ;;  %v2149_v55 = vmul.f32 %v10683_v60, %v10683_v60  ;;  %v2150_v58 = vmul.f32 %v10691_v14, %v10691_v14 }
 0x3b7   :  { %v2049_v51 = vsel %vm1983_vm14, %v10691_v14, 0.0 }
 0x3b8   :  { %v10914_v21 = vpop.f32.mrf.mxu2  ;;  %v2040_v41 = vadd.f32 %v2039_v44, %v2038_v16  ;;  %v2239_v43 = vadd.f32 %v2238_v40, %v2237_v57  ;;  %v2047_v16 = vsel %vm1983_vm14, %v10683_v60, 0.0  ;;  %v2151_v40 = vmul.f32 %v10701_v46, %v10701_v46 }
 0x3b9   :  { %17180 = vst [vmem:[#allocation39_spill] sm:$0xff] %v10914_v21  ;;  %v2246_v63 = vsel %vm1983_vm14, %v2150_v58, 0.0  ;;  %v2152_v60 = vmul.f32 %v10709_v45, %v10709_v45 }
 0x3ba   :  { %v2042_v13 = vadd.f32 %v2041_v47, %v2040_v41  ;;  %v2241_v47 = vadd.f32 %v2240_v29, %v2239_v43  ;;  %v2244_v41 = vsel %vm1983_vm14, %v2149_v55, 0.0  ;;  %v2248_v55 = vsel %vm1983_vm14, %v2151_v40, 0.0 }
 0x3bb   :  { %v2153_v43 = vmul.f32 %v10719_v61, %v10719_v61  ;;  %v2250_v58 = vsel %vm1983_vm14, %v2152_v60, 0.0 }
 0x3bc   :  { %v2044_v44 = vadd.f32 %v2043_v35, %v2042_v13  ;;  %v2243_v57 = vadd.f32 %v2242_v37, %v2241_v47  ;;  %v2051_v13 = vsel %vm1983_vm14, %v10701_v46, 0.0 }
 0x3be   :  { %v2046_v4 = vadd.f32 %v2045_v31, %v2044_v44  ;;  %v2245_v29 = vadd.f32 %v2244_v41, %v2243_v57  ;;  %v2053_v44 = vsel %vm1983_vm14, %v10709_v45, 0.0  ;;  %v2154_v41 = vmul.f32 %v10727_v18, %v10727_v18 }
 0x3bf   :  { %v2057_v57 = vsel %vm1983_vm14, %v10727_v18, 0.0 }
 0x3c0   :  { %v10936_v54 = vpop.f32.mrf.mxu2  ;;  %v2048_v35 = vadd.f32 %v2047_v16, %v2046_v4  ;;  %v2247_v37 = vadd.f32 %v2246_v63, %v2245_v29  ;;  %v2055_v4 = vsel %vm1983_vm14, %v10719_v61, 0.0  ;;  %v2155_v63 = vmul.f32 %v10737_v32, %v10737_v32 }
 0x3c1   :  { %17181 = vst [vmem:[#allocation78_spill] sm:$0xff] %v10936_v54  ;;  %v2254_v60 = vsel %vm1983_vm14, %v2154_v41, 0.0  ;;  %v2156_v61 = vmul.f32 %v10745_v38, %v10745_v38 }
 0x3c2   :  { %v2050_v31 = vadd.f32 %v2049_v51, %v2048_v35  ;;  %v2249_v51 = vadd.f32 %v2248_v55, %v2247_v37  ;;  %v2252_v35 = vsel %vm1983_vm14, %v2153_v43, 0.0  ;;  %v2256_v43 = vsel %vm1983_vm14, %v2155_v63, 0.0 }
 0x3c3   :  { %v2157_v37 = vmul.f32 %v10755_v0, %v10755_v0  ;;  %v2258_v41 = vsel %vm1983_vm14, %v2156_v61, 0.0 }
 0x3c4   :  { %v2052_v16 = vadd.f32 %v2051_v13, %v2050_v31  ;;  %v2251_v29 = vadd.f32 %v2250_v58, %v2249_v51  ;;  %v2059_v31 = vsel %vm1983_vm14, %v10737_v32, 0.0 }
 0x3c6   :  { %v2054_v40 = vadd.f32 %v2053_v44, %v2052_v16  ;;  %v2253_v55 = vadd.f32 %v2252_v35, %v2251_v29  ;;  %v2061_v16 = vsel %vm1983_vm14, %v10745_v38, 0.0  ;;  %v2158_v35 = vmul.f32 %v10763_v2, %v10763_v2 }
 0x3c7   :  { %v2065_v29 = vsel %vm1983_vm14, %v10763_v2, 0.0 }
 0x3c8   :  { %v10958_v1 = vpop.f32.mrf.mxu2  ;;  %v2056_v13 = vadd.f32 %v2055_v4, %v2054_v40  ;;  %v2255_v58 = vadd.f32 %v2254_v60, %v2253_v55  ;;  %v2063_v40 = vsel %vm1983_vm14, %v10755_v0, 0.0  ;;  %v2159_v60 = vmul.f32 %v10773_v62, %v10773_v62 }
 0x3c9   :  { %17182 = vst [vmem:[#allocation40_spill] sm:$0xff] %v10958_v1  ;;  %v2262_v61 = vsel %vm1983_vm14, %v2158_v35, 0.0  ;;  %v2160_v0 = vmul.f32 %v10781_v23, %v10781_v23 }
 0x3ca   :  { %v2058_v44 = vadd.f32 %v2057_v57, %v2056_v13  ;;  %v2257_v57 = vadd.f32 %v2256_v43, %v2255_v58  ;;  %v2260_v13 = vsel %vm1983_vm14, %v2157_v37, 0.0  ;;  %v2264_v37 = vsel %vm1983_vm14, %v2159_v60, 0.0 }
 0x3cb   :  { %v2161_v58 = vmul.f32 %v10791_v50, %v10791_v50  ;;  %v2266_v35 = vsel %vm1983_vm14, %v2160_v0, 0.0 }
 0x3cc   :  { %v2060_v4 = vadd.f32 %v2059_v31, %v2058_v44  ;;  %v2259_v55 = vadd.f32 %v2258_v41, %v2257_v57  ;;  %v2067_v44 = vsel %vm1983_vm14, %v10773_v62, 0.0 }
 0x3ce   :  { %v2062_v63 = vadd.f32 %v2061_v16, %v2060_v4  ;;  %v2261_v43 = vadd.f32 %v2260_v13, %v2259_v55  ;;  %v2069_v4 = vsel %vm1983_vm14, %v10781_v23, 0.0  ;;  %v2162_v13 = vmul.f32 %v10795_v59, %v10795_v59 }
 0x3cf   :  { %v2073_v55 = vsel %vm1983_vm14, %v10795_v59, 0.0  ;;  %v17210_v59 = vmov 0  }
 0x3d0   :  { %v10980_v6 = vpop.f32.mrf.mxu2  ;;  %v2064_v31 = vadd.f32 %v2063_v40, %v2062_v63  ;;  %v2263_v41 = vadd.f32 %v2262_v61, %v2261_v43  ;;  %v2071_v63 = vsel %vm1983_vm14, %v10791_v50, 0.0  ;;  %v2163_v61 = vmul.f32 %v10801_v28, %v10801_v28  ;;  %3177 = vst.msk [vmem:[#allocation2 + $0xe0] sm:$0x1] %vm3077_vm1, %v17210_v59 }
 0x3d1   :  { %17183 = vst [vmem:[#allocation79_spill] sm:$0xff] %v10980_v6  ;;  %v2270_v0 = vsel %vm1983_vm14, %v2162_v13, 0.0  ;;  %v2164_v50 = vmul.f32 %v10803_v19, %v10803_v19 }
 0x3d2   :  { %v2066_v16 = vadd.f32 %v2065_v29, %v2064_v31  ;;  %v2265_v29 = vadd.f32 %v2264_v37, %v2263_v41  ;;  %v2268_v31 = vsel %vm1983_vm14, %v2161_v58, 0.0  ;;  %v2272_v58 = vsel %vm1983_vm14, %v2163_v61, 0.0  ;;  %3179 = vst.msk [vmem:[#allocation2 + $0xcc] sm:$0xf] %vm3074_vm15, %v17210_v59 }
 0x3d3   :  { %v2165_v41 = vmul.f32 %v10826_v52, %v10826_v52  ;;  %v2274_v13 = vsel %vm1983_vm14, %v2164_v50, 0.0  ;;  %3180 = vst.msk [vmem:[#allocation2 + $0xd0] sm:$0xf] %vm3074_vm15, %v17210_v59 }
 0x3d4   :  { %v2068_v40 = vadd.f32 %v2067_v44, %v2066_v16  ;;  %v2267_v44 = vadd.f32 %v2266_v35, %v2265_v29  ;;  %v2075_v16 = vsel %vm1983_vm14, %v10801_v28, 0.0  ;;  %3181 = vst.msk [vmem:[#allocation2 + $0xd4] sm:$0x1] %vm3077_vm1, %v17210_v59 }
 0x3d5   :  { %3182 = vst.msk [vmem:[#allocation2 + $0x1a4] sm:$0xf] %vm3074_vm15, %v17210_v59 }
 0x3d6   :  { %v2070_v60 = vadd.f32 %v2069_v4, %v2068_v40  ;;  %v2269_v37 = vadd.f32 %v2268_v31, %v2267_v44  ;;  %v2077_v40 = vsel %vm1983_vm14, %v10803_v19, 0.0  ;;  %v2166_v31 = vmul.f32 %v10848_v22, %v10848_v22  ;;  %3183 = vst.msk [vmem:[#allocation2 + $0x1a8] sm:$0xf] %vm3074_vm15, %v17210_v59 }
 0x3d7   :  { %v2276_v44 = vsel %vm1983_vm14, %v2165_v41, 0.0  ;;  %3184 = vst.msk [vmem:[#allocation2 + $0x1ac] sm:$0x1] %vm3077_vm1, %v17210_v59 }
 0x3d8   :  { %v11002_v47 = vpop.f32.mrf.mxu2  ;;  %v2072_v43 = vadd.f32 %v2071_v63, %v2070_v60  ;;  %v2271_v35 = vadd.f32 %v2270_v0, %v2269_v37  ;;  %v2079_v60 = vsel %vm1983_vm14, %v10826_v52, 0.0  ;;  %v2167_v0 = vmul.f32 %v10870_v48, %v10870_v48  ;;  %v17208_v28 = vld [vmem:[#allocation79_spill] sm:$0xff] }
 0x3d9   :  { %17184 = vst [vmem:[#allocation41_spill] sm:$0xff] %v11002_v47  ;;  %v2278_v50 = vsel %vm1983_vm14, %v2166_v31, 0.0  ;;  %v2168_v52 = vmul.f32 %v10892_v30, %v10892_v30 }
 0x3da   :  { %v2074_v4 = vadd.f32 %v2073_v55, %v2072_v43  ;;  %v2273_v55 = vadd.f32 %v2272_v58, %v2271_v35  ;;  %v2081_v43 = vsel %vm1983_vm14, %v10848_v22, 0.0  ;;  %v2280_v41 = vsel %vm1983_vm14, %v2167_v0, 0.0 }
 0x3db   :  { %v2085_v35 = vsel %vm1983_vm14, %v10892_v30, 0.0  ;;  %v2282_v31 = vsel %vm1983_vm14, %v2168_v52, 0.0 }
 0x3dc   :  { %v2076_v63 = vadd.f32 %v2075_v16, %v2074_v4  ;;  %v2275_v16 = vadd.f32 %v2274_v13, %v2273_v55  ;;  %v2083_v4 = vsel %vm1983_vm14, %v10870_v48, 0.0 }
 0x3de   :  { %v2078_v61 = vadd.f32 %v2077_v40, %v2076_v63  ;;  %v2277_v58 = vadd.f32 %v2276_v44, %v2275_v16  ;;  %v2169_v63 = vmul.f32 %v10914_v21, %v10914_v21  ;;  %v2170_v44 = vmul.f32 %v10936_v54, %v10936_v54 }
 0x3e0   :  { %v11024_v51 = vpop.f32.mrf.mxu2  ;;  %v2080_v37 = vadd.f32 %v2079_v60, %v2078_v61  ;;  %v2279_v13 = vadd.f32 %v2278_v50, %v2277_v58  ;;  %v2087_v61 = vsel %vm1983_vm14, %v10914_v21, 0.0  ;;  %v2284_v16 = vsel %vm1983_vm14, %v2169_v63, 0.0 }
 0x3e1   :  { %17185 = vst [vmem:[#allocation65_spill] sm:$0xff] %v11024_v51  ;;  %v2171_v50 = vmul.f32 %v10958_v1, %v10958_v1  ;;  %v2286_v52 = vsel %vm1983_vm14, %v2170_v44, 0.0  ;;  %v2172_v21 = vmul.f32 %v10980_v6, %v10980_v6 }
 0x3e2   :  { %v2082_v40 = vadd.f32 %v2081_v43, %v2080_v37  ;;  %v2281_v43 = vadd.f32 %v2280_v41, %v2279_v13  ;;  %v2089_v37 = vsel %vm1983_vm14, %v10936_v54, 0.0  ;;  %v2093_v13 = vsel %vm1983_vm14, %v10980_v6, 0.0 }
 0x3e3   :  { %v2288_v63 = vsel %vm1983_vm14, %v2171_v50, 0.0  ;;  %v2290_v44 = vsel %vm1983_vm14, %v2172_v21, 0.0 }
 0x3e4   :  { %v2084_v60 = vadd.f32 %v2083_v4, %v2082_v40  ;;  %v2283_v4 = vadd.f32 %v2282_v31, %v2281_v43  ;;  %v2091_v40 = vsel %vm1983_vm14, %v10958_v1, 0.0 }
 0x3e6   :  { %v2086_v0 = vadd.f32 %v2085_v35, %v2084_v60  ;;  %v2285_v41 = vadd.f32 %v2284_v16, %v2283_v4  ;;  %v2173_v60 = vmul.f32 %v11002_v47, %v11002_v47  ;;  %v2174_v16 = vmul.f32 %v11024_v51, %v11024_v51 }
 0x3e8   :  { %v11046_v57 = vpop.f32.mrf.mxu2  ;;  %v2088_v58 = vadd.f32 %v2087_v61, %v2086_v0  ;;  %v2287_v31 = vadd.f32 %v2286_v52, %v2285_v41  ;;  %v2095_v0 = vsel %vm1983_vm14, %v11002_v47, 0.0  ;;  %v2292_v4 = vsel %vm1983_vm14, %v2173_v60, 0.0 }
 0x3e9   :  { %17186 = vst [vmem:[#allocation84_spill] sm:$0xff] %v11046_v57  ;;  %v2175_v52 = vmul.f32 %v11046_v57, %v11046_v57  ;;  %v2294_v21 = vsel %vm1983_vm14, %v2174_v16, 0.0 }
 0x3ea   :  { %v2090_v35 = vadd.f32 %v2089_v37, %v2088_v58  ;;  %v2289_v37 = vadd.f32 %v2288_v63, %v2287_v31  ;;  %v2097_v58 = vsel %vm1983_vm14, %v11024_v51, 0.0 }
 0x3eb   :  { %v2296_v60 = vsel %vm1983_vm14, %v2175_v52, 0.0 }
 0x3ec   :  { %v2092_v61 = vadd.f32 %v2091_v40, %v2090_v35  ;;  %v2291_v40 = vadd.f32 %v2290_v44, %v2289_v37  ;;  %v2099_v35 = vsel %vm1983_vm14, %v11046_v57, 0.0 }
 0x3ee   :  { %v2094_v50 = vadd.f32 %v2093_v13, %v2092_v61  ;;  %v2293_v63 = vadd.f32 %v2292_v4, %v2291_v40 }
 0x3f0   :  { %v11068_v29 = vpop.f32.mrf.mxu2  ;;  %v2096_v41 = vadd.f32 %v2095_v0, %v2094_v50  ;;  %v2295_v44 = vadd.f32 %v2294_v21, %v2293_v63 }
 0x3f1   :  { %17187 = vst [vmem:[#allocation66_spill] sm:$0xff] %v11068_v29  ;;  %v2176_v47 = vmul.f32 %v11068_v29, %v11068_v29  ;;  %v2101_v31 = vsel %vm1983_vm14, %v11068_v29, 0.0 }
 0x3f2   :  { %v2098_v13 = vadd.f32 %v2097_v58, %v2096_v41  ;;  %v2297_v58 = vadd.f32 %v2296_v60, %v2295_v44 }
 0x3f3   :  { %v2298_v16 = vsel %vm1983_vm14, %v2176_v47, 0.0 }
 0x3f4   :  { %v2100_v0 = vadd.f32 %v2099_v35, %v2098_v13  ;;  %v2299_v35 = vadd.f32 %v2298_v16, %v2297_v58 }
 0x3f6   :  { %v2102_v52 = vadd.f32 %v2101_v31, %v2100_v0 }
 0x3f8   :  { %v11090_v55 = vpop.f32.mrf.mxu2 }
 0x3f9   :  { %17188 = vst [vmem:[#allocation72_spill] sm:$0xff] %v11090_v55  ;;  %v2177_v61 = vmul.f32 %v11090_v55, %v11090_v55  ;;  %v2103_v50 = vsel %vm1983_vm14, %v11090_v55, 0.0 }
 0x3fa   :  { %v2104_v63 = vadd.f32 %v2103_v50, %v2102_v52 }
 0x3fb   :  { %v2300_v40 = vsel %vm1983_vm14, %v2177_v61, 0.0 }
 0x3fc   :  { %v2301_v29 = vadd.f32 %v2300_v40, %v2299_v35 }
 0x400   :  { %v11112_v43 = vpop.f32.mrf.mxu2 }
 0x401   :  { %17189 = vst [vmem:[#allocation73_spill] sm:$0xff] %v11112_v43  ;;  %v2178_v4 = vmul.f32 %v11112_v43, %v11112_v43  ;;  %v2105_v41 = vsel %vm1983_vm14, %v11112_v43, 0.0 }
 0x402   :  { %v2106_v57 = vadd.f32 %v2105_v41, %v2104_v63 }
 0x403   :  { %v2302_v47 = vsel %vm1983_vm14, %v2178_v4, 0.0 }
 0x404   :  { %v2303_v31 = vadd.f32 %v2302_v47, %v2301_v29 }
 0x408   :  { %v11134_v37 = vpop.f32.mrf.mxu2 }
 0x409   :  { %v2179_v21 = vmul.f32 %v11134_v37, %v11134_v37  ;;  %v2107_v13 = vsel %vm1983_vm14, %v11134_v37, 0.0 }
 0x40a   :  { %v2108_v44 = vadd.f32 %v2107_v13, %v2106_v57 }
 0x40b   :  { %v2304_v60 = vsel %vm1983_vm14, %v2179_v21, 0.0 }
 0x40c   :  { %v2305_v50 = vadd.f32 %v2304_v60, %v2303_v31 }
 0x410   :  { %v11150_v61 = vpop.f32.mrf.mxu2 }
 0x411   :  { %v2109_v0 = vsel %vm1983_vm14, %v11150_v61, 0.0  ;;  %v2180_v16 = vmul.f32 %v11150_v61, %v11150_v61 }
 0x412   :  { %v2110_v58 = vadd.f32 %v2109_v0, %v2108_v44 }
 0x413   :  { %v2306_v4 = vsel %vm1983_vm14, %v2180_v16, 0.0 }
 0x414   :  { %v2111_v52 = vrot.slane %v2110_v58, 4  ;;  %v2307_v51 = vadd.f32 %v2306_v4, %v2305_v50  ;;  %v16835_v50 = vmov 0  }
 0x415   :  { %3172 = vst.msk [vmem:[#allocation2] sm:$0xf] %vm3074_vm15, %v16835_v50 }
 0x416   :  { %v2112_v40 = vadd.f32 %v2111_v52, %v2110_v58  ;;  %v2308_v41 = vrot.slane %v2307_v51, 4  ;;  %v17191_v58 = vld [vmem:[#allocation17_spill] sm:$0xff]  ;;  %v17192_v52 = vld [vmem:[#allocation42_spill] sm:$0xff]  ;;  %3173 = vst.msk [vmem:[#allocation2 + $0x4] sm:$0xf] %vm3074_vm15, %v16835_v50 }
 0x417   :  { %3174 = vst.msk [vmem:[#allocation2 + $0x8] sm:$0x1] %vm3077_vm1, %v16835_v50 }
 0x418   :  { %v2113_v35 = vrot.slane %v2112_v40, 2  ;;  %v2309_v21 = vadd.f32 %v2308_v41, %v2307_v51  ;;  %v17201_v51 = vld [vmem:[#allocation10_spill] sm:$0xff]  ;;  %3175 = vst.msk [vmem:[#allocation2 + $0xd8] sm:$0xf] %vm3074_vm15, %v16835_v50 }
 0x419   :  { %3176 = vst.msk [vmem:[#allocation2 + $0xdc] sm:$0xf] %vm3074_vm15, %v16835_v50  ;;  %v17209_v50 = vld [vmem:[#allocation41_spill] sm:$0xff] }
 0x41a   :  { %v2114_v29 = vadd.f32 %v2113_v35, %v2112_v40  ;;  %v2310_v57 = vrot.slane %v2309_v21, 2  ;;  %v17200_v35 = vld [vmem:[#allocation54_spill] sm:$0xff] }
 0x41c   :  { %v2115_v63 = vrot.slane %v2114_v29, 1  ;;  %v2311_v47 = vadd.f32 %v2310_v57, %v2309_v21  ;;  %v17198_v57 = vld [vmem:[#allocation23_spill] sm:$0xff] }
 0x41e   :  { %v2116_v13 = vadd.f32 %v2115_v63, %v2114_v29  ;;  %v2312_v6 = vrot.slane %v2311_v47, 1  ;;  %v17193_v29 = vld [vmem:[#allocation43_spill] sm:$0xff]  ;;  %v17195_v63 = vld [vmem:[#allocation89_spill] sm:$0xff] }
 0x420   :  { %v2313_v1 = vadd.f32 %v2312_v6, %v2311_v47  ;;  %v11157_v54 = vmul.f32 0.001953125, %v2116_v13  ;;  %v17197_v47 = vld [vmem:[#allocation49_spill] sm:$0xff]  ;;  %v17203_v13 = vld [vmem:[#allocation63_spill] sm:$0xff] }
 0x422   :  { %v2315_v30 = vmul.f32 0.001953125, %v2313_v1  ;;  %v2316_v60 = vmul.f32 %v11157_v54, %v11157_v54  ;;  %v17199_v1 = vld [vmem:[#allocation52_spill] sm:$0xff]  ;;  %v17216_v22 = vsub.f32 %v11150_v61, %v11157_v54  ;;  %v17217_v21 = vsub.f32 %v10395_v56, %v11157_v54 }
 0x423   :  { %v17218_v55 = vsub.f32 %v10403_v24, %v11157_v54  ;;  %v17220_v56 = vsub.f32 %v17191_v58, %v11157_v54  ;;  %v17221_v24 = vsub.f32 %v17192_v52, %v11157_v54  ;;  %v17224_v52 = vsub.f32 %v10449_v33, %v11157_v54 }
 0x424   :  { %v2317_v31 = vsub.f32 %v2315_v30, %v2316_v60  ;;  %v17190_v30 = vld [vmem:[#allocation74_spill] sm:$0xff]  ;;  %v17194_v60 = vld [vmem:[#allocation81_spill] sm:$0xff]  ;;  %v17228_v33 = vsub.f32 %v17193_v29, %v11157_v54  ;;  %v17233_v59 = vsub.f32 %v10511_v39, %v11157_v54  ;;  %v17236_v39 = vsub.f32 %v17195_v63, %v11157_v54 }
 0x425   :  { %v17239_v63 = vsub.f32 %v10565_v49, %v11157_v54 }
 0x426   :  { %v2318_v44 = vmax.f32 %v2317_v31, 0.0 }
 0x428   :  { %v11161_v0 = vadd.f32 1e-05, %v2318_v44  ;;  %v17196_v44 = vld [vmem:[#allocation64_spill] sm:$0xff] }
 0x42a   :  { %9070 = vrsqrt.f32 %v11161_v0  ;;  %vm2390_vm2 = vweird.f32 %v11161_v0 }
 0x430   :  { %v9071_v40 = vpop.eup %9070 }
 0x431   :  { %v2385_v31 = vmul.f32 %v9071_v40, %v11161_v0  ;;  %vm2391_vm6 = vweird.f32 %v9071_v40  ;;  %v17211_v0 = vld [vmem:[#allocation65_spill] sm:$0xff] }
 0x432   :  { %vm2392_vm7 = vmor %vm2390_vm2, %vm2391_vm6 }
 0x433   :  { %v2386_v16 = vmul.f32 %v9071_v40, %v2385_v31 }
 0x435   :  { %v2387_v6 = vmul.f32 0.5, %v2386_v16  ;;  %v11321_v16 = vld [vmem:[%s16615_s7] ss:$0 sm:$0xff]  ;;  %s9181_s7 = smov 8  }
 0x436   :  { %17214 = vst [vmem:[#allocation77_spill] sm:$0xff] %v11321_v16 }
 0x437   :  { %v2388_v41 = vsub.f32 1.5, %v2387_v6  ;;  %v11293_v6 = vld [vmem:[%s16614_s6] ss:$0 sm:$0xff] }
 0x439   :  { %v2389_v43 = vmul.f32 %v9071_v40, %v2388_v41 }
 0x43b   :  { %v11308_v48 = vsel %vm2392_vm7, %v9071_v40, %v2389_v43  ;;  %v17215_v43 = vsub.f32 %v11134_v37, %v11157_v54  ;;  %v11345_v37 = vld [vmem:[#allocation2] sm:$0xff] }
 0x43c   :  { %v2457_v41 = vmul.f32 %v11308_v48, %v17216_v22  ;;  %v11335_v31 = vmul.f32 %v11308_v48, %v17217_v21  ;;  %v11341_v4 = vmul.f32 %v11308_v48, %v17218_v55  ;;  %v17219_v22 = vsub.f32 %v17190_v30, %v11157_v54 }
 0x43d   :  { %v2456_v40 = vmul.f32 %v11308_v48, %v17215_v43  ;;  %v11357_v21 = vmul.f32 %v11308_v48, %v17220_v56  ;;  %v11363_v55 = vmul.f32 %v11308_v48, %v17221_v24  ;;  %v17222_v43 = vsub.f32 %v10439_v5, %v11157_v54  ;;  %v3187_v56 = vld [vmem:[#allocation2 + $0x8] sm:$0x1] }
 0x43e   :  { %v11351_v61 = vmul.f32 %v11308_v48, %v17219_v22  ;;  %v2524_v22 = vmul.f32 %v11293_v6, %v2457_v41  ;;  %v11379_v24 = vmul.f32 %v11308_v48, %v17224_v52  ;;  %v17226_v5 = vsub.f32 %v10457_v25, %v11157_v54 }
 0x43f   :  { %v11369_v30 = vmul.f32 %v11308_v48, %v17222_v43  ;;  %v2523_v58 = vmul.f32 %v11293_v6, %v2456_v40  ;;  %v3732_v40 = vshrl.u32 %v11345_v37, 16  ;;  %v3734_v41 = vshll.u32 %v11345_v37, 16 }
 0x440   :  { %17225 = vst [vmem:[#allocation18_spill] sm:$0xff] %v11379_v24  ;;  %v11385_v43 = vmul.f32 %v11308_v48, %v17226_v5  ;;  %v11395_v52 = vmul.f32 %v11308_v48, %v17228_v33  ;;  %v2591_v5 = vadd.f32 %v11321_v16, %v2524_v22  ;;  %v17230_v24 = vsub.f32 %v10485_v17, %v11157_v54 }
 0x441   :  { %17223 = vst [vmem:[#allocation33_spill] sm:$0xff] %v11369_v30  ;;  %v3666_v30 = vunpack.c.l.b16 %v3187_v56  ;;  %v2590_v25 = vadd.f32 %v11321_v16, %v2523_v58  ;;  %v17229_v56 = vsub.f32 %v10475_v36, %v11157_v54  ;;  %v3736_v58 = vrot.slane %v3734_v41, 1 }
 0x442   :  { %17227 = vst [vmem:[#allocation30_spill] sm:$0xff] %v11385_v43  ;;  %v11411_v29 = vmul.f32 %v11308_v48, %v17230_v24  ;;  %v17231_v22 = vsub.f32 %v10493_v3, %v11157_v54  ;;  %v2655_v16 = vmax.f32 %v2591_v5, 0.0  ;;  %v17234_v3 = vsub.f32 %v10521_v34, %v11157_v54 }
 0x443   :  { %v11405_v43 = vmul.f32 %v11308_v48, %v17229_v56  ;;  %v11415_v33 = vpack.c.b16 %v3666_v30, %v3666_v30  ;;  %v17232_v56 = vsub.f32 %v17194_v60, %v11157_v54  ;;  %v2654_v24 = vmax.f32 %v2590_v25, 0.0 }
 0x444   :  { %v11421_v36 = vmul.f32 %v11308_v48, %v17231_v22  ;;  %v11433_v30 = vmul.f32 %v11308_v48, %v17233_v59  ;;  %v11439_v41 = vmul.f32 %v11308_v48, %v17234_v3  ;;  %v3737_v22 = vor.u32 %v3736_v58, %v3732_v40 }
 0x445   :  { %v11427_v17 = vmul.f32 %v11308_v48, %v17232_v56  ;;  %v3739_v60 = vshll.u32 %v11415_v33, 16  ;;  %v17235_v56 = vsub.f32 %v10529_v27, %v11157_v54  ;;  %v11452_v5 = vmul.f32 %v11308_v48, %v17236_v39 }
 0x446   :  { %v2814_v59 = vrot.slane %v2654_v24, 7  ;;  %v2815_v34 = vrot.slane %v2655_v16, 7  ;;  %v17237_v3 = vsub.f32 %v10547_v10, %v11157_v54  ;;  %v17238_v27 = vsub.f32 %v10557_v12, %v11157_v54 }
 0x447   :  { %v11446_v25 = vmul.f32 %v11308_v48, %v17235_v56  ;;  %v3741_v56 = vrot.slane %v3739_v60, 1  ;;  %v11470_v39 = vmul.f32 %v11308_v48, %v17239_v63  ;;  %v17240_v16 = vsub.f32 %v17196_v44, %v11157_v54 }
 0x448   :  { %v11458_v40 = vmul.f32 %v11308_v48, %v17237_v3  ;;  %v11464_v58 = vmul.f32 %v11308_v48, %v17238_v27  ;;  %v17242_v24 = vsub.f32 %v10583_v8, %v11157_v54  ;;  %v2816_v60 = vsel %vm2720_vm8, %v2814_v59, %v2815_v34 }
 0x449   :  { %v11476_v10 = vmul.f32 %v11308_v48, %v17240_v16  ;;  %v2976_v3 = vsel %vm2720_vm8, %v2815_v34, 0.0  ;;  %v2944_v49 = vsel %vm2720_vm8, 0.0, %v2814_v59  ;;  %v17243_v27 = vsub.f32 %v10593_v11, %v11157_v54 }
 0x44a   :  { %v11482_v12 = vmul.f32 %v11308_v48, %v17242_v24  ;;  %v3071_v63 = vpack.c.bf16 %v2816_v60, %v2816_v60  ;;  %v3072_v16 = vpack.c.bf16 %v2976_v3, %v2976_v3  ;;  %v17244_v8 = vsub.f32 %v10601_v20, %v11157_v54 }
 0x44b   :  { %17241 = vst [vmem:[#allocation19_spill] sm:$0xff] %v11476_v10  ;;  %v11491_v44 = vmul.f32 %v11308_v48, %v17243_v27  ;;  %v3742_v10 = vsel %vm3730_vm9, %v3737_v22, %v3741_v56  ;;  %v17245_v59 = vsub.f32 %v17197_v47, %v11157_v54  ;;  %v17246_v34 = vsub.f32 %v10619_v15, %v11157_v54 }
 0x44c   :  { %v11498_v24 = vmul.f32 %v11308_v48, %v17244_v8  ;;  %4115 = vrot.lane.b32.xlu2 %v3742_v10, %s9181_s7  ;;  %v17247_v20 = vsub.f32 %v10629_v26, %v11157_v54  ;;  %v17248_v10 = vsub.f32 %v10637_v9, %v11157_v54  ;;  %3170 = vst.msk [vmem:[#allocation2 + $0x19c] sm:$0xf] %vm3074_vm15, %v3071_v63 }
 0x44d   :  { %v11505_v11 = vmul.f32 %v11308_v48, %v17245_v59  ;;  %v11511_v22 = vmul.f32 %v11308_v48, %v17246_v34  ;;  %v17249_v15 = vsub.f32 %v17198_v57, %v11157_v54  ;;  %v17250_v26 = vsub.f32 %v10655_v42, %v11157_v54  ;;  %3171 = vst.msk [vmem:[#allocation2 + $0x1a0] sm:$0x1] %vm3077_vm1, %v3072_v16 }
 0x44e   :  { %v11517_v56 = vmul.f32 %v11308_v48, %v17247_v20  ;;  %v11523_v47 = vmul.f32 %v11308_v48, %v17248_v10  ;;  %v17251_v9 = vsub.f32 %v10665_v53, %v11157_v54  ;;  %v17252_v63 = vsub.f32 %v10673_v7, %v11157_v54 }
 0x44f   :  { %v11530_v60 = vmul.f32 %v11308_v48, %v17249_v15  ;;  %v11536_v3 = vmul.f32 %v11308_v48, %v17250_v26  ;;  %v17253_v42 = vsub.f32 %v17199_v1, %v11157_v54  ;;  %v17254_v53 = vsub.f32 %v10691_v14, %v11157_v54 }
 0x450   :  { %v11542_v27 = vmul.f32 %v11308_v48, %v17251_v9  ;;  %v11548_v57 = vmul.f32 %v11308_v48, %v17252_v63  ;;  %v17255_v7 = vsub.f32 %v10701_v46, %v11157_v54  ;;  %v17256_v16 = vsub.f32 %v10709_v45, %v11157_v54 }
 0x451   :  { %v11555_v8 = vmul.f32 %v11308_v48, %v17253_v42  ;;  %v11561_v59 = vmul.f32 %v11308_v48, %v17254_v53  ;;  %v17257_v20 = vsub.f32 %v17200_v35, %v11157_v54  ;;  %v17258_v10 = vsub.f32 %v10727_v18, %v11157_v54 }
 0x452   :  { %v11567_v34 = vmul.f32 %v11308_v48, %v17255_v7  ;;  %v11573_v1 = vmul.f32 %v11308_v48, %v17256_v16  ;;  %v17259_v15 = vsub.f32 %v10737_v32, %v11157_v54  ;;  %v17260_v26 = vsub.f32 %v10745_v38, %v11157_v54  ;;  %v17265_v7 = vld [vmem:[#allocation58_spill] sm:$0xff] }
 0x453   :  { %v11579_v14 = vmul.f32 %v11308_v48, %v17257_v20  ;;  %v11585_v46 = vmul.f32 %v11308_v48, %v17258_v10  ;;  %v17261_v9 = vsub.f32 %v17201_v51, %v11157_v54  ;;  %v17262_v63 = vsub.f32 %v10763_v2, %v11157_v54  ;;  %v17267_v20 = vld [vmem:[#allocation12_spill] sm:$0xff] }
 0x454   :  { %v11591_v45 = vmul.f32 %v11308_v48, %v17259_v15  ;;  %v11597_v35 = vmul.f32 %v11308_v48, %v17260_v26  ;;  %v17263_v42 = vsub.f32 %v10773_v62, %v11157_v54  ;;  %v17264_v53 = vsub.f32 %v10781_v23, %v11157_v54  ;;  %v17269_v15 = vld [vmem:[#allocation13_spill] sm:$0xff] }
 0x455   :  { %v11603_v18 = vmul.f32 %v11308_v48, %v17261_v9  ;;  %v11609_v32 = vmul.f32 %v11308_v48, %v17262_v63  ;;  %v17266_v16 = vsub.f32 %v17265_v7, %v11157_v54  ;;  %v17268_v10 = vsub.f32 %v17267_v20, %v11157_v54  ;;  %v17274_v7 = vld [vmem:[#allocation75_spill] sm:$0xff] }
 0x456   :  { %v11615_v38 = vmul.f32 %v11308_v48, %v17263_v42  ;;  %v11621_v51 = vmul.f32 %v11308_v48, %v17264_v53  ;;  %v17270_v26 = vsub.f32 %v17269_v15, %v11157_v54  ;;  %v17271_v9 = vsub.f32 %v10803_v19, %v11157_v54 }
 0x457   :  { %v11627_v2 = vmul.f32 %v11308_v48, %v17266_v16  ;;  %v11633_v62 = vmul.f32 %v11308_v48, %v17268_v10  ;;  %v17272_v42 = vsub.f32 %v17203_v13, %v11157_v54  ;;  %v17275_v16 = vsub.f32 %v17274_v7, %v11157_v54  ;;  %v17277_v10 = vld [vmem:[#allocation38_spill] sm:$0xff] }
 0x458   :  { %v11639_v23 = vmul.f32 %v11308_v48, %v17270_v26  ;;  %v11645_v63 = vmul.f32 %v11308_v48, %v17271_v9  ;;  %v17278_v15 = vsub.f32 %v17277_v10, %v11157_v54  ;;  %v17280_v26 = vld [vmem:[#allocation76_spill] sm:$0xff] }
 0x459   :  { %v11651_v53 = vmul.f32 %v11308_v48, %v17272_v42  ;;  %v11657_v20 = vmul.f32 %v11308_v48, %v17275_v16  ;;  %v17281_v9 = vsub.f32 %v17280_v26, %v11157_v54  ;;  %v17282_v42 = vld [vmem:[#allocation39_spill] sm:$0xff]  ;;  %v17284_v16 = vld [vmem:[#allocation78_spill] sm:$0xff] }
 0x45a   :  { %v11663_v19 = vmul.f32 %v11308_v48, %v17278_v15  ;;  %v17286_v15 = vld [vmem:[#allocation40_spill] sm:$0xff] }
 0x45b   :  { %17273 = vst [vmem:[#allocation31_spill] sm:$0xff] %v11651_v53  ;;  %v11669_v13 = vmul.f32 %v11308_v48, %v17281_v9  ;;  %v17283_v53 = vsub.f32 %v17282_v42, %v11157_v54  ;;  %v17289_v9 = vsub.f32 %v17208_v28, %v11157_v54 }
 0x45c   :  { %17276 = vst [vmem:[#allocation20_spill] sm:$0xff] %v11657_v20  ;;  %v17285_v20 = vsub.f32 %v17284_v16, %v11157_v54 }
 0x45d   :  { %17279 = vst [vmem:[#allocation32_spill] sm:$0xff] %v11663_v19  ;;  %v11675_v7 = vmul.f32 %v11308_v48, %v17283_v53  ;;  %v17287_v19 = vsub.f32 %v17286_v15, %v11157_v54  ;;  %v11693_v42 = vmul.f32 %v11308_v48, %v17289_v9  ;;  %v17291_v53 = vsub.f32 %v17209_v50, %v11157_v54  ;;  %v17298_v9 = vld [vmem:[#allocation66_spill] sm:$0xff] }
 0x45e   :  { %v11681_v10 = vmul.f32 %v11308_v48, %v17285_v20  ;;  %v17293_v20 = vsub.f32 %v17211_v0, %v11157_v54 }
 0x45f   :  { %v11687_v26 = vmul.f32 %v11308_v48, %v17287_v19  ;;  %17290 = vst [vmem:[#allocation6_spill] sm:$0xff] %v11693_v42  ;;  %v11699_v16 = vmul.f32 %v11308_v48, %v17291_v53  ;;  %v17295_v19 = vld [vmem:[#allocation84_spill] sm:$0xff]  ;;  %v17299_v42 = vsub.f32 %v17298_v9, %v11157_v54  ;;  %v4181_v9 = vrot.slane %v11415_v33, 1 }
 0x460   :  { %v11705_v15 = vmul.f32 %v11308_v48, %v17293_v20  ;;  %v17300_v53 = vld [vmem:[#allocation72_spill] sm:$0xff]  ;;  %v17302_v20 = vld [vmem:[#allocation73_spill] sm:$0xff] }
 0x461   :  { %17288 = vst [vmem:[#allocation22_spill] sm:$0xff] %v11687_v26  ;;  %v17296_v26 = vsub.f32 %v17295_v19, %v11157_v54  ;;  %v11717_v50 = vmul.f32 %v11308_v48, %v17299_v42  ;;  %v11735_v42 = vmul.f32 %v11293_v6, %v11335_v31  ;;  %v17305_v31 = vld [vmem:[#allocation18_spill] sm:$0xff] }
 0x462   :  { %17292 = vst [vmem:[#allocation46_spill] sm:$0xff] %v11699_v16  ;;  %v17301_v16 = vsub.f32 %v17300_v53, %v11157_v54  ;;  %v11739_v53 = vmul.f32 %v11293_v6, %v11341_v4 }
 0x463   :  { %17294 = vst [vmem:[#allocation7_spill] sm:$0xff] %v11705_v15  ;;  %v11711_v28 = vmul.f32 %v11308_v48, %v17296_v26  ;;  %v17303_v15 = vsub.f32 %v17302_v20, %v11157_v54  ;;  %v3070_v26 = vpack.c.bf16 %v2944_v49, %v2944_v49  ;;  %v2465_v54 = vmul.f32 %v11293_v6, %v11363_v55 }
 0x464   :  { %v11723_v0 = vmul.f32 %v11308_v48, %v17301_v16  ;;  %v11743_v16 = vmul.f32 %v11293_v6, %v11351_v61  ;;  %v11755_v49 = vmul.f32 %v11293_v6, %v17305_v31  ;;  %v17306_v61 = vld [vmem:[#allocation30_spill] sm:$0xff]  ;;  %v11769_v55 = vmul.f32 %v11293_v6, %v11405_v43  ;;  %v17308_v31 = vld [vmem:[#allocation31_spill] sm:$0xff] }
 0x465   :  { %17297 = vst [vmem:[#allocation47_spill] sm:$0xff] %v11711_v28  ;;  %v11729_v19 = vmul.f32 %v11308_v48, %v17303_v15  ;;  %v4180_v28 = vrot.slane %v11345_v37, 1  ;;  %v11747_v48 = vmul.f32 %v11293_v6, %v11357_v21  ;;  %v17304_v37 = vld [vmem:[#allocation33_spill] sm:$0xff]  ;;  %v11761_v15 = vmul.f32 %v11293_v6, %v17306_v61  ;;  %v17311_v61 = vld [vmem:[#allocation32_spill] sm:$0xff] }
 0x466   :  { %v2466_v33 = vmul.f32 %v11293_v6, %v17304_v37  ;;  %3169 = vst.msk [vmem:[#allocation2 + $0x198] sm:$0xf] %vm3074_vm15, %v3070_v26  ;;  %v11765_v21 = vmul.f32 %v11293_v6, %v11395_v52  ;;  %v11774_v20 = vmul.f32 %v11293_v6, %v11411_v29  ;;  %v11782_v26 = vmul.f32 %v11293_v6, %v11427_v17 }
 0x467   :  { %v4182_v4 = vsel %vm4179_vm10, %v4180_v28, %v4181_v9  ;;  %v11778_v28 = vmul.f32 %v11293_v6, %v11421_v36  ;;  %v11786_v52 = vmul.f32 %v11293_v6, %v11433_v30  ;;  %v11790_v43 = vmul.f32 %v11293_v6, %v11439_v41  ;;  %v17307_v9 = vld [vmem:[#allocation19_spill] sm:$0xff] }
 0x468   :  { %4276 = vrot.lane.b32.xlu0 %v4182_v4, %s9175_s15  ;;  %v11794_v29 = vmul.f32 %v11293_v6, %v11446_v25  ;;  %v11798_v36 = vmul.f32 %v11293_v6, %v11452_v5  ;;  %v11802_v17 = vmul.f32 %v11293_v6, %v11458_v40  ;;  %v11806_v30 = vmul.f32 %v11293_v6, %v11464_v58  ;;  %v17309_v4 = vld [vmem:[#allocation20_spill] sm:$0xff] }
 0x469   :  { %v11810_v41 = vmul.f32 %v11293_v6, %v11470_v39  ;;  %v11814_v25 = vmul.f32 %v11293_v6, %v17307_v9  ;;  %v11818_v5 = vmul.f32 %v11293_v6, %v11482_v12  ;;  %v11822_v40 = vmul.f32 %v11293_v6, %v11491_v44 }
 0x46a   :  { %v11826_v58 = vmul.f32 %v11293_v6, %v11498_v24  ;;  %v11830_v39 = vmul.f32 %v11293_v6, %v11505_v11  ;;  %v11834_v37 = vmul.f32 %v11293_v6, %v11511_v22  ;;  %v11838_v12 = vmul.f32 %v11293_v6, %v11517_v56 }
 0x46b   :  { %v11842_v44 = vmul.f32 %v11293_v6, %v11523_v47  ;;  %v11846_v24 = vmul.f32 %v11293_v6, %v11530_v60  ;;  %v11850_v11 = vmul.f32 %v11293_v6, %v11536_v3  ;;  %v11854_v22 = vmul.f32 %v11293_v6, %v11542_v27 }
 0x46c   :  { %v11858_v56 = vmul.f32 %v11293_v6, %v11548_v57  ;;  %v11862_v47 = vmul.f32 %v11293_v6, %v11555_v8  ;;  %v11866_v60 = vmul.f32 %v11293_v6, %v11561_v59  ;;  %v11870_v3 = vmul.f32 %v11293_v6, %v11567_v34 }
 0x46d   :  { %v11874_v27 = vmul.f32 %v11293_v6, %v11573_v1  ;;  %v11878_v57 = vmul.f32 %v11293_v6, %v11579_v14  ;;  %v11882_v8 = vmul.f32 %v11293_v6, %v11585_v46  ;;  %v11886_v59 = vmul.f32 %v11293_v6, %v11591_v45 }
 0x46e   :  { %v11890_v34 = vmul.f32 %v11293_v6, %v11597_v35  ;;  %v11894_v1 = vmul.f32 %v11293_v6, %v11603_v18  ;;  %v11898_v14 = vmul.f32 %v11293_v6, %v11609_v32  ;;  %v11902_v46 = vmul.f32 %v11293_v6, %v11615_v38 }
 0x46f   :  { %v11906_v45 = vmul.f32 %v11293_v6, %v11621_v51  ;;  %v11910_v35 = vmul.f32 %v11293_v6, %v11627_v2  ;;  %v11914_v18 = vmul.f32 %v11293_v6, %v11633_v62  ;;  %v11918_v32 = vmul.f32 %v11293_v6, %v11639_v23 }
 0x470   :  { %v11922_v38 = vmul.f32 %v11293_v6, %v11645_v63  ;;  %v11926_v51 = vmul.f32 %v11293_v6, %v17308_v31  ;;  %v11930_v2 = vmul.f32 %v11293_v6, %v17309_v4  ;;  %v11934_v62 = vmul.f32 %v11293_v6, %v17311_v61  ;;  %v17315_v31 = vld [vmem:[#allocation22_spill] sm:$0xff] }
 0x471   :  { %v11938_v23 = vmul.f32 %v11293_v6, %v11669_v13  ;;  %v11942_v63 = vmul.f32 %v11293_v6, %v11675_v7  ;;  %v11946_v9 = vmul.f32 %v11293_v6, %v11681_v10  ;;  %v11950_v4 = vmul.f32 %v11293_v6, %v17315_v31 }
 0x472   :  { %17310 = vst [vmem:[#allocation8_spill] sm:$0xff] %v11930_v2  ;;  %v17316_v2 = vld [vmem:[#allocation6_spill] sm:$0xff]  ;;  %v11970_v31 = vmul.f32 %v11293_v6, %v11717_v50 }
 0x473   :  { %17312 = vst [vmem:[#allocation48_spill] sm:$0xff] %v11934_v62  ;;  %v11954_v61 = vmul.f32 %v11293_v6, %v17316_v2  ;;  %v17318_v62 = vld [vmem:[#allocation46_spill] sm:$0xff]  ;;  %v11974_v2 = vmul.f32 %v11293_v6, %v11723_v0 }
 0x474   :  { %17313 = vst [vmem:[#allocation9_spill] sm:$0xff] %v11938_v23  ;;  %v11958_v13 = vmul.f32 %v11293_v6, %v17318_v62  ;;  %v17320_v23 = vld [vmem:[#allocation7_spill] sm:$0xff]  ;;  %v11978_v62 = vmul.f32 %v11293_v6, %v11729_v19 }
 0x475   :  { %17314 = vst [vmem:[#allocation56_spill] sm:$0xff] %v11942_v63  ;;  %v11962_v7 = vmul.f32 %v11293_v6, %v17320_v23  ;;  %v17321_v63 = vld [vmem:[#allocation47_spill] sm:$0xff] }
 0x476   :  { %17317 = vst [vmem:[#allocation68_spill] sm:$0xff] %v11954_v61  ;;  %v11966_v10 = vmul.f32 %v11293_v6, %v17321_v63 }
 0x477   :  { %17319 = vst [vmem:[#allocation34_spill] sm:$0xff] %v11958_v13  ;;  %v17322_v13 = vld [vmem:[#allocation77_spill] sm:$0xff] }
 0x478   :  { %v2532_v61 = vadd.f32 %v17322_v13, %v2465_v54  ;;  %v2533_v23 = vadd.f32 %v17322_v13, %v2466_v33  ;;  %v11984_v63 = vadd.f32 %v17322_v13, %v11735_v42  ;;  %v11988_v50 = vadd.f32 %v17322_v13, %v11739_v53 }
 0x479   :  { %v11992_v0 = vadd.f32 %v17322_v13, %v11743_v16  ;;  %v11996_v6 = vadd.f32 %v17322_v13, %v11747_v48  ;;  %v12000_v19 = vadd.f32 %v17322_v13, %v11755_v49  ;;  %v12004_v42 = vadd.f32 %v17322_v13, %v11761_v15 }
 0x47a   :  { %17323 = vst [vmem:[#allocation85_spill] sm:$0xff] %v11988_v50  ;;  %v2596_v54 = vmax.f32 %v2532_v61, 0.0  ;;  %v2597_v33 = vmax.f32 %v2533_v23, 0.0  ;;  %v12008_v53 = vadd.f32 %v17322_v13, %v11765_v21  ;;  %v12012_v16 = vadd.f32 %v17322_v13, %v11769_v55 }
 0x47b   :  { %v12016_v48 = vadd.f32 %v17322_v13, %v11774_v20  ;;  %v12020_v49 = vadd.f32 %v17322_v13, %v11778_v28  ;;  %v12024_v15 = vadd.f32 %v17322_v13, %v11782_v26  ;;  %v12028_v21 = vadd.f32 %v17322_v13, %v11786_v52 }
 0x47c   :  { %v2727_v61 = vrot.slane %v2596_v54, 7  ;;  %v2728_v23 = vrot.slane %v2597_v33, 7  ;;  %v12032_v55 = vadd.f32 %v17322_v13, %v11790_v43  ;;  %v12036_v20 = vadd.f32 %v17322_v13, %v11794_v29 }
 0x47d   :  { %17324 = vst [vmem:[#allocation67_spill] sm:$0xff] %v12016_v48  ;;  %v12040_v28 = vadd.f32 %v17322_v13, %v11798_v36  ;;  %v12044_v26 = vadd.f32 %v17322_v13, %v11802_v17  ;;  %v12048_v52 = vadd.f32 %v17322_v13, %v11806_v30  ;;  %v12052_v43 = vadd.f32 %v17322_v13, %v11810_v41 }
 0x47e   :  { %17325 = vst [vmem:[#allocation86_spill] sm:$0xff] %v12020_v49  ;;  %v2729_v54 = vsel %vm2720_vm8, %v2727_v61, %v2728_v23  ;;  %v2915_v29 = vsel %vm2720_vm8, 0.0, %v2727_v61  ;;  %v12058_v36 = vadd.f32 %v17322_v13, %v11814_v25  ;;  %v12062_v17 = vadd.f32 %v17322_v13, %v11818_v5 }
 0x47f   :  { %17326 = vst [vmem:[#allocation69_spill] sm:$0xff] %v12044_v26  ;;  %v2983_v33 = vpack.c.bf16 %v2915_v29, %v2915_v29  ;;  %v2984_v26 = vpack.c.bf16 %v2729_v54, %v2729_v54  ;;  %v12066_v30 = vadd.f32 %v17322_v13, %v11822_v40  ;;  %v12070_v41 = vadd.f32 %v17322_v13, %v11826_v58  ;;  %v17330_v54 = vld [vmem:[#allocation48_spill] sm:$0xff]  ;;  %v17332_v29 = vld [vmem:[#allocation9_spill] sm:$0xff] }
 0x480   :  { %v12074_v61 = vadd.f32 %v17322_v13, %v11830_v39  ;;  %v12078_v25 = vadd.f32 %v17322_v13, %v11834_v37  ;;  %v12082_v5 = vadd.f32 %v17322_v13, %v11838_v12  ;;  %v12086_v40 = vadd.f32 %v17322_v13, %v11842_v44 }
 0x481   :  { %3082 = vst.msk [vmem:[#allocation2 + $0x24] sm:$0xf] %vm3074_vm15, %v2983_v33  ;;  %v12091_v58 = vadd.f32 %v17322_v13, %v11846_v24  ;;  %v12095_v39 = vadd.f32 %v17322_v13, %v11850_v11  ;;  %v12099_v37 = vadd.f32 %v17322_v13, %v11854_v22  ;;  %v12103_v12 = vadd.f32 %v17322_v13, %v11858_v56  ;;  %v17334_v33 = vld [vmem:[#allocation56_spill] sm:$0xff] }
 0x482   :  { %3083 = vst.msk [vmem:[#allocation2 + $0x28] sm:$0xf] %vm3074_vm15, %v2984_v26  ;;  %v12108_v44 = vadd.f32 %v17322_v13, %v11862_v47  ;;  %v12112_v24 = vadd.f32 %v17322_v13, %v11866_v60  ;;  %v12116_v11 = vadd.f32 %v17322_v13, %v11870_v3  ;;  %v12120_v22 = vadd.f32 %v17322_v13, %v11874_v27  ;;  %v17328_v26 = vld [vmem:[#allocation8_spill] sm:$0xff] }
 0x483   :  { %v12124_v56 = vadd.f32 %v17322_v13, %v11878_v57  ;;  %v12128_v47 = vadd.f32 %v17322_v13, %v11882_v8  ;;  %v12132_v60 = vadd.f32 %v17322_v13, %v11886_v59  ;;  %v12136_v3 = vadd.f32 %v17322_v13, %v11890_v34 }
 0x484   :  { %v12140_v27 = vadd.f32 %v17322_v13, %v11894_v1  ;;  %v12144_v57 = vadd.f32 %v17322_v13, %v11898_v14  ;;  %v12148_v8 = vadd.f32 %v17322_v13, %v11902_v46  ;;  %v12152_v59 = vadd.f32 %v17322_v13, %v11906_v45 }
 0x485   :  { %v12156_v34 = vadd.f32 %v17322_v13, %v11910_v35  ;;  %v12160_v1 = vadd.f32 %v17322_v13, %v11914_v18  ;;  %v12164_v14 = vadd.f32 %v17322_v13, %v11918_v32  ;;  %v12168_v46 = vadd.f32 %v17322_v13, %v11922_v38 }
 0x486   :  { %v12172_v45 = vadd.f32 %v17322_v13, %v11926_v51  ;;  %v12176_v35 = vadd.f32 %v17322_v13, %v17328_v26  ;;  %v12180_v18 = vadd.f32 %v17322_v13, %v17330_v54  ;;  %v12184_v32 = vadd.f32 %v17322_v13, %v17332_v29 }
 0x487   :  { %17327 = vst [vmem:[#allocation87_spill] sm:$0xff] %v12168_v46  ;;  %v12188_v38 = vadd.f32 %v17322_v13, %v17334_v33  ;;  %v12192_v51 = vadd.f32 %v17322_v13, %v11946_v9  ;;  %v12196_v26 = vadd.f32 %v17322_v13, %v11950_v4  ;;  %v12208_v33 = vadd.f32 %v17322_v13, %v11962_v7 }
 0x488   :  { %17329 = vst [vmem:[#allocation74_spill] sm:$0xff] %v12176_v35  ;;  %v17336_v35 = vld [vmem:[#allocation68_spill] sm:$0xff]  ;;  %v12212_v9 = vadd.f32 %v17322_v13, %v11966_v10  ;;  %v12216_v4 = vadd.f32 %v17322_v13, %v11970_v31  ;;  %v2594_v7 = vmax.f32 %v11992_v0, 0.0  ;;  %v2595_v10 = vmax.f32 %v11996_v6, 0.0  ;;  %v17343_v6 = vld [vmem:[#allocation69_spill] sm:$0xff] }
 0x489   :  { %17331 = vst [vmem:[#allocation17_spill] sm:$0xff] %v12180_v18  ;;  %v12200_v54 = vadd.f32 %v17322_v13, %v17336_v35  ;;  %v17337_v18 = vld [vmem:[#allocation34_spill] sm:$0xff]  ;;  %v12222_v35 = vadd.f32 %v17322_v13, %v11974_v2  ;;  %v17351_v31 = vmax.f32 %v11984_v63, 0.0  ;;  %v17359_v63 = vmax.f32 %v12008_v53, 0.0 }
 0x48a   :  { %17333 = vst [vmem:[#allocation42_spill] sm:$0xff] %v12184_v32  ;;  %v12204_v29 = vadd.f32 %v17322_v13, %v17337_v18  ;;  %v12226_v18 = vadd.f32 %v17322_v13, %v11978_v62  ;;  %v2724_v2 = vrot.slane %v2594_v7, 7  ;;  %v12240_v0 = vrot.slane %v2595_v10, 7  ;;  %v17353_v7 = vld [vmem:[#allocation85_spill] sm:$0xff] }
 0x48b   :  { %17335 = vst [vmem:[#allocation43_spill] sm:$0xff] %v12196_v26  ;;  %v12218_v26 = vld [vmem:[#allocation2 + $0x24] sm:$0xff]  ;;  %v17354_v49 = vmax.f32 %v17353_v7, 0.0  ;;  %v17365_v53 = vmax.f32 %v12024_v15, 0.0 }
 0x48c   :  { %17338 = vst [vmem:[#allocation81_spill] sm:$0xff] %v12208_v33  ;;  %v12230_v33 = vsel %vm2720_vm8, %v2728_v23, 0.0  ;;  %4504 = vrot.lane.b32.xlu2 %v12218_v26, %s9182_s14  ;;  %v2726_v13 = vsel %vm2720_vm8, %v2724_v2, %v12240_v0 }
 0x48d   :  { %17339 = vst [vmem:[#allocation89_spill] sm:$0xff] %v12216_v4  ;;  %v2914_v4 = vsel %vm2720_vm8, 0.0, %v2724_v2  ;;  %v17350_v2 = vmov %v12222_v35  ;;  %v2985_v48 = vpack.c.bf16 %v12230_v33, %v12230_v33 }
 0x48e   :  { %17340 = vst [vmem:[#allocation64_spill] sm:$0xff] %v12218_v26  ;;  %v2980_v62 = vpack.c.bf16 %v2914_v4, %v2914_v4  ;;  %v2981_v26 = vpack.c.bf16 %v2726_v13, %v2726_v13  ;;  %v2721_v13 = vrot.slane %v17351_v31, 7  ;;  %v12327_v31 = vrot.slane %v17359_v63, 7 }
 0x48f   :  { %17341 = vst [vmem:[#allocation49_spill] sm:$0xff] %v12222_v35  ;;  %v12314_v35 = vrot.slane %v17354_v49, 7  ;;  %v17361_v49 = vld [vmem:[#allocation67_spill] sm:$0xff]  ;;  %v12346_v63 = vrot.slane %v17365_v53, 7 }
 0x490   :  { %17342 = vst [vmem:[#allocation23_spill] sm:$0xff] %v12226_v18  ;;  %v17345_v10 = vld [vmem:[#allocation17_spill] sm:$0xff]  ;;  %v2913_v33 = vsel %vm2720_vm8, 0.0, %v2721_v13  ;;  %v17362_v7 = vmax.f32 %v17361_v49, 0.0 }
 0x491   :  { %3079 = vst.msk [vmem:[#allocation2 + $0x18] sm:$0xf] %vm3074_vm15, %v2980_v62  ;;  %v12310_v62 = vsel %vm2720_vm8, %v12240_v0, 0.0  ;;  %v17360_v0 = vmax.f32 %v12012_v16, 0.0 }
 0x492   :  { %3080 = vst.msk [vmem:[#allocation2 + $0x1c] sm:$0xf] %vm3074_vm15, %v2981_v26  ;;  %v17347_v4 = vld [vmem:[#allocation43_spill] sm:$0xff]  ;;  %v17358_v26 = vmax.f32 %v12004_v42, 0.0  ;;  %v12335_v18 = vrot.slane %v17362_v7, 7  ;;  %v17363_v42 = vld [vmem:[#allocation86_spill] sm:$0xff] }
 0x493   :  { %v17348_v46 = vld [vmem:[#allocation81_spill] sm:$0xff]  ;;  %17352 = vst [vmem:[#allocation54_spill] sm:$0xff] %v12310_v62  ;;  %v12331_v62 = vrot.slane %v17360_v0, 7  ;;  %v17366_v0 = vmax.f32 %v12028_v21, 0.0  ;;  %v17367_v7 = vmax.f32 %v12032_v55, 0.0  ;;  %v17371_v21 = vmax.f32 %v12048_v52, 0.0 }
 0x494   :  { %17355 = vst [vmem:[#allocation10_spill] sm:$0xff] %v12314_v35  ;;  %v12322_v32 = vrot.slane %v17358_v26, 7  ;;  %v17364_v26 = vmax.f32 %v17363_v42, 0.0  ;;  %v17369_v42 = vmax.f32 %v12040_v28, 0.0  ;;  %v17372_v55 = vmax.f32 %v12052_v43, 0.0 }
 0x495   :  { %3084 = vst.msk [vmem:[#allocation2 + $0x2c] sm:$0x1] %vm3077_vm1, %v2985_v48  ;;  %v12350_v49 = vrot.slane %v17366_v0, 7  ;;  %v12354_v48 = vrot.slane %v17367_v7, 7  ;;  %v12371_v53 = vrot.slane %v17371_v21, 7  ;;  %v17374_v28 = vmax.f32 %v12062_v17, 0.0 }
 0x496   :  { %v12363_v15 = vrot.slane %v17369_v42, 7  ;;  %v12375_v0 = vrot.slane %v17372_v55, 7  ;;  %v17376_v52 = vmax.f32 %v12070_v41, 0.0  ;;  %v17377_v43 = vmax.f32 %v12074_v61, 0.0 }
 0x497   :  { %v12384_v7 = vrot.slane %v17374_v28, 7  ;;  %v17379_v17 = vmax.f32 %v12082_v5, 0.0  ;;  %v17382_v41 = vmax.f32 %v12091_v58, 0.0  ;;  %v17383_v61 = vmax.f32 %v12095_v39, 0.0 }
 0x498   :  { %v12392_v42 = vrot.slane %v17376_v52, 7  ;;  %v17386_v5 = vmax.f32 %v12103_v12, 0.0  ;;  %v17389_v58 = vmax.f32 %v12112_v24, 0.0  ;;  %v17391_v39 = vmax.f32 %v12116_v11, 0.0 }
 0x499   :  { %v12290_v50 = vld [vmem:[#allocation2 + $0x18] sm:$0xff]  ;;  %v12404_v21 = vrot.slane %v17379_v17, 7  ;;  %v12414_v28 = vrot.slane %v17382_v41, 7  ;;  %v17394_v12 = vmax.f32 %v12124_v56, 0.0  ;;  %v17401_v56 = vmax.f32 %v12144_v57, 0.0 }
 0x49a   :  { %17346 = vst [vmem:[#allocation52_spill] sm:$0xff] %v12290_v50  ;;  %4502 = vrot.lane.b32.xlu0 %v12290_v50, %s9182_s14  ;;  %v17356_v50 = vmax.f32 %v12000_v19, 0.0  ;;  %v2977_v19 = vpack.c.bf16 %v2913_v33, %v2913_v33  ;;  %v12434_v17 = vrot.slane %v17389_v58, 7  ;;  %v17409_v57 = vmax.f32 %v12164_v14, 0.0  ;;  %v17419_v14 = vld [vmem:[#allocation42_spill] sm:$0xff] }
 0x49c   :  { %v12318_v23 = vrot.slane %v17356_v50, 7  ;;  %v2723_v50 = vsel %vm2720_vm8, %v2721_v13, %v12314_v35  ;;  %v17368_v13 = vmax.f32 %v12036_v20, 0.0  ;;  %3075 = vst.msk [vmem:[#allocation2 + $0xc] sm:$0xf] %vm3074_vm15, %v2977_v19  ;;  %v17373_v20 = vmax.f32 %v12058_v36, 0.0 }
 0x49d   :  { %v2978_v16 = vpack.c.bf16 %v2723_v50, %v2723_v50  ;;  %v17370_v50 = vmax.f32 %v17343_v6, 0.0  ;;  %v17375_v6 = vmax.f32 %v12066_v30, 0.0  ;;  %v17378_v36 = vmax.f32 %v12078_v25, 0.0  ;;  %17390 = vst [vmem:[#allocation58_spill] sm:$0xff] %v12434_v17 }
 0x49e   :  { %17357 = vst [vmem:[#allocation63_spill] sm:$0xff] %v12318_v23  ;;  %v12342_v23 = vrot.slane %v17364_v26, 7  ;;  %v12358_v33 = vrot.slane %v17368_v13, 7  ;;  %v12380_v19 = vrot.slane %v17373_v20, 7  ;;  %v17380_v30 = vmax.f32 %v12086_v40, 0.0  ;;  %v12410_v20 = vld [vmem:[#allocation2 + $0x24] sm:$0xff] }
 0x49f   :  { %v12367_v26 = vrot.slane %v17370_v50, 7  ;;  %3076 = vst.msk [vmem:[#allocation2 + $0x10] sm:$0xf] %vm3074_vm15, %v2978_v16  ;;  %v12388_v13 = vrot.slane %v17375_v6, 7  ;;  %v12396_v50 = vrot.slane %v17377_v43, 7  ;;  %v12400_v16 = vrot.slane %v17378_v36, 7 }
 0x4a0   :  { %v12408_v55 = vrot.slane %v17380_v30, 7  ;;  %17381 = vst [vmem:[#allocation79_spill] sm:$0xff] %v12410_v20  ;;  %v12418_v6 = vrot.slane %v17383_v61, 7  ;;  %v17385_v25 = vmax.f32 %v12099_v37, 0.0  ;;  %v12426_v43 = vrot.slane %v17386_v5, 7 }
 0x4a1   :  { %v17388_v40 = vmax.f32 %v12108_v44, 0.0  ;;  %v12438_v30 = vrot.slane %v17391_v39, 7  ;;  %v17392_v37 = vmax.f32 %v12120_v22, 0.0  ;;  %v12448_v44 = vrot.slane %v17394_v12, 7 }
 0x4a2   :  { %17384 = vst [vmem:[#allocation41_spill] sm:$0xff] %v12418_v6  ;;  %v12422_v52 = vrot.slane %v17385_v25, 7  ;;  %5430 = vrot.lane.b32.xlu0 %v12410_v20, %s9176_s16  ;;  %v17395_v61 = vmax.f32 %v12128_v47, 0.0  ;;  %v17397_v25 = vmax.f32 %v12132_v60, 0.0  ;;  %v17398_v5 = vmax.f32 %v12136_v3, 0.0 }
 0x4a3   :  { %17387 = vst [vmem:[#allocation65_spill] sm:$0xff] %v12426_v43  ;;  %v12430_v36 = vrot.slane %v17388_v40, 7  ;;  %v12442_v41 = vrot.slane %v17392_v37, 7  ;;  %v17400_v40 = vmax.f32 %v12140_v27, 0.0  ;;  %v12468_v39 = vrot.slane %v17401_v56, 7 }
 0x4a4   :  { %v12452_v24 = vrot.slane %v17395_v61, 7  ;;  %v12456_v11 = vrot.slane %v17397_v25, 7  ;;  %v12460_v22 = vrot.slane %v17398_v5, 7  ;;  %v17403_v47 = vmax.f32 %v12148_v8, 0.0 }
 0x4a5   :  { %17393 = vst [vmem:[#allocation12_spill] sm:$0xff] %v12442_v41  ;;  %v12464_v58 = vrot.slane %v17400_v40, 7  ;;  %v17404_v60 = vmax.f32 %v12152_v59, 0.0  ;;  %v17406_v3 = vmax.f32 %v12156_v34, 0.0  ;;  %v17407_v27 = vmax.f32 %v12160_v1, 0.0  ;;  %v17410_v40 = vld [vmem:[#allocation87_spill] sm:$0xff] }
 0x4a6   :  { %17396 = vst [vmem:[#allocation13_spill] sm:$0xff] %v12452_v24  ;;  %v12472_v37 = vrot.slane %v17403_v47, 7  ;;  %v12488_v5 = vrot.slane %v17409_v57, 7  ;;  %v17411_v8 = vmax.f32 %v17410_v40, 0.0  ;;  %v12494_v47 = vld [vmem:[#allocation2 + $0xc] sm:$0xff]  ;;  %v17414_v59 = vmax.f32 %v12172_v45, 0.0 }
 0x4a7   :  { %17399 = vst [vmem:[#allocation75_spill] sm:$0xff] %v12460_v22  ;;  %v12476_v12 = vrot.slane %v17404_v60, 7  ;;  %v12480_v61 = vrot.slane %v17406_v3, 7  ;;  %v12484_v25 = vrot.slane %v17407_v27, 7  ;;  %v17415_v34 = vld [vmem:[#allocation74_spill] sm:$0xff]  ;;  %v17418_v1 = vmax.f32 %v17345_v10, 0.0  ;;  %4500 = vrot.lane.b32.xlu1 %v12494_v47, %s9182_s14 }
 0x4a8   :  { %17402 = vst [vmem:[#allocation38_spill] sm:$0xff] %v12468_v39  ;;  %v12492_v56 = vrot.slane %v17411_v8, 7  ;;  %v12498_v60 = vrot.slane %v17414_v59, 7  ;;  %v17416_v3 = vmax.f32 %v17415_v34, 0.0  ;;  %v17420_v57 = vmax.f32 %v17419_v14, 0.0 }
 0x4a9   :  { %17405 = vst [vmem:[#allocation76_spill] sm:$0xff] %v12476_v12  ;;  %v12506_v27 = vrot.slane %v17418_v1, 7  ;;  %v17422_v40 = vmax.f32 %v12188_v38, 0.0  ;;  %v17423_v45 = vmax.f32 %v12192_v51, 0.0  ;;  %v17425_v34 = vmax.f32 %v17347_v4, 0.0 }
 0x4aa   :  { %17408 = vst [vmem:[#allocation39_spill] sm:$0xff] %v12484_v25  ;;  %v12502_v20 = vrot.slane %v17416_v3, 7  ;;  %v12510_v35 = vrot.slane %v17420_v57, 7  ;;  %v17427_v10 = vmax.f32 %v12200_v54, 0.0  ;;  %v17428_v14 = vmax.f32 %v12204_v29, 0.0 }
 0x4ab   :  { %17412 = vst [vmem:[#allocation78_spill] sm:$0xff] %v12492_v56  ;;  %v12514_v8 = vrot.slane %v17422_v40, 7  ;;  %v12518_v59 = vrot.slane %v17423_v45, 7  ;;  %v12522_v3 = vrot.slane %v17425_v34, 7  ;;  %v17430_v57 = vmax.f32 %v17348_v46, 0.0  ;;  %v17434_v45 = vld [vmem:[#allocation89_spill] sm:$0xff] }
 0x4ac   :  { %17413 = vst [vmem:[#allocation40_spill] sm:$0xff] %v12494_v47  ;;  %v12526_v1 = vrot.slane %v17427_v10, 7  ;;  %v12532_v38 = vrot.slane %v17428_v14, 7  ;;  %v17432_v40 = vmax.f32 %v12212_v9, 0.0  ;;  %v17435_v34 = vmax.f32 %v17434_v45, 0.0  ;;  %v17439_v47 = vld [vmem:[#allocation23_spill] sm:$0xff] }
 0x4ad   :  { %17417 = vst [vmem:[#allocation84_spill] sm:$0xff] %v12502_v20  ;;  %v12536_v51 = vrot.slane %v17430_v57, 7  ;;  %v17437_v10 = vmax.f32 %v17350_v2, 0.0  ;;  %v17440_v29 = vmax.f32 %v17439_v47, 0.0  ;;  %v17443_v57 = vld [vmem:[#allocation63_spill] sm:$0xff]  ;;  %v2735_v2 = vsel %vm2720_vm8, %v12327_v31, %v12331_v62 }
 0x4ae   :  { %17421 = vst [vmem:[#allocation66_spill] sm:$0xff] %v12510_v35  ;;  %v12540_v4 = vrot.slane %v17432_v40, 7  ;;  %v12544_v54 = vrot.slane %v17435_v34, 7  ;;  %v2732_v9 = vsel %vm2720_vm8, %v17443_v57, %v12322_v32  ;;  %v2916_v40 = vsel %vm2720_vm8, 0.0, %v17443_v57 }
 0x4af   :  { %17424 = vst [vmem:[#allocation72_spill] sm:$0xff] %v12518_v59  ;;  %v12552_v14 = vrot.slane %v17440_v29, 7  ;;  %v2987_v45 = vpack.c.bf16 %v2732_v9, %v2732_v9  ;;  %v2738_v47 = vsel %vm2720_vm8, %v12335_v18, %v12342_v23  ;;  %v2986_v34 = vpack.c.bf16 %v2916_v40, %v2916_v40 }
 0x4b0   :  { %17426 = vst [vmem:[#allocation73_spill] sm:$0xff] %v12522_v3  ;;  %v12548_v3 = vrot.slane %v17437_v10, 7  ;;  %v12575_v10 = vsel %vm2720_vm8, %v12354_v48, %v12358_v33  ;;  %v12580_v29 = vsel %vm2720_vm8, %v12363_v15, %v12367_v26  ;;  %v12587_v57 = vsel %vm2720_vm8, %v12371_v53, %v12375_v0 }
 0x4b1   :  { %17429 = vst [vmem:[#allocation33_spill] sm:$0xff] %v12532_v38  ;;  %v17442_v38 = vld [vmem:[#allocation54_spill] sm:$0xff]  ;;  %v12592_v9 = vsel %vm2720_vm8, %v12380_v19, %v12384_v7  ;;  %v12597_v40 = vsel %vm2720_vm8, %v12388_v13, %v12392_v42 }
 0x4b2   :  { %17431 = vst [vmem:[#allocation18_spill] sm:$0xff] %v12536_v51  ;;  %v2982_v46 = vpack.c.bf16 %v17442_v38, %v17442_v38  ;;  %v12570_v38 = vsel %vm2720_vm8, %v12346_v63, %v12350_v49 }
 0x4b3   :  { %17433 = vst [vmem:[#allocation30_spill] sm:$0xff] %v12540_v4 }
 0x4b4   :  { %17436 = vst [vmem:[#allocation19_spill] sm:$0xff] %v12544_v54 }
 0x4b5   :  { %17438 = vst [vmem:[#allocation31_spill] sm:$0xff] %v12548_v3 }
 0x4b6   :  { %17441 = vst [vmem:[#allocation20_spill] sm:$0xff] %v12552_v14 }
 0x4b7   :  { %3081 = vst.msk [vmem:[#allocation2 + $0x20] sm:$0x1] %vm3077_vm1, %v2982_v46  ;;  %v12602_v46 = vsel %vm2720_vm8, %v12396_v50, %v12400_v16 }
 0x4b8   :  { %3086 = vst.msk [vmem:[#allocation2 + $0x34] sm:$0xf] %vm3074_vm15, %v2987_v45  ;;  %v12608_v45 = vsel %vm2720_vm8, %v12404_v21, %v12408_v55 }
 0x4b9   :  { %17444 = vst [vmem:[#allocation32_spill] sm:$0xff] %v12592_v9  ;;  %v12613_v9 = vsel %vm2720_vm8, %v12414_v28, %v12418_v6  ;;  %v12633_v6 = vsel %vm2720_vm8, %v12448_v44, %v12452_v24  ;;  %v12653_v24 = vsel %vm2720_vm8, %v12480_v61, %v12484_v25  ;;  %v12673_v25 = vsel %vm2720_vm8, %v12514_v8, %v12518_v59 }
 0x4ba   :  { %17445 = vst [vmem:[#allocation22_spill] sm:$0xff] %v12597_v40  ;;  %v12618_v40 = vsel %vm2720_vm8, %v12422_v52, %v12426_v43  ;;  %v12638_v43 = vsel %vm2720_vm8, %v12456_v11, %v12460_v22  ;;  %v12658_v22 = vsel %vm2720_vm8, %v12488_v5, %v12492_v56  ;;  %v12693_v59 = vsel %vm2720_vm8, %v12548_v3, %v12552_v14 }
 0x4bb   :  { %17446 = vst [vmem:[#allocation6_spill] sm:$0xff] %v12602_v46  ;;  %v12623_v46 = vsel %vm2720_vm8, %v12430_v36, %v12434_v17  ;;  %v12643_v17 = vsel %vm2720_vm8, %v12464_v58, %v12468_v39  ;;  %v12663_v39 = vsel %vm2720_vm8, %v12498_v60, %v12502_v20  ;;  %v2948_v14 = vsel %vm2720_vm8, %v12322_v32, 0.0 }
 0x4bc   :  { %3085 = vst.msk [vmem:[#allocation2 + $0x30] sm:$0xf] %vm3074_vm15, %v2986_v34  ;;  %v12628_v34 = vsel %vm2720_vm8, %v12438_v30, %v12442_v41  ;;  %v12648_v41 = vsel %vm2720_vm8, %v12472_v37, %v12476_v12  ;;  %v12668_v12 = vsel %vm2720_vm8, %v12506_v27, %v12510_v35  ;;  %v12688_v35 = vsel %vm2720_vm8, %v12540_v4, %v12544_v54 }
 0x4bd   :  { %17447 = vst [vmem:[#allocation46_spill] sm:$0xff] %v12653_v24  ;;  %v17451_v24 = vld [vmem:[#allocation73_spill] sm:$0xff]  ;;  %v2918_v3 = vsel %vm2720_vm8, 0.0, %v12335_v18  ;;  %v2951_v18 = vsel %vm2720_vm8, %v12350_v49, 0.0  ;;  %v2921_v49 = vsel %vm2720_vm8, 0.0, %v12363_v15  ;;  %v3002_v15 = vpack.c.bf16 %v12580_v29, %v12580_v29 }
 0x4be   :  { %17448 = vst [vmem:[#allocation7_spill] sm:$0xff] %v12658_v22  ;;  %v12678_v56 = vsel %vm2720_vm8, %v17451_v24, %v12526_v1  ;;  %v17453_v22 = vld [vmem:[#allocation33_spill] sm:$0xff]  ;;  %v2992_v32 = vpack.c.bf16 %v2918_v3, %v2918_v3  ;;  %v2997_v3 = vpack.c.bf16 %v2951_v18, %v2951_v18 }
 0x4bf   :  { %17449 = vst [vmem:[#allocation47_spill] sm:$0xff] %v12668_v12  ;;  %v12683_v20 = vsel %vm2720_vm8, %v17453_v22, %v12536_v51 }
 0x4c0   :  { %17450 = vst [vmem:[#allocation77_spill] sm:$0xff] %v12673_v25  ;;  %v12695_v25 = vld [vmem:[#allocation2 + $0x18] sm:$0xff] }
 0x4c1   :  { %17452 = vst [vmem:[#allocation8_spill] sm:$0xff] %v12678_v56  ;;  %5428 = vrot.lane.b32.xlu1 %v12695_v25, %s9176_s16  ;;  %v2990_v56 = vpack.c.bf16 %v2735_v2, %v2735_v2 }
 0x4c2   :  { %17454 = vst [vmem:[#allocation48_spill] sm:$0xff] %v12683_v20  ;;  %v17459_v20 = vld [vmem:[#allocation10_spill] sm:$0xff] }
 0x4c3   :  { %17455 = vst [vmem:[#allocation9_spill] sm:$0xff] %v12688_v35  ;;  %v12697_v12 = vld [vmem:[#allocation2 + $0x30] sm:$0xff]  ;;  %v2945_v51 = vsel %vm2720_vm8, %v17459_v20, 0.0  ;;  %v2917_v35 = vsel %vm2720_vm8, 0.0, %v12327_v31  ;;  %v2919_v31 = vsel %vm2720_vm8, 0.0, %v12346_v63  ;;  %v2996_v63 = vpack.c.bf16 %v12570_v38, %v12570_v38 }
 0x4c4   :  { %17456 = vst [vmem:[#allocation56_spill] sm:$0xff] %v12693_v59  ;;  %5432 = vrot.lane.b32.xlu2 %v12697_v12, %s9176_s16  ;;  %v2949_v59 = vsel %vm2720_vm8, %v12331_v62, 0.0  ;;  %v2979_v54 = vpack.c.bf16 %v2945_v51, %v2945_v51  ;;  %v2989_v4 = vpack.c.bf16 %v2917_v35, %v2917_v35  ;;  %v2993_v62 = vpack.c.bf16 %v2738_v47, %v2738_v47 }
 0x4c5   :  { %17457 = vst [vmem:[#allocation68_spill] sm:$0xff] %v12695_v25  ;;  %v2988_v25 = vpack.c.bf16 %v2948_v14, %v2948_v14  ;;  %v2991_v20 = vpack.c.bf16 %v2949_v59, %v2949_v59  ;;  %v2995_v59 = vpack.c.bf16 %v2919_v31, %v2919_v31  ;;  %v2955_v47 = vsel %vm2720_vm8, %v12384_v7, 0.0 }
 0x4c6   :  { %17458 = vst [vmem:[#allocation34_spill] sm:$0xff] %v12697_v12  ;;  %v2950_v12 = vsel %vm2720_vm8, %v12342_v23, 0.0  ;;  %v2920_v23 = vsel %vm2720_vm8, 0.0, %v12354_v48  ;;  %v2999_v48 = vpack.c.bf16 %v12575_v10, %v12575_v10  ;;  %v2925_v7 = vsel %vm2720_vm8, 0.0, %v12396_v50  ;;  %v17462_v50 = vld [vmem:[#allocation6_spill] sm:$0xff] }
 0x4c7   :  { %3078 = vst.msk [vmem:[#allocation2 + $0x14] sm:$0x1] %vm3077_vm1, %v2979_v54  ;;  %v2994_v35 = vpack.c.bf16 %v2950_v12, %v2950_v12  ;;  %v2998_v12 = vpack.c.bf16 %v2920_v23, %v2920_v23  ;;  %v2954_v54 = vsel %vm2720_vm8, %v12375_v0, 0.0  ;;  %v2924_v0 = vsel %vm2720_vm8, 0.0, %v12388_v13  ;;  %v17461_v13 = vld [vmem:[#allocation22_spill] sm:$0xff] }
 0x4c8   :  { %3087 = vst.msk [vmem:[#allocation2 + $0x38] sm:$0x1] %vm3077_vm1, %v2988_v25  ;;  %v2952_v25 = vsel %vm2720_vm8, %v12358_v33, 0.0  ;;  %v2922_v33 = vsel %vm2720_vm8, 0.0, %v12371_v53  ;;  %v3005_v53 = vpack.c.bf16 %v12587_v57, %v12587_v57  ;;  %v3006_v38 = vpack.c.bf16 %v2954_v54, %v2954_v54 }
 0x4c9   :  { %3088 = vst.msk [vmem:[#allocation2 + $0x3c] sm:$0xf] %vm3074_vm15, %v2989_v4  ;;  %v3000_v51 = vpack.c.bf16 %v2952_v25, %v2952_v25  ;;  %v3001_v4 = vpack.c.bf16 %v2921_v49, %v2921_v49  ;;  %v3004_v2 = vpack.c.bf16 %v2922_v33, %v2922_v33  ;;  %v2956_v57 = vsel %vm2720_vm8, %v12392_v42, 0.0 }
 0x4ca   :  { %3089 = vst.msk [vmem:[#allocation2 + $0x40] sm:$0xf] %vm3074_vm15, %v2990_v56  ;;  %v2953_v56 = vsel %vm2720_vm8, %v12367_v26, 0.0  ;;  %v2923_v26 = vsel %vm2720_vm8, 0.0, %v12380_v19  ;;  %v17460_v19 = vld [vmem:[#allocation32_spill] sm:$0xff]  ;;  %v3010_v31 = vpack.c.bf16 %v2924_v0, %v2924_v0  ;;  %v3012_v18 = vpack.c.bf16 %v2956_v57, %v2956_v57 }
 0x4cb   :  { %3090 = vst.msk [vmem:[#allocation2 + $0x44] sm:$0x1] %vm3077_vm1, %v2991_v20  ;;  %v3003_v14 = vpack.c.bf16 %v2953_v56, %v2953_v56  ;;  %v3007_v10 = vpack.c.bf16 %v2923_v26, %v2923_v26  ;;  %v3008_v29 = vpack.c.bf16 %v17460_v19, %v17460_v19  ;;  %v3009_v20 = vpack.c.bf16 %v2955_v47, %v2955_v47 }
 0x4cc   :  { %3091 = vst.msk [vmem:[#allocation2 + $0x48] sm:$0xf] %vm3074_vm15, %v2992_v32  ;;  %v3011_v32 = vpack.c.bf16 %v17461_v13, %v17461_v13  ;;  %v2926_v42 = vsel %vm2720_vm8, 0.0, %v12404_v21  ;;  %v3014_v23 = vpack.c.bf16 %v17462_v50, %v17462_v50  ;;  %v3017_v21 = vpack.c.bf16 %v12608_v45, %v12608_v45  ;;  %v17464_v45 = vld [vmem:[#allocation65_spill] sm:$0xff] }
 0x4cd   :  { %3092 = vst.msk [vmem:[#allocation2 + $0x4c] sm:$0xf] %vm3074_vm15, %v2993_v62  ;;  %v2957_v62 = vsel %vm2720_vm8, %v12400_v16, 0.0  ;;  %v2927_v16 = vsel %vm2720_vm8, 0.0, %v12414_v28  ;;  %v3016_v25 = vpack.c.bf16 %v2926_v42, %v2926_v42  ;;  %v3020_v28 = vpack.c.bf16 %v12613_v9, %v12613_v9  ;;  %v17465_v9 = vld [vmem:[#allocation58_spill] sm:$0xff] }
 0x4ce   :  { %3093 = vst.msk [vmem:[#allocation2 + $0x50] sm:$0x1] %vm3077_vm1, %v2994_v35  ;;  %v3013_v35 = vpack.c.bf16 %v2925_v7, %v2925_v7  ;;  %v2960_v56 = vsel %vm2720_vm8, %v17464_v45, 0.0  ;;  %v2929_v33 = vsel %vm2720_vm8, 0.0, %v12430_v36  ;;  %v3026_v36 = vpack.c.bf16 %v12623_v46, %v12623_v46  ;;  %v17467_v46 = vld [vmem:[#allocation13_spill] sm:$0xff]  ;;  %v17474_v45 = vld [vmem:[#allocation7_spill] sm:$0xff] }
 0x4cf   :  { %3094 = vst.msk [vmem:[#allocation2 + $0x54] sm:$0xf] %vm3074_vm15, %v2995_v59  ;;  %v2958_v59 = vsel %vm2720_vm8, %v12408_v55, 0.0  ;;  %v2928_v55 = vsel %vm2720_vm8, 0.0, %v12422_v52  ;;  %v3023_v52 = vpack.c.bf16 %v12618_v40, %v12618_v40  ;;  %v3024_v54 = vpack.c.bf16 %v2960_v56, %v2960_v56  ;;  %v17466_v40 = vld [vmem:[#allocation12_spill] sm:$0xff] }
 0x4d0   :  { %3095 = vst.msk [vmem:[#allocation2 + $0x58] sm:$0xf] %vm3074_vm15, %v2996_v63  ;;  %v3015_v63 = vpack.c.bf16 %v2957_v62, %v2957_v62  ;;  %v3025_v26 = vpack.c.bf16 %v2929_v33, %v2929_v33  ;;  %v2931_v47 = vsel %vm2720_vm8, 0.0, %v12448_v44  ;;  %v2963_v0 = vsel %vm2720_vm8, %v17467_v46, 0.0 }
 0x4d1   :  { %3096 = vst.msk [vmem:[#allocation2 + $0x5c] sm:$0x1] %vm3077_vm1, %v2997_v3  ;;  %v17463_v3 = vld [vmem:[#allocation41_spill] sm:$0xff]  ;;  %v2932_v19 = vsel %vm2720_vm8, 0.0, %v12456_v11  ;;  %v3032_v44 = vpack.c.bf16 %v12633_v6, %v12633_v6  ;;  %v2933_v7 = vsel %vm2720_vm8, 0.0, %v12464_v58  ;;  %v3035_v11 = vpack.c.bf16 %v12638_v43, %v12638_v43  ;;  %v17469_v6 = vld [vmem:[#allocation38_spill] sm:$0xff] }
 0x4d2   :  { %3097 = vst.msk [vmem:[#allocation2 + $0x60] sm:$0xf] %vm3074_vm15, %v2998_v12  ;;  %v2959_v49 = vsel %vm2720_vm8, %v17463_v3, 0.0  ;;  %v3018_v12 = vpack.c.bf16 %v2958_v59, %v2958_v59  ;;  %v2965_v13 = vsel %vm2720_vm8, %v17469_v6, 0.0  ;;  %v2934_v62 = vsel %vm2720_vm8, 0.0, %v12472_v37  ;;  %v17470_v43 = vld [vmem:[#allocation76_spill] sm:$0xff] }
 0x4d3   :  { %3098 = vst.msk [vmem:[#allocation2 + $0x64] sm:$0xf] %vm3074_vm15, %v2999_v48  ;;  %v3019_v48 = vpack.c.bf16 %v2927_v16, %v2927_v16  ;;  %v3038_v58 = vpack.c.bf16 %v12643_v17, %v12643_v17  ;;  %v2966_v42 = vsel %vm2720_vm8, %v17470_v43, 0.0  ;;  %v2935_v50 = vsel %vm2720_vm8, 0.0, %v12480_v61  ;;  %v12866_v59 = vld [vmem:[#allocation2 + $0x3c] sm:$0xff]  ;;  %v17482_v6 = vld [vmem:[#allocation30_spill] sm:$0xff] }
 0x4d4   :  { %3099 = vst.msk [vmem:[#allocation2 + $0x68] sm:$0x1] %vm3077_vm1, %v3000_v51  ;;  %v3021_v51 = vpack.c.bf16 %v2959_v49, %v2959_v49  ;;  %v3041_v37 = vpack.c.bf16 %v12648_v41, %v12648_v41  ;;  %v12864_v17 = vld [vmem:[#allocation2 + $0x48] sm:$0xff]  ;;  %v2936_v61 = vsel %vm2720_vm8, 0.0, %v12488_v5  ;;  %v3043_v3 = vpack.c.bf16 %v2935_v50, %v2935_v50  ;;  %4508 = vrot.lane.b32.xlu0 %v12866_v59, %s9182_s14  ;;  %v17472_v41 = vld [vmem:[#allocation46_spill] sm:$0xff] }
 0x4d5   :  { %3100 = vst.msk [vmem:[#allocation2 + $0x6c] sm:$0xf] %vm3074_vm15, %v3001_v4  ;;  %v3022_v4 = vpack.c.bf16 %v2928_v55, %v2928_v55  ;;  %4510 = vrot.lane.b32.xlu2 %v12864_v17, %s9182_s14  ;;  %v3044_v49 = vpack.c.bf16 %v17472_v41, %v17472_v41  ;;  %v3047_v56 = vpack.c.bf16 %v17474_v45, %v17474_v45 }
 0x4d6   :  { %3101 = vst.msk [vmem:[#allocation2 + $0x70] sm:$0xf] %vm3074_vm15, %v3002_v15  ;;  %v2961_v15 = vsel %vm2720_vm8, %v17465_v9, 0.0 }
 0x4d7   :  { %3102 = vst.msk [vmem:[#allocation2 + $0x74] sm:$0x1] %vm3077_vm1, %v3003_v14  ;;  %v2930_v14 = vsel %vm2720_vm8, 0.0, %v12438_v30  ;;  %v3029_v30 = vpack.c.bf16 %v12628_v34, %v12628_v34  ;;  %v17468_v34 = vld [vmem:[#allocation75_spill] sm:$0xff] }
 0x4d8   :  { %3103 = vst.msk [vmem:[#allocation2 + $0x78] sm:$0xf] %vm3074_vm15, %v3004_v2  ;;  %v2962_v2 = vsel %vm2720_vm8, %v17466_v40, 0.0  ;;  %v2964_v57 = vsel %vm2720_vm8, %v17468_v34, 0.0 }
 0x4d9   :  { %3104 = vst.msk [vmem:[#allocation2 + $0x7c] sm:$0xf] %vm3074_vm15, %v3005_v53  ;;  %v3027_v53 = vpack.c.bf16 %v2961_v15, %v2961_v15  ;;  %v12902_v15 = vld [vmem:[#allocation2 + $0x48] sm:$0xff] }
 0x4da   :  { %3105 = vst.msk [vmem:[#allocation2 + $0x80] sm:$0x1] %vm3077_vm1, %v3006_v38  ;;  %v3028_v38 = vpack.c.bf16 %v2930_v14, %v2930_v14  ;;  %v12907_v14 = vld [vmem:[#allocation2 + $0x3c] sm:$0xff] }
 0x4db   :  { %3106 = vst.msk [vmem:[#allocation2 + $0x84] sm:$0xf] %vm3074_vm15, %v3007_v10  ;;  %v3030_v10 = vpack.c.bf16 %v2962_v2, %v2962_v2  ;;  %v17477_v2 = vld [vmem:[#allocation47_spill] sm:$0xff]  ;;  %v12938_v34 = vld [vmem:[#allocation2 + $0x60] sm:$0xff] }
 0x4dc   :  { %3107 = vst.msk [vmem:[#allocation2 + $0x88] sm:$0xf] %vm3074_vm15, %v3008_v29  ;;  %v3031_v29 = vpack.c.bf16 %v2931_v47, %v2931_v47  ;;  %5436 = vrot.lane.b32.xlu0 %v12902_v15, %s9176_s16  ;;  %v17478_v47 = vld [vmem:[#allocation72_spill] sm:$0xff] }
 0x4dd   :  { %3108 = vst.msk [vmem:[#allocation2 + $0x8c] sm:$0x1] %vm3077_vm1, %v3009_v20  ;;  %v3033_v20 = vpack.c.bf16 %v2963_v0, %v2963_v0  ;;  %v17479_v0 = vld [vmem:[#allocation77_spill] sm:$0xff] }
 0x4de   :  { %3109 = vst.msk [vmem:[#allocation2 + $0x90] sm:$0xf] %vm3074_vm15, %v3010_v31  ;;  %v3034_v31 = vpack.c.bf16 %v2932_v19, %v2932_v19  ;;  %v2972_v19 = vsel %vm2720_vm8, %v12526_v1, 0.0  ;;  %v17481_v1 = vld [vmem:[#allocation18_spill] sm:$0xff] }
 0x4df   :  { %3110 = vst.msk [vmem:[#allocation2 + $0x94] sm:$0xf] %vm3074_vm15, %v3011_v32  ;;  %v3036_v32 = vpack.c.bf16 %v2964_v57, %v2964_v57 }
 0x4e0   :  { %3111 = vst.msk [vmem:[#allocation2 + $0x98] sm:$0x1] %vm3077_vm1, %v3012_v18  ;;  %v3037_v18 = vpack.c.bf16 %v2933_v7, %v2933_v7  ;;  %v17480_v7 = vld [vmem:[#allocation8_spill] sm:$0xff] }
 0x4e1   :  { %3112 = vst.msk [vmem:[#allocation2 + $0x9c] sm:$0xf] %vm3074_vm15, %v3013_v35  ;;  %v3039_v35 = vpack.c.bf16 %v2965_v13, %v2965_v13  ;;  %v2942_v13 = vsel %vm2720_vm8, 0.0, %v17482_v6 }
 0x4e2   :  { %3113 = vst.msk [vmem:[#allocation2 + $0xa0] sm:$0xf] %vm3074_vm15, %v3014_v23  ;;  %v3040_v23 = vpack.c.bf16 %v2934_v62, %v2934_v62  ;;  %v17483_v62 = vld [vmem:[#allocation48_spill] sm:$0xff] }
 0x4e3   :  { %3114 = vst.msk [vmem:[#allocation2 + $0xa4] sm:$0x1] %vm3077_vm1, %v3015_v63  ;;  %v17471_v63 = vld [vmem:[#allocation39_spill] sm:$0xff]  ;;  %v12998_v45 = vld [vmem:[#allocation2 + $0x84] sm:$0xff] }
 0x4e4   :  { %3115 = vst.msk [vmem:[#allocation2 + $0xa8] sm:$0xf] %vm3074_vm15, %v3016_v25  ;;  %v2967_v16 = vsel %vm2720_vm8, %v17471_v63, 0.0  ;;  %v3042_v25 = vpack.c.bf16 %v2966_v42, %v2966_v42  ;;  %4514 = vrot.lane.b32.xlu0 %v12938_v34, %s9182_s14 }
 0x4e5   :  { %3116 = vst.msk [vmem:[#allocation2 + $0xac] sm:$0xf] %vm3074_vm15, %v3017_v21  ;;  %v12871_v21 = vld [vmem:[#allocation2 + $0x30] sm:$0xff]  ;;  %v3045_v55 = vpack.c.bf16 %v2967_v16, %v2967_v16  ;;  %v12972_v16 = vld [vmem:[#allocation2 + $0x78] sm:$0xff] }
 0x4e6   :  { %3117 = vst.msk [vmem:[#allocation2 + $0xb0] sm:$0x1] %vm3077_vm1, %v3018_v12  ;;  %4506 = vrot.lane.b32.xlu1 %v12871_v21, %s9182_s14  ;;  %v17473_v12 = vld [vmem:[#allocation78_spill] sm:$0xff] }
 0x4e7   :  { %3118 = vst.msk [vmem:[#allocation2 + $0xb4] sm:$0xf] %vm3074_vm15, %v3019_v48  ;;  %v2968_v5 = vsel %vm2720_vm8, %v17473_v12, 0.0  ;;  %v2937_v48 = vsel %vm2720_vm8, 0.0, %v12498_v60  ;;  %v12900_v60 = vld [vmem:[#allocation2 + $0x54] sm:$0xff] }
 0x4e8   :  { %3119 = vst.msk [vmem:[#allocation2 + $0xb8] sm:$0xf] %vm3074_vm15, %v3020_v28  ;;  %v3046_v28 = vpack.c.bf16 %v2936_v61, %v2936_v61  ;;  %v3049_v9 = vpack.c.bf16 %v2937_v48, %v2937_v48  ;;  %5438 = vrot.lane.b32.xlu2 %v12900_v60, %s9176_s16  ;;  %v17487_v61 = vld [vmem:[#allocation20_spill] sm:$0xff] }
 0x4e9   :  { %3120 = vst.msk [vmem:[#allocation2 + $0xbc] sm:$0x1] %vm3077_vm1, %v3021_v51  ;;  %v17475_v51 = vld [vmem:[#allocation84_spill] sm:$0xff] }
 0x4ea   :  { %3121 = vst.msk [vmem:[#allocation2 + $0xc0] sm:$0xf] %vm3074_vm15, %v3022_v4  ;;  %v2969_v33 = vsel %vm2720_vm8, %v17475_v51, 0.0  ;;  %v3048_v4 = vpack.c.bf16 %v2968_v5, %v2968_v5  ;;  %v17488_v5 = vld [vmem:[#allocation56_spill] sm:$0xff]  ;;  %v3190_v51 = vld [vmem:[#allocation2 + $0x14] sm:$0x1] }
 0x4eb   :  { %3122 = vst.msk [vmem:[#allocation2 + $0xc4] sm:$0xf] %vm3074_vm15, %v3023_v52  ;;  %v2938_v52 = vsel %vm2720_vm8, 0.0, %v12506_v27  ;;  %v3051_v40 = vpack.c.bf16 %v2969_v33, %v2969_v33  ;;  %v2939_v27 = vsel %vm2720_vm8, 0.0, %v12514_v8  ;;  %v2940_v8 = vsel %vm2720_vm8, 0.0, %v17451_v24 }
 0x4ec   :  { %3123 = vst.msk [vmem:[#allocation2 + $0xc8] sm:$0x1] %vm3077_vm1, %v3024_v54  ;;  %v3050_v54 = vpack.c.bf16 %v12663_v39, %v12663_v39  ;;  %v3052_v39 = vpack.c.bf16 %v2938_v52, %v2938_v52  ;;  %v3055_v46 = vpack.c.bf16 %v2939_v27, %v2939_v27  ;;  %v2941_v24 = vsel %vm2720_vm8, 0.0, %v17453_v22  ;;  %v13010_v52 = vld [vmem:[#allocation2 + $0x90] sm:$0xff] }
 0x4ed   :  { %3124 = vst.msk [vmem:[#allocation2 + $0xe4] sm:$0xf] %vm3074_vm15, %v3025_v26  ;;  %v17476_v26 = vld [vmem:[#allocation66_spill] sm:$0xff]  ;;  %v3058_v57 = vpack.c.bf16 %v2940_v8, %v2940_v8  ;;  %v3060_v22 = vpack.c.bf16 %v2972_v19, %v2972_v19  ;;  %v3667_v33 = vunpack.c.l.b16 %v3190_v51  ;;  %v3383_v8 = vld [vmem:[#allocation2 + $0x2c] sm:$0x1] }
 0x4ee   :  { %3125 = vst.msk [vmem:[#allocation2 + $0xe8] sm:$0xf] %vm3074_vm15, %v3026_v36  ;;  %v2970_v36 = vsel %vm2720_vm8, %v17476_v26, 0.0  ;;  %5434 = vrot.lane.b32.xlu1 %v12907_v14, %s9176_s16  ;;  %v3286_v26 = vld [vmem:[#allocation2 + $0x20] sm:$0x1]  ;;  %v5525_v19 = vunpack.c.l.b16 %v3383_v8 }
 0x4ef   :  { %3126 = vst.msk [vmem:[#allocation2 + $0xec] sm:$0x1] %vm3077_vm1, %v3027_v53  ;;  %v3053_v53 = vpack.c.bf16 %v17477_v2, %v17477_v2  ;;  %v4597_v27 = vunpack.c.l.b16 %v3286_v26  ;;  %v13026_v2 = vld [vmem:[#allocation2 + $0xa8] sm:$0xff] }
 0x4f0   :  { %3127 = vst.msk [vmem:[#allocation2 + $0xf0] sm:$0xf] %vm3074_vm15, %v3028_v38  ;;  %v2971_v38 = vsel %vm2720_vm8, %v17478_v47, 0.0 }
 0x4f1   :  { %3128 = vst.msk [vmem:[#allocation2 + $0xf4] sm:$0xf] %vm3074_vm15, %v3029_v30  ;;  %v3054_v30 = vpack.c.bf16 %v2970_v36, %v2970_v36  ;;  %v13022_v36 = vld [vmem:[#allocation2 + $0xc] sm:$0xff] }
 0x4f2   :  { %3129 = vst.msk [vmem:[#allocation2 + $0xf8] sm:$0x1] %vm3077_vm1, %v3030_v10  ;;  %v3056_v10 = vpack.c.bf16 %v17479_v0, %v17479_v0 }
 0x4f3   :  { %3130 = vst.msk [vmem:[#allocation2 + $0xfc] sm:$0xf] %vm3074_vm15, %v3031_v29  ;;  %v3057_v29 = vpack.c.bf16 %v2971_v38, %v2971_v38  ;;  %v13031_v38 = vpack.c.b16 %v4597_v27, %v4597_v27  ;;  %v3295_v27 = vld [vmem:[#allocation2 + $0x44] sm:$0x1] }
 0x4f4   :  { %3131 = vst.msk [vmem:[#allocation2 + $0x100] sm:$0xf] %vm3074_vm15, %v3032_v44  ;;  %v12936_v44 = vld [vmem:[#allocation2 + $0x6c] sm:$0xff] }
 0x4f5   :  { %3132 = vst.msk [vmem:[#allocation2 + $0x104] sm:$0x1] %vm3077_vm1, %v3033_v20  ;;  %v12943_v20 = vld [vmem:[#allocation2 + $0x54] sm:$0xff]  ;;  %4516 = vrot.lane.b32.xlu2 %v12936_v44, %s9182_s14  ;;  %v5112_v0 = vrot.slane %v13031_v38, 1 }
 0x4f6   :  { %3133 = vst.msk [vmem:[#allocation2 + $0x108] sm:$0xf] %vm3074_vm15, %v3034_v31  ;;  %v3059_v31 = vpack.c.bf16 %v17480_v7, %v17480_v7  ;;  %4512 = vrot.lane.b32.xlu1 %v12943_v20, %s9182_s14  ;;  %v13040_v7 = vld [vmem:[#allocation2 + $0xb4] sm:$0xff] }
 0x4f7   :  { %3134 = vst.msk [vmem:[#allocation2 + $0x10c] sm:$0xf] %vm3074_vm15, %v3035_v11  ;;  %v2973_v11 = vsel %vm2720_vm8, %v17481_v1, 0.0 }
 0x4f8   :  { %3135 = vst.msk [vmem:[#allocation2 + $0x110] sm:$0x1] %vm3077_vm1, %v3036_v32  ;;  %v3061_v32 = vpack.c.bf16 %v2941_v24, %v2941_v24  ;;  %v3063_v42 = vpack.c.bf16 %v2973_v11, %v2973_v11  ;;  %v17489_v24 = vld [vmem:[#allocation52_spill] sm:$0xff] }
 0x4f9   :  { %3136 = vst.msk [vmem:[#allocation2 + $0x114] sm:$0xf] %vm3074_vm15, %v3037_v18  ;;  %v3062_v18 = vpack.c.bf16 %v17483_v62, %v17483_v62  ;;  %v3289_v62 = vld [vmem:[#allocation2 + $0x2c] sm:$0x1] }
 0x4fa   :  { %3137 = vst.msk [vmem:[#allocation2 + $0x118] sm:$0xf] %vm3074_vm15, %v3038_v58  ;;  %v17484_v58 = vld [vmem:[#allocation19_spill] sm:$0xff] }
 0x4fb   :  { %3138 = vst.msk [vmem:[#allocation2 + $0x11c] sm:$0x1] %vm3077_vm1, %v3039_v35  ;;  %v2974_v43 = vsel %vm2720_vm8, %v17484_v58, 0.0  ;;  %v17485_v35 = vld [vmem:[#allocation31_spill] sm:$0xff] }
 0x4fc   :  { %3139 = vst.msk [vmem:[#allocation2 + $0x120] sm:$0xf] %vm3074_vm15, %v3040_v23  ;;  %v2943_v50 = vsel %vm2720_vm8, 0.0, %v17485_v35  ;;  %v3064_v23 = vpack.c.bf16 %v2942_v13, %v2942_v13  ;;  %v3066_v41 = vpack.c.bf16 %v2974_v43, %v2974_v43  ;;  %v3380_v13 = vld [vmem:[#allocation2 + $0x20] sm:$0x1] }
 0x4fd   :  { %3140 = vst.msk [vmem:[#allocation2 + $0x124] sm:$0xf] %vm3074_vm15, %v3041_v37  ;;  %v17486_v37 = vld [vmem:[#allocation9_spill] sm:$0xff]  ;;  %v3067_v12 = vpack.c.bf16 %v2943_v50, %v2943_v50  ;;  %5444 = vrot.lane.b32.xlu2 %v12972_v16, %s9176_s16 }
 0x4fe   :  { %3141 = vst.msk [vmem:[#allocation2 + $0x128] sm:$0x1] %vm3077_vm1, %v3042_v25  ;;  %v3065_v63 = vpack.c.bf16 %v17486_v37, %v17486_v37  ;;  %v12974_v25 = vld [vmem:[#allocation2 + $0x6c] sm:$0xff]  ;;  %v4598_v37 = vunpack.c.l.b16 %v3289_v62 }
 0x4ff   :  { %3142 = vst.msk [vmem:[#allocation2 + $0x12c] sm:$0xf] %vm3074_vm15, %v3043_v3  ;;  %v2975_v3 = vsel %vm2720_vm8, %v17487_v61, 0.0  ;;  %5442 = vrot.lane.b32.xlu0 %v12974_v25, %s9176_s16 }
 0x500   :  { %3143 = vst.msk [vmem:[#allocation2 + $0x130] sm:$0xf] %vm3074_vm15, %v3044_v49  ;;  %v12979_v49 = vld [vmem:[#allocation2 + $0x60] sm:$0xff]  ;;  %v3069_v48 = vpack.c.bf16 %v2975_v3, %v2975_v3  ;;  %v17491_v3 = vld [vmem:[#allocation79_spill] sm:$0xff]  ;;  %v13075_v26 = vpack.c.b16 %v4598_v37, %v4598_v37 }
 0x501   :  { %3144 = vst.msk [vmem:[#allocation2 + $0x134] sm:$0x1] %vm3077_vm1, %v3045_v55  ;;  %v3068_v55 = vpack.c.bf16 %v17488_v5, %v17488_v5  ;;  %5440 = vrot.lane.b32.xlu1 %v12979_v49, %s9176_s16  ;;  %v3292_v37 = vld [vmem:[#allocation2 + $0x38] sm:$0x1] }
 0x502   :  { %3145 = vst.msk [vmem:[#allocation2 + $0x138] sm:$0xf] %vm3074_vm15, %v3046_v28  ;;  %v12996_v28 = vld [vmem:[#allocation2 + $0x90] sm:$0xff] }
 0x503   :  { %3146 = vst.msk [vmem:[#allocation2 + $0x13c] sm:$0xf] %vm3074_vm15, %v3047_v56  ;;  %v13000_v56 = vld [vmem:[#allocation2 + $0x78] sm:$0xff] }
 0x504   :  { %3147 = vst.msk [vmem:[#allocation2 + $0x140] sm:$0x1] %vm3077_vm1, %v3048_v4  ;;  %v13008_v4 = vld [vmem:[#allocation2 + $0x9c] sm:$0xff] }
 0x505   :  { %3148 = vst.msk [vmem:[#allocation2 + $0x144] sm:$0xf] %vm3074_vm15, %v3049_v9  ;;  %4522 = vrot.lane.b32.xlu2 %v12996_v28, %s9182_s14  ;;  %v13012_v9 = vld [vmem:[#allocation2 + $0x84] sm:$0xff] }
 0x506   :  { %3149 = vst.msk [vmem:[#allocation2 + $0x148] sm:$0xf] %vm3074_vm15, %v3050_v54  ;;  %v13014_v54 = vpack.c.b16 %v3667_v33, %v3667_v33 }
 0x507   :  { %3150 = vst.msk [vmem:[#allocation2 + $0x14c] sm:$0x1] %vm3077_vm1, %v3051_v40  ;;  %4520 = vrot.lane.b32.xlu0 %v12998_v45, %s9182_s14 }
 0x508   :  { %3151 = vst.msk [vmem:[#allocation2 + $0x150] sm:$0xf] %vm3074_vm15, %v3052_v39  ;;  %v4184_v40 = vrot.slane %v13014_v54, 1  ;;  %v4183_v39 = vrot.slane %v13022_v36, 1 }
 0x509   :  { %3152 = vst.msk [vmem:[#allocation2 + $0x154] sm:$0xf] %vm3074_vm15, %v3053_v53  ;;  %4518 = vrot.lane.b32.xlu1 %v13000_v56, %s9182_s14  ;;  %v13028_v53 = vld [vmem:[#allocation2 + $0x9c] sm:$0xff] }
 0x50a   :  { %3153 = vst.msk [vmem:[#allocation2 + $0x158] sm:$0x1] %vm3077_vm1, %v3054_v30  ;;  %v4185_v47 = vsel %vm4179_vm10, %v4183_v39, %v4184_v40  ;;  %v3283_v30 = vld [vmem:[#allocation2 + $0x14] sm:$0x1]  ;;  %v3196_v40 = vld [vmem:[#allocation2 + $0x2c] sm:$0x1] }
 0x50b   :  { %3154 = vst.msk [vmem:[#allocation2 + $0x15c] sm:$0xf] %vm3074_vm15, %v3055_v46  ;;  %v3193_v46 = vld [vmem:[#allocation2 + $0x20] sm:$0x1]  ;;  %v13078_v39 = vld [vmem:[#allocation2 + $0x30] sm:$0xff] }
 0x50c   :  { %3155 = vst.msk [vmem:[#allocation2 + $0x160] sm:$0xf] %vm3074_vm15, %v3056_v10  ;;  %v4596_v10 = vunpack.c.l.b16 %v3283_v30 }
 0x50d   :  { %3156 = vst.msk [vmem:[#allocation2 + $0x164] sm:$0x1] %vm3077_vm1, %v3057_v29  ;;  %5450 = vrot.lane.b32.xlu2 %v13008_v4, %s9176_s16  ;;  %v3668_v29 = vunpack.c.l.b16 %v3193_v46  ;;  %v3669_v46 = vunpack.c.l.b16 %v3196_v40 }
 0x50e   :  { %3157 = vst.msk [vmem:[#allocation2 + $0x168] sm:$0xf] %vm3074_vm15, %v3058_v57  ;;  %v5111_v57 = vrot.slane %v17489_v24, 1  ;;  %v13045_v11 = vpack.c.b16 %v4596_v10, %v4596_v10  ;;  %v5115_v10 = vrot.slane %v13075_v26, 1 }
 0x50f   :  { %3158 = vst.msk [vmem:[#allocation2 + $0x16c] sm:$0xf] %vm3074_vm15, %v3059_v31  ;;  %5448 = vrot.lane.b32.xlu0 %v13010_v52, %s9176_s16  ;;  %v13042_v31 = vld [vmem:[#allocation2 + $0xa8] sm:$0xff]  ;;  %v13052_v6 = vpack.c.b16 %v3668_v29, %v3668_v29  ;;  %v17492_v29 = vld [vmem:[#allocation68_spill] sm:$0xff] }
 0x510   :  { %3159 = vst.msk [vmem:[#allocation2 + $0x170] sm:$0x1] %vm3077_vm1, %v3060_v22  ;;  %v5113_v1 = vsel %vm4179_vm10, %v5111_v57, %v5112_v0  ;;  %v13047_v22 = vpack.c.b16 %v5525_v19, %v5525_v19  ;;  %v5109_v58 = vrot.slane %v13045_v11, 1  ;;  %v4600_v0 = vunpack.c.l.b16 %v3295_v27 }
 0x511   :  { %3160 = vst.msk [vmem:[#allocation2 + $0x174] sm:$0xf] %vm3074_vm15, %v3061_v32  ;;  %5446 = vrot.lane.b32.xlu1 %v13012_v9, %s9176_s16  ;;  %v3199_v32 = vld [vmem:[#allocation2 + $0x38] sm:$0x1]  ;;  %v4187_v50 = vrot.slane %v13052_v6, 1  ;;  %v6036_v24 = vrot.slane %v17492_v29, 1 }
 0x512   :  { %3161 = vst.msk [vmem:[#allocation2 + $0x178] sm:$0xf] %vm3074_vm15, %v3062_v18  ;;  %v13056_v18 = vld [vmem:[#allocation2 + $0x18] sm:$0xff]  ;;  %v6040_v43 = vrot.slane %v13047_v22, 1  ;;  %v3670_v35 = vunpack.c.l.b16 %v3199_v32  ;;  %v4192_v57 = vrot.slane %v13078_v39, 1 }
 0x513   :  { %3162 = vst.msk [vmem:[#allocation2 + $0x17c] sm:$0x1] %vm3077_vm1, %v3063_v42  ;;  %v5524_v42 = vunpack.c.l.b16 %v3380_v13 }
 0x514   :  { %3163 = vst.msk [vmem:[#allocation2 + $0x180] sm:$0xf] %vm3074_vm15, %v3064_v23  ;;  %v13061_v23 = vpop.permute.xlu2 %4115  ;;  %v13070_v51 = vpack.c.b16 %v3670_v35, %v3670_v35 }
 0x515   :  { %3164 = vst.msk [vmem:[#allocation2 + $0x184] sm:$0xf] %vm3074_vm15, %v3065_v63  ;;  %4278 = vrot.lane.b32.xlu2 %v4185_v47, %s9175_s15  ;;  %v17490_v63 = vld [vmem:[#allocation40_spill] sm:$0xff]  ;;  %v3386_v47 = vld [vmem:[#allocation2 + $0x38] sm:$0x1] }
 0x516   :  { %3165 = vst.msk [vmem:[#allocation2 + $0x188] sm:$0x1] %vm3077_vm1, %v3066_v41  ;;  %v5108_v61 = vrot.slane %v17490_v63, 1  ;;  %v6039_v41 = vrot.slane %v17491_v3, 1  ;;  %v4193_v8 = vrot.slane %v13070_v51, 1  ;;  %v5526_v19 = vunpack.c.l.b16 %v3386_v47 }
 0x517   :  { %3166 = vst.msk [vmem:[#allocation2 + $0x18c] sm:$0xf] %vm3074_vm15, %v3067_v12  ;;  %4526 = vrot.lane.b32.xlu0 %v13026_v2, %s9182_s14  ;;  %v4186_v12 = vrot.slane %v13056_v18, 1  ;;  %v3392_v63 = vld [vmem:[#allocation2 + $0x50] sm:$0x1]  ;;  %v5120_v47 = vrot.slane %v12866_v59, 1 }
 0x518   :  { %3167 = vst.msk [vmem:[#allocation2 + $0x190] sm:$0xf] %vm3074_vm15, %v3068_v55  ;;  %v5110_v5 = vsel %vm4179_vm10, %v5108_v61, %v5109_v58  ;;  %v6041_v55 = vsel %vm4179_vm10, %v6039_v41, %v6040_v43  ;;  %v4194_v58 = vsel %vm4179_vm10, %v4192_v57, %v4193_v8  ;;  %v13090_v43 = vpack.c.b16 %v3669_v46, %v3669_v46  ;;  %v13100_v61 = vld [vmem:[#allocation2 + $0x24] sm:$0xff] }
 0x519   :  { %3168 = vst.msk [vmem:[#allocation2 + $0x194] sm:$0x1] %vm3077_vm1, %v3069_v48  ;;  %4524 = vrot.lane.b32.xlu1 %v13028_v53, %s9182_s14  ;;  %v13068_v48 = vpack.c.b16 %v5524_v42, %v5524_v42  ;;  %v4188_v33 = vsel %vm4179_vm10, %v4186_v12, %v4187_v50  ;;  %v13092_v42 = vpack.c.b16 %v4600_v0, %v4600_v0  ;;  %v3202_v3 = vld [vmem:[#allocation2 + $0x44] sm:$0x1]  ;;  %v4189_v27 = vrot.slane %v13100_v61, 1 }
 0x51a   :  { %v13097_v50 = vpack.c.b16 %v5526_v19, %v5526_v19  ;;  %v4190_v41 = vrot.slane %v13090_v43, 1  ;;  %v3671_v40 = vunpack.c.l.b16 %v3202_v3  ;;  %v3389_v59 = vld [vmem:[#allocation2 + $0x44] sm:$0x1]  ;;  %vm6582_vm15 = vcmask 457728  }
 0x51b   :  { %v6037_v30 = vrot.slane %v13068_v48, 1  ;;  %v5121_v12 = vrot.slane %v13092_v42, 1  ;;  %vm6747_vm1 = vcmask 588800  }
 0x51c   :  { %v13086_v32 = vpop.permute.xlu2 %4504  ;;  %v4191_v46 = vsel %vm4179_vm10, %v4189_v27, %v4190_v41  ;;  %v13119_v57 = vpack.c.b16 %v3671_v40, %v3671_v40  ;;  %v13127_v41 = vpop.permute.xlu0 %4276 }
 0x51d   :  { %5206 = vrot.lane.b32.xlu2 %v5113_v1, %s9183_s17  ;;  %v17493_v1 = vld [vmem:[#allocation64_spill] sm:$0xff]  ;;  %17494 = vst [vmem:[#allocation69_spill] sm:$0xff] %v13086_v32  ;;  %v6038_v62 = vsel %vm4179_vm10, %v6036_v24, %v6037_v30  ;;  %v17495_v30 = vld [vmem:[#allocation34_spill] sm:$0xff]  ;;  %v5122_v0 = vsel %vm4179_vm10, %v5120_v47, %v5121_v12  ;;  %v6057_v32 = vrot.slane %v12974_v25, 1  ;;  %v8793_v25 = vld [vmem:[#allocation2 + $0x78] sm:$0xff] }
 0x51e   :  { %v5114_v13 = vrot.slane %v17493_v1, 1  ;;  %v6042_v8 = vrot.slane %v17495_v30, 1  ;;  %v3208_v1 = vld [vmem:[#allocation2 + $0x5c] sm:$0x1]  ;;  %v4196_v3 = vrot.slane %v13119_v57, 1 }
 0x51f   :  { %5454 = vrot.lane.b32.xlu0 %v13040_v7, %s9176_s16 }
 0x520   :  { %v5116_v35 = vsel %vm4179_vm10, %v5114_v13, %v5115_v10  ;;  %v3298_v13 = vld [vmem:[#allocation2 + $0x50] sm:$0x1] }
 0x521   :  { %5452 = vrot.lane.b32.xlu1 %v13042_v31, %s9176_s16  ;;  %v4601_v12 = vunpack.c.l.b16 %v3298_v13 }
 0x524   :  { %v13117_v24 = vpop.permute.xlu2 %5432 }
 0x525   :  { %6134 = vrot.lane.b32.xlu2 %v6041_v55, %s9172_s30  ;;  %v5528_v55 = vunpack.c.l.b16 %v3392_v63  ;;  %17496 = vst [vmem:[#allocation17_spill] sm:$0xff] %v13117_v24  ;;  %v3673_v63 = vunpack.c.l.b16 %v3208_v1 }
 0x527   :  { %5204 = vrot.lane.b32.xlu0 %v5110_v5, %s9183_s17  ;;  %v4599_v5 = vunpack.c.l.b16 %v3292_v37  ;;  %v13112_v19 = vpack.c.b16 %v5528_v55, %v5528_v55  ;;  %v5527_v37 = vunpack.c.l.b16 %v3389_v59  ;;  %v6048_v55 = vrot.slane %v12902_v15, 1  ;;  %v3304_v15 = vld [vmem:[#allocation2 + $0x68] sm:$0x1] }
 0x528   :  { %v13136_v30 = vpack.c.b16 %v3673_v63, %v3673_v63 }
 0x529   :  { %4280 = vrot.lane.b32.xlu1 %v4188_v33, %s9175_s15  ;;  %v6043_v33 = vrot.slane %v13097_v50, 1  ;;  %v13110_v10 = vpack.c.b16 %v4599_v5, %v4599_v5  ;;  %v5117_v5 = vrot.slane %v12871_v21, 1  ;;  %v13134_v47 = vpack.c.b16 %v5527_v37, %v5527_v37  ;;  %v3205_v21 = vld [vmem:[#allocation2 + $0x50] sm:$0x1] }
 0x52a   :  { %v4202_v13 = vrot.slane %v13136_v30, 1 }
 0x52b   :  { %v6044_v29 = vsel %vm4179_vm10, %v6042_v8, %v6043_v33  ;;  %v6046_v1 = vrot.slane %v13134_v47, 1 }
 0x52d   :  { %4284 = vrot.lane.b32.xlu2 %v4194_v58, %s9175_s15  ;;  %v5118_v58 = vrot.slane %v13110_v10, 1 }
 0x52f   :  { %6132 = vrot.lane.b32.xlu0 %v6038_v62, %s9172_s30  ;;  %v13122_v62 = vld [vmem:[#allocation2 + $0x3c] sm:$0xff]  ;;  %v5119_v40 = vsel %vm4179_vm10, %v5117_v5, %v5118_v58  ;;  %v13144_v59 = vpop.permute.xlu2 %4510  ;;  %v3672_v58 = vunpack.c.l.b16 %v3205_v21  ;;  %v5123_v5 = vrot.slane %v12864_v17, 1 }
 0x530   :  { %v4195_v33 = vrot.slane %v13122_v62, 1  ;;  %17497 = vst [vmem:[#allocation43_spill] sm:$0xff] %v13144_v59  ;;  %v3301_v17 = vld [vmem:[#allocation2 + $0x5c] sm:$0x1] }
 0x531   :  { %5208 = vrot.lane.b32.xlu1 %v5116_v35, %s9183_s17  ;;  %v6049_v35 = vrot.slane %v13112_v19, 1 }
 0x532   :  { %v4197_v8 = vsel %vm4179_vm10, %v4195_v33, %v4196_v3  ;;  %v6045_v3 = vrot.slane %v12907_v14, 1 }
 0x533   :  { %v6050_v27 = vsel %vm4179_vm10, %v6048_v55, %v6049_v35  ;;  %v4603_v35 = vunpack.c.l.b16 %v3304_v15  ;;  %v13151_v55 = vpop.permute.xlu0 %4502 }
 0x534   :  { %17498 = vst [vmem:[#allocation81_spill] sm:$0xff] %v13151_v55  ;;  %v6047_v33 = vsel %vm4179_vm10, %v6045_v3, %v6046_v1  ;;  %v3211_v1 = vld [vmem:[#allocation2 + $0x68] sm:$0x1] }
 0x535   :  { %5212 = vrot.lane.b32.xlu2 %v5122_v0, %s9183_s17  ;;  %v8790_v0 = vld [vmem:[#allocation2 + $0x54] sm:$0xff]  ;;  %v13159_v21 = vpack.c.b16 %v4603_v35, %v4603_v35 }
 0x537   :  { %4282 = vrot.lane.b32.xlu0 %v4191_v46, %s9175_s15  ;;  %v13141_v46 = vpack.c.b16 %v4601_v12, %v4601_v12  ;;  %v4201_v12 = vrot.slane %v8790_v0, 1  ;;  %17499 = vst [vmem:[#allocation49_spill] sm:$0xff] %v13159_v21  ;;  %v3401_v0 = vld [vmem:[#allocation2 + $0x74] sm:$0x1]  ;;  %v5130_v35 = vrot.slane %v13159_v21, 1 }
 0x538   :  { %v5531_v3 = vunpack.c.l.b16 %v3401_v0 }
 0x539   :  { %6136 = vrot.lane.b32.xlu1 %v6044_v29, %s9172_s30  ;;  %v3395_v29 = vld [vmem:[#allocation2 + $0x5c] sm:$0x1]  ;;  %v5124_v37 = vrot.slane %v13141_v46, 1 }
 0x53a   :  { %v5529_v63 = vunpack.c.l.b16 %v3395_v29  ;;  %v13167_v29 = vld [vmem:[#allocation2 + $0x48] sm:$0xff]  ;;  %v13181_v24 = vpack.c.b16 %v5531_v3, %v5531_v3  ;;  %v8791_v3 = vld [vmem:[#allocation2 + $0x60] sm:$0xff] }
 0x53b   :  { %v5125_v15 = vsel %vm4179_vm10, %v5123_v5, %v5124_v37  ;;  %v4602_v37 = vunpack.c.l.b16 %v3301_v17  ;;  %v3674_v5 = vunpack.c.l.b16 %v3211_v1  ;;  %v13186_v0 = vpop.permute.xlu0 %5430 }
 0x53c   :  { %v13164_v14 = vpack.c.b16 %v5529_v63, %v5529_v63  ;;  %v4198_v63 = vrot.slane %v13167_v29, 1  ;;  %17501 = vst [vmem:[#allocation67_spill] sm:$0xff] %v13181_v24 }
 0x53d   :  { %6140 = vrot.lane.b32.xlu2 %v6050_v27, %s9172_s30  ;;  %v13155_v27 = vpop.permute.xlu1 %4500  ;;  %17502 = vst [vmem:[#allocation86_spill] sm:$0xff] %v13186_v0  ;;  %v13188_v1 = vpack.c.b16 %v3674_v5, %v3674_v5 }
 0x53f   :  { %5210 = vrot.lane.b32.xlu0 %v5119_v40, %s9183_s17  ;;  %v4203_v40 = vsel %vm4179_vm10, %v4201_v12, %v4202_v13  ;;  %v6052_v12 = vrot.slane %v13164_v14, 1 }
 0x541   :  { %4286 = vrot.lane.b32.xlu1 %v4197_v8, %s9175_s15  ;;  %v13157_v8 = vpack.c.b16 %v3672_v58, %v3672_v58 }
 0x542   :  { %v13169_v13 = vpop.permute.xlu2 %5438 }
 0x543   :  { %17500 = vst [vmem:[#allocation85_spill] sm:$0xff] %v13169_v13  ;;  %v4199_v58 = vrot.slane %v13157_v8, 1  ;;  %v13179_v13 = vpack.c.b16 %v4602_v37, %v4602_v37 }
 0x545   :  { %4290 = vrot.lane.b32.xlu2 %v4203_v40, %s9175_s15  ;;  %v6051_v40 = vrot.slane %v12900_v60, 1  ;;  %v3217_v60 = vld [vmem:[#allocation2 + $0x80] sm:$0x1] }
 0x547   :  { %6138 = vrot.lane.b32.xlu0 %v6047_v33, %s9172_s30  ;;  %v5129_v33 = vrot.slane %v12938_v34, 1  ;;  %v6053_v17 = vsel %vm4179_vm10, %v6051_v40, %v6052_v12  ;;  %v3398_v34 = vld [vmem:[#allocation2 + $0x68] sm:$0x1]  ;;  %v5127_v12 = vrot.slane %v13179_v13, 1  ;;  %v4205_v40 = vrot.slane %v13188_v1, 1 }
 0x549   :  { %5214 = vrot.lane.b32.xlu1 %v5125_v15, %s9183_s17  ;;  %v4200_v15 = vsel %vm4179_vm10, %v4198_v63, %v4199_v58  ;;  %v5131_v59 = vsel %vm4179_vm10, %v5129_v33, %v5130_v35  ;;  %v13191_v58 = vpop.permute.xlu1 %5428  ;;  %v3307_v35 = vld [vmem:[#allocation2 + $0x74] sm:$0x1]  ;;  %v6058_v63 = vrot.slane %v13181_v24, 1  ;;  %v5530_v33 = vunpack.c.l.b16 %v3398_v34 }
 0x54a   :  { %v4604_v5 = vunpack.c.l.b16 %v3307_v35  ;;  %v3404_v35 = vld [vmem:[#allocation2 + $0x80] sm:$0x1] }
 0x54b   :  { %v6059_v55 = vsel %vm4179_vm10, %v6057_v32, %v6058_v63  ;;  %v13214_v32 = vpop.permute.xlu0 %4508 }
 0x54c   :  { %v13209_v34 = vpack.c.b16 %v4604_v5, %v4604_v5  ;;  %17506 = vst [vmem:[#allocation89_spill] sm:$0xff] %v13214_v32  ;;  %v6054_v5 = vrot.slane %v12979_v49, 1  ;;  %v3310_v49 = vld [vmem:[#allocation2 + $0x80] sm:$0x1] }
 0x54d   :  { %5218 = vrot.lane.b32.xlu2 %v5131_v59, %s9183_s17  ;;  %v3676_v59 = vunpack.c.l.b16 %v3217_v60  ;;  %v3313_v60 = vld [vmem:[#allocation2 + $0x8c] sm:$0x1] }
 0x54f   :  { %4288 = vrot.lane.b32.xlu0 %v4200_v15, %s9175_s15  ;;  %v13193_v37 = vpop.permute.xlu2 %4516  ;;  %v5126_v15 = vrot.slane %v12943_v20, 1  ;;  %v13204_v21 = vpack.c.b16 %v3676_v59, %v3676_v59  ;;  %v3214_v20 = vld [vmem:[#allocation2 + $0x74] sm:$0x1]  ;;  %v5133_v59 = vrot.slane %v13209_v34, 1 }
 0x550   :  { %17503 = vst [vmem:[#allocation87_spill] sm:$0xff] %v13193_v37  ;;  %v13202_v37 = vpack.c.b16 %v5530_v33, %v5530_v33  ;;  %v3675_v33 = vunpack.c.l.b16 %v3214_v20 }
 0x551   :  { %6142 = vrot.lane.b32.xlu1 %v6053_v17, %s9172_s30  ;;  %v4204_v17 = vrot.slane %v8791_v3, 1  ;;  %v5128_v0 = vsel %vm4179_vm10, %v5126_v15, %v5127_v12  ;;  %17504 = vst [vmem:[#allocation74_spill] sm:$0xff] %v13204_v21  ;;  %v5132_v15 = vrot.slane %v12936_v44, 1  ;;  %v8792_v44 = vld [vmem:[#allocation2 + $0x6c] sm:$0xff] }
 0x552   :  { %v6055_v63 = vrot.slane %v13202_v37, 1  ;;  %v13225_v32 = vpack.c.b16 %v3675_v33, %v3675_v33 }
 0x553   :  { %v4206_v24 = vsel %vm4179_vm10, %v4204_v17, %v4205_v40  ;;  %v5532_v40 = vunpack.c.l.b16 %v3404_v35 }
 0x554   :  { %v6056_v17 = vsel %vm4179_vm10, %v6054_v5, %v6055_v63  ;;  %v13237_v63 = vpop.permute.xlu0 %5436  ;;  %v4208_v33 = vrot.slane %v13225_v32, 1 }
 0x555   :  { %6146 = vrot.lane.b32.xlu2 %v6059_v55, %s9172_s30  ;;  %v4606_v55 = vunpack.c.l.b16 %v3313_v60  ;;  %v13232_v20 = vpack.c.b16 %v5532_v40, %v5532_v40  ;;  %v3410_v60 = vld [vmem:[#allocation2 + $0x98] sm:$0x1]  ;;  %17510 = vst [vmem:[#allocation73_spill] sm:$0xff] %v13237_v63 }
 0x557   :  { %5216 = vrot.lane.b32.xlu0 %v5128_v0, %s9183_s17  ;;  %v13212_v3 = vpop.permute.xlu2 %5444  ;;  %v4211_v0 = vrot.slane %v13204_v21, 1  ;;  %v5134_v21 = vsel %vm4179_vm10, %v5132_v15, %v5133_v59  ;;  %v4605_v59 = vunpack.c.l.b16 %v3310_v49  ;;  %v6061_v40 = vrot.slane %v13232_v20, 1 }
 0x558   :  { %17505 = vst [vmem:[#allocation42_spill] sm:$0xff] %v13212_v3  ;;  %v13216_v12 = vpop.permute.xlu1 %4506  ;;  %v6060_v15 = vrot.slane %v12972_v16, 1  ;;  %v3316_v16 = vld [vmem:[#allocation2 + $0x98] sm:$0x1] }
 0x559   :  { %4292 = vrot.lane.b32.xlu1 %v4206_v24, %s9175_s15  ;;  %17507 = vst [vmem:[#allocation23_spill] sm:$0xff] %v13216_v12  ;;  %v4210_v24 = vrot.slane %v8793_v25, 1  ;;  %v13227_v12 = vpack.c.b16 %v4606_v55, %v4606_v55  ;;  %v3220_v25 = vld [vmem:[#allocation2 + $0x8c] sm:$0x1]  ;;  %v13248_v63 = vpack.c.b16 %v4605_v59, %v4605_v59 }
 0x55a   :  { %v3677_v5 = vunpack.c.l.b16 %v3220_v25 }
 0x55b   :  { %v4212_v3 = vsel %vm4179_vm10, %v4210_v24, %v4211_v0  ;;  %17508 = vst [vmem:[#allocation54_spill] sm:$0xff] %v13227_v12  ;;  %v5139_v55 = vrot.slane %v13227_v12, 1  ;;  %v4207_v24 = vrot.slane %v8792_v44, 1  ;;  %v6062_v12 = vsel %vm4179_vm10, %v6060_v15, %v6061_v40 }
 0x55c   :  { %v13255_v49 = vpack.c.b16 %v3677_v5, %v3677_v5  ;;  %v13260_v25 = vpop.permute.xlu0 %4514  ;;  %v5136_v59 = vrot.slane %v13248_v63, 1 }
 0x55d   :  { %4296 = vrot.lane.b32.xlu2 %v4212_v3, %s9175_s15  ;;  %v5534_v3 = vunpack.c.l.b16 %v3410_v60  ;;  %v3407_v60 = vld [vmem:[#allocation2 + $0x8c] sm:$0x1]  ;;  %17515 = vst [vmem:[#allocation6_spill] sm:$0xff] %v13260_v25 }
 0x55e   :  { %17513 = vst [vmem:[#allocation32_spill] sm:$0xff] %v13255_v49  ;;  %v5533_v40 = vunpack.c.l.b16 %v3407_v60  ;;  %v4214_v5 = vrot.slane %v13255_v49, 1 }
 0x55f   :  { %6144 = vrot.lane.b32.xlu0 %v6056_v17, %s9172_s30  ;;  %v13235_v35 = vpop.permute.xlu2 %4522  ;;  %v4209_v17 = vsel %vm4179_vm10, %v4207_v24, %v4208_v33  ;;  %v8794_v33 = vld [vmem:[#allocation2 + $0x84] sm:$0xff]  ;;  %v4607_v24 = vunpack.c.l.b16 %v3316_v16 }
 0x560   :  { %17509 = vst [vmem:[#allocation63_spill] sm:$0xff] %v13235_v35  ;;  %v13239_v0 = vpop.permute.xlu1 %5434  ;;  %v4213_v15 = vrot.slane %v8794_v33, 1  ;;  %v13271_v25 = vpack.c.b16 %v5533_v40, %v5533_v40  ;;  %v3413_v16 = vld [vmem:[#allocation2 + $0xa4] sm:$0x1] }
 0x561   :  { %5220 = vrot.lane.b32.xlu1 %v5134_v21, %s9183_s17  ;;  %17511 = vst [vmem:[#allocation33_spill] sm:$0xff] %v13239_v0  ;;  %v5138_v21 = vrot.slane %v12998_v45, 1  ;;  %v13250_v0 = vpack.c.b16 %v5534_v3, %v5534_v3  ;;  %v3226_v45 = vld [vmem:[#allocation2 + $0xa4] sm:$0x1]  ;;  %v13278_v60 = vpack.c.b16 %v4607_v24, %v4607_v24 }
 0x562   :  { %17517 = vst [vmem:[#allocation65_spill] sm:$0xff] %v13271_v25  ;;  %v6064_v40 = vrot.slane %v13271_v25, 1  ;;  %v3319_v25 = vld [vmem:[#allocation2 + $0xa4] sm:$0x1] }
 0x563   :  { %v5140_v35 = vsel %vm4179_vm10, %v5138_v21, %v5139_v55  ;;  %17512 = vst [vmem:[#allocation10_spill] sm:$0xff] %v13250_v0  ;;  %v6067_v3 = vrot.slane %v13250_v0, 1  ;;  %v5135_v21 = vrot.slane %v13000_v56, 1  ;;  %v4215_v0 = vsel %vm4179_vm10, %v4213_v15, %v4214_v5  ;;  %v3223_v56 = vld [vmem:[#allocation2 + $0x98] sm:$0x1] }
 0x564   :  { %v3678_v5 = vunpack.c.l.b16 %v3223_v56  ;;  %v5142_v24 = vrot.slane %v13278_v60, 1  ;;  %v5141_v15 = vrot.slane %v12996_v28, 1  ;;  %v8795_v28 = vld [vmem:[#allocation2 + $0x90] sm:$0xff] }
 0x565   :  { %5224 = vrot.lane.b32.xlu2 %v5140_v35, %s9183_s17  ;;  %v3679_v35 = vunpack.c.l.b16 %v3226_v45  ;;  %v3322_v45 = vld [vmem:[#allocation2 + $0xb0] sm:$0x1] }
 0x566   :  { %v13294_v49 = vpack.c.b16 %v3678_v5, %v3678_v5  ;;  %v5143_v56 = vsel %vm4179_vm10, %v5141_v15, %v5142_v24  ;;  %v9078_v24 = vld [vmem:[#allocation2 + $0xc] sm:$0xff]  ;;  %v5147_v15 = vrot.slane %v13026_v2, 1 }
 0x567   :  { %4294 = vrot.lane.b32.xlu0 %v4209_v17, %s9175_s15  ;;  %v13258_v44 = vpop.permute.xlu2 %5450  ;;  %v5137_v17 = vsel %vm4179_vm10, %v5135_v21, %v5136_v59  ;;  %v5535_v21 = vunpack.c.l.b16 %v3413_v16  ;;  %v3416_v2 = vld [vmem:[#allocation2 + $0xb0] sm:$0x1] }
 0x568   :  { %17514 = vst [vmem:[#allocation22_spill] sm:$0xff] %v13258_v44  ;;  %v13262_v55 = vpop.permute.xlu1 %4512  ;;  %v4217_v5 = vrot.slane %v13294_v49, 1 }
 0x569   :  { %6148 = vrot.lane.b32.xlu1 %v6062_v12, %s9172_s30  ;;  %17516 = vst [vmem:[#allocation41_spill] sm:$0xff] %v13262_v55  ;;  %v6066_v12 = vrot.slane %v13010_v52, 1  ;;  %v13273_v55 = vpack.c.b16 %v3679_v35, %v3679_v35  ;;  %v8796_v52 = vld [vmem:[#allocation2 + $0x9c] sm:$0xff] }
 0x56a   :  { %17521 = vst [vmem:[#allocation75_spill] sm:$0xff] %v13294_v49 }
 0x56b   :  { %v6068_v44 = vsel %vm4179_vm10, %v6066_v12, %v6067_v3  ;;  %17518 = vst [vmem:[#allocation58_spill] sm:$0xff] %v13273_v55  ;;  %v4220_v35 = vrot.slane %v13273_v55, 1  ;;  %v6063_v12 = vrot.slane %v13012_v9, 1  ;;  %v3229_v9 = vld [vmem:[#allocation2 + $0xb0] sm:$0x1]  ;;  %v4668_v55 = vshll.u32 %v13045_v11, 16 }
 0x56d   :  { %6152 = vrot.lane.b32.xlu2 %v6068_v44, %s9172_s30  ;;  %v4609_v44 = vunpack.c.l.b16 %v3322_v45  ;;  %v13301_v45 = vpack.c.b16 %v5535_v21, %v5535_v21  ;;  %v3680_v21 = vunpack.c.l.b16 %v3229_v9  ;;  %v3325_v9 = vld [vmem:[#allocation2 + $0xbc] sm:$0x1] }
 0x56f   :  { %5222 = vrot.lane.b32.xlu0 %v5137_v17, %s9183_s17  ;;  %v13283_v59 = vpop.permute.xlu2 %4278  ;;  %v6065_v17 = vsel %vm4179_vm10, %v6063_v12, %v6064_v40  ;;  %17523 = vst [vmem:[#allocation76_spill] sm:$0xff] %v13301_v45  ;;  %v4608_v40 = vunpack.c.l.b16 %v3319_v25  ;;  %v4663_v12 = vshll.u32 %v9078_v24, 16 }
 0x571   :  { %4298 = vrot.lane.b32.xlu1 %v4215_v0, %s9175_s15  ;;  %v13281_v33 = vpop.permute.xlu0 %5442  ;;  %v4219_v0 = vrot.slane %v8796_v52, 1 }
 0x572   :  { %17519 = vst [vmem:[#allocation12_spill] sm:$0xff] %v13281_v33 }
 0x573   :  { %v13285_v3 = vpop.permute.xlu1 %5440  ;;  %v4221_v33 = vsel %vm4179_vm10, %v4219_v0, %v4220_v35  ;;  %v4216_v0 = vrot.slane %v8795_v28, 1  ;;  %v13323_v28 = vpack.c.b16 %v3680_v21, %v3680_v21 }
 0x574   :  { %17520 = vst [vmem:[#allocation13_spill] sm:$0xff] %v13285_v3  ;;  %v13296_v3 = vpack.c.b16 %v4609_v44, %v4609_v44 }
 0x575   :  { %4302 = vrot.lane.b32.xlu2 %v4221_v33, %s9175_s15  ;;  %v6070_v33 = vrot.slane %v13301_v45, 1  ;;  %v4218_v25 = vsel %vm4179_vm10, %v4216_v0, %v4217_v5  ;;  %v4670_v0 = vrot.slane %v4668_v55, 1 }
 0x576   :  { %17522 = vst [vmem:[#allocation38_spill] sm:$0xff] %v13296_v3  ;;  %v5148_v44 = vrot.slane %v13296_v3, 1 }
 0x577   :  { %6150 = vrot.lane.b32.xlu0 %v6065_v17, %s9172_s30  ;;  %v13306_v16 = vpop.permute.xlu2 %5206  ;;  %v6069_v17 = vrot.slane %v13008_v4, 1  ;;  %v4661_v4 = vshrl.u32 %v9078_v24, 16  ;;  %v4610_v24 = vunpack.c.l.b16 %v3325_v9 }
 0x579   :  { %5226 = vrot.lane.b32.xlu1 %v5143_v56, %s9183_s17  ;;  %v13304_v52 = vpop.permute.xlu0 %4520  ;;  %v13315_v56 = vpack.c.b16 %v4608_v40, %v4608_v40  ;;  %v6071_v3 = vsel %vm4179_vm10, %v6069_v17, %v6070_v33  ;;  %v4223_v17 = vrot.slane %v13323_v28, 1 }
 0x57a   :  { %17524 = vst [vmem:[#allocation39_spill] sm:$0xff] %v13304_v52  ;;  %v5149_v52 = vsel %vm4179_vm10, %v5147_v15, %v5148_v44  ;;  %v8797_v44 = vld [vmem:[#allocation2 + $0xa8] sm:$0xff]  ;;  %v5536_v15 = vunpack.c.l.b16 %v3416_v2  ;;  %v13343_v2 = vpack.c.b16 %v4610_v24, %v4610_v24 }
 0x57b   :  { %v13308_v35 = vpop.permute.xlu1 %4518  ;;  %17526 = vst [vmem:[#allocation78_spill] sm:$0xff] %v13315_v56  ;;  %v5145_v11 = vrot.slane %v13315_v56, 1 }
 0x57c   :  { %17525 = vst [vmem:[#allocation46_spill] sm:$0xff] %v13308_v35  ;;  %v4665_v35 = vrot.slane %v4663_v12, 1  ;;  %v13337_v45 = vpack.c.b16 %v5536_v15, %v5536_v15 }
 0x57d   :  { %5230 = vrot.lane.b32.xlu2 %v5149_v52, %s9183_s17  ;;  %v9079_v52 = vld [vmem:[#allocation2 + $0x18] sm:$0xff]  ;;  %17529 = vst [vmem:[#allocation66_spill] sm:$0xff] %v13343_v2 }
 0x57e   :  { %v4666_v33 = vor.u32 %v4665_v35, %v4661_v4  ;;  %v5591_v21 = vshll.u32 %v9079_v52, 16  ;;  %v3232_v35 = vld [vmem:[#allocation2 + $0xbc] sm:$0x1]  ;;  %v5589_v4 = vshrl.u32 %v9079_v52, 16 }
 0x57f   :  { %4300 = vrot.lane.b32.xlu0 %v4218_v25, %s9175_s15  ;;  %v13328_v5 = vpop.permute.xlu2 %6134  ;;  %v4222_v25 = vrot.slane %v8797_v44, 1 }
 0x580   :  { %v4671_v49 = vsel %vm3730_vm9, %v4666_v33, %v4670_v0  ;;  %v5593_v56 = vrot.slane %v5591_v21, 1  ;;  %v3681_v33 = vunpack.c.l.b16 %v3232_v35  ;;  %v6073_v0 = vrot.slane %v13337_v45, 1 }
 0x581   :  { %6154 = vrot.lane.b32.xlu1 %v6071_v3, %s9172_s30  ;;  %v13326_v40 = vpop.permute.xlu0 %5448  ;;  %v5144_v3 = vrot.slane %v13028_v53, 1  ;;  %v4224_v55 = vsel %vm4179_vm10, %v4222_v25, %v4223_v17  ;;  %v3419_v53 = vld [vmem:[#allocation2 + $0xbc] sm:$0x1]  ;;  %v3746_v17 = vshll.u32 %v13022_v36, 16 }
 0x582   :  { %17527 = vst [vmem:[#allocation7_spill] sm:$0xff] %v13326_v40  ;;  %v5594_v15 = vor.u32 %v5593_v56, %v5589_v4  ;;  %v5537_v21 = vunpack.c.l.b16 %v3419_v53 }
 0x583   :  { %v13331_v12 = vpop.permute.xlu1 %5446  ;;  %v5146_v40 = vsel %vm4179_vm10, %v5144_v3, %v5145_v11  ;;  %v8829_v11 = vld [vmem:[#allocation2 + $0xb4] sm:$0xff]  ;;  %v6072_v3 = vrot.slane %v13042_v31, 1  ;;  %v3748_v56 = vrot.slane %v3746_v17, 1 }
 0x584   :  { %17528 = vst [vmem:[#allocation84_spill] sm:$0xff] %v13331_v12  ;;  %v5596_v12 = vshll.u32 %v13068_v48, 16  ;;  %v5150_v52 = vrot.slane %v8829_v11, 1  ;;  %v13360_v35 = vpack.c.b16 %v5537_v21, %v5537_v21  ;;  %v8798_v31 = vld [vmem:[#allocation2 + $0xb4] sm:$0xff]  ;;  %v3758_v21 = vshll.u32 %v13056_v18, 16 }
 0x585   :  { %5044 = vrot.lane.b32.xlu2 %v4671_v49, %s9174_s0  ;;  %v5151_v49 = vrot.slane %v13343_v2, 1  ;;  %v6074_v24 = vsel %vm4179_vm10, %v6072_v3, %v6073_v0  ;;  %v4728_v2 = vshll.u32 %v13141_v46, 16 }
 0x586   :  { %17533 = vst [vmem:[#allocation8_spill] sm:$0xff] %v13360_v35 }
 0x587   :  { %5228 = vrot.lane.b32.xlu0 %v5146_v40, %s9183_s17  ;;  %v13348_v44 = vpop.permute.xlu2 %4284  ;;  %v5598_v40 = vrot.slane %v5596_v12, 1  ;;  %v3751_v12 = vshll.u32 %v13014_v54, 16  ;;  %v9080_v54 = vld [vmem:[#allocation2 + $0x18] sm:$0xff] }
 0x588   :  { %v4675_v3 = vshll.u32 %v9080_v54, 16 }
 0x589   :  { %4304 = vrot.lane.b32.xlu1 %v4224_v55, %s9175_s15  ;;  %v13346_v9 = vpop.permute.xlu0 %4526  ;;  %v5599_v25 = vsel %vm3730_vm9, %v5594_v15, %v5598_v40  ;;  %v13358_v55 = vpack.c.b16 %v3681_v33, %v3681_v33  ;;  %v3744_v33 = vshrl.u32 %v13022_v36, 16  ;;  %v6076_v40 = vrot.slane %v13360_v35, 1 }
 0x58a   :  { %17530 = vst [vmem:[#allocation47_spill] sm:$0xff] %v13346_v9  ;;  %v5152_v9 = vsel %vm4179_vm10, %v5150_v52, %v5151_v49  ;;  %v3753_v17 = vrot.slane %v3751_v12, 1  ;;  %v6075_v52 = vrot.slane %v13040_v7, 1  ;;  %v3760_v36 = vrot.slane %v3758_v21, 1 }
 0x58b   :  { %v13350_v48 = vpop.permute.xlu1 %4524  ;;  %17532 = vst [vmem:[#allocation77_spill] sm:$0xff] %v13358_v55  ;;  %v4226_v15 = vrot.slane %v13358_v55, 1  ;;  %v3749_v49 = vor.u32 %v3748_v56, %v3744_v33  ;;  %v4677_v56 = vrot.slane %v4675_v3, 1  ;;  %v4680_v12 = vshll.u32 %v13031_v38, 16 }
 0x58c   :  { %17531 = vst [vmem:[#allocation72_spill] sm:$0xff] %v13350_v48  ;;  %v3756_v7 = vshrl.u32 %v13056_v18, 16  ;;  %v4692_v18 = vshll.u32 %v13075_v26, 16 }
 0x58d   :  { %5972 = vrot.lane.b32.xlu2 %v5599_v25, %s9184_s18  ;;  %v6077_v25 = vsel %vm4179_vm10, %v6075_v52, %v6076_v40 }
 0x58f   :  { %6156 = vrot.lane.b32.xlu0 %v6074_v24, %s9172_s30  ;;  %v13369_v4 = vpop.permute.xlu2 %5212 }
 0x591   :  { %5232 = vrot.lane.b32.xlu1 %v5152_v9, %s9183_s17  ;;  %v13367_v53 = vpop.permute.xlu0 %5454  ;;  %v4225_v9 = vrot.slane %v8798_v31, 1 }
 0x592   :  { %17534 = vst [vmem:[#allocation18_spill] sm:$0xff] %v13367_v53  ;;  %v3763_v53 = vshll.u32 %v13052_v6, 16  ;;  %v3761_v6 = vor.u32 %v3760_v36, %v3756_v7 }
 0x593   :  { %v13372_v0 = vpop.permute.xlu1 %5452  ;;  %v4227_v24 = vsel %vm4179_vm10, %v4225_v9, %v4226_v15  ;;  %v4673_v15 = vshrl.u32 %v9080_v54, 16  ;;  %v9081_v9 = vld [vmem:[#allocation2 + $0x24] sm:$0xff] }
 0x594   :  { %17535 = vst [vmem:[#allocation30_spill] sm:$0xff] %v13372_v0  ;;  %v3754_v0 = vsel %vm3730_vm9, %v3749_v49, %v3753_v17  ;;  %v3765_v21 = vrot.slane %v3763_v53, 1  ;;  %v4687_v52 = vshll.u32 %v9081_v9, 16  ;;  %v4682_v49 = vrot.slane %v4680_v12, 1  ;;  %v9082_v17 = vld [vmem:[#allocation2 + $0x24] sm:$0xff] }
 0x595   :  { %6158 = vrot.lane.b32.xlu2 %v6077_v25, %s9172_s30  ;;  %v5603_v3 = vshll.u32 %v9082_v17, 16  ;;  %v5608_v53 = vshll.u32 %v13047_v22, 16  ;;  %v4685_v36 = vshrl.u32 %v9081_v9, 16  ;;  %v5620_v9 = vshll.u32 %v13097_v50, 16 }
 0x596   :  { %v3766_v38 = vsel %vm3730_vm9, %v3761_v6, %v3765_v21  ;;  %v9083_v6 = vld [vmem:[#allocation2 + $0x30] sm:$0xff] }
 0x597   :  { %4306 = vrot.lane.b32.xlu0 %v4227_v24, %s9175_s15  ;;  %v13389_v33 = vpop.permute.xlu2 %6140  ;;  %v4678_v24 = vor.u32 %v4677_v56, %v4673_v15  ;;  %v5605_v25 = vrot.slane %v5603_v3, 1  ;;  %v3422_v56 = vld [vmem:[#allocation2 + $0xc8] sm:$0x1]  ;;  %v5601_v15 = vshrl.u32 %v9082_v17, 16  ;;  %v5615_v26 = vshll.u32 %v9083_v6, 16 }
 0x598   :  { %v5610_v3 = vrot.slane %v5608_v53, 1  ;;  %v5538_v22 = vunpack.c.l.b16 %v3422_v56  ;;  %v3775_v17 = vshll.u32 %v13090_v43, 16  ;;  %v3768_v53 = vshrl.u32 %v13100_v61, 16 }
 0x599   :  { %4117 = vrot.lane.b32.xlu1 %v3754_v0, %s9181_s7  ;;  %v13387_v31 = vpop.permute.xlu0 %5204  ;;  %v4689_v0 = vrot.slane %v4687_v52, 1  ;;  %v4683_v54 = vsel %vm3730_vm9, %v4678_v24, %v4682_v49  ;;  %v3770_v24 = vshll.u32 %v13100_v61, 16  ;;  %v5606_v49 = vor.u32 %v5605_v25, %v5601_v15  ;;  %v3328_v25 = vld [vmem:[#allocation2 + $0xc8] sm:$0x1] }
 0x59a   :  { %v5622_v43 = vrot.slane %v5620_v9, 1 }
 0x59b   :  { %v13391_v40 = vpop.permute.xlu1 %4280  ;;  %v4690_v52 = vor.u32 %v4689_v0, %v4685_v36  ;;  %v3772_v55 = vrot.slane %v3770_v24, 1  ;;  %v5611_v0 = vsel %vm3730_vm9, %v5606_v49, %v5610_v3  ;;  %v13413_v36 = vpack.c.b16 %v5538_v22, %v5538_v22  ;;  %v9084_v24 = vld [vmem:[#allocation2 + $0x30] sm:$0xff] }
 0x59c   :  { %v3425_v3 = vld [vmem:[#allocation2 + $0xd4] sm:$0x1] }
 0x59d   :  { %4528 = vrot.lane.b32.xlu2 %v8829_v11, %s9182_s14  ;;  %v4694_v11 = vrot.slane %v4692_v18, 1  ;;  %v5613_v18 = vshrl.u32 %v9083_v6, 16  ;;  %17537 = vst [vmem:[#allocation19_spill] sm:$0xff] %v13413_v36  ;;  %v4699_v6 = vshll.u32 %v9084_v24, 16  ;;  %v6079_v49 = vrot.slane %v13413_v36, 1 }
 0x59e   :  { %v5539_v9 = vunpack.c.l.b16 %v3425_v3 }
 0x59f   :  { %4119 = vrot.lane.b32.xlu0 %v3766_v38, %s9181_s7  ;;  %v13402_v7 = vpop.permute.xlu2 %4290  ;;  %v8861_v38 = vld [vmem:[#allocation2 + $0xc0] sm:$0xff]  ;;  %v4695_v48 = vsel %vm3730_vm9, %v4690_v52, %v4694_v11  ;;  %v3777_v52 = vrot.slane %v3775_v17, 1  ;;  %v4611_v11 = vunpack.c.l.b16 %v3328_v25 }
 0x5a0   :  { %17536 = vst [vmem:[#allocation48_spill] sm:$0xff] %v13402_v7  ;;  %v8830_v17 = vld [vmem:[#allocation2 + $0xc0] sm:$0xff] }
 0x5a1   :  { %5046 = vrot.lane.b32.xlu1 %v4683_v54, %s9174_s0  ;;  %v13400_v12 = vpop.permute.xlu0 %6132  ;;  %v5617_v54 = vrot.slane %v5615_v26, 1  ;;  %v13426_v7 = vpack.c.b16 %v4611_v11, %v4611_v11  ;;  %v8862_v11 = vld [vmem:[#allocation2 + $0xcc] sm:$0xff] }
 0x5a3   :  { %v13404_v21 = vpop.permute.xlu1 %5208  ;;  %v5618_v15 = vor.u32 %v5617_v54, %v5613_v18  ;;  %17539 = vst [vmem:[#allocation9_spill] sm:$0xff] %v13426_v7  ;;  %v4704_v54 = vshll.u32 %v13110_v10, 16  ;;  %v4697_v18 = vshrl.u32 %v9084_v24, 16 }
 0x5a5   :  { %5456 = vrot.lane.b32.xlu2 %v8861_v38, %s9176_s16  ;;  %v5623_v22 = vsel %vm3730_vm9, %v5618_v15, %v5622_v43  ;;  %v5154_v15 = vrot.slane %v13426_v7, 1  ;;  %v4706_v43 = vrot.slane %v4704_v54, 1  ;;  %v5771_v54 = vshll.u32 %v8862_v11, 16 }
 0x5a6   :  { %v5769_v7 = vshrl.u32 %v8862_v11, 16 }
 0x5a7   :  { %5048 = vrot.lane.b32.xlu0 %v4695_v48, %s9174_s0  ;;  %v13419_v56 = vpop.permute.xlu2 %5218  ;;  %v3773_v48 = vor.u32 %v3772_v55, %v3768_v53 }
 0x5a8   :  { %17538 = vst [vmem:[#allocation31_spill] sm:$0xff] %v13419_v56  ;;  %v4701_v56 = vrot.slane %v4699_v6, 1  ;;  %v5571_v6 = vpack.c.b16 %v5539_v9, %v5539_v9  ;;  %v6719_v9 = vld [vmem:[%s16616_s8 + $0x20] sm:$0xf] }
 0x5a9   :  { %5974 = vrot.lane.b32.xlu1 %v5611_v0, %s9184_s18  ;;  %v13417_v50 = vpop.permute.xlu0 %4282  ;;  %v6078_v0 = vrot.slane %v8861_v38, 1  ;;  %v3778_v61 = vsel %vm3730_vm9, %v3773_v48, %v3777_v52  ;;  %v9085_v48 = vld [vmem:[#allocation2 + $0x3c] sm:$0xff] }
 0x5aa   :  { %v4702_v10 = vor.u32 %v4701_v56, %v4697_v18  ;;  %v5627_v52 = vshll.u32 %v9085_v48, 16  ;;  %v5625_v56 = vshrl.u32 %v9085_v48, 16  ;;  %v7691_v18 = vld [vmem:[%s16619_s11] sm:$0xf] }
 0x5ab   :  { %v13421_v26 = vpop.permute.xlu1 %6136  ;;  %v6080_v55 = vsel %vm4179_vm10, %v6078_v0, %v6079_v49  ;;  %v5153_v49 = vrot.slane %v8830_v17, 1  ;;  %v5632_v0 = vshll.u32 %v13134_v47, 16 }
 0x5ac   :  { %v5629_v24 = vrot.slane %v5627_v52, 1 }
 0x5ad   :  { %4121 = vrot.lane.b32.xlu2 %v3778_v61, %s9181_s7  ;;  %v5155_v3 = vsel %vm4179_vm10, %v5153_v49, %v5154_v15  ;;  %v6081_v61 = vrot.slane %v8862_v11, 1  ;;  %v5634_v52 = vrot.slane %v5632_v0, 1  ;;  %v8781_v49 = vld [vmem:[%s16620_s12] sm:$0xff]  ;;  %v8882_v0 = vld [vmem:[%s16616_s8 + $0x18] sm:$0xff] }
 0x5ae   :  { %1642 = vmatpush.bf16.msra.mxu3 %v8781_v49 }
 0x5af   :  { %5976 = vrot.lane.b32.xlu0 %v5623_v22, %s9184_s18  ;;  %v13435_v38 = vpop.permute.xlu2 %6146  ;;  %v4707_v22 = vsel %vm3730_vm9, %v4702_v10, %v4706_v43  ;;  %v6737_v10 = vunpack.c.l.b16 %v6719_v9  ;;  %v7789_v43 = vsel %vm6812_vm11, %v7691_v18, 0  ;;  %v5776_v9 = vshll.u32 %v5571_v6, 16  ;;  %v3235_v18 = vld [vmem:[#allocation2 + $0xe0] sm:$0x1] }
 0x5b0   :  { %17540 = vst [vmem:[#allocation20_spill] sm:$0xff] %v13435_v38  ;;  %9047 = vmatpush.bf16.msra.mxu2 %v7789_v43  ;;  %7798 = vmatpush.bf16.msrb.mxu1 %v7789_v43 }
 0x5b1   :  { %6160 = vrot.lane.b32.xlu1 %v6080_v55, %s9172_s30  ;;  %v13433_v25 = vpop.permute.xlu0 %5210  ;;  %v6082_v55 = vrot.slane %v5571_v6, 1 }
 0x5b3   :  { %v13437_v53 = vpop.permute.xlu1 %4286  ;;  %v6083_v38 = vsel %vm4179_vm10, %v6081_v61, %v6082_v55  ;;  %v3787_v55 = vshll.u32 %v13070_v51, 16  ;;  %v8881_v51 = vld [vmem:[%s16616_s8 + $0x10] sm:$0xff] }
 0x5b5   :  { %5050 = vrot.lane.b32.xlu2 %v4707_v22, %s9174_s0  ;;  %v6742_v22 = vpack.c.b16 %v6737_v10, %v6737_v10  ;;  %v17542_v10 = vld [vmem:[#allocation26_spill] sm:$0xff] }
 0x5b6   :  { %8233 = vmatmul.msk.bf16.vlgmr.msra.gmra.mxu3 %vm189_vm0, %v17542_v10 }
 0x5b7   :  { %5234 = vrot.lane.b32.xlu0 %v5155_v3, %s9183_s17  ;;  %v13454_v15 = vpop.permute.xlu2 %4296  ;;  %v3782_v3 = vshll.u32 %v13078_v39, 16  ;;  %v6814_v36 = vsel %vm6812_vm11, %v6742_v22, 0  ;;  %v13487_v22 = vld [vmem:[#allocation2 + $0xd8] sm:$0xff] }
 0x5b8   :  { %17541 = vst [vmem:[#allocation56_spill] sm:$0xff] %v13454_v15  ;;  %v5773_v15 = vrot.slane %v5771_v54, 1  ;;  %6819 = vmatpush.bf16.msrb.mxu0 %v6814_v36  ;;  %9042 = vmatpush.bf16.msrb.mxu3 %v6814_v36  ;;  %v3682_v54 = vunpack.c.l.b16 %v3235_v18  ;;  %v3780_v36 = vshrl.u32 %v13078_v39, 16  ;;  %v13491_v39 = vld [vmem:[#allocation2 + $0xe4] sm:$0xff] }
 0x5b9   :  { %4530 = vrot.lane.b32.xlu1 %v8830_v17, %s9182_s14  ;;  %v13452_v47 = vpop.permute.xlu0 %6138  ;;  %v5630_v17 = vor.u32 %v5629_v24, %v5625_v56  ;;  %v3784_v61 = vrot.slane %v3782_v3, 1  ;;  %v5778_v56 = vrot.slane %v5776_v9, 1 }
 0x5ba   :  { %v5774_v6 = vor.u32 %v5773_v15, %v5769_v7  ;;  %v9086_v15 = vld [vmem:[#allocation2 + $0x3c] sm:$0xff]  ;;  %v13489_v9 = vpack.c.b16 %v3682_v54, %v3682_v54  ;;  %v4228_v54 = vrot.slane %v13487_v22, 1 }
 0x5bb   :  { %v13457_v48 = vpop.permute.xlu1 %5214  ;;  %v5635_v24 = vsel %vm3730_vm9, %v5630_v17, %v5634_v52  ;;  %v3794_v52 = vshll.u32 %v13122_v62, 16  ;;  %v3785_v7 = vor.u32 %v3784_v61, %v3780_v36  ;;  %v4711_v49 = vshll.u32 %v9086_v15, 16 }
 0x5bc   :  { %6820 = vmatpush.bf16.msrb.mxu0 %v8882_v0  ;;  %9043 = vmatpush.bf16.msrb.mxu3 %v8882_v0  ;;  %v5779_v3 = vsel %vm3730_vm9, %v5774_v6, %v5778_v56  ;;  %v8880_v0 = vld [vmem:[%s16616_s8 + $0x8] sm:$0xff]  ;;  %v4716_v6 = vshll.u32 %v13092_v42, 16  ;;  %v4229_v10 = vrot.slane %v13489_v9, 1 }
 0x5bd   :  { %5978 = vrot.lane.b32.xlu2 %v5635_v24, %s9184_s18  ;;  %v3796_v18 = vrot.slane %v3794_v52, 1  ;;  %v3799_v24 = vshll.u32 %v13119_v57, 16  ;;  %v3331_v56 = vld [vmem:[#allocation2 + $0xec] sm:$0x1]  ;;  %v3792_v57 = vshrl.u32 %v13122_v62, 16  ;;  %v8879_v62 = vld [vmem:[%s16616_s8] sm:$0xff] }
 0x5be   :  { %v4718_v35 = vrot.slane %v4716_v6, 1  ;;  %v5644_v6 = vshll.u32 %v13112_v19, 16 }
 0x5bf   :  { %6162 = vrot.lane.b32.xlu0 %v6083_v38, %s9172_s30  ;;  %v13477_v17 = vpop.permute.xlu2 %5224  ;;  %v3801_v42 = vrot.slane %v3799_v24, 1 }
 0x5c0   :  { %17544 = vst [vmem:[#allocation40_spill] sm:$0xff] %v13477_v17  ;;  %6821 = vmatpush.bf16.msrb.mxu0 %v8881_v51  ;;  %9044 = vmatpush.bf16.msrb.mxu3 %v8881_v51  ;;  %v4709_v51 = vshrl.u32 %v9086_v15, 16 }
 0x5c1   :  { %5458 = vrot.lane.b32.xlu1 %v8862_v11, %s9176_s16  ;;  %v13475_v43 = vpop.permute.xlu0 %4288  ;;  %v3789_v11 = vrot.slane %v3787_v55, 1  ;;  %v4713_v55 = vrot.slane %v4711_v49, 1  ;;  %v4612_v49 = vunpack.c.l.b16 %v3331_v56 }
 0x5c2   :  { %17543 = vst [vmem:[#allocation52_spill] sm:$0xff] %v13475_v43  ;;  %v9088_v43 = vld [vmem:[#allocation2 + $0x48] sm:$0xff] }
 0x5c3   :  { %v13480_v38 = vpop.permute.xlu1 %6142  ;;  %v3790_v61 = vsel %vm3730_vm9, %v3785_v7, %v3789_v11  ;;  %v3797_v11 = vor.u32 %v3796_v18, %v3792_v57  ;;  %v13518_v18 = vpack.c.b16 %v4612_v49, %v4612_v49  ;;  %v5656_v49 = vshll.u32 %v13164_v14, 16 }
 0x5c4   :  { %6822 = vmatpush.bf16.msrb.mxu0 %v8880_v0  ;;  %9045 = vmatpush.bf16.msrb.mxu3 %v8880_v0 }
 0x5c5   :  { %6002 = vrot.lane.b32.xlu2 %v5779_v3, %s9184_s18  ;;  %v9087_v3 = vld [vmem:[#allocation2 + $0x48] sm:$0xff] }
 0x5c6   :  { %v4723_v17 = vshll.u32 %v9087_v3, 16  ;;  %v4721_v0 = vshrl.u32 %v9087_v3, 16  ;;  %v3806_v3 = vshll.u32 %v13167_v29, 16 }
 0x5c7   :  { %4532 = vrot.lane.b32.xlu0 %v13491_v39, %s9182_s14  ;;  %v13508_v52 = vpop.permute.xlu2 %6152 }
 0x5c8   :  { %17546 = vst [vmem:[#allocation68_spill] sm:$0xff] %v13508_v52  ;;  %v4230_v52 = vsel %vm4179_vm10, %v4228_v54, %v4229_v10  ;;  %v4725_v15 = vrot.slane %v4723_v17, 1  ;;  %6823 = vmatpush.bf16.msrb.mxu0 %v8879_v62  ;;  %9046 = vmatpush.bf16.msrb.mxu3 %v8879_v62  ;;  %v17548_v17 = vld [vmem:[#allocation27_spill] sm:$0xff]  ;;  %v4730_v54 = vrot.slane %v4728_v2, 1  ;;  %v5637_v10 = vshrl.u32 %v9088_v43, 16 }
 0x5c9   :  { %4123 = vrot.lane.b32.xlu1 %v3790_v61, %s9181_s7  ;;  %v13506_v36 = vpop.permute.xlu0 %5216  ;;  %v4714_v61 = vor.u32 %v4713_v55, %v4709_v51  ;;  %8234 = vmatmul.msk.bf16.gmra.mxu3 %vm189_vm0, %v17548_v17  ;;  %v3924_v2 = vshrl.u32 %v13487_v22, 16  ;;  %v3811_v17 = vshll.u32 %v13157_v8, 16 }
 0x5ca   :  { %17545 = vst [vmem:[#allocation79_spill] sm:$0xff] %v13506_v36  ;;  %v5639_v36 = vshll.u32 %v9088_v43, 16  ;;  %v4726_v57 = vor.u32 %v4725_v15, %v4721_v0  ;;  %v3808_v0 = vrot.slane %v3806_v3, 1  ;;  %v9090_v3 = vld [vmem:[#allocation2 + $0x54] sm:$0xff] }
 0x5cb   :  { %v13510_v7 = vpop.permute.xlu1 %4292  ;;  %v4719_v24 = vsel %vm3730_vm9, %v4714_v61, %v4718_v35  ;;  %v5157_v35 = vrot.slane %v13518_v18, 1  ;;  %v3931_v61 = vshll.u32 %v13489_v9, 16 }
 0x5cc   :  { %17547 = vst [vmem:[#allocation64_spill] sm:$0xff] %v13510_v7  ;;  %v3802_v7 = vsel %vm3730_vm9, %v3797_v11, %v3801_v42  ;;  %v5641_v55 = vrot.slane %v5639_v36, 1  ;;  %v9089_v36 = vld [vmem:[#allocation2 + $0x54] sm:$0xff]  ;;  %v5646_v11 = vrot.slane %v5644_v6, 1  ;;  %v5156_v42 = vrot.slane %v13491_v39, 1 }
 0x5cd   :  { %4308 = vrot.lane.b32.xlu2 %v4230_v52, %s9175_s15  ;;  %v3926_v52 = vshll.u32 %v13487_v22, 16  ;;  %v5651_v19 = vshll.u32 %v9089_v36, 16  ;;  %v4731_v62 = vsel %vm3730_vm9, %v4726_v57, %v4730_v54  ;;  %v5649_v14 = vshrl.u32 %v9089_v36, 16 }
 0x5ce   :  { %v5158_v15 = vsel %vm4179_vm10, %v5156_v42, %v5157_v35  ;;  %v3804_v22 = vshrl.u32 %v13167_v29, 16  ;;  %v5658_v57 = vrot.slane %v5656_v49, 1  ;;  %v9091_v42 = vld [vmem:[#allocation2] sm:$0xff] }
 0x5cf   :  { %4125 = vrot.lane.b32.xlu0 %v3802_v7, %s9181_s7  ;;  %v13529_v56 = vpop.permute.xlu2 %4302  ;;  %v5642_v7 = vor.u32 %v5641_v55, %v5637_v10  ;;  %v3928_v43 = vrot.slane %v3926_v52, 1  ;;  %v3238_v55 = vld [vmem:[#allocation2 + $0xec] sm:$0x1]  ;;  %v3933_v10 = vrot.slane %v3931_v61, 1  ;;  %v6197_v29 = vsel %vm1983_vm14, %v9091_v42, %v13061_v23  ;;  %v3241_v61 = vld [vmem:[#allocation2 + $0xf8] sm:$0x1] }
 0x5d0   :  { %17549 = vst [vmem:[#allocation34_spill] sm:$0xff] %v13529_v56  ;;  %v3809_v35 = vor.u32 %v3808_v0, %v3804_v22  ;;  %v4733_v23 = vshrl.u32 %v9090_v3, 16  ;;  %v17551_v0 = vld [vmem:[#allocation28_spill] sm:$0xff]  ;;  %v3684_v22 = vunpack.c.l.b16 %v3241_v61  ;;  %v3428_v61 = vld [vmem:[#allocation2 + $0xf8] sm:$0x1]  ;;  %v5692_v56 = vshll.u32 %v13232_v20, 16 }
 0x5d1   :  { %5052 = vrot.lane.b32.xlu1 %v4719_v24, %s9174_s0  ;;  %v13527_v46 = vpop.permute.xlu0 %6144  ;;  %v5653_v24 = vrot.slane %v5651_v19, 1  ;;  %v5647_v39 = vsel %vm3730_vm9, %v5642_v7, %v5646_v11  ;;  %v3929_v54 = vor.u32 %v3928_v43, %v3924_v2  ;;  %v3813_v19 = vrot.slane %v3811_v17, 1 }
 0x5d2   :  { %v4735_v7 = vshll.u32 %v9090_v3, 16  ;;  %v3683_v11 = vunpack.c.l.b16 %v3238_v55  ;;  %v4740_v43 = vshll.u32 %v13179_v13, 16  ;;  %v6261_v17 = vsel %vm189_vm0, %v6197_v29, %v13127_v41 }
 0x5d3   :  { %v13532_v51 = vpop.permute.xlu1 %5220  ;;  %v5654_v52 = vor.u32 %v5653_v24, %v5649_v14  ;;  %v3934_v36 = vsel %vm3730_vm9, %v3929_v54, %v3933_v10  ;;  %v3814_v49 = vsel %vm3730_vm9, %v3809_v35, %v3813_v19  ;;  %v3334_v24 = vld [vmem:[#allocation2 + $0xf8] sm:$0x1]  ;;  %v8800_v14 = vld [vmem:[#allocation2 + $0xe4] sm:$0xff]  ;;  %v6326_v55 = vsel %vm6324_vm12, %v6261_v17, %v13155_v27 }
 0x5d4   :  { %v4737_v2 = vrot.slane %v4735_v7, 1  ;;  %v4742_v10 = vrot.slane %v4740_v43, 1  ;;  %v4613_v41 = vunpack.c.l.b16 %v3334_v24  ;;  %v13577_v7 = vld [vmem:[#allocation2 + $0xf0] sm:$0xff]  ;;  %v13579_v42 = vpack.c.b16 %v3684_v22, %v3684_v22 }
 0x5d5   :  { %5236 = vrot.lane.b32.xlu2 %v5158_v15, %s9183_s17  ;;  %v13562_v15 = vpack.c.b16 %v3683_v11, %v3683_v11  ;;  %v4231_v11 = vrot.slane %v8800_v14, 1 }
 0x5d6   :  { %v4738_v54 = vor.u32 %v4737_v2, %v4733_v23  ;;  %v13589_v43 = vpack.c.b16 %v4613_v41, %v4613_v41  ;;  %v4235_v17 = vrot.slane %v13579_v42, 1 }
 0x5d7   :  { %5054 = vrot.lane.b32.xlu0 %v4731_v62, %s9174_s0  ;;  %v13550_v9 = vpop.permute.xlu2 %5230  ;;  %v5659_v62 = vsel %vm3730_vm9, %v5654_v52, %v5658_v57  ;;  %v9092_v52 = vld [vmem:[#allocation2 + $0x60] sm:$0xff]  ;;  %v4232_v3 = vrot.slane %v13562_v15, 1 }
 0x5d8   :  { %17550 = vst [vmem:[#allocation26_spill] sm:$0xff] %v13550_v9  ;;  %v5663_v35 = vshll.u32 %v9092_v52, 16  ;;  %v4743_v29 = vsel %vm3730_vm9, %v4738_v54, %v4742_v10  ;;  %v5661_v23 = vshrl.u32 %v9092_v52, 16  ;;  %v4764_v9 = vshll.u32 %v13209_v34, 16 }
 0x5d9   :  { %5980 = vrot.lane.b32.xlu1 %v5647_v39, %s9184_s18  ;;  %v13548_v6 = vpop.permute.xlu0 %4294  ;;  %8235 = vmatmul.msk.bf16.gmra.mxu3 %vm189_vm0, %v17551_v0  ;;  %v4233_v2 = vsel %vm4179_vm10, %v4231_v11, %v4232_v3 }
 0x5db   :  { %v13552_v8 = vpop.permute.xlu1 %6148 }
 0x5dd   :  { %4127 = vrot.lane.b32.xlu2 %v3814_v49, %s9181_s7  ;;  %v3337_v49 = vld [vmem:[#allocation2 + $0x104] sm:$0x1] }
 0x5de   :  { %v4614_v14 = vunpack.c.l.b16 %v3337_v49 }
 0x5df   :  { %5982 = vrot.lane.b32.xlu0 %v5659_v62, %s9184_s18  ;;  %v5045_v13 = vpop.permute.xlu2 %5044  ;;  %v5668_v62 = vshll.u32 %v13202_v37, 16 }
 0x5e0   :  { %v6390_v19 = vsel %vm669_vm3, %v6326_v55, %v5045_v13  ;;  %v13597_v13 = vld [vmem:[#allocation2 + $0xf0] sm:$0xff] }
 0x5e1   :  { %4147 = vrot.lane.b32.xlu1 %v3934_v36, %s9181_s7  ;;  %v13569_v39 = vpop.permute.xlu0 %5222  ;;  %v6455_v27 = vsel %vm6453_vm13, %v6390_v19, %v13387_v31  ;;  %v5665_v36 = vrot.slane %v5663_v35, 1  ;;  %v8801_v31 = vld [vmem:[#allocation2 + $0xf0] sm:$0xff]  ;;  %v5670_v10 = vrot.slane %v5668_v62, 1  ;;  %v5540_v35 = vunpack.c.l.b16 %v3428_v61  ;;  %v13621_v61 = vld [vmem:[#allocation2 + $0xfc] sm:$0xff] }
 0x5e2   :  { %v6519_v37 = vsel %vm671_vm4, %v6455_v27, %v13191_v58  ;;  %v5160_v19 = vrot.slane %v13589_v43, 1  ;;  %v13605_v58 = vld [vmem:[#allocation2 + $0x54] sm:$0xff]  ;;  %v4234_v41 = vrot.slane %v8801_v31, 1  ;;  %v5159_v11 = vrot.slane %v13597_v13, 1  ;;  %v17554_v31 = vld [vmem:[#allocation53_spill] sm:$0xff] }
 0x5e3   :  { %v13573_v57 = vpop.permute.xlu1 %4298  ;;  %v5666_v54 = vor.u32 %v5665_v36, %v5661_v23  ;;  %v3818_v3 = vshll.u32 %v13605_v58, 16  ;;  %v13612_v36 = vpack.c.b16 %v4614_v14, %v4614_v14  ;;  %v13614_v62 = vpack.c.b16 %v5540_v35, %v5540_v35 }
 0x5e4   :  { %17552 = vst [vmem:[#allocation27_spill] sm:$0xff] %v13573_v57  ;;  %v4236_v27 = vsel %vm4179_vm10, %v4234_v41, %v4235_v17  ;;  %v6084_v41 = vrot.slane %v13577_v7, 1  ;;  %v9108_v57 = vld [vmem:[#allocation2 + $0x24] sm:$0xff] }
 0x5e5   :  { %5056 = vrot.lane.b32.xlu2 %v4743_v29, %s9174_s0  ;;  %v5671_v29 = vsel %vm3730_vm9, %v5666_v54, %v5670_v10  ;;  %v3820_v49 = vrot.slane %v3818_v3, 1  ;;  %v5163_v14 = vrot.slane %v13612_v36, 1  ;;  %v5162_v3 = vrot.slane %v13621_v61, 1 }
 0x5e7   :  { %5460 = vrot.lane.b32.xlu0 %v13577_v7, %s9176_s16  ;;  %v5973_v0 = vpop.permute.xlu2 %5972 }
 0x5e8   :  { %v6584_v55 = vsel %vm6582_vm15, %v6519_v37, %v5973_v0  ;;  %v3816_v0 = vshrl.u32 %v13605_v58, 16 }
 0x5e9   :  { %4310 = vrot.lane.b32.xlu1 %v4233_v2, %s9175_s15  ;;  %v13592_v24 = vpop.permute.xlu0 %6150  ;;  %v6648_v52 = vsel %vm673_vm5, %v6584_v55, %v13400_v12  ;;  %v5161_v12 = vsel %vm4179_vm10, %v5159_v11, %v5160_v19  ;;  %v3823_v2 = vshll.u32 %v13136_v30, 16  ;;  %8236 = vmatmul.msk.bf16.gmra.mxu3 %vm189_vm0, %v17554_v31  ;;  %v6085_v55 = vrot.slane %v13614_v62, 1  ;;  %v13634_v30 = vld [vmem:[#allocation2 + $0x60] sm:$0xff]  ;;  %v17558_v31 = vld [vmem:[#allocation49_spill] sm:$0xff] }
 0x5ea   :  { %8701 = vmatmul.msk.bf16.vlgmr.msrb.gmra.mxu0 %vm6747_vm1, %v6648_v52  ;;  %v3830_v54 = vshll.u32 %v13634_v30, 16  ;;  %v3821_v10 = vor.u32 %v3820_v49, %v3816_v0  ;;  %v9095_v52 = vld [vmem:[#allocation2 + $0x60] sm:$0xff]  ;;  %v5164_v11 = vsel %vm4179_vm10, %v5162_v3, %v5163_v14  ;;  %v4752_v0 = vshll.u32 %v17558_v31, 16 }
 0x5eb   :  { %v13599_v22 = vpop.permute.xlu1 %5226  ;;  %v3825_v35 = vrot.slane %v3823_v2, 1  ;;  %v4747_v19 = vshll.u32 %v9095_v52, 16  ;;  %v3828_v7 = vshrl.u32 %v13634_v30, 16 }
 0x5ec   :  { %17553 = vst [vmem:[#allocation28_spill] sm:$0xff] %v13599_v22 }
 0x5ed   :  { %5984 = vrot.lane.b32.xlu2 %v5671_v29, %s9184_s18  ;;  %v3832_v29 = vrot.slane %v3830_v54, 1  ;;  %v3826_v49 = vsel %vm3730_vm9, %v3821_v10, %v3825_v35  ;;  %v4749_v2 = vrot.slane %v4747_v19, 1  ;;  %v4754_v10 = vrot.slane %v4752_v0, 1  ;;  %v9097_v35 = vld [vmem:[#allocation2 + $0x6c] sm:$0xff]  ;;  %v3431_v0 = vld [vmem:[#allocation2 + $0x104] sm:$0x1] }
 0x5ee   :  { %v5675_v19 = vshll.u32 %v9097_v35, 16 }
 0x5ef   :  { %4312 = vrot.lane.b32.xlu0 %v4236_v27, %s9175_s15  ;;  %v13627_v37 = vpop.permute.xlu2 %6158  ;;  %v6086_v27 = vsel %vm4179_vm10, %v6084_v41, %v6085_v55  ;;  %v4745_v55 = vshrl.u32 %v9095_v52, 16  ;;  %v9096_v41 = vld [vmem:[#allocation2 + $0x6c] sm:$0xff] }
 0x5f0   :  { %17556 = vst [vmem:[#allocation92_spill] sm:$0xff] %v13627_v37 }
 0x5f1   :  { %5238 = vrot.lane.b32.xlu1 %v5161_v12, %s9183_s17  ;;  %v13625_v23 = vpop.permute.xlu0 %4300  ;;  %v3835_v12 = vshll.u32 %v13188_v1, 16  ;;  %v3833_v1 = vor.u32 %v3832_v29, %v3828_v7  ;;  %v5677_v29 = vrot.slane %v5675_v19, 1  ;;  %v13670_v19 = vld [vmem:[#allocation2 + $0x6c] sm:$0xff] }
 0x5f2   :  { %17555 = vst [vmem:[#allocation53_spill] sm:$0xff] %v13625_v23  ;;  %v3840_v20 = vshrl.u32 %v13670_v19, 16  ;;  %v17578_v23 = vld [vmem:[#allocation32_spill] sm:$0xff] }
 0x5f3   :  { %v13630_v17 = vpop.permute.xlu1 %6154  ;;  %v3837_v3 = vrot.slane %v3835_v12, 1  ;;  %v17562_v12 = vld [vmem:[#allocation67_spill] sm:$0xff] }
 0x5f4   :  { %17557 = vst [vmem:[#allocation93_spill] sm:$0xff] %v13630_v17  ;;  %v5680_v7 = vshll.u32 %v17562_v12, 16  ;;  %v3871_v17 = vshll.u32 %v17578_v23, 16 }
 0x5f5   :  { %6164 = vrot.lane.b32.xlu2 %v6086_v27, %s9172_s30  ;;  %v4750_v27 = vor.u32 %v4749_v2, %v4745_v55  ;;  %v3838_v31 = vsel %vm3730_vm9, %v3833_v1, %v3837_v3  ;;  %v4757_v2 = vshrl.u32 %v9096_v41, 16  ;;  %v17563_v55 = vld [vmem:[#allocation29_spill] sm:$0xff]  ;;  %v5673_v3 = vshrl.u32 %v9097_v35, 16 }
 0x5f6   :  { %v5682_v12 = vrot.slane %v5680_v7, 1  ;;  %v3434_v7 = vld [vmem:[#allocation2 + $0x110] sm:$0x1] }
 0x5f7   :  { %5240 = vrot.lane.b32.xlu0 %v5164_v11, %s9183_s17  ;;  %v13650_v14 = vpop.permute.xlu2 %4528  ;;  %v4759_v11 = vshll.u32 %v9096_v41, 16  ;;  %v4755_v52 = vsel %vm3730_vm9, %v4750_v27, %v4754_v10  ;;  %v4766_v10 = vrot.slane %v4764_v9, 1  ;;  %v5678_v41 = vor.u32 %v5677_v29, %v5673_v3 }
 0x5f8   :  { %17560 = vst [vmem:[#allocation94_spill] sm:$0xff] %v13650_v14  ;;  %v5541_v14 = vunpack.c.l.b16 %v3431_v0  ;;  %v5694_v3 = vrot.slane %v5692_v56, 1 }
 0x5f9   :  { %4129 = vrot.lane.b32.xlu1 %v3826_v49, %s9181_s7  ;;  %v13648_v37 = vpop.permute.xlu0 %5228  ;;  %v4761_v49 = vrot.slane %v4759_v11, 1  ;;  %8237 = vmatmul.msk.bf16.gmra.mxu3 %vm189_vm0, %v17563_v55  ;;  %v9098_v11 = vld [vmem:[#allocation2 + $0x78] sm:$0xff]  ;;  %v5683_v9 = vsel %vm3730_vm9, %v5678_v41, %v5682_v12 }
 0x5fa   :  { %17559 = vst [vmem:[#allocation49_spill] sm:$0xff] %v13648_v37  ;;  %v13682_v29 = vpack.c.b16 %v5541_v14, %v5541_v14 }
 0x5fb   :  { %v13652_v54 = vpop.permute.xlu1 %4304  ;;  %v4762_v27 = vor.u32 %v4761_v49, %v4757_v2  ;;  %v5685_v49 = vshrl.u32 %v9098_v11, 16 }
 0x5fc   :  { %17561 = vst [vmem:[#allocation95_spill] sm:$0xff] %v13652_v54  ;;  %v13673_v54 = vld [vmem:[#allocation2 + $0xfc] sm:$0xff]  ;;  %v6088_v14 = vrot.slane %v13682_v29, 1 }
 0x5fd   :  { %4534 = vrot.lane.b32.xlu2 %v13597_v13, %s9182_s14  ;;  %v4767_v35 = vsel %vm3730_vm9, %v4762_v27, %v4766_v10 }
 0x5ff   :  { %4131 = vrot.lane.b32.xlu0 %v3838_v31, %s9181_s7  ;;  %v13666_v34 = vpop.permute.xlu2 %5456  ;;  %v5687_v31 = vshll.u32 %v9098_v11, 16  ;;  %v9101_v11 = vld [vmem:[#allocation2 + $0xc] sm:$0xff] }
 0x600   :  { %17565 = vst [vmem:[#allocation29_spill] sm:$0xff] %v13666_v34 }
 0x601   :  { %5058 = vrot.lane.b32.xlu1 %v4755_v52, %s9174_s0  ;;  %v13664_v1 = vpop.permute.xlu0 %6156  ;;  %v3842_v52 = vshll.u32 %v13670_v19, 16  ;;  %v5689_v55 = vrot.slane %v5687_v31, 1 }
 0x602   :  { %17564 = vst [vmem:[#allocation67_spill] sm:$0xff] %v13664_v1  ;;  %v3847_v1 = vshll.u32 %v13225_v32, 16 }
 0x603   :  { %v13668_v13 = vpop.permute.xlu1 %5232  ;;  %v3844_v34 = vrot.slane %v3842_v52, 1  ;;  %v5690_v32 = vor.u32 %v5689_v55, %v5685_v49  ;;  %v5542_v52 = vunpack.c.l.b16 %v3434_v7  ;;  %v8865_v49 = vld [vmem:[#allocation2 + $0x108] sm:$0xff] }
 0x604   :  { %17566 = vst [vmem:[#allocation96_spill] sm:$0xff] %v13668_v13  ;;  %v3849_v10 = vrot.slane %v3847_v1, 1  ;;  %v6087_v13 = vrot.slane %v13673_v54, 1 }
 0x605   :  { %5462 = vrot.lane.b32.xlu2 %v13673_v54, %s9176_s16  ;;  %v3845_v27 = vor.u32 %v3844_v34, %v3840_v20  ;;  %v13695_v37 = vpack.c.b16 %v5542_v52, %v5542_v52  ;;  %v4776_v34 = vshll.u32 %v13248_v63, 16  ;;  %v17568_v20 = vld [vmem:[#allocation35_spill] sm:$0xff]  ;;  %v17569_v52 = vld [vmem:[#allocation81_spill] sm:$0xff] }
 0x606   :  { %v6089_v1 = vsel %vm4179_vm10, %v6087_v13, %v6088_v14  ;;  %v6090_v14 = vrot.slane %v8865_v49, 1 }
 0x607   :  { %5060 = vrot.lane.b32.xlu0 %v4767_v35, %s9174_s0  ;;  %v13688_v0 = vpop.permute.xlu2 %4121  ;;  %v9100_v35 = vld [vmem:[#allocation2 + $0x78] sm:$0xff] }
 0x608   :  { %v4771_v41 = vshll.u32 %v9100_v35, 16  ;;  %v4769_v7 = vshrl.u32 %v9100_v35, 16 }
 0x609   :  { %5986 = vrot.lane.b32.xlu1 %v5683_v9, %s9184_s18  ;;  %v13686_v2 = vpop.permute.xlu0 %4306  ;;  %v5695_v9 = vsel %vm3730_vm9, %v5690_v32, %v5694_v3  ;;  %8238 = vmatmul.msk.bf16.gmra.mxu3 %vm189_vm0, %v17568_v20 }
 0x60a   :  { %17567 = vst [vmem:[#allocation97_spill] sm:$0xff] %v13686_v2  ;;  %v3850_v2 = vsel %vm3730_vm9, %v3845_v27, %v3849_v10  ;;  %v4773_v56 = vrot.slane %v4771_v41, 1  ;;  %v9102_v10 = vld [vmem:[#allocation2 + $0x84] sm:$0xff] }
 0x60b   :  { %v4118_v31 = vpop.permute.xlu1 %4117  ;;  %v5699_v13 = vshll.u32 %v9102_v10, 16 }
 0x60c   :  { %v6199_v12 = vsel %vm1983_vm14, %v9101_v11, %v4118_v31  ;;  %v6091_v31 = vrot.slane %v13695_v37, 1  ;;  %v4774_v27 = vor.u32 %v4773_v56, %v4769_v7  ;;  %v3244_v56 = vld [vmem:[#allocation2 + $0x104] sm:$0x1] }
 0x60d   :  { %4133 = vrot.lane.b32.xlu2 %v3850_v2, %s9181_s7  ;;  %v6263_v55 = vsel %vm189_vm0, %v6199_v12, %v13283_v59  ;;  %v4778_v2 = vrot.slane %v4776_v34, 1  ;;  %v5701_v12 = vrot.slane %v5699_v13, 1  ;;  %v5697_v34 = vshrl.u32 %v9102_v10, 16 }
 0x60e   :  { %v6328_v59 = vsel %vm6324_vm12, %v6263_v55, %v17569_v52  ;;  %v6092_v35 = vsel %vm4179_vm10, %v6090_v14, %v6091_v31  ;;  %v3685_v52 = vunpack.c.l.b16 %v3244_v56  ;;  %v13727_v14 = vld [vmem:[#allocation2 + $0x78] sm:$0xff] }
 0x60f   :  { %5988 = vrot.lane.b32.xlu0 %v5695_v9, %s9184_s18  ;;  %v13706_v3 = vpop.permute.xlu2 %5050  ;;  %v4779_v11 = vsel %vm3730_vm9, %v4774_v27, %v4778_v2  ;;  %v17570_v9 = vld [vmem:[#allocation65_spill] sm:$0xff]  ;;  %v5702_v2 = vor.u32 %v5701_v12, %v5697_v34  ;;  %v13745_v56 = vld [vmem:[#allocation2 + $0xfc] sm:$0xff]  ;;  %v17574_v34 = vld [vmem:[#allocation14_spill] sm:$0xff] }
 0x611   :  { %6166 = vrot.lane.b32.xlu1 %v6089_v1, %s9172_s30  ;;  %v4120_v32 = vpop.permute.xlu0 %4119  ;;  %v5704_v1 = vshll.u32 %v17570_v9, 16  ;;  %v13738_v9 = vpack.c.b16 %v3685_v52, %v3685_v52 }
 0x613   :  { %v5047_v63 = vpop.permute.xlu1 %5046  ;;  %v5706_v13 = vrot.slane %v5704_v1, 1  ;;  %17572 = vst [vmem:[#allocation35_spill] sm:$0xff] %v13738_v9  ;;  %v17573_v1 = vld [vmem:[#allocation74_spill] sm:$0xff] }
 0x614   :  { %v6392_v41 = vsel %vm669_vm3, %v6328_v59, %v5047_v63  ;;  %v17571_v63 = vld [vmem:[#allocation86_spill] sm:$0xff] }
 0x615   :  { %v6457_v20 = vsel %vm6453_vm13, %v6392_v41, %v13306_v16  ;;  %5062 = vrot.lane.b32.xlu2 %v4779_v11, %s9174_s0  ;;  %v9103_v16 = vld [vmem:[#allocation2 + $0x18] sm:$0xff]  ;;  %v5707_v12 = vsel %vm3730_vm9, %v5702_v2, %v5706_v13  ;;  %v3852_v2 = vshrl.u32 %v13727_v14, 16  ;;  %v13754_v13 = vld [vmem:[#allocation2 + $0x84] sm:$0xff] }
 0x616   :  { %v6521_v31 = vsel %vm671_vm4, %v6457_v20, %v17571_v63  ;;  %v6201_v59 = vsel %vm1983_vm14, %v9103_v16, %v4120_v32  ;;  %v3859_v20 = vshll.u32 %v17573_v1, 16  ;;  %v3866_v52 = vshll.u32 %v13754_v13, 16 }
 0x617   :  { %6168 = vrot.lane.b32.xlu0 %v6092_v35, %s9172_s30  ;;  %v13721_v7 = vpop.permute.xlu2 %5978  ;;  %v13733_v35 = vld [vmem:[#allocation2 + $0x108] sm:$0xff]  ;;  %v6265_v11 = vsel %vm189_vm0, %v6201_v59, %v13391_v40  ;;  %v4238_v59 = vrot.slane %v13738_v9, 1  ;;  %v4237_v1 = vrot.slane %v13745_v56, 1 }
 0x618   :  { %v17575_v40 = vld [vmem:[#allocation69_spill] sm:$0xff] }
 0x619   :  { %4536 = vrot.lane.b32.xlu1 %v13621_v61, %s9182_s14  ;;  %v5049_v55 = vpop.permute.xlu0 %5048  ;;  %v3854_v61 = vshll.u32 %v13727_v14, 16  ;;  %8239 = vmatmul.msk.bf16.gmra.mxu3 %vm189_vm0, %v17574_v34  ;;  %v6330_v63 = vsel %vm6324_vm12, %v6265_v11, %v17575_v40  ;;  %v13764_v40 = vld [vmem:[#allocation2 + $0x114] sm:$0xff] }
 0x61a   :  { %v6394_v16 = vsel %vm669_vm3, %v6330_v63, %v5049_v55  ;;  %v4239_v55 = vsel %vm4179_vm10, %v4237_v1, %v4238_v59 }
 0x61b   :  { %v5975_v27 = vpop.permute.xlu1 %5974  ;;  %v3856_v32 = vrot.slane %v3854_v61, 1  ;;  %v6459_v34 = vsel %vm6453_vm13, %v6394_v16, %v13404_v21  ;;  %v17579_v21 = vld [vmem:[#allocation54_spill] sm:$0xff]  ;;  %v3437_v16 = vld [vmem:[#allocation2 + $0x11c] sm:$0x1] }
 0x61c   :  { %v6586_v41 = vsel %vm6582_vm15, %v6521_v31, %v5975_v27  ;;  %v5543_v9 = vunpack.c.l.b16 %v3437_v16 }
 0x61d   :  { %v6650_v10 = vsel %vm673_vm5, %v6586_v41, %v13328_v5  ;;  %5990 = vrot.lane.b32.xlu2 %v5707_v12, %s9184_s18  ;;  %v3340_v5 = vld [vmem:[#allocation2 + $0x110] sm:$0x1]  ;;  %v3857_v61 = vor.u32 %v3856_v32, %v3852_v2  ;;  %v9106_v12 = vld [vmem:[#allocation2 + $0x84] sm:$0xff]  ;;  %v4788_v2 = vshll.u32 %v17579_v21, 16 }
 0x61e   :  { %8702 = vmatmul.msk.bf16.gmra.mxu0 %vm6747_vm1, %v6650_v10  ;;  %v4615_v41 = vunpack.c.l.b16 %v3340_v5  ;;  %v3861_v10 = vrot.slane %v3859_v20, 1  ;;  %v4783_v11 = vshll.u32 %v9106_v12, 16  ;;  %v3864_v20 = vshrl.u32 %v13754_v13, 16  ;;  %v9107_v21 = vld [vmem:[#allocation2 + $0x90] sm:$0xff] }
 0x61f   :  { %4538 = vrot.lane.b32.xlu0 %v13733_v35, %s9182_s14  ;;  %v13751_v27 = vpop.permute.xlu2 %6002  ;;  %v4795_v22 = vshll.u32 %v9107_v21, 16 }
 0x620   :  { %17576 = vst [vmem:[#allocation81_spill] sm:$0xff] %v13751_v27  ;;  %v3868_v27 = vrot.slane %v3866_v52, 1  ;;  %v13768_v63 = vpack.c.b16 %v4615_v41, %v4615_v41  ;;  %v3862_v32 = vsel %vm3730_vm9, %v3857_v61, %v3861_v10  ;;  %v4785_v5 = vrot.slane %v4783_v11, 1  ;;  %v17580_v52 = vld [vmem:[#allocation17_spill] sm:$0xff] }
 0x621   :  { %5464 = vrot.lane.b32.xlu1 %v8865_v49, %s9176_s16  ;;  %v5977_v31 = vpop.permute.xlu0 %5976  ;;  %v6523_v23 = vsel %vm671_vm4, %v6459_v34, %v17580_v52  ;;  %v4781_v61 = vshrl.u32 %v9106_v12, 16  ;;  %v6203_v34 = vsel %vm1983_vm14, %v9108_v57, %v13688_v0  ;;  %v9109_v52 = vld [vmem:[#allocation2 + $0x90] sm:$0xff]  ;;  %v4797_v0 = vrot.slane %v4795_v22, 1 }
 0x622   :  { %v6588_v59 = vsel %vm6582_vm15, %v6523_v23, %v5977_v31  ;;  %v5166_v11 = vrot.slane %v13768_v63, 1  ;;  %v4790_v31 = vrot.slane %v4788_v2, 1  ;;  %v5711_v23 = vshll.u32 %v9109_v52, 16  ;;  %v17584_v2 = vld [vmem:[#allocation10_spill] sm:$0xff] }
 0x623   :  { %v13758_v49 = vpop.permute.xlu1 %6160  ;;  %v6267_v16 = vsel %vm189_vm0, %v6203_v34, %v13417_v50  ;;  %v17586_v50 = vld [vmem:[#allocation23_spill] sm:$0xff]  ;;  %v5709_v34 = vshrl.u32 %v9109_v52, 16 }
 0x624   :  { %17577 = vst [vmem:[#allocation65_spill] sm:$0xff] %v13758_v49  ;;  %v3873_v49 = vrot.slane %v3871_v17, 1  ;;  %v5165_v17 = vrot.slane %v13733_v35, 1  ;;  %v5713_v35 = vrot.slane %v5711_v23, 1  ;;  %v6332_v22 = vsel %vm6324_vm12, %v6267_v16, %v17586_v50  ;;  %v17590_v50 = vld [vmem:[#allocation76_spill] sm:$0xff] }
 0x625   :  { %4314 = vrot.lane.b32.xlu2 %v4239_v55, %s9175_s15  ;;  %v3869_v55 = vor.u32 %v3868_v27, %v3864_v20  ;;  %v6652_v27 = vsel %vm673_vm5, %v6588_v59, %v13421_v26  ;;  %v4800_v20 = vshll.u32 %v13278_v60, 16  ;;  %v5716_v59 = vshll.u32 %v17584_v2, 16 }
 0x626   :  { %v5167_v57 = vsel %vm4179_vm10, %v5165_v17, %v5166_v11  ;;  %v4793_v60 = vshrl.u32 %v9107_v21, 16  ;;  %v6396_v23 = vsel %vm669_vm3, %v6332_v22, %v13706_v3  ;;  %v5728_v3 = vshll.u32 %v17590_v50, 16 }
 0x627   :  { %5466 = vrot.lane.b32.xlu0 %v13764_v40, %s9176_s16  ;;  %v13782_v1 = vpop.permute.xlu2 %4308  ;;  %v3874_v12 = vsel %vm3730_vm9, %v3869_v55, %v3873_v49  ;;  %v3247_v49 = vld [vmem:[#allocation2 + $0x110] sm:$0x1]  ;;  %v4802_v11 = vrot.slane %v4800_v20, 1  ;;  %v6093_v20 = vrot.slane %v13764_v40, 1  ;;  %v6461_v52 = vsel %vm6453_vm13, %v6396_v23, %v13433_v25  ;;  %v3250_v25 = vld [vmem:[#allocation2 + $0x11c] sm:$0x1] }
 0x628   :  { %17582 = vst [vmem:[#allocation74_spill] sm:$0xff] %v13782_v1  ;;  %v17585_v55 = vld [vmem:[#allocation70_spill] sm:$0xff]  ;;  %v4798_v21 = vor.u32 %v4797_v0, %v4793_v60  ;;  %v3686_v2 = vunpack.c.l.b16 %v3247_v49  ;;  %v17592_v49 = vld [vmem:[#allocation33_spill] sm:$0xff] }
 0x629   :  { %4135 = vrot.lane.b32.xlu1 %v3862_v32, %s9181_s7  ;;  %v13780_v41 = vpop.permute.xlu0 %5234  ;;  %v4786_v32 = vor.u32 %v4785_v5, %v4781_v61  ;;  %v13798_v5 = vpack.c.b16 %v5543_v9, %v5543_v9  ;;  %8240 = vmatmul.msk.bf16.gmra.mxu3 %vm189_vm0, %v17585_v55 }
 0x62a   :  { %17581 = vst [vmem:[#allocation86_spill] sm:$0xff] %v13780_v41  ;;  %v4803_v22 = vsel %vm3730_vm9, %v4798_v21, %v4802_v11 }
 0x62b   :  { %v13784_v10 = vpop.permute.xlu1 %4530  ;;  %v4791_v26 = vsel %vm3730_vm9, %v4786_v32, %v4790_v31  ;;  %v9110_v32 = vld [vmem:[#allocation2 + $0x9c] sm:$0xff]  ;;  %v6094_v17 = vrot.slane %v13798_v5, 1 }
 0x62c   :  { %17583 = vst [vmem:[#allocation14_spill] sm:$0xff] %v13784_v10  ;;  %v5723_v31 = vshll.u32 %v9110_v32, 16  ;;  %v5721_v40 = vshrl.u32 %v9110_v32, 16  ;;  %v5730_v32 = vrot.slane %v5728_v3, 1  ;;  %v17609_v10 = vld [vmem:[#allocation85_spill] sm:$0xff] }
 0x62d   :  { %5242 = vrot.lane.b32.xlu2 %v5167_v57, %s9183_s17  ;;  %v5714_v57 = vor.u32 %v5713_v35, %v5709_v34  ;;  %v6095_v0 = vsel %vm4179_vm10, %v6093_v20, %v6094_v17  ;;  %v6525_v34 = vsel %vm671_vm4, %v6461_v52, %v17592_v49  ;;  %v3687_v20 = vunpack.c.l.b16 %v3250_v25  ;;  %v9112_v52 = vld [vmem:[#allocation2 + $0x9c] sm:$0xff]  ;;  %v17594_v25 = vld [vmem:[#allocation78_spill] sm:$0xff] }
 0x62e   :  { %8703 = vmatmul.msk.bf16.gmra.mxu0 %vm6747_vm1, %v6652_v27  ;;  %v5725_v55 = vrot.slane %v5723_v31, 1  ;;  %v3343_v31 = vld [vmem:[#allocation2 + $0x11c] sm:$0x1]  ;;  %v4807_v50 = vshll.u32 %v9112_v52, 16 }
 0x62f   :  { %4137 = vrot.lane.b32.xlu0 %v3874_v12, %s9181_s7  ;;  %v13811_v61 = vpop.permute.xlu2 %5236  ;;  %v13818_v12 = vld [vmem:[#allocation2 + $0x90] sm:$0xff] }
 0x630   :  { %17588 = vst [vmem:[#allocation32_spill] sm:$0xff] %v13811_v61  ;;  %v3878_v16 = vshll.u32 %v13818_v12, 16  ;;  %v17591_v61 = vld [vmem:[#allocation75_spill] sm:$0xff]  ;;  %v3876_v11 = vshrl.u32 %v13818_v12, 16  ;;  %v5726_v17 = vor.u32 %v5725_v55, %v5721_v40  ;;  %v4809_v40 = vrot.slane %v4807_v50, 1 }
 0x631   :  { %5064 = vrot.lane.b32.xlu1 %v4791_v26, %s9174_s0  ;;  %v13809_v9 = vpop.permute.xlu0 %6162  ;;  %v5718_v26 = vrot.slane %v5716_v59, 1  ;;  %v3883_v1 = vshll.u32 %v17591_v61, 16  ;;  %v13831_v59 = vpack.c.b16 %v3686_v2, %v3686_v2  ;;  %v6590_v61 = vsel %vm6582_vm15, %v6525_v34, %v13721_v7  ;;  %v13870_v50 = vld [vmem:[#allocation2 + $0x114] sm:$0xff] }
 0x632   :  { %17587 = vst [vmem:[#allocation69_spill] sm:$0xff] %v13809_v9  ;;  %v3880_v60 = vrot.slane %v3878_v16, 1  ;;  %v13843_v16 = vld [vmem:[#allocation2 + $0x108] sm:$0xff]  ;;  %v6654_v7 = vsel %vm673_vm5, %v6590_v61, %v13452_v47  ;;  %v5731_v55 = vsel %vm3730_vm9, %v5726_v17, %v5730_v32  ;;  %v4812_v34 = vshll.u32 %v17594_v25, 16  ;;  %v13864_v17 = vld [vmem:[#allocation2 + $0x114] sm:$0xff] }
 0x633   :  { %v13815_v27 = vpop.permute.xlu1 %5458  ;;  %v5719_v35 = vsel %vm3730_vm9, %v5714_v57, %v5718_v26  ;;  %v3885_v2 = vrot.slane %v3883_v1, 1  ;;  %v4240_v3 = vrot.slane %v13843_v16, 1  ;;  %v4805_v32 = vshrl.u32 %v9112_v52, 16 }
 0x634   :  { %17589 = vst [vmem:[#allocation54_spill] sm:$0xff] %v13815_v27  ;;  %v3881_v26 = vor.u32 %v3880_v60, %v3876_v11  ;;  %v13853_v60 = vpack.c.b16 %v3687_v20, %v3687_v20  ;;  %v3346_v11 = vld [vmem:[#allocation2 + $0x128] sm:$0x1] }
 0x635   :  { %6170 = vrot.lane.b32.xlu2 %v6095_v0, %s9172_s30  ;;  %v4616_v0 = vunpack.c.l.b16 %v3343_v31 }
 0x636   :  { %v3886_v1 = vsel %vm3730_vm9, %v3881_v26, %v3885_v2  ;;  %v17595_v26 = vld [vmem:[#allocation36_spill] sm:$0xff] }
 0x637   :  { %5066 = vrot.lane.b32.xlu0 %v4803_v22, %s9174_s0  ;;  %v13841_v21 = vpop.permute.xlu2 %4127  ;;  %v4241_v22 = vrot.slane %v13831_v59, 1  ;;  %v13859_v31 = vpack.c.b16 %v4616_v0, %v4616_v0 }
 0x639   :  { %5992 = vrot.lane.b32.xlu1 %v5719_v35, %s9184_s18  ;;  %v13839_v23 = vpop.permute.xlu0 %4532  ;;  %v9113_v35 = vld [vmem:[#allocation2 + $0x30] sm:$0xff]  ;;  %v4242_v47 = vsel %vm4179_vm10, %v4240_v3, %v4241_v22  ;;  %8241 = vmatmul.msk.bf16.gmra.mxu3 %vm189_vm0, %v17595_v26  ;;  %v4617_v22 = vunpack.c.l.b16 %v3346_v11  ;;  %v17596_v3 = vld [vmem:[#allocation89_spill] sm:$0xff]  ;;  %v5168_v11 = vrot.slane %v13870_v50, 1 }
 0x63a   :  { %17593 = vst [vmem:[#allocation17_spill] sm:$0xff] %v13839_v23  ;;  %v4243_v23 = vrot.slane %v13864_v17, 1 }
 0x63b   :  { %v4124_v57 = vpop.permute.xlu1 %4123  ;;  %v13881_v9 = vpack.c.b16 %v4617_v22, %v4617_v22  ;;  %v3443_v22 = vld [vmem:[#allocation2 + $0x134] sm:$0x1] }
 0x63c   :  { %v6205_v49 = vsel %vm1983_vm14, %v9113_v35, %v4124_v57  ;;  %v3440_v57 = vld [vmem:[#allocation2 + $0x128] sm:$0x1]  ;;  %v4810_v35 = vor.u32 %v4809_v40, %v4805_v32 }
 0x63d   :  { %4139 = vrot.lane.b32.xlu2 %v3886_v1, %s9181_s7  ;;  %v6269_v61 = vsel %vm189_vm0, %v6205_v49, %v13348_v44  ;;  %v4814_v44 = vrot.slane %v4812_v34, 1  ;;  %v9114_v49 = vld [vmem:[#allocation2 + $0xa8] sm:$0xff]  ;;  %v5169_v1 = vrot.slane %v13859_v31, 1  ;;  %v5544_v25 = vunpack.c.l.b16 %v3440_v57 }
 0x63e   :  { %8704 = vmatmul.msk.bf16.gmra.mxu0 %vm6747_vm1, %v6654_v7  ;;  %v4244_v7 = vrot.slane %v13853_v60, 1  ;;  %v6334_v52 = vsel %vm6324_vm12, %v6269_v61, %v17596_v3  ;;  %v5740_v61 = vshll.u32 %v13337_v45, 16  ;;  %v5172_v45 = vrot.slane %v13881_v9, 1 }
 0x63f   :  { %5994 = vrot.lane.b32.xlu0 %v5731_v55, %s9184_s18  ;;  %v13868_v20 = vpop.permute.xlu2 %5056  ;;  %v5735_v55 = vshll.u32 %v9114_v49, 16  ;;  %v4815_v34 = vsel %vm3730_vm9, %v4810_v35, %v4814_v44  ;;  %v13891_v3 = vpack.c.b16 %v5544_v25, %v5544_v25 }
 0x640   :  { %v4245_v40 = vsel %vm4179_vm10, %v4243_v23, %v4244_v7  ;;  %v13894_v23 = vld [vmem:[#allocation2 + $0x120] sm:$0xff]  ;;  %v5733_v7 = vshrl.u32 %v9114_v49, 16  ;;  %v5742_v25 = vrot.slane %v5740_v61, 1 }
 0x641   :  { %4316 = vrot.lane.b32.xlu1 %v4242_v47, %s9175_s15  ;;  %v4126_v2 = vpop.permute.xlu0 %4125  ;;  %v13876_v47 = vpop.f32.mrf.mxu3  ;;  %v5737_v32 = vrot.slane %v5735_v55, 1  ;;  %v17598_v55 = vld [vmem:[#allocation73_spill] sm:$0xff]  ;;  %v6097_v49 = vrot.slane %v13891_v3, 1 }
 0x642   :  { %17597 = vst [vmem:[#allocation10_spill] sm:$0xff] %v13876_v47  ;;  %v13906_v47 = vld [vmem:[#allocation2 + $0x9c] sm:$0xff] }
 0x643   :  { %v5053_v0 = vpop.permute.xlu1 %5052  ;;  %v3890_v27 = vshll.u32 %v13906_v47, 16 }
 0x644   :  { %v6398_v26 = vsel %vm669_vm3, %v6334_v52, %v5053_v0  ;;  %v5170_v0 = vsel %vm4179_vm10, %v5168_v11, %v5169_v1  ;;  %v5738_v1 = vor.u32 %v5737_v32, %v5733_v7  ;;  %v5545_v11 = vunpack.c.l.b16 %v3443_v22 }
 0x645   :  { %v6463_v57 = vsel %vm6453_vm13, %v6398_v26, %v13369_v4  ;;  %5068 = vrot.lane.b32.xlu2 %v4815_v34, %s9174_s0  ;;  %v13899_v4 = vld [vmem:[#allocation2 + $0x120] sm:$0xff] }
 0x646   :  { %v6527_v52 = vsel %vm671_vm4, %v6463_v57, %v17598_v55  ;;  %v5171_v57 = vrot.slane %v13894_v23, 1  ;;  %v6096_v32 = vrot.slane %v13899_v4, 1  ;;  %v5743_v7 = vsel %vm3730_vm9, %v5738_v1, %v5742_v25 }
 0x647   :  { %4318 = vrot.lane.b32.xlu0 %v4245_v40, %s9175_s15  ;;  %v13896_v44 = vpop.permute.xlu2 %5984  ;;  %v9115_v40 = vld [vmem:[#allocation2 + $0x3c] sm:$0xff]  ;;  %v13920_v55 = vpack.c.b16 %v5545_v11, %v5545_v11 }
 0x648   :  { %v6207_v34 = vsel %vm1983_vm14, %v9115_v40, %v4126_v2  ;;  %v5173_v22 = vsel %vm4179_vm10, %v5171_v57, %v5172_v45  ;;  %v13927_v40 = vld [vmem:[#allocation2 + $0x12c] sm:$0xff]  ;;  %v17603_v45 = vld [vmem:[#allocation43_spill] sm:$0xff] }
 0x649   :  { %5244 = vrot.lane.b32.xlu1 %v5170_v0, %s9183_s17  ;;  %v5055_v35 = vpop.permute.xlu0 %5054  ;;  %v13914_v61 = vpop.f32.mrf.mxu3  ;;  %v6271_v2 = vsel %vm189_vm0, %v6207_v34, %v13437_v53  ;;  %17600 = vst [vmem:[#allocation23_spill] sm:$0xff] %v13920_v55  ;;  %v17602_v53 = vld [vmem:[#allocation16_spill] sm:$0xff]  ;;  %v3888_v34 = vshrl.u32 %v13906_v47, 16  ;;  %v13940_v57 = vld [vmem:[#allocation2 + $0xa8] sm:$0xff] }
 0x64a   :  { %17599 = vst [vmem:[#allocation70_spill] sm:$0xff] %v13914_v61  ;;  %8242 = vmatmul.msk.bf16.gmra.mxu3 %vm189_vm0, %v17602_v53  ;;  %v6336_v1 = vsel %vm6324_vm12, %v6271_v2, %v17603_v45  ;;  %v6099_v2 = vrot.slane %v13927_v40, 1 }
 0x64b   :  { %v5981_v26 = vpop.permute.xlu1 %5980  ;;  %17606 = vst [vmem:[#allocation33_spill] sm:$0xff] %v13940_v57 }
 0x64c   :  { %v6592_v0 = vsel %vm6582_vm15, %v6527_v52, %v5981_v26  ;;  %v17601_v52 = vld [vmem:[#allocation58_spill] sm:$0xff] }
 0x64d   :  { %v6656_v41 = vsel %vm673_vm5, %v6592_v0, %v13389_v33  ;;  %5996 = vrot.lane.b32.xlu2 %v5743_v7, %s9184_s18  ;;  %v6098_v33 = vsel %vm4179_vm10, %v6096_v32, %v6097_v49  ;;  %v3895_v26 = vshll.u32 %v17601_v52, 16  ;;  %v6400_v0 = vsel %vm669_vm3, %v6336_v1, %v5055_v35 }
 0x64e   :  { %8705 = vmatmul.msk.bf16.gmra.mxu0 %vm6747_vm1, %v6656_v41  ;;  %v3892_v41 = vrot.slane %v3890_v27, 1  ;;  %v6100_v49 = vrot.slane %v13920_v55, 1  ;;  %v3902_v32 = vshll.u32 %v13940_v57, 16  ;;  %v6465_v53 = vsel %vm6453_vm13, %v6400_v0, %v13457_v48  ;;  %v9120_v55 = vld [vmem:[#allocation2 + $0x48] sm:$0xff] }
 0x64f   :  { %5246 = vrot.lane.b32.xlu0 %v5173_v22, %s9183_s17  ;;  %v13933_v11 = vpop.permute.xlu2 %6164  ;;  %v3897_v7 = vrot.slane %v3895_v26, 1  ;;  %v3907_v1 = vshll.u32 %v13323_v28, 16  ;;  %v6529_v48 = vsel %vm671_vm4, %v6465_v53, %v17609_v10  ;;  %v3900_v28 = vshrl.u32 %v13940_v57, 16  ;;  %v9121_v57 = vld [vmem:[#allocation2 + $0xb4] sm:$0xff] }
 0x650   :  { %17604 = vst [vmem:[#allocation76_spill] sm:$0xff] %v13933_v11  ;;  %v3893_v22 = vor.u32 %v3892_v41, %v3888_v34  ;;  %v6101_v45 = vsel %vm4179_vm10, %v6099_v2, %v6100_v49  ;;  %v3904_v35 = vrot.slane %v3902_v32, 1  ;;  %v17607_v34 = vld [vmem:[#allocation38_spill] sm:$0xff]  ;;  %v3253_v11 = vld [vmem:[#allocation2 + $0x128] sm:$0x1]  ;;  %v6209_v10 = vsel %vm1983_vm14, %v9120_v55, %v13841_v21  ;;  %v17615_v55 = vld [vmem:[#allocation8_spill] sm:$0xff] }
 0x651   :  { %6172 = vrot.lane.b32.xlu1 %v6098_v33, %s9172_s30  ;;  %v5983_v25 = vpop.permute.xlu0 %5982  ;;  %v9118_v33 = vld [vmem:[#allocation2 + $0xa8] sm:$0xff]  ;;  %v4824_v61 = vshll.u32 %v17607_v34, 16  ;;  %v3909_v34 = vrot.slane %v3907_v1, 1 }
 0x652   :  { %v4819_v52 = vshll.u32 %v9118_v33, 16  ;;  %v3898_v41 = vsel %vm3730_vm9, %v3893_v22, %v3897_v7  ;;  %v6594_v0 = vsel %vm6582_vm15, %v6529_v48, %v5983_v25  ;;  %v4817_v22 = vshrl.u32 %v9118_v33, 16  ;;  %v9119_v7 = vld [vmem:[#allocation2 + $0xb4] sm:$0xff] }
 0x653   :  { %v13937_v27 = vpop.permute.xlu1 %4147  ;;  %v5747_v25 = vshll.u32 %v9121_v57, 16  ;;  %v6658_v48 = vsel %vm673_vm5, %v6594_v0, %v13480_v38  ;;  %v4829_v38 = vshrl.u32 %v9119_v7, 16 }
 0x654   :  { %17605 = vst [vmem:[#allocation75_spill] sm:$0xff] %v13937_v27  ;;  %v4821_v26 = vrot.slane %v4819_v52, 1  ;;  %v13953_v27 = vpop.f32.mrf.mxu3  ;;  %v4831_v52 = vshll.u32 %v9119_v7, 16 }
 0x655   :  { %4540 = vrot.lane.b32.xlu2 %v13870_v50, %s9182_s14  ;;  %17608 = vst [vmem:[#allocation78_spill] sm:$0xff] %v13953_v27  ;;  %v3688_v27 = vunpack.c.l.b16 %v3253_v11 }
 0x656   :  { %v4822_v53 = vor.u32 %v4821_v26, %v4817_v22  ;;  %v4833_v33 = vrot.slane %v4831_v52, 1  ;;  %v5752_v26 = vshll.u32 %v17615_v55, 16  ;;  %v17618_v22 = vld [vmem:[#allocation41_spill] sm:$0xff] }
 0x657   :  { %6174 = vrot.lane.b32.xlu0 %v6101_v45, %s9172_s30  ;;  %v13962_v32 = vpop.permute.xlu2 %4534  ;;  %v3905_v45 = vor.u32 %v3904_v35, %v3900_v28  ;;  %v13975_v1 = vpack.c.b16 %v3688_v27, %v3688_v27  ;;  %v3349_v28 = vld [vmem:[#allocation2 + $0x134] sm:$0x1]  ;;  %v17617_v27 = vld [vmem:[#allocation37_spill] sm:$0xff] }
 0x658   :  { %17611 = vst [vmem:[#allocation89_spill] sm:$0xff] %v13962_v32  ;;  %v17613_v32 = vld [vmem:[#allocation66_spill] sm:$0xff]  ;;  %v4834_v7 = vor.u32 %v4833_v33, %v4829_v38 }
 0x659   :  { %4141 = vrot.lane.b32.xlu1 %v3898_v41, %s9181_s7  ;;  %v13960_v49 = vpop.permute.xlu0 %5460  ;;  %v4826_v41 = vrot.slane %v4824_v61, 1  ;;  %v3910_v11 = vsel %vm3730_vm9, %v3905_v45, %v3909_v34  ;;  %v5749_v61 = vrot.slane %v5747_v25, 1  ;;  %v4247_v25 = vrot.slane %v13975_v1, 1 }
 0x65a   :  { %17610 = vst [vmem:[#allocation36_spill] sm:$0xff] %v13960_v49  ;;  %v4836_v49 = vshll.u32 %v17613_v32, 16  ;;  %v13985_v32 = vld [vmem:[#allocation2 + $0x120] sm:$0xff]  ;;  %8243 = vmatmul.msk.bf16.gmra.mxu3 %vm189_vm0, %v17617_v27  ;;  %v5754_v27 = vrot.slane %v5752_v26, 1 }
 0x65b   :  { %v13964_v2 = vpop.permute.xlu1 %4310  ;;  %v4827_v21 = vsel %vm3730_vm9, %v4822_v53, %v4826_v41 }
 0x65c   :  { %17612 = vst [vmem:[#allocation73_spill] sm:$0xff] %v13964_v2  ;;  %v17614_v2 = vld [vmem:[#allocation52_spill] sm:$0xff]  ;;  %v13982_v0 = vpop.f32.mrf.mxu3  ;;  %v4838_v34 = vrot.slane %v4836_v49, 1 }
 0x65d   :  { %v6273_v35 = vsel %vm189_vm0, %v6209_v10, %v17614_v2  ;;  %5468 = vrot.lane.b32.xlu2 %v13899_v4, %s9176_s16  ;;  %17616 = vst [vmem:[#allocation58_spill] sm:$0xff] %v13982_v0  ;;  %v5745_v10 = vshrl.u32 %v9121_v57, 16 }
 0x65e   :  { %8706 = vmatmul.msk.bf16.gmra.mxu0 %vm6747_vm1, %v6658_v48  ;;  %v6338_v52 = vsel %vm6324_vm12, %v6273_v35, %v17618_v22  ;;  %v9122_v48 = vld [vmem:[#allocation2 + $0xc0] sm:$0xff]  ;;  %v4246_v35 = vrot.slane %v13985_v32, 1  ;;  %v17622_v22 = vld [vmem:[#allocation79_spill] sm:$0xff]  ;;  %v4839_v49 = vsel %vm3730_vm9, %v4834_v7, %v4838_v34  ;;  %v14016_v34 = vld [vmem:[#allocation2 + $0x12c] sm:$0xff] }
 0x65f   :  { %4143 = vrot.lane.b32.xlu0 %v3910_v11, %s9181_s7  ;;  %v13993_v45 = vpop.permute.xlu2 %5462  ;;  %v6402_v53 = vsel %vm669_vm3, %v6338_v52, %v13868_v20  ;;  %v5759_v11 = vshll.u32 %v9122_v48, 16  ;;  %v5750_v55 = vor.u32 %v5749_v61, %v5745_v10  ;;  %v17623_v20 = vld [vmem:[#allocation19_spill] sm:$0xff]  ;;  %v5757_v7 = vshrl.u32 %v9122_v48, 16 }
 0x660   :  { %17620 = vst [vmem:[#allocation43_spill] sm:$0xff] %v13993_v45  ;;  %v6467_v0 = vsel %vm6453_vm13, %v6402_v53, %v17622_v22  ;;  %v4248_v57 = vsel %vm4179_vm10, %v4246_v35, %v4247_v25  ;;  %v5764_v38 = vshll.u32 %v17623_v20, 16  ;;  %v14025_v22 = vld [vmem:[#allocation2 + $0xb4] sm:$0xff] }
 0x661   :  { %5070 = vrot.lane.b32.xlu1 %v4827_v21, %s9174_s0  ;;  %v13991_v2 = vpop.permute.xlu0 %4312  ;;  %v4618_v21 = vunpack.c.l.b16 %v3349_v28  ;;  %v5761_v33 = vrot.slane %v5759_v11, 1  ;;  %v5755_v61 = vsel %vm3730_vm9, %v5750_v55, %v5754_v27  ;;  %v17626_v28 = vld [vmem:[#allocation13_spill] sm:$0xff]  ;;  %17628 = vst [vmem:[#allocation8_spill] sm:$0xff] %v14025_v22 }
 0x662   :  { %17619 = vst [vmem:[#allocation16_spill] sm:$0xff] %v13991_v2  ;;  %v6531_v10 = vsel %vm671_vm4, %v6467_v0, %v17626_v28  ;;  %v5766_v55 = vrot.slane %v5764_v38, 1  ;;  %v3914_v0 = vshll.u32 %v14025_v22, 16  ;;  %v17629_v38 = vld [vmem:[#allocation77_spill] sm:$0xff] }
 0x663   :  { %v13997_v41 = vpop.permute.xlu1 %5238  ;;  %v14006_v52 = vpack.c.b16 %v4618_v21, %v4618_v21  ;;  %v6596_v53 = vsel %vm6582_vm15, %v6531_v10, %v13896_v44  ;;  %v5762_v35 = vor.u32 %v5761_v33, %v5757_v7  ;;  %v3256_v7 = vld [vmem:[#allocation2 + $0x134] sm:$0x1] }
 0x664   :  { %17621 = vst [vmem:[#allocation38_spill] sm:$0xff] %v13997_v41  ;;  %v14011_v26 = vpop.f32.mrf.mxu3  ;;  %v6660_v48 = vsel %vm673_vm5, %v6596_v53, %v13527_v46  ;;  %v3916_v20 = vrot.slane %v3914_v0, 1  ;;  %v17631_v46 = vld [vmem:[#allocation48_spill] sm:$0xff]  ;;  %v17632_v53 = vld [vmem:[#allocation59_spill] sm:$0xff] }
 0x665   :  { %17624 = vst [vmem:[#allocation85_spill] sm:$0xff] %v14006_v52  ;;  %4320 = vrot.lane.b32.xlu2 %v4248_v57, %s9175_s15  ;;  %v5175_v27 = vrot.slane %v14006_v52, 1  ;;  %v5767_v57 = vsel %vm3730_vm9, %v5762_v35, %v5766_v55  ;;  %v14079_v52 = vld [vmem:[#allocation2 + $0x138] sm:$0xff] }
 0x666   :  { %17625 = vst [vmem:[#allocation66_spill] sm:$0xff] %v14011_v26 }
 0x667   :  { %5072 = vrot.lane.b32.xlu0 %v4839_v49, %s9174_s0  ;;  %v14022_v11 = vpop.permute.xlu2 %4133  ;;  %v5174_v49 = vrot.slane %v14016_v34, 1 }
 0x669   :  { %5998 = vrot.lane.b32.xlu1 %v5755_v61, %s9184_s18  ;;  %v14020_v25 = vpop.permute.xlu0 %5240  ;;  %v5176_v33 = vsel %vm4179_vm10, %v5174_v49, %v5175_v27  ;;  %v3919_v61 = vshll.u32 %v17629_v38, 16 }
 0x66a   :  { %17627 = vst [vmem:[#allocation52_spill] sm:$0xff] %v14020_v25  ;;  %8244 = vmatmul.msk.bf16.gmra.mxu3 %vm189_vm0, %v17632_v53  ;;  %v17635_v53 = vld [vmem:[#allocation31_spill] sm:$0xff] }
 0x66b   :  { %v4130_v21 = vpop.permute.xlu1 %4129  ;;  %v3921_v0 = vrot.slane %v3919_v61, 1  ;;  %v3259_v61 = vld [vmem:[#allocation2 + $0x140] sm:$0x1] }
 0x66c   :  { %v6211_v44 = vsel %vm1983_vm14, %v13605_v58, %v4130_v21  ;;  %v14039_v28 = vpop.f32.mrf.mxu3  ;;  %v3912_v58 = vshrl.u32 %v14025_v22, 16  ;;  %v17638_v22 = vld [vmem:[#allocation20_spill] sm:$0xff] }
 0x66d   :  { %5248 = vrot.lane.b32.xlu2 %v5176_v33, %s9183_s17  ;;  %17630 = vst [vmem:[#allocation37_spill] sm:$0xff] %v14039_v28  ;;  %v6275_v10 = vsel %vm189_vm0, %v6211_v44, %v17631_v46  ;;  %v3689_v33 = vunpack.c.l.b16 %v3256_v7  ;;  %v17634_v46 = vld [vmem:[#allocation9_spill] sm:$0xff] }
 0x66e   :  { %8707 = vmatmul.msk.bf16.gmra.mxu0 %vm6747_vm1, %v6660_v48  ;;  %v3917_v27 = vor.u32 %v3916_v20, %v3912_v58  ;;  %v9124_v48 = vld [vmem:[#allocation2 + $0xc0] sm:$0xff]  ;;  %v4848_v28 = vshll.u32 %v17634_v46, 16  ;;  %v3690_v46 = vunpack.c.l.b16 %v3259_v61 }
 0x66f   :  { %6000 = vrot.lane.b32.xlu0 %v5767_v57, %s9184_s18  ;;  %v14048_v35 = vpop.permute.xlu2 %5062  ;;  %v4843_v49 = vshll.u32 %v9124_v48, 16  ;;  %v17633_v57 = vld [vmem:[#allocation6_spill] sm:$0xff]  ;;  %v14060_v20 = vpack.c.b16 %v3689_v33, %v3689_v33  ;;  %v4841_v7 = vshrl.u32 %v9124_v48, 16 }
 0x670   :  { %v6340_v44 = vsel %vm6324_vm12, %v6275_v10, %v17633_v57  ;;  %v3922_v26 = vsel %vm3730_vm9, %v3917_v27, %v3921_v0  ;;  %v3446_v10 = vld [vmem:[#allocation2 + $0x140] sm:$0x1]  ;;  %v14068_v57 = vld [vmem:[#allocation2 + $0x12c] sm:$0xff] }
 0x671   :  { %4542 = vrot.lane.b32.xlu1 %v13894_v23, %s9182_s14  ;;  %v4132_v21 = vpop.permute.xlu0 %4131  ;;  %v4845_v25 = vrot.slane %v4843_v49, 1  ;;  %v4850_v49 = vrot.slane %v4848_v28, 1  ;;  %v4250_v48 = vrot.slane %v14060_v20, 1 }
 0x673   :  { %v5059_v55 = vpop.permute.xlu1 %5058 }
 0x674   :  { %v6404_v38 = vsel %vm669_vm3, %v6340_v44, %v5059_v55  ;;  %v14062_v58 = vpop.f32.mrf.mxu3  ;;  %v3352_v55 = vld [vmem:[#allocation2 + $0x140] sm:$0x1] }
 0x675   :  { %v6469_v2 = vsel %vm6453_vm13, %v6404_v38, %v17635_v53  ;;  %4145 = vrot.lane.b32.xlu2 %v3922_v26, %s9181_s7  ;;  %17636 = vst [vmem:[#allocation41_spill] sm:$0xff] %v14062_v58  ;;  %v17637_v44 = vld [vmem:[#allocation12_spill] sm:$0xff]  ;;  %v4846_v38 = vor.u32 %v4845_v25, %v4841_v7  ;;  %v5546_v53 = vunpack.c.l.b16 %v3446_v10  ;;  %v6213_v58 = vsel %vm1983_vm14, %v13634_v30, %v4132_v21 }
 0x676   :  { %v6533_v26 = vsel %vm671_vm4, %v6469_v2, %v17637_v44  ;;  %v4619_v41 = vunpack.c.l.b16 %v3352_v55  ;;  %v4249_v2 = vrot.slane %v14068_v57, 1  ;;  %v17639_v25 = vld [vmem:[#allocation64_spill] sm:$0xff]  ;;  %v14085_v30 = vpack.c.b16 %v3690_v46, %v3690_v46 }
 0x677   :  { %4544 = vrot.lane.b32.xlu0 %v14016_v34, %s9182_s14  ;;  %v14066_v0 = vpop.permute.xlu2 %5990  ;;  %v6277_v61 = vsel %vm189_vm0, %v6213_v58, %v17639_v25  ;;  %v4851_v10 = vsel %vm3730_vm9, %v4846_v38, %v4850_v49  ;;  %v14087_v21 = vpack.c.b16 %v5546_v53, %v5546_v53  ;;  %v14098_v58 = vld [vmem:[#allocation2 + $0x138] sm:$0xff]  ;;  %v17645_v55 = vld [vmem:[#allocation80_spill] sm:$0xff] }
 0x678   :  { %17640 = vst [vmem:[#allocation79_spill] sm:$0xff] %v14085_v30  ;;  %v17646_v49 = vld [vmem:[#allocation87_spill] sm:$0xff]  ;;  %v4253_v53 = vrot.slane %v14085_v30, 1 }
 0x679   :  { %5470 = vrot.lane.b32.xlu1 %v13927_v40, %s9176_s16  ;;  %v5061_v27 = vpop.permute.xlu0 %5060  ;;  %17641 = vst [vmem:[#allocation19_spill] sm:$0xff] %v14087_v21  ;;  %v6342_v44 = vsel %vm6324_vm12, %v6277_v61, %v17646_v49  ;;  %v14106_v38 = vld [vmem:[#allocation2 + $0x138] sm:$0xff]  ;;  %v9126_v61 = vld [vmem:[#allocation2 + $0xe4] sm:$0xff] }
 0x67a   :  { %17644 = vst [vmem:[#allocation48_spill] sm:$0xff] %v14098_v58  ;;  %8245 = vmatmul.msk.bf16.gmra.mxu3 %vm189_vm0, %v17645_v55  ;;  %v6102_v55 = vrot.slane %v14079_v52, 1  ;;  %v5177_v49 = vrot.slane %v14106_v38, 1 }
 0x67b   :  { %v5987_v33 = vpop.permute.xlu1 %5986 }
 0x67c   :  { %v6598_v45 = vsel %vm6582_vm15, %v6533_v26, %v5987_v33  ;;  %v14095_v7 = vpop.f32.mrf.mxu3 }
 0x67d   :  { %v6662_v28 = vsel %vm673_vm5, %v6598_v45, %v17638_v22  ;;  %5074 = vrot.lane.b32.xlu2 %v4851_v10, %s9174_s0  ;;  %v4251_v45 = vsel %vm4179_vm10, %v4249_v2, %v4250_v48  ;;  %v14093_v22 = vpack.c.b16 %v4619_v41, %v4619_v41  ;;  %17643 = vst [vmem:[#allocation77_spill] sm:$0xff] %v14095_v7  ;;  %v6103_v48 = vrot.slane %v14087_v21, 1 }
 0x67e   :  { %8708 = vmatmul.msk.bf16.gmra.mxu0 %vm6747_vm1, %v6662_v28  ;;  %v6406_v41 = vsel %vm669_vm3, %v6342_v44, %v5061_v27  ;;  %v14113_v28 = vld [vmem:[#allocation2 + $0xe4] sm:$0xff]  ;;  %v4855_v10 = vshll.u32 %v9126_v61, 16  ;;  %v4860_v21 = vshll.u32 %v13518_v18, 16 }
 0x67f   :  { %5472 = vrot.lane.b32.xlu0 %v14079_v52, %s9176_s16  ;;  %17642 = vst [vmem:[#allocation13_spill] sm:$0xff] %v14093_v22  ;;  %v14104_v33 = vpop.permute.xlu2 %4314  ;;  %v3938_v2 = vshll.u32 %v14113_v28, 16  ;;  %v5178_v25 = vrot.slane %v14093_v22, 1  ;;  %v6471_v27 = vsel %vm6453_vm13, %v6406_v41, %v13532_v51  ;;  %v6104_v7 = vsel %vm4179_vm10, %v6102_v55, %v6103_v48  ;;  %v14131_v51 = vpop.f32.mrf.mxu0  ;;  %v17651_v41 = vld [vmem:[#allocation42_spill] sm:$0xff] }
 0x680   :  { %17647 = vst [vmem:[#allocation59_spill] sm:$0xff] %v14104_v33  ;;  %v9127_v55 = vld [vmem:[#allocation2 + $0xf0] sm:$0xff] }
 0x681   :  { %4322 = vrot.lane.b32.xlu1 %v4251_v45, %s9175_s15  ;;  %v5989_v26 = vpop.permute.xlu0 %5988  ;;  %v4252_v45 = vrot.slane %v14098_v58, 1  ;;  %v3940_v33 = vrot.slane %v3938_v2, 1  ;;  %v5179_v30 = vsel %vm4179_vm10, %v5177_v49, %v5178_v25  ;;  %v4857_v58 = vrot.slane %v4855_v10, 1  ;;  %17650 = vst [vmem:[#allocation31_spill] sm:$0xff] %v14131_v51 }
 0x682   :  { %v4853_v25 = vshrl.u32 %v9126_v61, 16  ;;  %v4867_v49 = vshll.u32 %v9127_v55, 16 }
 0x683   :  { %v14109_v46 = vpop.permute.xlu1 %6166  ;;  %v4254_v44 = vsel %vm4179_vm10, %v4252_v45, %v4253_v53  ;;  %v6535_v53 = vsel %vm671_vm4, %v6471_v27, %v17651_v41  ;;  %v6215_v27 = vsel %vm1983_vm14, %v13670_v19, %v14022_v11  ;;  %v9128_v41 = vld [vmem:[#allocation2 + $0xf0] sm:$0xff] }
 0x684   :  { %17648 = vst [vmem:[#allocation6_spill] sm:$0xff] %v14109_v46  ;;  %v3943_v46 = vshll.u32 %v13562_v15, 16  ;;  %v14129_v22 = vpop.f32.mrf.mxu3  ;;  %v3936_v15 = vshrl.u32 %v14113_v28, 16  ;;  %v6600_v48 = vsel %vm6582_vm15, %v6535_v53, %v5989_v26  ;;  %v6279_v61 = vsel %vm189_vm0, %v6215_v27, %v13548_v6 }
 0x685   :  { %6176 = vrot.lane.b32.xlu2 %v6104_v7, %s9172_s30  ;;  %17649 = vst [vmem:[#allocation9_spill] sm:$0xff] %v14129_v22  ;;  %v5783_v22 = vshll.u32 %v9128_v41, 16  ;;  %v6664_v26 = vsel %vm673_vm5, %v6600_v48, %v13552_v8  ;;  %v4872_v53 = vshll.u32 %v13589_v43, 16  ;;  %v5788_v8 = vshll.u32 %v13614_v62, 16  ;;  %v17654_v43 = vld [vmem:[#allocation46_spill] sm:$0xff] }
 0x686   :  { %v3941_v18 = vor.u32 %v3940_v33, %v3936_v15  ;;  %v3945_v45 = vrot.slane %v3943_v46, 1  ;;  %v4869_v46 = vrot.slane %v4867_v49, 1  ;;  %v4865_v6 = vshrl.u32 %v9127_v55, 16  ;;  %v17653_v15 = vld [vmem:[#allocation61_spill] sm:$0xff] }
 0x687   :  { %4324 = vrot.lane.b32.xlu0 %v4254_v44, %s9175_s15  ;;  %v14140_v7 = vpop.permute.xlu2 %5242  ;;  %v4862_v44 = vrot.slane %v4860_v21, 1  ;;  %v5785_v11 = vrot.slane %v5783_v22, 1  ;;  %v6344_v48 = vsel %vm6324_vm12, %v6279_v61, %v17654_v43  ;;  %v5795_v22 = vshll.u32 %v13673_v54, 16  ;;  %v14173_v49 = vpop.f32.mrf.mxu0 }
 0x688   :  { %v3946_v33 = vsel %vm3730_vm9, %v3941_v18, %v3945_v45  ;;  %v5781_v45 = vshrl.u32 %v9128_v41, 16  ;;  %v6408_v62 = vsel %vm669_vm3, %v6344_v48, %v14048_v35  ;;  %17655 = vst [vmem:[#allocation20_spill] sm:$0xff] %v14173_v49  ;;  %v4870_v27 = vor.u32 %v4869_v46, %v4865_v6 }
 0x689   :  { %5250 = vrot.lane.b32.xlu1 %v5179_v30, %s9183_s17  ;;  %v14138_v2 = vpop.permute.xlu0 %6168  ;;  %v4858_v30 = vor.u32 %v4857_v58, %v4853_v25  ;;  %v3449_v58 = vld [vmem:[#allocation2 + $0x14c] sm:$0x1]  ;;  %v6473_v41 = vsel %vm6453_vm13, %v6408_v62, %v13569_v39  ;;  %v5797_v43 = vrot.slane %v5795_v22, 1  ;;  %v5800_v35 = vshll.u32 %v13682_v29, 16  ;;  %v17657_v29 = vld [vmem:[#allocation84_spill] sm:$0xff] }
 0x68a   :  { %8246 = vmatmul.msk.bf16.gmra.mxu3 %vm189_vm0, %v17653_v15  ;;  %v5786_v61 = vor.u32 %v5785_v11, %v5781_v45  ;;  %v14182_v15 = vld [vmem:[#allocation2 + $0x144] sm:$0xff]  ;;  %v3955_v46 = vshll.u32 %v13579_v42, 16  ;;  %v5793_v11 = vshrl.u32 %v13673_v54, 16 }
 0x68b   :  { %v14142_v10 = vpop.permute.xlu1 %4536  ;;  %v4863_v19 = vsel %vm3730_vm9, %v4858_v30, %v4862_v44  ;;  %v4874_v30 = vrot.slane %v4872_v53, 1  ;;  %v14177_v44 = vld [vmem:[#allocation2 + $0xf0] sm:$0xff] }
 0x68c   :  { %v14159_v21 = vpop.f32.mrf.mxu3  ;;  %v3948_v42 = vshrl.u32 %v14177_v44, 16  ;;  %v5798_v54 = vor.u32 %v5797_v43, %v5793_v11 }
 0x68d   :  { %4546 = vrot.lane.b32.xlu2 %v14106_v38, %s9182_s14  ;;  %17652 = vst [vmem:[#allocation12_spill] sm:$0xff] %v14159_v21  ;;  %v4875_v48 = vsel %vm3730_vm9, %v4870_v27, %v4874_v30  ;;  %v5802_v27 = vrot.slane %v5800_v35, 1  ;;  %v6105_v35 = vrot.slane %v14182_v15, 1 }
 0x68e   :  { %8709 = vmatmul.msk.bf16.gmra.mxu0 %vm6747_vm1, %v6664_v26  ;;  %v3950_v26 = vshll.u32 %v14177_v44, 16 }
 0x68f   :  { %4149 = vrot.lane.b32.xlu0 %v3946_v33, %s9181_s7  ;;  %v14168_v18 = vpop.permute.xlu2 %6170  ;;  %v5790_v33 = vrot.slane %v5788_v8, 1  ;;  %v3355_v8 = vld [vmem:[#allocation2 + $0x14c] sm:$0x1]  ;;  %v5803_v43 = vsel %vm3730_vm9, %v5798_v54, %v5802_v27  ;;  %v14228_v54 = vld [vmem:[#allocation2 + $0x144] sm:$0xff] }
 0x690   :  { %v3952_v21 = vrot.slane %v3950_v26, 1 }
 0x691   :  { %5076 = vrot.lane.b32.xlu1 %v4863_v19, %s9174_s0  ;;  %v14166_v25 = vpop.permute.xlu0 %4538  ;;  %v5547_v19 = vunpack.c.l.b16 %v3449_v58  ;;  %v5791_v53 = vsel %vm3730_vm9, %v5786_v61, %v5790_v33  ;;  %v6537_v58 = vsel %vm671_vm4, %v6473_v41, %v17657_v29  ;;  %v3957_v33 = vrot.slane %v3955_v46, 1  ;;  %v9130_v41 = vld [vmem:[#allocation2 + $0xfc] sm:$0xff] }
 0x692   :  { %v6602_v45 = vsel %vm6582_vm15, %v6537_v58, %v14066_v0  ;;  %v3953_v61 = vor.u32 %v3952_v21, %v3948_v42  ;;  %v3452_v58 = vld [vmem:[#allocation2 + $0x158] sm:$0x1]  ;;  %v17660_v42 = vld [vmem:[#allocation56_spill] sm:$0xff]  ;;  %v4877_v27 = vshrl.u32 %v9130_v41, 16 }
 0x693   :  { %v14175_v55 = vpop.permute.xlu1 %5464  ;;  %v14192_v39 = vpack.c.b16 %v5547_v19, %v5547_v19  ;;  %v4620_v19 = vunpack.c.l.b16 %v3355_v8  ;;  %v6666_v29 = vsel %vm673_vm5, %v6602_v45, %v13592_v24  ;;  %v4884_v8 = vshll.u32 %v13612_v36, 16 }
 0x694   :  { %v14194_v6 = vpop.f32.mrf.mxu3  ;;  %v3958_v21 = vsel %vm3730_vm9, %v3953_v61, %v3957_v33  ;;  %v5548_v33 = vunpack.c.l.b16 %v3452_v58 }
 0x695   :  { %5474 = vrot.lane.b32.xlu2 %v14182_v15, %s9176_s16  ;;  %17656 = vst [vmem:[#allocation64_spill] sm:$0xff] %v14194_v6  ;;  %v14217_v46 = vpack.c.b16 %v4620_v19, %v4620_v19 }
 0x697   :  { %5078 = vrot.lane.b32.xlu0 %v4875_v48, %s9174_s0  ;;  %v14204_v62 = vpop.permute.xlu2 %4139  ;;  %v4879_v48 = vshll.u32 %v9130_v41, 16 }
 0x699   :  { %6004 = vrot.lane.b32.xlu1 %v5791_v53, %s9184_s18  ;;  %v14202_v22 = vpop.permute.xlu0 %5466  ;;  %v6106_v53 = vrot.slane %v14192_v39, 1  ;;  %v4881_v11 = vrot.slane %v4879_v48, 1 }
 0x69b   :  { %v4136_v30 = vpop.permute.xlu1 %4135  ;;  %v14206_v26 = vpop.f32.mrf.mxu0  ;;  %v6107_v24 = vsel %vm4179_vm10, %v6105_v35, %v6106_v53  ;;  %v5181_v53 = vrot.slane %v14217_v46, 1 }
 0x69c   :  { %17658 = vst [vmem:[#allocation80_spill] sm:$0xff] %v14206_v26  ;;  %v6217_v0 = vsel %vm1983_vm14, %v13727_v14, %v4136_v30  ;;  %v14223_v14 = vpop.f32.mrf.mxu3  ;;  %v17661_v30 = vld [vmem:[#allocation88_spill] sm:$0xff] }
 0x69d   :  { %4151 = vrot.lane.b32.xlu2 %v3958_v21, %s9181_s7  ;;  %17659 = vst [vmem:[#allocation87_spill] sm:$0xff] %v14223_v14  ;;  %v6281_v45 = vsel %vm189_vm0, %v6217_v0, %v17660_v42  ;;  %8247 = vmatmul.msk.bf16.gmra.mxu3 %vm189_vm0, %v17661_v30  ;;  %v9131_v0 = vld [vmem:[#allocation2 + $0x108] sm:$0xff]  ;;  %v17663_v21 = vld [vmem:[#allocation39_spill] sm:$0xff]  ;;  %v5180_v42 = vrot.slane %v14228_v54, 1  ;;  %v14241_v30 = vpack.c.b16 %v5548_v33, %v5548_v33  ;;  %v14254_v33 = vld [vmem:[#allocation2 + $0x150] sm:$0xff] }
 0x69e   :  { %8710 = vmatmul.msk.bf16.gmra.mxu0 %vm6747_vm1, %v6666_v29  ;;  %v4882_v29 = vor.u32 %v4881_v11, %v4877_v27  ;;  %v5807_v35 = vshll.u32 %v9131_v0, 16  ;;  %v17664_v11 = vld [vmem:[#allocation40_spill] sm:$0xff]  ;;  %v6108_v51 = vrot.slane %v14254_v33, 1 }
 0x69f   :  { %6006 = vrot.lane.b32.xlu0 %v5803_v43, %s9184_s18  ;;  %v14232_v61 = vpop.permute.xlu2 %5068  ;;  %v4886_v43 = vrot.slane %v4884_v8, 1  ;;  %v5182_v58 = vsel %vm4179_vm10, %v5180_v42, %v5181_v53 }
 0x6a0   :  { %v5809_v6 = vrot.slane %v5807_v35, 1 }
 0x6a1   :  { %6178 = vrot.lane.b32.xlu1 %v6107_v24, %s9172_s30  ;;  %v4138_v36 = vpop.permute.xlu0 %4137  ;;  %v6346_v24 = vsel %vm6324_vm12, %v6281_v45, %v17663_v21  ;;  %v4887_v14 = vsel %vm3730_vm9, %v4882_v29, %v4886_v43  ;;  %v3262_v45 = vld [vmem:[#allocation2 + $0x14c] sm:$0x1]  ;;  %v17666_v43 = vld [vmem:[#allocation7_spill] sm:$0xff] }
 0x6a2   :  { %v3691_v42 = vunpack.c.l.b16 %v3262_v45 }
 0x6a3   :  { %v5065_v19 = vpop.permute.xlu1 %5064  ;;  %v14234_v48 = vpop.f32.mrf.mxu0 }
 0x6a4   :  { %17662 = vst [vmem:[#allocation42_spill] sm:$0xff] %v14234_v48  ;;  %v6410_v41 = vsel %vm669_vm3, %v6346_v24, %v5065_v19  ;;  %v5812_v48 = vshll.u32 %v13695_v37, 16  ;;  %v14250_v27 = vpop.f32.mrf.mxu3  ;;  %v5805_v19 = vshrl.u32 %v9131_v0, 16  ;;  %v6109_v37 = vrot.slane %v14241_v30, 1 }
 0x6a5   :  { %v6475_v8 = vsel %vm6453_vm13, %v6410_v41, %v17664_v11  ;;  %5080 = vrot.lane.b32.xlu2 %v4887_v14, %s9174_s0  ;;  %17665 = vst [vmem:[#allocation61_spill] sm:$0xff] %v14250_v27  ;;  %v3962_v0 = vshll.u32 %v13745_v56, 16  ;;  %v17668_v27 = vld [vmem:[#allocation68_spill] sm:$0xff]  ;;  %v14275_v45 = vpack.c.b16 %v3691_v42, %v3691_v42 }
 0x6a6   :  { %v6539_v35 = vsel %vm671_vm4, %v6475_v8, %v17666_v43  ;;  %v5810_v14 = vor.u32 %v5809_v6, %v5805_v19  ;;  %v5814_v41 = vrot.slane %v5812_v48, 1  ;;  %v17669_v8 = vld [vmem:[#allocation27_spill] sm:$0xff]  ;;  %v6110_v6 = vsel %vm4179_vm10, %v6108_v51, %v6109_v37  ;;  %v17672_v51 = vld [vmem:[#allocation44_spill] sm:$0xff] }
 0x6a7   :  { %5252 = vrot.lane.b32.xlu0 %v5182_v58, %s9183_s17  ;;  %v14256_v29 = vpop.permute.xlu2 %5996  ;;  %v6219_v58 = vsel %vm1983_vm14, %v13754_v13, %v4138_v36  ;;  %v3964_v56 = vrot.slane %v3962_v0, 1  ;;  %v17670_v13 = vld [vmem:[#allocation35_spill] sm:$0xff] }
 0x6a8   :  { %v6283_v43 = vsel %vm189_vm0, %v6219_v58, %v17669_v8  ;;  %v5815_v48 = vsel %vm3730_vm9, %v5810_v14, %v5814_v41  ;;  %v3967_v36 = vshll.u32 %v17670_v13, 16  ;;  %v17673_v37 = vld [vmem:[#allocation63_spill] sm:$0xff]  ;;  %v4256_v8 = vrot.slane %v14275_v45, 1 }
 0x6a9   :  { %4548 = vrot.lane.b32.xlu1 %v14228_v54, %s9182_s14  ;;  %v5067_v53 = vpop.permute.xlu0 %5066  ;;  %v14292_v41 = vld [vmem:[#allocation2 + $0xfc] sm:$0xff] }
 0x6aa   :  { %v3960_v42 = vshrl.u32 %v14292_v41, 16 }
 0x6ab   :  { %v5993_v21 = vpop.permute.xlu1 %5992  ;;  %v14261_v24 = vpop.f32.mrf.mxu0 }
 0x6ac   :  { %17667 = vst [vmem:[#allocation46_spill] sm:$0xff] %v14261_v24  ;;  %v6604_v11 = vsel %vm6582_vm15, %v6539_v35, %v5993_v21  ;;  %v14280_v19 = vpop.f32.mrf.mxu3  ;;  %v6348_v35 = vsel %vm6324_vm12, %v6283_v43, %v17673_v37  ;;  %v3965_v13 = vor.u32 %v3964_v56, %v3960_v42  ;;  %v3969_v43 = vrot.slane %v3967_v36, 1  ;;  %v17677_v24 = vld [vmem:[#allocation28_spill] sm:$0xff] }
 0x6ad   :  { %v6668_v26 = vsel %vm673_vm5, %v6604_v11, %v17668_v27  ;;  %6008 = vrot.lane.b32.xlu2 %v5815_v48, %s9184_s18  ;;  %v3358_v27 = vld [vmem:[#allocation2 + $0x158] sm:$0x1]  ;;  %17671 = vst [vmem:[#allocation84_spill] sm:$0xff] %v14280_v19  ;;  %8248 = vmatmul.msk.bf16.gmra.mxu3 %vm189_vm0, %v17672_v51  ;;  %v6412_v58 = vsel %vm669_vm3, %v6348_v35, %v5067_v53  ;;  %v9133_v51 = vld [vmem:[#allocation2 + $0x108] sm:$0xff] }
 0x6ae   :  { %8711 = vmatmul.msk.bf16.gmra.mxu0 %vm6747_vm1, %v6668_v26  ;;  %v14284_v26 = vld [vmem:[#allocation2 + $0x144] sm:$0xff]  ;;  %v4621_v48 = vunpack.c.l.b16 %v3358_v27  ;;  %v4891_v37 = vshll.u32 %v9133_v51, 16  ;;  %v6477_v49 = vsel %vm6453_vm13, %v6412_v58, %v17677_v24  ;;  %v3970_v56 = vsel %vm3730_vm9, %v3965_v13, %v3969_v43  ;;  %v17679_v58 = vld [vmem:[#allocation22_spill] sm:$0xff] }
 0x6af   :  { %6180 = vrot.lane.b32.xlu0 %v6110_v6, %s9172_s30  ;;  %v14290_v14 = vpop.permute.xlu2 %4540  ;;  %v3974_v6 = vshll.u32 %v13843_v16, 16  ;;  %v4255_v19 = vrot.slane %v14284_v26, 1  ;;  %v4896_v27 = vshll.u32 %v13768_v63, 16  ;;  %v3455_v24 = vld [vmem:[#allocation2 + $0x164] sm:$0x1]  ;;  %v4889_v13 = vshrl.u32 %v9133_v51, 16 }
 0x6b0   :  { %17674 = vst [vmem:[#allocation56_spill] sm:$0xff] %v14290_v14  ;;  %v14305_v14 = vld [vmem:[#allocation2 + $0x150] sm:$0xff]  ;;  %v4893_v36 = vrot.slane %v4891_v37, 1  ;;  %v4903_v43 = vshll.u32 %v13870_v50, 16  ;;  %v17684_v51 = vld [vmem:[#allocation93_spill] sm:$0xff] }
 0x6b1   :  { %5476 = vrot.lane.b32.xlu1 %v14254_v33, %s9176_s16  ;;  %v5995_v21 = vpop.permute.xlu0 %5994  ;;  %v4257_v53 = vsel %vm4179_vm10, %v4255_v19, %v4256_v8  ;;  %v3976_v35 = vrot.slane %v3974_v6, 1  ;;  %v6541_v19 = vsel %vm671_vm4, %v6477_v49, %v17679_v58  ;;  %v4898_v58 = vrot.slane %v4896_v27, 1 }
 0x6b2   :  { %v6606_v8 = vsel %vm6582_vm15, %v6541_v19, %v5995_v21  ;;  %v4894_v21 = vor.u32 %v4893_v36, %v4889_v13  ;;  %v9134_v19 = vld [vmem:[#allocation2 + $0x114] sm:$0xff]  ;;  %v4901_v27 = vshrl.u32 %v13870_v50, 16 }
 0x6b3   :  { %v14296_v11 = vpop.permute.xlu1 %4316  ;;  %v14298_v0 = vpop.f32.mrf.mxu0  ;;  %v3265_v13 = vld [vmem:[#allocation2 + $0x158] sm:$0x1] }
 0x6b4   :  { %17675 = vst [vmem:[#allocation88_spill] sm:$0xff] %v14296_v11  ;;  %v14309_v11 = vpack.c.b16 %v4621_v48, %v4621_v48  ;;  %v14316_v42 = vpop.f32.mrf.mxu3  ;;  %v4899_v36 = vsel %vm3730_vm9, %v4894_v21, %v4898_v58 }
 0x6b5   :  { %17676 = vst [vmem:[#allocation39_spill] sm:$0xff] %v14298_v0  ;;  %v3979_v0 = vshll.u32 %v13831_v59, 16  ;;  %4326 = vrot.lane.b32.xlu2 %v4257_v53, %s9175_s15  ;;  %v3972_v59 = vshrl.u32 %v13843_v16, 16  ;;  %v6221_v16 = vsel %vm1983_vm14, %v13818_v12, %v14204_v62 }
 0x6b6   :  { %17678 = vst [vmem:[#allocation40_spill] sm:$0xff] %v14316_v42  ;;  %v5184_v49 = vrot.slane %v14309_v11, 1 }
 0x6b7   :  { %4550 = vrot.lane.b32.xlu0 %v14305_v14, %s9182_s14  ;;  %v14325_v48 = vpop.permute.xlu2 %5468  ;;  %v3977_v53 = vor.u32 %v3976_v35, %v3972_v59  ;;  %v3981_v42 = vrot.slane %v3979_v0, 1  ;;  %v4905_v35 = vrot.slane %v4903_v43, 1  ;;  %v4908_v0 = vshll.u32 %v13859_v31, 16  ;;  %v17685_v59 = vld [vmem:[#allocation53_spill] sm:$0xff]  ;;  %v17687_v43 = vld [vmem:[#allocation62_spill] sm:$0xff] }
 0x6b8   :  { %17681 = vst [vmem:[#allocation68_spill] sm:$0xff] %v14325_v48  ;;  %v6670_v48 = vsel %vm673_vm5, %v6606_v8, %v17684_v51  ;;  %v5824_v31 = vshll.u32 %v13798_v5, 16  ;;  %v5817_v5 = vshrl.u32 %v9134_v19, 16  ;;  %v5831_v51 = vshll.u32 %v13899_v4, 16 }
 0x6b9   :  { %4153 = vrot.lane.b32.xlu1 %v3970_v56, %s9181_s7  ;;  %v14323_v6 = vpop.permute.xlu0 %4318  ;;  %v5549_v56 = vunpack.c.l.b16 %v3455_v24  ;;  %v6285_v24 = vsel %vm189_vm0, %v6221_v16, %v17685_v59  ;;  %v4906_v50 = vor.u32 %v4905_v35, %v4901_v27  ;;  %v3986_v59 = vshll.u32 %v13864_v17, 16 }
 0x6ba   :  { %17680 = vst [vmem:[#allocation7_spill] sm:$0xff] %v14323_v6  ;;  %v5819_v6 = vshll.u32 %v9134_v19, 16  ;;  %v5836_v27 = vshll.u32 %v13891_v3, 16  ;;  %v5829_v3 = vshrl.u32 %v13899_v4, 16  ;;  %v4915_v4 = vshll.u32 %v13894_v23, 16 }
 0x6bb   :  { %v14328_v63 = vpop.permute.xlu1 %5244  ;;  %v14330_v37 = vpop.f32.mrf.mxu0  ;;  %v14345_v62 = vpack.c.b16 %v5549_v56, %v5549_v56 }
 0x6bc   :  { %17682 = vst [vmem:[#allocation27_spill] sm:$0xff] %v14328_v63  ;;  %v5183_v63 = vrot.slane %v14305_v14, 1  ;;  %v5821_v8 = vrot.slane %v5819_v6, 1  ;;  %v4910_v6 = vrot.slane %v4908_v0, 1  ;;  %v17691_v0 = vld [vmem:[#allocation49_spill] sm:$0xff] }
 0x6bd   :  { %17683 = vst [vmem:[#allocation35_spill] sm:$0xff] %v14330_v37  ;;  %v3982_v37 = vsel %vm3730_vm9, %v3977_v53, %v3981_v42  ;;  %v14355_v42 = vld [vmem:[#allocation2 + $0x15c] sm:$0xff]  ;;  %8249 = vmatmul.msk.bf16.gmra.mxu3 %vm189_vm0, %v17687_v43  ;;  %v6112_v58 = vrot.slane %v14345_v62, 1 }
 0x6be   :  { %8712 = vmatmul.msk.bf16.gmra.mxu0 %vm6747_vm1, %v6670_v48  ;;  %v5185_v12 = vsel %vm4179_vm10, %v5183_v63, %v5184_v49  ;;  %v14352_v48 = vpop.f32.mrf.mxu3  ;;  %v17688_v63 = vld [vmem:[#allocation72_spill] sm:$0xff]  ;;  %v6111_v35 = vrot.slane %v14355_v42, 1 }
 0x6bf   :  { %4155 = vrot.lane.b32.xlu0 %v3982_v37, %s9181_s7  ;;  %5254 = vrot.lane.b32.xlu2 %v5185_v12, %s9183_s17  ;;  %17686 = vst [vmem:[#allocation44_spill] sm:$0xff] %v14352_v48  ;;  %v6350_v37 = vsel %vm6324_vm12, %v6285_v24, %v17688_v63  ;;  %v14363_v49 = vpop.permute.xlu2 %4320  ;;  %v5822_v24 = vor.u32 %v5821_v8, %v5817_v5  ;;  %v5826_v12 = vrot.slane %v5824_v31, 1  ;;  %v5833_v63 = vrot.slane %v5831_v51, 1  ;;  %v17693_v5 = vld [vmem:[#allocation30_spill] sm:$0xff] }
 0x6c0   :  { %17689 = vst [vmem:[#allocation63_spill] sm:$0xff] %v14363_v49  ;;  %v6414_v56 = vsel %vm669_vm3, %v6350_v37, %v14232_v61  ;;  %v4911_v61 = vsel %vm3730_vm9, %v4906_v50, %v4910_v6  ;;  %v6113_v43 = vsel %vm4179_vm10, %v6111_v35, %v6112_v58  ;;  %v3988_v37 = vrot.slane %v3986_v59, 1 }
 0x6c1   :  { %5082 = vrot.lane.b32.xlu1 %v4899_v36, %s9174_s0  ;;  %v14361_v53 = vpop.permute.xlu0 %5246  ;;  %v3692_v36 = vunpack.c.l.b16 %v3265_v13  ;;  %v6479_v19 = vsel %vm6453_vm13, %v6414_v56, %v17691_v0  ;;  %v3991_v48 = vshll.u32 %v13853_v60, 16  ;;  %v5827_v8 = vsel %vm3730_vm9, %v5822_v24, %v5826_v12  ;;  %v3361_v60 = vld [vmem:[#allocation2 + $0x164] sm:$0x1]  ;;  %v14399_v24 = vld [vmem:[#allocation2 + $0x150] sm:$0xff] }
 0x6c2   :  { %v6543_v50 = vsel %vm671_vm4, %v6479_v19, %v17693_v5  ;;  %v3984_v6 = vshrl.u32 %v13864_v17, 16  ;;  %v5838_v59 = vrot.slane %v5836_v27, 1  ;;  %v5834_v35 = vor.u32 %v5833_v63, %v5829_v3 }
 0x6c3   :  { %v14367_v16 = vpop.permute.xlu1 %6172  ;;  %v14369_v21 = vpop.f32.mrf.mxu0  ;;  %v14384_v31 = vpack.c.b16 %v3692_v36, %v3692_v36  ;;  %v6608_v56 = vsel %vm6582_vm15, %v6543_v50, %v14256_v29  ;;  %v3993_v19 = vrot.slane %v3991_v48, 1  ;;  %v4258_v27 = vrot.slane %v14399_v24, 1  ;;  %v3268_v50 = vld [vmem:[#allocation2 + $0x164] sm:$0x1] }
 0x6c4   :  { %17690 = vst [vmem:[#allocation28_spill] sm:$0xff] %v14369_v21  ;;  %v3989_v0 = vor.u32 %v3988_v37, %v3984_v6  ;;  %v5839_v5 = vsel %vm3730_vm9, %v5834_v35, %v5838_v59  ;;  %v4917_v48 = vrot.slane %v4915_v4, 1  ;;  %v4920_v37 = vshll.u32 %v13881_v9, 16  ;;  %v17699_v9 = vld [vmem:[#allocation82_spill] sm:$0xff] }
 0x6c5   :  { %v4259_v17 = vrot.slane %v14384_v31, 1  ;;  %v4913_v59 = vshrl.u32 %v13894_v23, 16  ;;  %v3693_v4 = vunpack.c.l.b16 %v3268_v50  ;;  %v3998_v21 = vshll.u32 %v13985_v32, 16 }
 0x6c6   :  { %v14386_v13 = vpop.f32.mrf.mxu3  ;;  %v3994_v63 = vsel %vm3730_vm9, %v3989_v0, %v3993_v19  ;;  %v14429_v19 = vld [vmem:[#allocation2 + $0x15c] sm:$0xff] }
 0x6c7   :  { %5084 = vrot.lane.b32.xlu0 %v4911_v61, %s9174_s0  ;;  %6182 = vrot.lane.b32.xlu2 %v6113_v43, %s9172_s30  ;;  %17692 = vst [vmem:[#allocation22_spill] sm:$0xff] %v14386_v13  ;;  %v14397_v51 = vpop.permute.xlu2 %5248  ;;  %v4622_v61 = vunpack.c.l.b16 %v3361_v60  ;;  %v17696_v43 = vld [vmem:[#allocation67_spill] sm:$0xff]  ;;  %v4260_v3 = vsel %vm4179_vm10, %v4258_v27, %v4259_v17  ;;  %v17698_v60 = vld [vmem:[#allocation34_spill] sm:$0xff] }
 0x6c8   :  { %17694 = vst [vmem:[#allocation93_spill] sm:$0xff] %v14397_v51  ;;  %v6672_v29 = vsel %vm673_vm5, %v6608_v56, %v17696_v43  ;;  %v4918_v43 = vor.u32 %v4917_v48, %v4913_v59  ;;  %v17701_v27 = vld [vmem:[#allocation47_spill] sm:$0xff]  ;;  %v17708_v51 = vld [vmem:[#allocation92_spill] sm:$0xff] }
 0x6c9   :  { %6010 = vrot.lane.b32.xlu1 %v5827_v8, %s9184_s18  ;;  %v14395_v58 = vpop.permute.xlu0 %6174  ;;  %v14417_v6 = vpack.c.b16 %v4622_v61, %v4622_v61  ;;  %v17702_v13 = vld [vmem:[#allocation23_spill] sm:$0xff] }
 0x6ca   :  { %v5848_v48 = vshll.u32 %v17702_v13, 16  ;;  %v5841_v13 = vshrl.u32 %v13927_v40, 16 }
 0x6cb   :  { %v4142_v12 = vpop.permute.xlu1 %4141  ;;  %v14401_v36 = vpop.f32.mrf.mxu0 }
 0x6cc   :  { %17695 = vst [vmem:[#allocation53_spill] sm:$0xff] %v14401_v36  ;;  %v6223_v8 = vsel %vm1983_vm14, %v13906_v47, %v4142_v12  ;;  %v3458_v12 = vld [vmem:[#allocation2 + $0x170] sm:$0x1] }
 0x6cd   :  { %v6287_v56 = vsel %vm189_vm0, %v6223_v8, %v17698_v60  ;;  %8250 = vmatmul.msk.bf16.gmra.mxu3 %vm189_vm0, %v17699_v9  ;;  %v5843_v8 = vshll.u32 %v13927_v40, 16  ;;  %v5186_v60 = vrot.slane %v14429_v19, 1  ;;  %v14439_v9 = vpack.c.b16 %v3693_v4, %v3693_v4 }
 0x6ce   :  { %8713 = vmatmul.msk.bf16.gmra.mxu0 %vm6747_vm1, %v6672_v29  ;;  %v14419_v47 = vpop.f32.mrf.mxu3  ;;  %v4922_v29 = vrot.slane %v4920_v37, 1  ;;  %v6352_v23 = vsel %vm6324_vm12, %v6287_v56, %v17701_v27  ;;  %v17703_v37 = vld [vmem:[#allocation26_spill] sm:$0xff] }
 0x6cf   :  { %6012 = vrot.lane.b32.xlu0 %v5839_v5, %s9184_s18  ;;  %4157 = vrot.lane.b32.xlu2 %v3994_v63, %s9181_s7  ;;  %17697 = vst [vmem:[#allocation62_spill] sm:$0xff] %v14419_v47  ;;  %v14427_v0 = vpop.permute.xlu2 %4145  ;;  %v5187_v5 = vrot.slane %v14417_v6, 1  ;;  %v5550_v63 = vunpack.c.l.b16 %v3458_v12  ;;  %v5845_v47 = vrot.slane %v5843_v8, 1  ;;  %v4262_v27 = vrot.slane %v14439_v9, 1 }
 0x6d0   :  { %v4923_v50 = vsel %vm3730_vm9, %v4918_v43, %v4922_v29  ;;  %v14454_v43 = vld [vmem:[#allocation2 + $0x15c] sm:$0xff] }
 0x6d1   :  { %4328 = vrot.lane.b32.xlu1 %v4260_v3, %s9175_s15  ;;  %v4144_v35 = vpop.permute.xlu0 %4143  ;;  %v5188_v56 = vsel %vm4179_vm10, %v5186_v60, %v5187_v5  ;;  %v14449_v12 = vpack.c.b16 %v5550_v63, %v5550_v63 }
 0x6d3   :  { %v5071_v17 = vpop.permute.xlu1 %5070  ;;  %v14431_v61 = vpop.f32.mrf.mxu0  ;;  %v6115_v36 = vrot.slane %v14449_v12, 1 }
 0x6d4   :  { %17700 = vst [vmem:[#allocation72_spill] sm:$0xff] %v14431_v61  ;;  %v6416_v3 = vsel %vm669_vm3, %v6352_v23, %v5071_v17  ;;  %v3364_v17 = vld [vmem:[#allocation2 + $0x170] sm:$0x1]  ;;  %v14460_v23 = vld [vmem:[#allocation2 + $0x168] sm:$0xff] }
 0x6d5   :  { %v6481_v59 = vsel %vm6453_vm13, %v6416_v3, %v17703_v37  ;;  %v17705_v3 = vld [vmem:[#allocation18_spill] sm:$0xff]  ;;  %v5850_v37 = vrot.slane %v5848_v48, 1  ;;  %v17709_v48 = vld [vmem:[#allocation95_spill] sm:$0xff] }
 0x6d6   :  { %v14451_v4 = vpop.f32.mrf.mxu3  ;;  %v6545_v5 = vsel %vm671_vm4, %v6481_v59, %v17705_v3  ;;  %v4261_v59 = vrot.slane %v14454_v43, 1  ;;  %v4000_v3 = vrot.slane %v3998_v21, 1 }
 0x6d7   :  { %5478 = vrot.lane.b32.xlu0 %v14355_v42, %s9176_s16  ;;  %5086 = vrot.lane.b32.xlu2 %v4923_v50, %s9174_s0  ;;  %17704 = vst [vmem:[#allocation49_spill] sm:$0xff] %v14451_v4  ;;  %v14457_v8 = vpop.permute.xlu2 %5074  ;;  %v5846_v50 = vor.u32 %v5845_v47, %v5841_v13  ;;  %v17707_v4 = vld [vmem:[#allocation33_spill] sm:$0xff]  ;;  %v6114_v47 = vrot.slane %v14460_v23, 1 }
 0x6d8   :  { %v6225_v61 = vsel %vm1983_vm14, %v17707_v4, %v4144_v35  ;;  %v4263_v35 = vsel %vm4179_vm10, %v4261_v59, %v4262_v27  ;;  %v17711_v27 = vld [vmem:[#allocation45_spill] sm:$0xff] }
 0x6d9   :  { %5256 = vrot.lane.b32.xlu1 %v5188_v56, %s9183_s17  ;;  %v5073_v29 = vpop.permute.xlu0 %5072  ;;  %v4623_v56 = vunpack.c.l.b16 %v3364_v17  ;;  %v6289_v17 = vsel %vm189_vm0, %v6225_v61, %v17709_v48  ;;  %v5851_v4 = vsel %vm3730_vm9, %v5846_v50, %v5850_v37  ;;  %v14489_v61 = vld [vmem:[#allocation2 + $0x168] sm:$0xff] }
 0x6db   :  { %v5999_v63 = vpop.permute.xlu1 %5998  ;;  %v14464_v60 = vpop.f32.mrf.mxu0  ;;  %v14480_v13 = vpack.c.b16 %v4623_v56, %v4623_v56 }
 0x6dc   :  { %17706 = vst [vmem:[#allocation30_spill] sm:$0xff] %v14464_v60  ;;  %v6610_v40 = vsel %vm6582_vm15, %v6545_v5, %v5999_v63  ;;  %v17712_v63 = vld [vmem:[#allocation94_spill] sm:$0xff]  ;;  %v17718_v60 = vld [vmem:[#allocation29_spill] sm:$0xff] }
 0x6dd   :  { %v6674_v49 = vsel %vm673_vm5, %v6610_v40, %v17708_v51  ;;  %v6116_v51 = vsel %vm4179_vm10, %v6114_v47, %v6115_v36  ;;  %8251 = vmatmul.msk.bf16.gmra.mxu3 %vm189_vm0, %v17711_v27  ;;  %v6354_v50 = vsel %vm6324_vm12, %v6289_v17, %v17712_v63  ;;  %v3996_v36 = vshrl.u32 %v13985_v32, 16 }
 0x6de   :  { %8714 = vmatmul.msk.bf16.gmra.mxu0 %vm6747_vm1, %v6674_v49  ;;  %v4003_v49 = vshll.u32 %v13975_v1, 16  ;;  %v14486_v5 = vpop.f32.mrf.mxu3  ;;  %v6418_v21 = vsel %vm669_vm3, %v6354_v50, %v5073_v29  ;;  %v5190_v59 = vrot.slane %v14480_v13, 1  ;;  %v4010_v47 = vshll.u32 %v14068_v57, 16  ;;  %v17716_v50 = vld [vmem:[#allocation85_spill] sm:$0xff] }
 0x6df   :  { %4330 = vrot.lane.b32.xlu0 %v4263_v35, %s9175_s15  ;;  %6014 = vrot.lane.b32.xlu2 %v5851_v4, %s9184_s18  ;;  %17710 = vst [vmem:[#allocation67_spill] sm:$0xff] %v14486_v5  ;;  %v14495_v56 = vpop.permute.xlu2 %6176  ;;  %v4001_v48 = vor.u32 %v4000_v3, %v3996_v36  ;;  %v4927_v4 = vshll.u32 %v14016_v34, 16  ;;  %v5189_v17 = vrot.slane %v14489_v61, 1  ;;  %v4015_v63 = vshll.u32 %v14060_v20, 16  ;;  %v3271_v5 = vld [vmem:[#allocation2 + $0x170] sm:$0x1] }
 0x6e0   :  { %17713 = vst [vmem:[#allocation34_spill] sm:$0xff] %v14495_v56  ;;  %v4005_v35 = vrot.slane %v4003_v49, 1  ;;  %v4012_v29 = vrot.slane %v4010_v47, 1  ;;  %v4932_v36 = vshll.u32 %v17716_v50, 16  ;;  %v4008_v20 = vshrl.u32 %v14068_v57, 16  ;;  %v17725_v56 = vld [vmem:[#allocation13_spill] sm:$0xff] }
 0x6e1   :  { %6184 = vrot.lane.b32.xlu1 %v6116_v51, %s9172_s30  ;;  %v6001_v37 = vpop.permute.xlu0 %6000  ;;  %v17715_v51 = vld [vmem:[#allocation96_spill] sm:$0xff]  ;;  %v5191_v32 = vsel %vm4179_vm10, %v5189_v17, %v5190_v59  ;;  %v4929_v49 = vrot.slane %v4927_v4, 1  ;;  %v4925_v4 = vshrl.u32 %v14016_v34, 16  ;;  %v4017_v57 = vrot.slane %v4015_v63, 1  ;;  %v17726_v63 = vld [vmem:[#allocation14_spill] sm:$0xff] }
 0x6e2   :  { %v6483_v27 = vsel %vm6453_vm13, %v6418_v21, %v17715_v51  ;;  %v4006_v3 = vsel %vm3730_vm9, %v4001_v48, %v4005_v35  ;;  %v17719_v59 = vld [vmem:[#allocation8_spill] sm:$0xff]  ;;  %v4939_v51 = vshll.u32 %v14106_v38, 16 }
 0x6e3   :  { %v14499_v1 = vpop.permute.xlu1 %4542  ;;  %v14501_v40 = vpop.f32.mrf.mxu0  ;;  %v6547_v21 = vsel %vm671_vm4, %v6483_v27, %v17718_v60  ;;  %v6227_v47 = vsel %vm1983_vm14, %v17719_v59, %v14427_v0  ;;  %v4013_v27 = vor.u32 %v4012_v29, %v4008_v20  ;;  %v4930_v50 = vor.u32 %v4929_v49, %v4925_v4  ;;  %v17724_v59 = vld [vmem:[#allocation65_spill] sm:$0xff]  ;;  %v17729_v4 = vld [vmem:[#allocation71_spill] sm:$0xff] }
 0x6e4   :  { %17714 = vst [vmem:[#allocation82_spill] sm:$0xff] %v14501_v40  ;;  %v6612_v17 = vsel %vm6582_vm15, %v6547_v21, %v6001_v37  ;;  %v5855_v0 = vshll.u32 %v14079_v52, 16  ;;  %v17723_v37 = vld [vmem:[#allocation97_spill] sm:$0xff]  ;;  %v4941_v34 = vrot.slane %v4939_v51, 1  ;;  %v4937_v29 = vshrl.u32 %v14106_v38, 16 }
 0x6e5   :  { %v6291_v21 = vsel %vm189_vm0, %v6227_v47, %v17723_v37  ;;  %v17727_v47 = vld [vmem:[#allocation19_spill] sm:$0xff]  ;;  %v17734_v37 = vld [vmem:[#allocation48_spill] sm:$0xff] }
 0x6e6   :  { %v14516_v40 = vpop.f32.mrf.mxu3  ;;  %v6356_v49 = vsel %vm6324_vm12, %v6291_v21, %v17726_v63  ;;  %v5857_v20 = vrot.slane %v5855_v0, 1  ;;  %v4022_v21 = vshll.u32 %v17734_v37, 16 }
 0x6e7   :  { %5258 = vrot.lane.b32.xlu0 %v5191_v32, %s9183_s17  ;;  %4552 = vrot.lane.b32.xlu2 %v14429_v19, %s9182_s14  ;;  %17717 = vst [vmem:[#allocation47_spill] sm:$0xff] %v14516_v40  ;;  %v14528_v35 = vpop.permute.xlu2 %4546  ;;  %v4934_v40 = vrot.slane %v4932_v36, 1  ;;  %v6420_v38 = vsel %vm669_vm3, %v6356_v49, %v14457_v8 }
 0x6e8   :  { %17721 = vst [vmem:[#allocation26_spill] sm:$0xff] %v14528_v35  ;;  %v6676_v35 = vsel %vm673_vm5, %v6612_v17, %v17724_v59  ;;  %v5860_v17 = vshll.u32 %v17727_v47, 16  ;;  %v17735_v59 = vld [vmem:[#allocation86_spill] sm:$0xff] }
 0x6e9   :  { %4159 = vrot.lane.b32.xlu1 %v4006_v3, %s9181_s7  ;;  %v14526_v48 = vpop.permute.xlu0 %4544  ;;  %v3694_v3 = vunpack.c.l.b16 %v3271_v5  ;;  %v4935_v36 = vsel %vm3730_vm9, %v4930_v50, %v4934_v40  ;;  %v4942_v40 = vor.u32 %v4941_v34, %v4937_v29  ;;  %v6485_v63 = vsel %vm6453_vm13, %v6420_v38, %v17735_v59  ;;  %v17736_v47 = vld [vmem:[#allocation54_spill] sm:$0xff] }
 0x6ea   :  { %17720 = vst [vmem:[#allocation23_spill] sm:$0xff] %v14526_v48  ;;  %v4944_v48 = vshll.u32 %v17725_v56, 16  ;;  %v5872_v29 = vshll.u32 %v14192_v39, 16  ;;  %v5865_v39 = vshrl.u32 %v14182_v15, 16  ;;  %v4020_v38 = vshrl.u32 %v17734_v37, 16 }
 0x6eb   :  { %v14532_v32 = vpop.permute.xlu1 %5470  ;;  %v14534_v60 = vpop.f32.mrf.mxu0  ;;  %v14545_v5 = vpack.c.b16 %v3694_v3, %v3694_v3  ;;  %v5867_v3 = vshll.u32 %v14182_v15, 16  ;;  %v4951_v15 = vshll.u32 %v14228_v54, 16 }
 0x6ec   :  { %17722 = vst [vmem:[#allocation18_spill] sm:$0xff] %v14534_v60  ;;  %v4018_v60 = vsel %vm3730_vm9, %v4013_v27, %v4017_v57  ;;  %v4946_v27 = vrot.slane %v4944_v48, 1  ;;  %v5853_v57 = vshrl.u32 %v14079_v52, 16 }
 0x6ed   :  { %8252 = vmatmul.msk.bf16.gmra.mxu3 %vm189_vm0, %v17729_v4  ;;  %v4265_v0 = vrot.slane %v14545_v5, 1  ;;  %v5869_v52 = vrot.slane %v5867_v3, 1  ;;  %v6549_v4 = vsel %vm671_vm4, %v6485_v63, %v17736_v47  ;;  %v5874_v3 = vrot.slane %v5872_v29, 1 }
 0x6ee   :  { %8715 = vmatmul.msk.bf16.gmra.mxu0 %vm6747_vm1, %v6676_v35  ;;  %v14554_v56 = vpop.f32.mrf.mxu3  ;;  %v14559_v35 = vld [vmem:[#allocation2 + $0x168] sm:$0xff]  ;;  %v5858_v49 = vor.u32 %v5857_v20, %v5853_v57  ;;  %v4947_v48 = vsel %vm3730_vm9, %v4942_v40, %v4946_v27 }
 0x6ef   :  { %4161 = vrot.lane.b32.xlu0 %v4018_v60, %s9181_s7  ;;  %5480 = vrot.lane.b32.xlu2 %v14460_v23, %s9176_s16  ;;  %17728 = vst [vmem:[#allocation33_spill] sm:$0xff] %v14554_v56  ;;  %v14565_v60 = vpop.permute.xlu2 %5474  ;;  %v4264_v34 = vrot.slane %v14559_v35, 1  ;;  %v5870_v59 = vor.u32 %v5869_v52, %v5865_v39  ;;  %v4953_v52 = vrot.slane %v4951_v15, 1 }
 0x6f0   :  { %17731 = vst [vmem:[#allocation95_spill] sm:$0xff] %v14565_v60  ;;  %v17737_v60 = vld [vmem:[#allocation79_spill] sm:$0xff] }
 0x6f1   :  { %5088 = vrot.lane.b32.xlu1 %v4935_v36, %s9174_s0  ;;  %v14563_v51 = vpop.permute.xlu0 %5472  ;;  %v5862_v36 = vrot.slane %v5860_v17, 1  ;;  %v4266_v56 = vsel %vm4179_vm10, %v4264_v34, %v4265_v0  ;;  %v9135_v34 = vld [vmem:[#allocation2 + $0xd8] sm:$0xff] }
 0x6f2   :  { %17730 = vst [vmem:[#allocation92_spill] sm:$0xff] %v14563_v51  ;;  %v3461_v51 = vld [vmem:[#allocation2 + $0x17c] sm:$0x1] }
 0x6f3   :  { %v14569_v50 = vpop.permute.xlu1 %4322  ;;  %v14571_v8 = vpop.f32.mrf.mxu0  ;;  %v5863_v20 = vsel %vm3730_vm9, %v5858_v49, %v5862_v36  ;;  %v5551_v0 = vunpack.c.l.b16 %v3461_v51  ;;  %v17741_v36 = vld [vmem:[#allocation69_spill] sm:$0xff]  ;;  %v5875_v51 = vsel %vm3730_vm9, %v5870_v59, %v5874_v3  ;;  %v17745_v3 = vld [vmem:[#allocation83_spill] sm:$0xff] }
 0x6f4   :  { %17732 = vst [vmem:[#allocation45_spill] sm:$0xff] %v14569_v50  ;;  %v4027_v50 = vshll.u32 %v17737_v60, 16  ;;  %v17739_v60 = vld [vmem:[#allocation81_spill] sm:$0xff] }
 0x6f5   :  { %17733 = vst [vmem:[#allocation94_spill] sm:$0xff] %v14571_v8  ;;  %v4024_v8 = vrot.slane %v4022_v21, 1  ;;  %v6614_v57 = vsel %vm6582_vm15, %v6549_v4, %v17739_v60  ;;  %v14608_v29 = vpack.c.b16 %v5551_v0, %v5551_v0  ;;  %v4949_v60 = vshrl.u32 %v14228_v54, 16 }
 0x6f6   :  { %v14587_v17 = vpop.f32.mrf.mxu3  ;;  %v4029_v49 = vrot.slane %v4027_v50, 1  ;;  %v6678_v37 = vsel %vm673_vm5, %v6614_v57, %v17741_v36  ;;  %v4956_v50 = vshll.u32 %v14217_v46, 16  ;;  %v3274_v57 = vld [vmem:[#allocation2 + $0x17c] sm:$0x1] }
 0x6f7   :  { %5090 = vrot.lane.b32.xlu0 %v4947_v48, %s9174_s0  ;;  %4332 = vrot.lane.b32.xlu2 %v4266_v56, %s9175_s15  ;;  %17738 = vst [vmem:[#allocation96_spill] sm:$0xff] %v14587_v17  ;;  %v14594_v27 = vpop.permute.xlu2 %4151  ;;  %v4025_v63 = vor.u32 %v4024_v8, %v4020_v38  ;;  %v17742_v48 = vld [vmem:[#allocation75_spill] sm:$0xff]  ;;  %v4954_v15 = vor.u32 %v4953_v52, %v4949_v60  ;;  %v3695_v54 = vunpack.c.l.b16 %v3274_v57  ;;  %v17748_v17 = vld [vmem:[#allocation32_spill] sm:$0xff]  ;;  %v5877_v57 = vshrl.u32 %v14254_v33, 16 }
 0x6f8   :  { %v6229_v47 = vsel %vm1983_vm14, %v9135_v34, %v17742_v48  ;;  %v14621_v38 = vld [vmem:[#allocation2 + $0x174] sm:$0xff]  ;;  %v4958_v36 = vrot.slane %v4956_v50, 1  ;;  %v17747_v34 = vld [vmem:[#allocation17_spill] sm:$0xff] }
 0x6f9   :  { %6016 = vrot.lane.b32.xlu1 %v5863_v20, %s9184_s18  ;;  %v14592_v40 = vpop.permute.xlu0 %4324  ;;  %v4030_v4 = vsel %vm3730_vm9, %v4025_v63, %v4029_v49  ;;  %v17744_v20 = vld [vmem:[#allocation74_spill] sm:$0xff]  ;;  %v6118_v49 = vrot.slane %v14608_v29, 1  ;;  %v14643_v50 = vpack.c.b16 %v3695_v54, %v3695_v54 }
 0x6fa   :  { %v6293_v39 = vsel %vm189_vm0, %v6229_v47, %v17744_v20  ;;  %v4959_v20 = vsel %vm3730_vm9, %v4954_v15, %v4958_v36 }
 0x6fb   :  { %v14598_v56 = vpop.permute.xlu1 %5250  ;;  %v14600_v21 = vpop.f32.mrf.mxu0  ;;  %v6358_v48 = vsel %vm6324_vm12, %v6293_v39, %v17747_v34  ;;  %v3367_v39 = vld [vmem:[#allocation2 + $0x17c] sm:$0x1] }
 0x6fc   :  { %17740 = vst [vmem:[#allocation85_spill] sm:$0xff] %v14600_v21  ;;  %v4624_v54 = vunpack.c.l.b16 %v3367_v39 }
 0x6fd   :  { %8253 = vmatmul.msk.bf16.gmra.mxu3 %vm189_vm0, %v17745_v3 }
 0x6fe   :  { %8716 = vmatmul.msk.bf16.gmra.mxu0 %vm6747_vm1, %v6678_v37  ;;  %v14615_v8 = vpop.f32.mrf.mxu3  ;;  %v5879_v37 = vshll.u32 %v14254_v33, 16  ;;  %v4268_v33 = vrot.slane %v14643_v50, 1 }
 0x6ff   :  { %6018 = vrot.lane.b32.xlu0 %v5875_v51, %s9184_s18  ;;  %4163 = vrot.lane.b32.xlu2 %v4030_v4, %s9181_s7  ;;  %17743 = vst [vmem:[#allocation29_spill] sm:$0xff] %v14615_v8  ;;  %v14626_v0 = vpop.permute.xlu2 %5080  ;;  %v6117_v51 = vrot.slane %v14621_v38, 1  ;;  %v5884_v8 = vshll.u32 %v14241_v30, 16  ;;  %v14652_v30 = vld [vmem:[#allocation2 + $0x174] sm:$0xff] }
 0x700   :  { %v5881_v3 = vrot.slane %v5879_v37, 1 }
 0x701   :  { %4554 = vrot.lane.b32.xlu1 %v14489_v61, %s9182_s14  ;;  %v4150_v46 = vpop.permute.xlu0 %4149  ;;  %v6119_v4 = vsel %vm4179_vm10, %v6117_v51, %v6118_v49 }
 0x702   :  { %v5882_v34 = vor.u32 %v5881_v3, %v5877_v57  ;;  %v4267_v3 = vrot.slane %v14652_v30, 1 }
 0x703   :  { %v5077_v59 = vpop.permute.xlu1 %5076  ;;  %v14628_v63 = vpop.f32.mrf.mxu0 }
 0x704   :  { %17746 = vst [vmem:[#allocation8_spill] sm:$0xff] %v14628_v63  ;;  %v6422_v47 = vsel %vm669_vm3, %v6358_v48, %v5077_v59  ;;  %v5886_v48 = vrot.slane %v5884_v8, 1  ;;  %v17753_v8 = vld [vmem:[#allocation73_spill] sm:$0xff]  ;;  %v4269_v57 = vsel %vm4179_vm10, %v4267_v3, %v4268_v33  ;;  %v4046_v33 = vshll.u32 %v14399_v24, 16 }
 0x705   :  { %v6487_v52 = vsel %vm6453_vm13, %v6422_v47, %v17748_v17  ;;  %v17750_v17 = vld [vmem:[#allocation36_spill] sm:$0xff]  ;;  %v6231_v47 = vsel %vm1983_vm14, %v14113_v28, %v4150_v46  ;;  %v14672_v46 = vpack.c.b16 %v4624_v54, %v4624_v54 }
 0x706   :  { %v14645_v60 = vpop.f32.mrf.mxu3  ;;  %v6551_v15 = vsel %vm671_vm4, %v6487_v52, %v17750_v17  ;;  %v14666_v52 = vld [vmem:[#allocation2 + $0x174] sm:$0xff]  ;;  %v6295_v39 = vsel %vm189_vm0, %v6231_v47, %v17753_v8  ;;  %v5887_v28 = vsel %vm3730_vm9, %v5882_v34, %v5886_v48  ;;  %v17755_v47 = vld [vmem:[#allocation21_spill] sm:$0xff]  ;;  %v4048_v63 = vrot.slane %v4046_v33, 1 }
 0x707   :  { %6186 = vrot.lane.b32.xlu0 %v6119_v4, %s9172_s30  ;;  %5092 = vrot.lane.b32.xlu2 %v4959_v20, %s9174_s0  ;;  %17749 = vst [vmem:[#allocation97_spill] sm:$0xff] %v14645_v60  ;;  %v14650_v49 = vpop.permute.xlu2 %6008  ;;  %v4034_v4 = vshll.u32 %v14284_v26, 16  ;;  %v17752_v20 = vld [vmem:[#allocation76_spill] sm:$0xff]  ;;  %v17756_v34 = vld [vmem:[#allocation89_spill] sm:$0xff]  ;;  %v5193_v8 = vrot.slane %v14672_v46, 1  ;;  %v17760_v33 = vld [vmem:[#allocation43_spill] sm:$0xff] }
 0x708   :  { %v6360_v48 = vsel %vm6324_vm12, %v6295_v39, %v17756_v34  ;;  %v4963_v39 = vshll.u32 %v14305_v14, 16  ;;  %v5192_v34 = vrot.slane %v14666_v52, 1 }
 0x709   :  { %5482 = vrot.lane.b32.xlu1 %v14621_v38, %s9176_s16  ;;  %v5079_v59 = vpop.permute.xlu0 %5078  ;;  %v4036_v17 = vrot.slane %v4034_v4, 1 }
 0x70b   :  { %v6005_v36 = vpop.permute.xlu1 %6004  ;;  %v14656_v37 = vpop.f32.mrf.mxu0 }
 0x70c   :  { %17751 = vst [vmem:[#allocation65_spill] sm:$0xff] %v14656_v37  ;;  %v6616_v51 = vsel %vm6582_vm15, %v6551_v15, %v6005_v36  ;;  %v3464_v15 = vld [vmem:[#allocation2 + $0x188] sm:$0x1]  ;;  %v14700_v37 = vld [vmem:[#allocation2 + $0x180] sm:$0xff] }
 0x70d   :  { %v6680_v60 = vsel %vm673_vm5, %v6616_v51, %v17752_v20  ;;  %8254 = vmatmul.msk.bf16.gmra.mxu3 %vm189_vm0, %v17755_v47  ;;  %v4032_v20 = vshrl.u32 %v14284_v26, 16 }
 0x70e   :  { %8717 = vmatmul.msk.bf16.gmra.mxu0 %vm6747_vm1, %v6680_v60  ;;  %v4039_v60 = vshll.u32 %v14275_v45, 16  ;;  %v14679_v36 = vpop.f32.mrf.mxu3  ;;  %v6424_v45 = vsel %vm669_vm3, %v6360_v48, %v5079_v59  ;;  %v4051_v59 = vshll.u32 %v14384_v31, 16  ;;  %v5194_v48 = vsel %vm4179_vm10, %v5192_v34, %v5193_v8 }
 0x70f   :  { %4556 = vrot.lane.b32.xlu0 %v14666_v52, %s9182_s14  ;;  %6020 = vrot.lane.b32.xlu2 %v5887_v28, %s9184_s18  ;;  %17754 = vst [vmem:[#allocation13_spill] sm:$0xff] %v14679_v36  ;;  %v14686_v51 = vpop.permute.xlu2 %4326  ;;  %v5552_v28 = vunpack.c.l.b16 %v3464_v15  ;;  %v17758_v36 = vld [vmem:[#allocation38_spill] sm:$0xff]  ;;  %v4965_v15 = vrot.slane %v4963_v39, 1 }
 0x710   :  { %v4041_v47 = vrot.slane %v4039_v60, 1  ;;  %v6489_v26 = vsel %vm6453_vm13, %v6424_v45, %v17758_v36  ;;  %v4044_v60 = vshrl.u32 %v14399_v24, 16  ;;  %v4968_v36 = vshll.u32 %v14309_v11, 16 }
 0x711   :  { %4334 = vrot.lane.b32.xlu1 %v4269_v57, %s9175_s15  ;;  %v6007_v54 = vpop.permute.xlu0 %6006  ;;  %v4037_v57 = vor.u32 %v4036_v17, %v4032_v20  ;;  %v6553_v31 = vsel %vm671_vm4, %v6489_v26, %v17760_v33  ;;  %v4961_v24 = vshrl.u32 %v14305_v14, 16  ;;  %v4975_v26 = vshll.u32 %v14429_v19, 16 }
 0x712   :  { %v6618_v45 = vsel %vm6582_vm15, %v6553_v31, %v6007_v54  ;;  %v4049_v34 = vor.u32 %v4048_v63, %v4044_v60  ;;  %v6233_v54 = vsel %vm1983_vm14, %v14177_v44, %v14594_v27  ;;  %v5891_v33 = vshll.u32 %v14355_v42, 16  ;;  %v17762_v63 = vld [vmem:[#allocation6_spill] sm:$0xff]  ;;  %v17763_v31 = vld [vmem:[#allocation16_spill] sm:$0xff] }
 0x713   :  { %v14691_v4 = vpop.permute.xlu1 %6178  ;;  %v14693_v3 = vpop.f32.mrf.mxu0  ;;  %v4042_v17 = vsel %vm3730_vm9, %v4037_v57, %v4041_v47  ;;  %v4053_v57 = vrot.slane %v4051_v59, 1  ;;  %v6682_v59 = vsel %vm673_vm5, %v6618_v45, %v17762_v63  ;;  %v6120_v14 = vrot.slane %v14700_v37, 1 }
 0x714   :  { %17757 = vst [vmem:[#allocation14_spill] sm:$0xff] %v14693_v3  ;;  %v14704_v3 = vpack.c.b16 %v5552_v28, %v5552_v28  ;;  %v4977_v21 = vrot.slane %v4975_v26, 1  ;;  %v4980_v44 = vshll.u32 %v14417_v6, 16  ;;  %v5889_v26 = vshrl.u32 %v14355_v42, 16  ;;  %v14769_v42 = vld [vmem:[#allocation2 + $0x180] sm:$0xff] }
 0x715   :  { %v4054_v60 = vsel %vm3730_vm9, %v4049_v34, %v4053_v57  ;;  %v4973_v34 = vshrl.u32 %v14429_v19, 16  ;;  %v3370_v57 = vld [vmem:[#allocation2 + $0x188] sm:$0x1]  ;;  %v4058_v63 = vshll.u32 %v14454_v43, 16 }
 0x716   :  { %v14712_v20 = vpop.f32.mrf.mxu3  ;;  %v6121_v39 = vrot.slane %v14704_v3, 1 }
 0x717   :  { %5484 = vrot.lane.b32.xlu0 %v14700_v37, %s9176_s16  ;;  %5260 = vrot.lane.b32.xlu2 %v5194_v48, %s9183_s17  ;;  %17759 = vst [vmem:[#allocation19_spill] sm:$0xff] %v14712_v20  ;;  %v4966_v48 = vor.u32 %v4965_v15, %v4961_v24  ;;  %v6297_v20 = vsel %vm189_vm0, %v6233_v54, %v17763_v31  ;;  %v5893_v15 = vrot.slane %v5891_v33, 1  ;;  %v17765_v24 = vld [vmem:[#allocation50_spill] sm:$0xff]  ;;  %v4982_v33 = vrot.slane %v4980_v44, 1 }
 0x718   :  { %v6362_v6 = vsel %vm6324_vm12, %v6297_v20, %v14142_v10  ;;  %v5901_v44 = vshrl.u32 %v14460_v23, 16 }
 0x719   :  { %4165 = vrot.lane.b32.xlu1 %v4042_v17, %s9181_s7  ;;  %v14718_v8 = vpop.permute.xlu0 %5252  ;;  %v14720_v28 = vpop.permute.xlu2 %5254  ;;  %v4970_v17 = vrot.slane %v4968_v36, 1  ;;  %v5896_v36 = vshll.u32 %v14345_v62, 16  ;;  %v5903_v62 = vshll.u32 %v14460_v23, 16  ;;  %v6426_v54 = vsel %vm669_vm3, %v6362_v6, %v14626_v0 }
 0x71a   :  { %v5894_v10 = vor.u32 %v5893_v15, %v5889_v26  ;;  %v4063_v6 = vshll.u32 %v14439_v9, 16  ;;  %v4056_v9 = vshrl.u32 %v14454_v43, 16 }
 0x71b   :  { %v14723_v47 = vpop.permute.xlu1 %4548  ;;  %v14725_v11 = vpop.f32.mrf.mxu0  ;;  %v4971_v27 = vsel %vm3730_vm9, %v4966_v48, %v4970_v17  ;;  %v4978_v17 = vor.u32 %v4977_v21, %v4973_v34  ;;  %v5898_v20 = vrot.slane %v5896_v36, 1  ;;  %v5905_v31 = vrot.slane %v5903_v62, 1  ;;  %v3280_v36 = vld [vmem:[#allocation2 + $0x194] sm:$0x1] }
 0x71c   :  { %17761 = vst [vmem:[#allocation71_spill] sm:$0xff] %v14725_v11  ;;  %v6122_v11 = vsel %vm4179_vm10, %v6120_v14, %v6121_v39  ;;  %v17766_v14 = vld [vmem:[#allocation52_spill] sm:$0xff] }
 0x71d   :  { %8255 = vmatmul.msk.bf16.gmra.mxu3 %vm189_vm0, %v17765_v24  ;;  %v4983_v0 = vsel %vm3730_vm9, %v4978_v17, %v4982_v33  ;;  %v4060_v24 = vrot.slane %v4058_v63, 1  ;;  %v5899_v21 = vsel %vm3730_vm9, %v5894_v10, %v5898_v20  ;;  %v5906_v23 = vor.u32 %v5905_v31, %v5901_v44  ;;  %v3277_v44 = vld [vmem:[#allocation2 + $0x188] sm:$0x1] }
 0x71e   :  { %8718 = vmatmul.msk.bf16.gmra.mxu0 %vm6747_vm1, %v6682_v59  ;;  %v14746_v45 = vpop.f32.mrf.mxu3  ;;  %v4625_v59 = vunpack.c.l.b16 %v3370_v57  ;;  %v3467_v57 = vld [vmem:[#allocation2 + $0x194] sm:$0x1]  ;;  %v4065_v20 = vrot.slane %v4063_v6, 1 }
 0x71f   :  { %4167 = vrot.lane.b32.xlu0 %v4054_v60, %s9181_s7  ;;  %6188 = vrot.lane.b32.xlu2 %v6122_v11, %s9172_s30  ;;  %17764 = vst [vmem:[#allocation48_spill] sm:$0xff] %v14746_v45  ;;  %v6491_v60 = vsel %vm6453_vm13, %v6426_v54, %v17766_v14  ;;  %v4061_v10 = vor.u32 %v4060_v24, %v4056_v9  ;;  %v5553_v14 = vunpack.c.l.b16 %v3467_v57  ;;  %v14818_v57 = vld [vmem:[#allocation2 + $0x18c] sm:$0xff]  ;;  %v17838_v45 = vld [vmem:[#allocation8_spill] sm:$0xff] }
 0x720   :  { %v14779_v15 = vpack.c.b16 %v4625_v59, %v4625_v59  ;;  %v4987_v59 = vshll.u32 %v14489_v61, 16 }
 0x721   :  { %5094 = vrot.lane.b32.xlu1 %v4971_v27, %s9174_s0  ;;  %v14754_v39 = vpop.permute.xlu0 %6180  ;;  %v14756_v11 = vpop.permute.xlu2 %6182  ;;  %v5908_v27 = vshll.u32 %v14449_v12, 16  ;;  %v6555_v12 = vsel %vm671_vm4, %v6491_v60, %v14175_v55  ;;  %v3697_v55 = vunpack.c.l.b16 %v3280_v36 }
 0x722   :  { %v6620_v26 = vsel %vm6582_vm15, %v6555_v12, %v14650_v49  ;;  %v5196_v43 = vrot.slane %v14779_v15, 1  ;;  %v4989_v6 = vrot.slane %v4987_v59, 1  ;;  %v17769_v12 = vld [vmem:[#allocation59_spill] sm:$0xff] }
 0x723   :  { %v14762_v48 = vpop.permute.xlu1 %5476  ;;  %v14764_v19 = vpop.f32.mrf.mxu0  ;;  %v5910_v17 = vrot.slane %v5908_v27, 1  ;;  %v6684_v49 = vsel %vm673_vm5, %v6620_v26, %v14138_v2  ;;  %v5195_v27 = vrot.slane %v14769_v42, 1  ;;  %v14805_v24 = vpack.c.b16 %v3697_v55, %v3697_v55  ;;  %v17770_v26 = vld [vmem:[#allocation51_spill] sm:$0xff] }
 0x725   :  { %v5911_v31 = vsel %vm3730_vm9, %v5906_v23, %v5910_v17  ;;  %v5197_v2 = vsel %vm4179_vm10, %v5195_v27, %v5196_v43  ;;  %v4274_v59 = vrot.slane %v14805_v24, 1 }
 0x726   :  { %v14781_v34 = vpop.f32.mrf.mxu3 }
 0x727   :  { %5096 = vrot.lane.b32.xlu0 %v4983_v0, %s9174_s0  ;;  %4558 = vrot.lane.b32.xlu2 %v14769_v42, %s9182_s14  ;;  %17767 = vst [vmem:[#allocation86_spill] sm:$0xff] %v14781_v34  ;;  %v4066_v0 = vsel %vm3730_vm9, %v4061_v10, %v4065_v20  ;;  %v3696_v10 = vunpack.c.l.b16 %v3277_v44 }
 0x729   :  { %6022 = vrot.lane.b32.xlu1 %v5899_v21, %s9184_s18  ;;  %v14789_v62 = vpop.permute.xlu0 %4550  ;;  %v14791_v54 = vpop.permute.xlu2 %4157  ;;  %v4992_v21 = vshll.u32 %v14480_v13, 16  ;;  %v4985_v13 = vshrl.u32 %v14489_v61, 16 }
 0x72b   :  { %v4154_v33 = vpop.permute.xlu1 %4153  ;;  %v14793_v63 = vpop.f32.mrf.mxu0  ;;  %v4990_v43 = vor.u32 %v4989_v6, %v4985_v13  ;;  %v5920_v6 = vshll.u32 %v14608_v29, 16  ;;  %v14852_v29 = vld [vmem:[#allocation2 + $0x180] sm:$0xff] }
 0x72c   :  { %v6235_v60 = vsel %vm1983_vm14, %v14292_v41, %v4154_v33  ;;  %v14811_v41 = vpack.c.b16 %v5553_v14, %v5553_v14  ;;  %v14825_v33 = vld [vmem:[#allocation2 + $0x18c] sm:$0xff]  ;;  %v4994_v14 = vrot.slane %v4992_v21, 1 }
 0x72d   :  { %v6299_v9 = vsel %vm189_vm0, %v6235_v60, %v17769_v12  ;;  %8256 = vmatmul.msk.bf16.gmra.mxu3 %vm189_vm0, %v17770_v26  ;;  %v6123_v44 = vrot.slane %v14825_v33, 1 }
 0x72e   :  { %8719 = vmatmul.msk.bf16.gmra.mxu0 %vm6747_vm1, %v6684_v49  ;;  %v14813_v36 = vpop.f32.mrf.mxu3  ;;  %v5915_v49 = vshll.u32 %v14621_v38, 16  ;;  %v6364_v61 = vsel %vm6324_vm12, %v6299_v9, %v14166_v25  ;;  %v6124_v60 = vrot.slane %v14811_v41, 1  ;;  %v4995_v12 = vsel %vm3730_vm9, %v4990_v43, %v4994_v14 }
 0x72f   :  { %6024 = vrot.lane.b32.xlu0 %v5911_v31, %s9184_s18  ;;  %4169 = vrot.lane.b32.xlu2 %v4066_v0, %s9181_s7  ;;  %17768 = vst [vmem:[#allocation54_spill] sm:$0xff] %v14813_v36  ;;  %v4070_v31 = vshll.u32 %v14559_v35, 16  ;;  %v4273_v0 = vrot.slane %v14818_v57, 1  ;;  %v4075_v25 = vshll.u32 %v14545_v5, 16  ;;  %v5922_v14 = vrot.slane %v5920_v6, 1 }
 0x730   :  { %v5917_v13 = vrot.slane %v5915_v49, 1  ;;  %v6125_v26 = vsel %vm4179_vm10, %v6123_v44, %v6124_v60  ;;  %v4068_v49 = vshrl.u32 %v14559_v35, 16  ;;  %v4999_v36 = vshll.u32 %v14666_v52, 16 }
 0x731   :  { %5262 = vrot.lane.b32.xlu1 %v5197_v2, %s9183_s17  ;;  %v4156_v23 = vpop.permute.xlu0 %4155  ;;  %v14823_v17 = vpop.permute.xlu2 %5086  ;;  %v14838_v2 = vpack.c.b16 %v3696_v10, %v3696_v10  ;;  %v4275_v21 = vsel %vm4179_vm10, %v4273_v0, %v4274_v59  ;;  %v4072_v10 = vrot.slane %v4070_v31, 1  ;;  %v5913_v59 = vshrl.u32 %v14621_v38, 16 }
 0x732   :  { %v4077_v44 = vrot.slane %v4075_v25, 1  ;;  %v4270_v6 = vrot.slane %v14852_v29, 1 }
 0x733   :  { %v5083_v20 = vpop.permute.xlu1 %5082  ;;  %v14827_v55 = vpop.f32.mrf.mxu0  ;;  %v5918_v0 = vor.u32 %v5917_v13, %v5913_v59 }
 0x734   :  { %v6428_v27 = vsel %vm669_vm3, %v6364_v61, %v5083_v20  ;;  %v3376_v20 = vld [vmem:[#allocation2 + $0x1a0] sm:$0x1] }
 0x735   :  { %v6493_v9 = vsel %vm6453_vm13, %v6428_v27, %v14140_v7  ;;  %v4271_v7 = vrot.slane %v14838_v2, 1 }
 0x736   :  { %v14849_v61 = vpop.f32.mrf.mxu3  ;;  %v6557_v60 = vsel %vm671_vm4, %v6493_v9, %v14202_v22  ;;  %v17772_v22 = vld [vmem:[#allocation88_spill] sm:$0xff]  ;;  %v5923_v9 = vsel %vm3730_vm9, %v5918_v0, %v5922_v14 }
 0x737   :  { %4338 = vrot.lane.b32.xlu0 %v4275_v21, %s9175_s15  ;;  %5098 = vrot.lane.b32.xlu2 %v4995_v12, %s9174_s0  ;;  %17771 = vst [vmem:[#allocation79_spill] sm:$0xff] %v14849_v61  ;;  %v4627_v21 = vunpack.c.l.b16 %v3376_v20  ;;  %v9136_v12 = vld [vmem:[#allocation2 + $0x108] sm:$0xff]  ;;  %v4073_v61 = vor.u32 %v4072_v10, %v4068_v49  ;;  %v4272_v25 = vsel %vm4179_vm10, %v4270_v6, %v4271_v7  ;;  %v5004_v20 = vshll.u32 %v14672_v46, 16  ;;  %v14883_v49 = vld [vmem:[#allocation2 + $0x198] sm:$0xff]  ;;  %v17774_v7 = vld [vmem:[#allocation24_spill] sm:$0xff] }
 0x738   :  { %v6237_v38 = vsel %vm1983_vm14, %v9136_v12, %v4156_v23  ;;  %v17775_v14 = vld [vmem:[#allocation56_spill] sm:$0xff]  ;;  %v4082_v12 = vshll.u32 %v14652_v30, 16  ;;  %v5927_v6 = vshll.u32 %v14700_v37, 16 }
 0x739   :  { %6190 = vrot.lane.b32.xlu1 %v6125_v26, %s9172_s30  ;;  %v5085_v5 = vpop.permute.xlu0 %5084  ;;  %v14855_v43 = vpop.permute.xlu2 %6014  ;;  %v6301_v13 = vsel %vm189_vm0, %v6237_v38, %v17772_v22  ;;  %v14874_v23 = vpack.c.b16 %v4627_v21, %v4627_v21  ;;  %v4078_v10 = vsel %vm3730_vm9, %v4073_v61, %v4077_v44  ;;  %v4997_v61 = vshrl.u32 %v14666_v52, 16  ;;  %v3473_v38 = vld [vmem:[#allocation2 + $0x1ac] sm:$0x1] }
 0x73a   :  { %v5201_v22 = vrot.slane %v14883_v49, 1 }
 0x73b   :  { %v6011_v31 = vpop.permute.xlu1 %6010  ;;  %v14861_v27 = vpop.f32.mrf.mxu0  ;;  %v5202_v21 = vrot.slane %v14874_v23, 1 }
 0x73c   :  { %v6622_v26 = vsel %vm6582_vm15, %v6557_v60, %v6011_v31  ;;  %v6366_v60 = vsel %vm6324_vm12, %v6301_v13, %v17775_v14  ;;  %v17776_v13 = vld [vmem:[#allocation27_spill] sm:$0xff]  ;;  %v5932_v14 = vshll.u32 %v14704_v3, 16 }
 0x73d   :  { %v6686_v35 = vsel %vm673_vm5, %v6622_v26, %v14168_v18  ;;  %v5001_v18 = vrot.slane %v4999_v36, 1  ;;  %8257 = vmatmul.msk.bf16.gmra.mxu3 %vm189_vm0, %v17774_v7  ;;  %v6430_v36 = vsel %vm669_vm3, %v6366_v60, %v5085_v5  ;;  %v5555_v5 = vunpack.c.l.b16 %v3473_v38 }
 0x73e   :  { %8720 = vmatmul.msk.bf16.gmra.mxu0 %vm6747_vm1, %v6686_v35  ;;  %v14880_v59 = vpop.f32.mrf.mxu3  ;;  %v5006_v35 = vrot.slane %v5004_v20, 1  ;;  %v6495_v52 = vsel %vm6453_vm13, %v6430_v36, %v17776_v13  ;;  %v4087_v7 = vshll.u32 %v14643_v50, 16  ;;  %v5929_v20 = vrot.slane %v5927_v6, 1 }
 0x73f   :  { %4336 = vrot.lane.b32.xlu0 %v4272_v25, %s9175_s15  ;;  %6026 = vrot.lane.b32.xlu2 %v5923_v9, %s9184_s18  ;;  %17773 = vst [vmem:[#allocation81_spill] sm:$0xff] %v14880_v59  ;;  %v5002_v26 = vor.u32 %v5001_v18, %v4997_v61  ;;  %v14903_v25 = vld [vmem:[#allocation2 + $0x1a4] sm:$0xff]  ;;  %v5203_v9 = vsel %vm4179_vm10, %v5201_v22, %v5202_v21  ;;  %v4080_v21 = vshrl.u32 %v14652_v30, 16 }
 0x740   :  { %v17778_v61 = vld [vmem:[#allocation68_spill] sm:$0xff]  ;;  %v5963_v3 = vshll.u32 %v14903_v25, 16 }
 0x741   :  { %4171 = vrot.lane.b32.xlu1 %v4078_v10, %s9181_s7  ;;  %v6013_v31 = vpop.permute.xlu0 %6012  ;;  %v14889_v0 = vpop.permute.xlu2 %4552  ;;  %v4084_v10 = vrot.slane %v4082_v12, 1  ;;  %v5007_v18 = vsel %vm3730_vm9, %v5002_v26, %v5006_v35  ;;  %v6559_v36 = vsel %vm671_vm4, %v6495_v52, %v17778_v61  ;;  %v5925_v26 = vshrl.u32 %v14700_v37, 16 }
 0x742   :  { %v6624_v50 = vsel %vm6582_vm15, %v6559_v36, %v6013_v31  ;;  %v14924_v35 = vpack.c.b16 %v5555_v5, %v5555_v5  ;;  %v4089_v52 = vrot.slane %v4087_v7, 1  ;;  %v5934_v36 = vrot.slane %v5932_v14, 1 }
 0x743   :  { %v14893_v46 = vpop.permute.xlu1 %4328  ;;  %v14895_v44 = vpop.f32.mrf.mxu0  ;;  %v4085_v13 = vor.u32 %v4084_v10, %v4080_v21  ;;  %v5930_v61 = vor.u32 %v5929_v20, %v5925_v26  ;;  %v6688_v37 = vsel %vm673_vm5, %v6624_v50, %v14367_v16  ;;  %v5961_v5 = vshrl.u32 %v14903_v25, 16  ;;  %v17779_v10 = vld [vmem:[#allocation7_spill] sm:$0xff]  ;;  %v17781_v50 = vld [vmem:[#allocation25_spill] sm:$0xff] }
 0x744   :  { %v5968_v59 = vshll.u32 %v14924_v35, 16  ;;  %v5009_v14 = vshrl.u32 %v14769_v42, 16 }
 0x745   :  { %v4090_v21 = vsel %vm3730_vm9, %v4085_v13, %v4089_v52  ;;  %v5935_v16 = vsel %vm3730_vm9, %v5930_v61, %v5934_v36  ;;  %v5939_v36 = vshll.u32 %v14825_v33, 16 }
 0x746   :  { %v14912_v60 = vpop.f32.mrf.mxu3  ;;  %v5970_v52 = vrot.slane %v5968_v59, 1 }
 0x747   :  { %5266 = vrot.lane.b32.xlu0 %v5203_v9, %s9183_s17  ;;  %5486 = vrot.lane.b32.xlu2 %v14825_v33, %s9176_s16  ;;  %17777 = vst [vmem:[#allocation69_spill] sm:$0xff] %v14912_v60  ;;  %v5011_v9 = vshll.u32 %v14769_v42, 16  ;;  %v5965_v60 = vrot.slane %v5963_v3, 1 }
 0x749   :  { %5100 = vrot.lane.b32.xlu1 %v5007_v18, %s9174_s0  ;;  %v14919_v12 = vpop.permute.xlu0 %5478  ;;  %v14921_v38 = vpop.permute.xlu2 %5480  ;;  %v9137_v18 = vld [vmem:[#allocation2 + $0x114] sm:$0xff]  ;;  %v5013_v34 = vrot.slane %v5011_v9, 1  ;;  %v5966_v13 = vor.u32 %v5965_v60, %v5961_v5  ;;  %v5944_v5 = vshll.u32 %v14811_v41, 16 }
 0x74a   :  { %v6239_v31 = vsel %vm1983_vm14, %v9137_v18, %v14791_v54  ;;  %v5016_v54 = vshll.u32 %v14779_v15, 16 }
 0x74b   :  { %v14927_v6 = vpop.permute.xlu1 %5256  ;;  %v14929_v22 = vpop.f32.mrf.mxu0  ;;  %v6303_v7 = vsel %vm189_vm0, %v6239_v31, %v17779_v10  ;;  %v5014_v42 = vor.u32 %v5013_v34, %v5009_v14  ;;  %v14969_v10 = vld [vmem:[#allocation2 + $0x18c] sm:$0xff]  ;;  %v5971_v59 = vsel %vm3730_vm9, %v5966_v13, %v5970_v52 }
 0x74c   :  { %v6368_v26 = vsel %vm6324_vm12, %v6303_v7, %v14499_v1  ;;  %v5018_v61 = vrot.slane %v5016_v54, 1  ;;  %v3373_v7 = vld [vmem:[#allocation2 + $0x194] sm:$0x1] }
 0x74d   :  { %8258 = vmatmul.msk.bf16.gmra.mxu3 %vm189_vm0, %v17781_v50  ;;  %v6432_v9 = vsel %vm669_vm3, %v6368_v26, %v14823_v17  ;;  %v5941_v17 = vrot.slane %v5939_v36, 1  ;;  %v4092_v26 = vshrl.u32 %v14852_v29, 16  ;;  %v4626_v13 = vunpack.c.l.b16 %v3373_v7 }
 0x74e   :  { %8721 = vmatmul.msk.bf16.gmra.mxu0 %vm6747_vm1, %v6688_v37  ;;  %v14947_v20 = vpop.f32.mrf.mxu3  ;;  %v4094_v37 = vshll.u32 %v14852_v29, 16  ;;  %v6497_v1 = vsel %vm6453_vm13, %v6432_v9, %v14361_v53  ;;  %v5019_v60 = vsel %vm3730_vm9, %v5014_v42, %v5018_v61  ;;  %v5946_v42 = vrot.slane %v5944_v5, 1  ;;  %v9138_v61 = vld [vmem:[#allocation2 + $0x138] sm:$0xff] }
 0x74f   :  { %4173 = vrot.lane.b32.xlu0 %v4090_v21, %s9181_s7  ;;  %4562 = vrot.lane.b32.xlu2 %v14883_v49, %s9182_s14  ;;  %17780 = vst [vmem:[#allocation75_spill] sm:$0xff] %v14947_v20  ;;  %v4099_v21 = vshll.u32 %v14838_v2, 16  ;;  %v6561_v53 = vsel %vm671_vm4, %v6497_v1, %v14532_v32  ;;  %v4106_v32 = vshll.u32 %v14818_v57, 16  ;;  %v4658_v7 = vpack.c.b16 %v4626_v13, %v4626_v13  ;;  %v17836_v20 = vld [vmem:[#allocation85_spill] sm:$0xff] }
 0x750   :  { %v4096_v34 = vrot.slane %v4094_v37, 1  ;;  %v6626_v41 = vsel %vm6582_vm15, %v6561_v53, %v14855_v43  ;;  %v5035_v43 = vshll.u32 %v14883_v49, 16 }
 0x751   :  { %6028 = vrot.lane.b32.xlu1 %v5935_v16, %s9184_s18  ;;  %v14955_v15 = vpop.permute.xlu0 %4330  ;;  %v14957_v3 = vpop.permute.xlu2 %4332  ;;  %v5937_v16 = vshrl.u32 %v14825_v33, 16  ;;  %v4101_v37 = vrot.slane %v4099_v21, 1  ;;  %v6690_v1 = vsel %vm673_vm5, %v6626_v41, %v14395_v58  ;;  %v4108_v53 = vrot.slane %v4106_v32, 1 }
 0x752   :  { %v4097_v33 = vor.u32 %v4096_v34, %v4092_v26  ;;  %v4111_v34 = vshll.u32 %v14805_v24, 16  ;;  %v5037_v21 = vrot.slane %v5035_v43, 1  ;;  %v4104_v26 = vshrl.u32 %v14818_v57, 16  ;;  %v17785_v24 = vld [vmem:[#allocation55_spill] sm:$0xff] }
 0x753   :  { %v14961_v18 = vpop.permute.xlu1 %6184  ;;  %v14963_v31 = vpop.f32.mrf.mxu0  ;;  %v5942_v9 = vor.u32 %v5941_v17, %v5937_v16  ;;  %v5040_v16 = vshll.u32 %v14874_v23, 16  ;;  %v5033_v23 = vshrl.u32 %v14883_v49, 16  ;;  %v5023_v43 = vshll.u32 %v14969_v10, 16 }
 0x754   :  { %v4102_v58 = vsel %vm3730_vm9, %v4097_v33, %v4101_v37  ;;  %v4109_v33 = vor.u32 %v4108_v53, %v4104_v26  ;;  %v4113_v37 = vrot.slane %v4111_v34, 1  ;;  %v5198_v49 = vrot.slane %v14969_v10, 1  ;;  %v3470_v53 = vld [vmem:[#allocation2 + $0x1a0] sm:$0x1] }
 0x755   :  { %v5947_v5 = vsel %vm3730_vm9, %v5942_v9, %v5946_v42  ;;  %v5199_v42 = vrot.slane %v4658_v7, 1  ;;  %v5025_v26 = vrot.slane %v5023_v43, 1 }
 0x756   :  { %v14978_v54 = vpop.f32.mrf.mxu3 }
 0x757   :  { %5102 = vrot.lane.b32.xlu0 %v5019_v60, %s9174_s0  ;;  %4560 = vrot.lane.b32.xlu2 %v14969_v10, %s9182_s14  ;;  %17782 = vst [vmem:[#allocation74_spill] sm:$0xff] %v14978_v54  ;;  %v5200_v34 = vsel %vm4179_vm10, %v5198_v49, %v5199_v42  ;;  %v6130_v42 = vrot.slane %v14924_v35, 1  ;;  %v17790_v35 = vld [vmem:[#allocation34_spill] sm:$0xff] }
 0x758   :  { %v17835_v54 = vld [vmem:[#allocation94_spill] sm:$0xff] }
 0x759   :  { %6034 = vrot.lane.b32.xlu1 %v5971_v59, %s9184_s18  ;;  %v14986_v14 = vpop.permute.xlu0 %5258  ;;  %v4164_v50 = vpop.permute.xlu2 %4163  ;;  %v9139_v59 = vld [vmem:[#allocation2 + $0x120] sm:$0xff] }
 0x75a   :  { %v6245_v36 = vsel %vm1983_vm14, %v9138_v61, %v4164_v50  ;;  %v17784_v50 = vld [vmem:[#allocation63_spill] sm:$0xff] }
 0x75b   :  { %v4160_v52 = vpop.permute.xlu1 %4159  ;;  %v14989_v2 = vpop.f32.mrf.mxu0  ;;  %v6309_v17 = vsel %vm189_vm0, %v6245_v36, %v14592_v40 }
 0x75c   :  { %v6241_v60 = vsel %vm1983_vm14, %v9139_v59, %v4160_v52  ;;  %v6374_v9 = vsel %vm6324_vm12, %v6309_v17, %v14723_v47  ;;  %v17786_v59 = vld [vmem:[#allocation23_spill] sm:$0xff]  ;;  %v5042_v47 = vrot.slane %v5040_v16, 1 }
 0x75d   :  { %v6305_v40 = vsel %vm189_vm0, %v6241_v60, %v17784_v50  ;;  %8259 = vmatmul.msk.bf16.gmra.mxu3 %vm189_vm0, %v17785_v24  ;;  %v4114_v50 = vsel %vm3730_vm9, %v4109_v33, %v4113_v37  ;;  %v17787_v24 = vld [vmem:[#allocation93_spill] sm:$0xff]  ;;  %v8877_v16 = vld [vmem:[#allocation2 + $0x198] sm:$0xff] }
 0x75e   :  { %8722 = vmatmul.msk.bf16.gmra.mxu0 %vm6747_vm1, %v6690_v1  ;;  %v15007_v41 = vpop.f32.mrf.mxu3  ;;  %v6370_v60 = vsel %vm6324_vm12, %v6305_v40, %v17786_v59 }
 0x75f   :  { %6030 = vrot.lane.b32.xlu0 %v5947_v5, %s9184_s18  ;;  %5490 = vrot.lane.b32.xlu2 %v14903_v25, %s9176_s16  ;;  %17783 = vst [vmem:[#allocation83_spill] sm:$0xff] %v15007_v41  ;;  %v5038_v5 = vor.u32 %v5037_v21, %v5033_v23 }
 0x761   :  { %4175 = vrot.lane.b32.xlu1 %v4102_v58, %s9181_s7  ;;  %v4162_v13 = vpop.permute.xlu0 %4161  ;;  %v5093_v52 = vpop.permute.xlu2 %5092  ;;  %v5043_v21 = vsel %vm3730_vm9, %v5038_v5, %v5042_v47 }
 0x762   :  { %v6438_v32 = vsel %vm669_vm3, %v6374_v9, %v5093_v52  ;;  %v5554_v52 = vunpack.c.l.b16 %v3470_v53  ;;  %v6129_v9 = vrot.slane %v14903_v25, 1  ;;  %v17791_v53 = vld [vmem:[#allocation45_spill] sm:$0xff] }
 0x763   :  { %v5089_v61 = vpop.permute.xlu1 %5088  ;;  %v15019_v36 = vpop.f32.mrf.mxu0  ;;  %v6503_v1 = vsel %vm6453_vm13, %v6438_v32, %v14718_v8  ;;  %v5028_v8 = vshll.u32 %v4658_v7, 16  ;;  %v5021_v7 = vshrl.u32 %v14969_v10, 16 }
 0x764   :  { %v6434_v17 = vsel %vm669_vm3, %v6370_v60, %v5089_v61  ;;  %v15030_v58 = vsel %vm671_vm4, %v6503_v1, %v14762_v48  ;;  %v17789_v61 = vld [vmem:[#allocation92_spill] sm:$0xff]  ;;  %v9140_v60 = vld [vmem:[#allocation2 + $0x12c] sm:$0xff]  ;;  %v5586_v25 = vpack.c.b16 %v5554_v52, %v5554_v52  ;;  %v6131_v49 = vsel %vm4179_vm10, %v6129_v9, %v6130_v42 }
 0x765   :  { %v6499_v40 = vsel %vm6453_vm13, %v6434_v17, %v17787_v24  ;;  %v5026_v1 = vor.u32 %v5025_v26, %v5021_v7  ;;  %v5030_v59 = vrot.slane %v5028_v8, 1  ;;  %v6243_v5 = vsel %vm1983_vm14, %v9140_v60, %v4162_v13  ;;  %v17793_v24 = vld [vmem:[#allocation90_spill] sm:$0xff] }
 0x766   :  { %v15039_v48 = vpop.f32.mrf.mxu3  ;;  %v6563_v33 = vsel %vm671_vm4, %v6499_v40, %v17789_v61  ;;  %v5951_v17 = vshll.u32 %v8877_v16, 16  ;;  %v5956_v26 = vshll.u32 %v5586_v25, 16  ;;  %v17794_v40 = vld [vmem:[#allocation26_spill] sm:$0xff]  ;;  %v5949_v42 = vshrl.u32 %v8877_v16, 16 }
 0x767   :  { %5264 = vrot.lane.b32.xlu0 %v5200_v34, %s9183_s17  ;;  %4177 = vrot.lane.b32.xlu2 %v4114_v50, %s9181_s7  ;;  %17788 = vst [vmem:[#allocation17_spill] sm:$0xff] %v15039_v48  ;;  %v6307_v34 = vsel %vm189_vm0, %v6243_v5, %v17791_v53  ;;  %v5031_v13 = vsel %vm3730_vm9, %v5026_v1, %v5030_v59  ;;  %v6126_v60 = vrot.slane %v8877_v16, 1  ;;  %v17833_v48 = vld [vmem:[#allocation18_spill] sm:$0xff] }
 0x768   :  { %v5953_v50 = vrot.slane %v5951_v17, 1  ;;  %v5958_v59 = vrot.slane %v5956_v26, 1  ;;  %v7010_v41 = vsel %vm1983_vm14, %v17833_v48, 0.0 }
 0x769   :  { %5106 = vrot.lane.b32.xlu1 %v5043_v21, %s9174_s0  ;;  %v5091_v23 = vpop.permute.xlu0 %5090  ;;  %v6021_v32 = vpop.permute.xlu2 %6020  ;;  %v6372_v21 = vsel %vm6324_vm12, %v6307_v34, %v17794_v40 }
 0x76a   :  { %v6436_v7 = vsel %vm669_vm3, %v6372_v21, %v5091_v23  ;;  %v5954_v1 = vor.u32 %v5953_v50, %v5949_v42  ;;  %v17798_v50 = vld [vmem:[#allocation91_spill] sm:$0xff] }
 0x76b   :  { %v6017_v37 = vpop.permute.xlu1 %6016  ;;  %v15047_v43 = vpop.f32.mrf.mxu0  ;;  %v6501_v5 = vsel %vm6453_vm13, %v6436_v7, %v14598_v56 }
 0x76c   :  { %v6628_v47 = vsel %vm6582_vm15, %v6563_v33, %v6017_v37  ;;  %v6127_v37 = vrot.slane %v5586_v25, 1  ;;  %v5959_v17 = vsel %vm3730_vm9, %v5954_v1, %v5958_v59 }
 0x76d   :  { %v6692_v10 = vsel %vm673_vm5, %v6628_v47, %v17790_v35  ;;  %8260 = vmatmul.msk.bf16.gmra.mxu3 %vm189_vm0, %v17793_v24 }
 0x76e   :  { %8723 = vmatmul.msk.bf16.gmra.mxu0 %vm6747_vm1, %v6692_v10  ;;  %v15060_v8 = vpop.f32.mrf.mxu3  ;;  %v6128_v47 = vsel %vm4179_vm10, %v6126_v60, %v6127_v37  ;;  %v17796_v10 = vld [vmem:[#allocation95_spill] sm:$0xff] }
 0x76f   :  { %6194 = vrot.lane.b32.xlu0 %v6131_v49, %s9172_s30  ;;  %5488 = vrot.lane.b32.xlu2 %v8877_v16, %s9176_s16  ;;  %17792 = vst [vmem:[#allocation32_spill] sm:$0xff] %v15060_v8  ;;  %v6565_v23 = vsel %vm671_vm4, %v6501_v5, %v17796_v10  ;;  %v9141_v37 = vld [vmem:[#allocation2 + $0x15c] sm:$0xff]  ;;  %v9142_v10 = vld [vmem:[#allocation2 + $0x144] sm:$0xff]  ;;  %v17832_v8 = vld [vmem:[#allocation82_spill] sm:$0xff] }
 0x771   :  { %5104 = vrot.lane.b32.xlu1 %v5031_v13, %s9174_s0  ;;  %v6019_v52 = vpop.permute.xlu0 %6018  ;;  %v15067_v9 = vpop.permute.xlu2 %5260 }
 0x772   :  { %v6630_v25 = vsel %vm6582_vm15, %v6565_v23, %v6019_v52 }
 0x773   :  { %v4555_v61 = vpop.permute.xlu1 %4554  ;;  %v15070_v33 = vpop.f32.mrf.mxu0  ;;  %v6694_v34 = vsel %vm673_vm5, %v6630_v25, %v14691_v4  ;;  %v6632_v4 = vsel %vm6582_vm15, %v15030_v58, %v6021_v32  ;;  %v17801_v25 = vld [vmem:[#allocation57_spill] sm:$0xff] }
 0x776   :  { %v15077_v35 = vpop.f32.mrf.mxu3 }
 0x777   :  { %6192 = vrot.lane.b32.xlu2 %v6128_v47, %s9172_s30  ;;  %17795 = vst [vmem:[#allocation36_spill] sm:$0xff] %v15077_v35  ;;  %v6696_v47 = vsel %vm673_vm5, %v6632_v4, %v14754_v39 }
 0x779   :  { %6032 = vrot.lane.b32.xlu1 %v5959_v17, %s9184_s18  ;;  %v6187_v49 = vpop.permute.xlu0 %6186  ;;  %v15083_v16 = vpop.permute.xlu2 %6188 }
 0x77b   :  { %v5483_v53 = vpop.permute.xlu1 %5482  ;;  %v15085_v56 = vpop.f32.mrf.mxu0 }
 0x77d   :  { %8261 = vmatmul.msk.bf16.gmra.mxu3 %vm189_vm0, %v17798_v50 }
 0x77e   :  { %8724 = vmatmul.msk.bf16.gmra.mxu0 %vm6747_vm1, %v6694_v34  ;;  %v15090_v13 = vpop.f32.mrf.mxu3 }
 0x77f   :  { %17797 = vst [vmem:[#allocation76_spill] sm:$0xff] %v15090_v13  ;;  %v17830_v13 = vld [vmem:[#allocation72_spill] sm:$0xff] }
 0x781   :  { %v15094_v26 = vpop.permute.xlu0 %4556  ;;  %v15096_v24 = vpop.permute.xlu2 %4558 }
 0x783   :  { %v15098_v40 = vpop.permute.xlu1 %4334  ;;  %v15100_v21 = vpop.f32.mrf.mxu0 }
 0x786   :  { %v15102_v52 = vpop.f32.mrf.mxu3 }
 0x787   :  { %17799 = vst [vmem:[#allocation73_spill] sm:$0xff] %v15102_v52 }
 0x789   :  { %v15106_v42 = vpop.permute.xlu0 %5484  ;;  %v4170_v7 = vpop.permute.xlu2 %4169 }
 0x78a   :  { %v6251_v1 = vsel %vm1983_vm14, %v9141_v37, %v4170_v7 }
 0x78b   :  { %v4166_v59 = vpop.permute.xlu1 %4165  ;;  %v15109_v60 = vpop.f32.mrf.mxu0  ;;  %v6315_v5 = vsel %vm189_vm0, %v6251_v1, %v14955_v15 }
 0x78c   :  { %v6380_v17 = vsel %vm6324_vm12, %v6315_v5, %v4555_v61  ;;  %v6247_v58 = vsel %vm1983_vm14, %v9142_v10, %v4166_v59 }
 0x78d   :  { %v6311_v23 = vsel %vm189_vm0, %v6247_v58, %v14686_v51  ;;  %8262 = vmatmul.msk.bf16.gmra.mxu3 %vm189_vm0, %v17801_v25 }
 0x78e   :  { %8725 = vmatmul.msk.bf16.gmra.mxu0 %vm6747_vm1, %v6696_v47  ;;  %v15118_v32 = vpop.f32.mrf.mxu3  ;;  %v6376_v7 = vsel %vm6324_vm12, %v6311_v23, %v14789_v62 }
 0x78f   :  { %17800 = vst [vmem:[#allocation21_spill] sm:$0xff] %v15118_v32 }
 0x791   :  { %v4168_v34 = vpop.permute.xlu0 %4167  ;;  %v5099_v15 = vpop.permute.xlu2 %5098 }
 0x792   :  { %v6444_v50 = vsel %vm669_vm3, %v6380_v17, %v5099_v15 }
 0x793   :  { %v5095_v39 = vpop.permute.xlu1 %5094  ;;  %v15125_v4 = vpop.f32.mrf.mxu0  ;;  %v6509_v61 = vsel %vm6453_vm13, %v6444_v50, %v14986_v14  ;;  %v9143_v14 = vld [vmem:[#allocation2 + $0x150] sm:$0xff]  ;;  %v17805_v50 = vld [vmem:[#allocation11_spill] sm:$0xff] }
 0x794   :  { %v6440_v37 = vsel %vm669_vm3, %v6376_v7, %v5095_v39  ;;  %v6573_v47 = vsel %vm671_vm4, %v6509_v61, %v5483_v53  ;;  %v6249_v62 = vsel %vm1983_vm14, %v9143_v14, %v4168_v34 }
 0x795   :  { %v6505_v51 = vsel %vm6453_vm13, %v6440_v37, %v14720_v28  ;;  %v6313_v53 = vsel %vm189_vm0, %v6249_v62, %v14893_v46 }
 0x796   :  { %v15134_v1 = vpop.f32.mrf.mxu3  ;;  %v6569_v17 = vsel %vm671_vm4, %v6505_v51, %v14919_v12  ;;  %v6378_v34 = vsel %vm6324_vm12, %v6313_v53, %v14889_v0 }
 0x797   :  { %17802 = vst [vmem:[#allocation89_spill] sm:$0xff] %v15134_v1  ;;  %v17827_v1 = vld [vmem:[#allocation28_spill] sm:$0xff] }
 0x799   :  { %v5097_v59 = vpop.permute.xlu0 %5096  ;;  %v6027_v5 = vpop.permute.xlu2 %6026 }
 0x79a   :  { %v6638_v23 = vsel %vm6582_vm15, %v6573_v47, %v6027_v5  ;;  %v6442_v61 = vsel %vm669_vm3, %v6378_v34, %v5097_v59 }
 0x79b   :  { %v6023_v10 = vpop.permute.xlu1 %6022  ;;  %v15139_v58 = vpop.f32.mrf.mxu0  ;;  %v6702_v12 = vsel %vm673_vm5, %v6638_v23, %v6187_v49  ;;  %v6507_v37 = vsel %vm6453_vm13, %v6442_v61, %v14927_v6  ;;  %v17808_v6 = vld [vmem:[#allocation60_spill] sm:$0xff] }
 0x79c   :  { %17803 = vst [vmem:[#allocation38_spill] sm:$0xff] %v15139_v58  ;;  %v6634_v25 = vsel %vm6582_vm15, %v6569_v17, %v6023_v10  ;;  %v6571_v49 = vsel %vm671_vm4, %v6507_v37, %v14921_v38 }
 0x79d   :  { %v6698_v28 = vsel %vm673_vm5, %v6634_v25, %v14756_v11  ;;  %8263 = vmatmul.msk.bf16.gmra.mxu3 %vm189_vm0, %v17805_v50  ;;  %v9144_v25 = vld [vmem:[#allocation2 + $0x168] sm:$0xff] }
 0x79e   :  { %8726 = vmatmul.msk.bf16.gmra.mxu0 %vm6747_vm1, %v6698_v28  ;;  %v15150_v15 = vpop.f32.mrf.mxu3 }
 0x79f   :  { %17804 = vst [vmem:[#allocation43_spill] sm:$0xff] %v15150_v15 }
 0x7a1   :  { %v6025_v39 = vpop.permute.xlu0 %6024  ;;  %v5487_v46 = vpop.permute.xlu2 %5486 }
 0x7a2   :  { %v6636_v5 = vsel %vm6582_vm15, %v6571_v49, %v6025_v39 }
 0x7a3   :  { %v5263_v7 = vpop.permute.xlu1 %5262  ;;  %v15157_v11 = vpop.f32.mrf.mxu0  ;;  %v6700_v59 = vsel %vm673_vm5, %v6636_v5, %v14961_v18 }
 0x7a6   :  { %v15161_v51 = vpop.f32.mrf.mxu3 }
 0x7a7   :  { %17806 = vst [vmem:[#allocation6_spill] sm:$0xff] %v15161_v51  ;;  %v17826_v51 = vld [vmem:[#allocation35_spill] sm:$0xff] }
 0x7a8   :  { %v7126_v15 = vmul.f32 %v17826_v51, %v17826_v51 }
 0x7a9   :  { %v4339_v47 = vpop.permute.xlu0 %4338  ;;  %v4563_v14 = vpop.permute.xlu2 %4562 }
 0x7ab   :  { %v6191_v17 = vpop.permute.xlu1 %6190  ;;  %v15166_v0 = vpop.f32.mrf.mxu0 }
 0x7ad   :  { %8264 = vmatmul.msk.bf16.gmra.mxu3 %vm189_vm0, %v17808_v6 }
 0x7ae   :  { %8727 = vmatmul.msk.bf16.gmra.mxu0 %vm6747_vm1, %v6700_v59  ;;  %v15171_v10 = vpop.f32.mrf.mxu3 }
 0x7af   :  { %17807 = vst [vmem:[#allocation16_spill] sm:$0xff] %v15171_v10 }
 0x7b1   :  { %v4337_v62 = vpop.permute.xlu0 %4336  ;;  %v4561_v49 = vpop.permute.xlu2 %4560 }
 0x7b3   :  { %v4172_v23 = vpop.permute.xlu1 %4171  ;;  %v15175_v38 = vpop.f32.mrf.mxu0 }
 0x7b4   :  { %v6253_v28 = vsel %vm1983_vm14, %v9144_v25, %v4172_v23 }
 0x7b5   :  { %v6317_v53 = vsel %vm189_vm0, %v6253_v28, %v14957_v3 }
 0x7b6   :  { %v15180_v50 = vpop.f32.mrf.mxu3  ;;  %v6382_v34 = vsel %vm6324_vm12, %v6317_v53, %v15094_v26 }
 0x7b7   :  { %17809 = vst [vmem:[#allocation50_spill] sm:$0xff] %v15180_v50 }
 0x7b9   :  { %v5267_v18 = vpop.permute.xlu0 %5266  ;;  %v5491_v26 = vpop.permute.xlu2 %5490 }
 0x7bb   :  { %v5101_v39 = vpop.permute.xlu1 %5100  ;;  %v15184_v61 = vpop.f32.mrf.mxu0 }
 0x7bc   :  { %17810 = vst [vmem:[#allocation52_spill] sm:$0xff] %v15184_v61  ;;  %v6446_v37 = vsel %vm669_vm3, %v6382_v34, %v5101_v39 }
 0x7bd   :  { %v6511_v5 = vsel %vm6453_vm13, %v6446_v37, %v15067_v9 }
 0x7be   :  { %8728 = vmatmul.msk.bf16.gmra.mxu0 %vm6747_vm1, %v6702_v12  ;;  %v6575_v3 = vsel %vm671_vm4, %v6511_v5, %v15106_v42  ;;  %v15192_v59 = vpop.f32.mrf.mxu3 }
 0x7bf   :  { %17811 = vst [vmem:[#allocation59_spill] sm:$0xff] %v15192_v59 }
 0x7c1   :  { %v4174_v6 = vpop.permute.xlu0 %4173  ;;  %v4178_v37 = vpop.permute.xlu2 %4177 }
 0x7c2   :  { %v6255_v9 = vsel %vm1983_vm14, %v14652_v30, %v4174_v6  ;;  %v6259_v30 = vsel %vm1983_vm14, %v14818_v57, %v4178_v37 }
 0x7c3   :  { %v6029_v23 = vpop.permute.xlu1 %6028  ;;  %v15194_v25 = vpop.f32.mrf.mxu0  ;;  %v6319_v12 = vsel %vm189_vm0, %v6255_v9, %v15098_v40  ;;  %v6323_v6 = vsel %vm189_vm0, %v6259_v30, %v4339_v47 }
 0x7c4   :  { %v6640_v53 = vsel %vm6582_vm15, %v6575_v3, %v6029_v23  ;;  %v6384_v5 = vsel %vm6324_vm12, %v6319_v12, %v15096_v24  ;;  %v6388_v9 = vsel %vm6324_vm12, %v6323_v6, %v4563_v14 }
 0x7c5   :  { %v6704_v42 = vsel %vm673_vm5, %v6640_v53, %v15083_v16 }
 0x7c6   :  { %v15196_v28 = vpop.f32.mrf.mxu3 }
 0x7c7   :  { %17812 = vst [vmem:[#allocation51_spill] sm:$0xff] %v15196_v28 }
 0x7c9   :  { %v5103_v34 = vpop.permute.xlu0 %5102  ;;  %v5489_v14 = vpop.permute.xlu2 %5488 }
 0x7ca   :  { %v6448_v28 = vsel %vm669_vm3, %v6384_v5, %v5103_v34 }
 0x7cb   :  { %v6035_v39 = vpop.permute.xlu1 %6034  ;;  %v15199_v50 = vpop.f32.mrf.mxu0  ;;  %v6513_v16 = vsel %vm6453_vm13, %v6448_v28, %v5263_v7 }
 0x7cc   :  { %v6577_v40 = vsel %vm671_vm4, %v6513_v16, %v5487_v46 }
 0x7ce   :  { %8729 = vmatmul.msk.bf16.gmra.mxu0 %vm6747_vm1, %v6704_v42  ;;  %v15210_v23 = vpop.f32.mrf.mxu3 }
 0x7cf   :  { %17813 = vst [vmem:[#allocation88_spill] sm:$0xff] %v15210_v23 }
 0x7d1   :  { %v6031_v3 = vpop.permute.xlu0 %6030 }
 0x7d2   :  { %v6642_v53 = vsel %vm6582_vm15, %v6577_v40, %v6031_v3 }
 0x7d3   :  { %v4176_v59 = vpop.permute.xlu1 %4175  ;;  %v15213_v10 = vpop.f32.mrf.mxu0  ;;  %v6706_v57 = vsel %vm673_vm5, %v6642_v53, %v6191_v17 }
 0x7d4   :  { %v6257_v7 = vsel %vm1983_vm14, %v14852_v29, %v4176_v59 }
 0x7d5   :  { %v6321_v47 = vsel %vm189_vm0, %v6257_v7, %v4337_v62 }
 0x7d6   :  { %v15227_v37 = vpop.f32.mrf.mxu3  ;;  %v6386_v17 = vsel %vm6324_vm12, %v6321_v47, %v4561_v49 }
 0x7d7   :  { %17815 = vst [vmem:[#allocation56_spill] sm:$0xff] %v15227_v37  ;;  %v17825_v37 = vld [vmem:[#allocation39_spill] sm:$0xff] }
 0x7d8   :  { %v6996_v23 = vsel %vm1983_vm14, %v17825_v37, 0.0 }
 0x7d9   :  { %v5265_v24 = vpop.permute.xlu0 %5264 }
 0x7db   :  { %v5107_v42 = vpop.permute.xlu1 %5106  ;;  %v15222_v12 = vpop.f32.mrf.mxu0 }
 0x7dc   :  { %17814 = vst [vmem:[#allocation24_spill] sm:$0xff] %v15222_v12  ;;  %v6452_v34 = vsel %vm669_vm3, %v6388_v9, %v5107_v42 }
 0x7dd   :  { %v6517_v5 = vsel %vm6453_vm13, %v6452_v34, %v5267_v18  ;;  %v17818_v34 = vld [vmem:[#allocation20_spill] sm:$0xff] }
 0x7de   :  { %8730 = vmatmul.msk.bf16.gmra.mxu0 %vm6747_vm1, %v6706_v57  ;;  %v6581_v46 = vsel %vm671_vm4, %v6517_v5, %v5491_v26  ;;  %v15241_v59 = vpop.f32.mrf.mxu3  ;;  %v7121_v5 = vmul.f32 %v17818_v34, %v17818_v34  ;;  %v6988_v7 = vsel %vm1983_vm14, %v17818_v34, 0.0  ;;  %v7042_v34 = vsel %vm1983_vm14, %v15047_v43, 0.0 }
 0x7df   :  { %v6646_v3 = vsel %vm6582_vm15, %v6581_v46, %v6035_v39  ;;  %17816 = vst [vmem:[#allocation27_spill] sm:$0xff] %v15241_v59  ;;  %v6193_v39 = vpop.permute.xlu2 %6192  ;;  %v17820_v46 = vld [vmem:[#allocation80_spill] sm:$0xff] }
 0x7e0   :  { %v7122_v47 = vmul.f32 %v17820_v46, %v17820_v46 }
 0x7e1   :  { %v6195_v28 = vpop.permute.xlu0 %6194 }
 0x7e2   :  { %v6710_v30 = vsel %vm673_vm5, %v6646_v3, %v6195_v28 }
 0x7e3   :  { %v5105_v18 = vpop.permute.xlu1 %5104  ;;  %v15236_v16 = vpop.f32.mrf.mxu0  ;;  %8732 = vmatmul.msk.bf16.vlgmr.msrb.gmra.mxu3 %vm6747_vm1, %v6710_v30  ;;  %v7185_v30 = vsel %vm1983_vm14, %v7121_v5, 0.0 }
 0x7e4   :  { %v6450_v29 = vsel %vm669_vm3, %v6386_v17, %v5105_v18  ;;  %v6990_v18 = vsel %vm1983_vm14, %v17820_v46, 0.0  ;;  %v17823_v17 = vld [vmem:[#allocation42_spill] sm:$0xff]  ;;  %v7145_v46 = vmul.f32 %v14963_v31, %v14963_v31 }
 0x7e5   :  { %v6515_v26 = vsel %vm6453_vm13, %v6450_v29, %v5265_v24  ;;  %v17819_v24 = vld [vmem:[#allocation31_spill] sm:$0xff]  ;;  %v7123_v29 = vmul.f32 %v17823_v17, %v17823_v17 }
 0x7e6   :  { %v6579_v62 = vsel %vm671_vm4, %v6515_v26, %v5489_v14  ;;  %v15250_v49 = vpop.f32.mrf.mxu3  ;;  %v7120_v57 = vmul.f32 %v17819_v24, %v17819_v24  ;;  %v6987_v3 = vsel %vm1983_vm14, %v17819_v24, 0.0  ;;  %v7050_v24 = vsel %vm1983_vm14, %v15109_v60, 0.0 }
 0x7e7   :  { %17817 = vst [vmem:[#allocation68_spill] sm:$0xff] %v15250_v49  ;;  %v6989_v26 = vadd.f32 %v6988_v7, %v6987_v3  ;;  %v7189_v5 = vsel %vm1983_vm14, %v7123_v29, 0.0  ;;  %v7125_v7 = vmul.f32 %v17825_v37, %v17825_v37 }
 0x7e9   :  { %v6991_v49 = vadd.f32 %v6990_v18, %v6989_v26  ;;  %v7193_v29 = vsel %vm1983_vm14, %v7125_v7, 0.0 }
 0x7eb   :  { %v6033_v6 = vpop.permute.xlu1 %6032  ;;  %v15245_v40 = vpop.f32.mrf.mxu0 }
 0x7ec   :  { %v6644_v53 = vsel %vm6582_vm15, %v6579_v62, %v6033_v6  ;;  %v7184_v62 = vsel %vm1983_vm14, %v7120_v57, 0.0  ;;  %v7187_v6 = vsel %vm1983_vm14, %v7122_v47, 0.0 }
 0x7ed   :  { %v6708_v9 = vsel %vm673_vm5, %v6644_v53, %v6193_v39  ;;  %v6992_v39 = vsel %vm1983_vm14, %v17823_v17, 0.0  ;;  %v17824_v53 = vld [vmem:[#allocation46_spill] sm:$0xff]  ;;  %v7141_v17 = vmul.f32 %v14827_v55, %v14827_v55 }
 0x7ee   :  { %8731 = vmatmul.msk.bf16.gmra.mxu0 %vm6747_vm1, %v6708_v9  ;;  %v15264_v28 = vpop.f32.mrf.mxu3  ;;  %v7124_v9 = vmul.f32 %v17824_v53, %v17824_v53  ;;  %v6994_v59 = vsel %vm1983_vm14, %v17824_v53, 0.0  ;;  %v6993_v57 = vadd.f32 %v6992_v39, %v6991_v49  ;;  %v7127_v49 = vmul.f32 %v17827_v1, %v17827_v1  ;;  %v17842_v53 = vld [vmem:[#allocation71_spill] sm:$0xff] }
 0x7ef   :  { %17822 = vst [vmem:[#allocation25_spill] sm:$0xff] %v15264_v28  ;;  %v7186_v28 = vadd.f32 %v7185_v30, %v7184_v62  ;;  %v6998_v62 = vsel %vm1983_vm14, %v17826_v51, 0.0  ;;  %v17840_v51 = vld [vmem:[#allocation14_spill] sm:$0xff] }
 0x7f0   :  { %v7191_v47 = vsel %vm1983_vm14, %v7124_v9, 0.0  ;;  %v6995_v18 = vadd.f32 %v6994_v59, %v6993_v57  ;;  %v7195_v9 = vsel %vm1983_vm14, %v7126_v15, 0.0  ;;  %v17829_v59 = vld [vmem:[#allocation53_spill] sm:$0xff]  ;;  %v7197_v32 = vsel %vm1983_vm14, %v7127_v49, 0.0 }
 0x7f1   :  { %v7188_v3 = vadd.f32 %v7187_v6, %v7186_v28  ;;  %v7002_v52 = vsel %vm1983_vm14, %v17829_v59, 0.0  ;;  %v7137_v37 = vmul.f32 %v17840_v51, %v17840_v51 }
 0x7f2   :  { %v6997_v6 = vadd.f32 %v6996_v23, %v6995_v18  ;;  %v7129_v23 = vmul.f32 %v17830_v13, %v17830_v13  ;;  %v7004_v18 = vsel %vm1983_vm14, %v17830_v13, 0.0 }
 0x7f3   :  { %v15252_v42 = vpop.f32.mrf.mxu0  ;;  %v7190_v30 = vadd.f32 %v7189_v5, %v7188_v3  ;;  %v7000_v5 = vsel %vm1983_vm14, %v17827_v1, 0.0  ;;  %v7128_v3 = vmul.f32 %v17829_v59, %v17829_v59  ;;  %v17839_v1 = vld [vmem:[#allocation65_spill] sm:$0xff] }
 0x7f4   :  { %v6999_v7 = vadd.f32 %v6998_v62, %v6997_v6  ;;  %v7201_v49 = vsel %vm1983_vm14, %v7129_v23, 0.0 }
 0x7f5   :  { %v7192_v28 = vadd.f32 %v7191_v47, %v7190_v30  ;;  %v7199_v15 = vsel %vm1983_vm14, %v7128_v3, 0.0 }
 0x7f6   :  { %v15296_v39 = vpop.f32.mrf.mxu3  ;;  %v7001_v30 = vadd.f32 %v7000_v5, %v6999_v7  ;;  %v7008_v7 = vsel %vm1983_vm14, %v17832_v8, 0.0 }
 0x7f7   :  { %17828 = vst [vmem:[#allocation63_spill] sm:$0xff] %v15296_v39  ;;  %v7194_v57 = vadd.f32 %v7193_v29, %v7192_v28  ;;  %v17831_v39 = vld [vmem:[#allocation30_spill] sm:$0xff] }
 0x7f8   :  { %v7130_v35 = vmul.f32 %v17831_v39, %v17831_v39  ;;  %v7003_v62 = vadd.f32 %v7002_v52, %v7001_v30  ;;  %v7006_v6 = vsel %vm1983_vm14, %v17831_v39, 0.0  ;;  %v7132_v52 = vmul.f32 %v17833_v48, %v17833_v48 }
 0x7f9   :  { %v7196_v47 = vadd.f32 %v7195_v9, %v7194_v57  ;;  %v7131_v9 = vmul.f32 %v17832_v8, %v17832_v8 }
 0x7fa   :  { %v7005_v3 = vadd.f32 %v7004_v18, %v7003_v62  ;;  %v7203_v57 = vsel %vm1983_vm14, %v7130_v35, 0.0  ;;  %v7012_v62 = vsel %vm1983_vm14, %v17835_v54, 0.0 }
 0x7fb   :  { %v15262_v14 = vpop.f32.mrf.mxu0  ;;  %v7198_v29 = vadd.f32 %v7197_v32, %v7196_v47  ;;  %v7205_v23 = vsel %vm1983_vm14, %v7131_v9, 0.0 }
 0x7fc   :  { %17821 = vst [vmem:[#allocation7_spill] sm:$0xff] %v15262_v14  ;;  %v7007_v47 = vadd.f32 %v7006_v6, %v7005_v3 }
 0x7fd   :  { %v7200_v5 = vadd.f32 %v7199_v15, %v7198_v29  ;;  %v7133_v15 = vmul.f32 %v17835_v54, %v17835_v54  ;;  %v7207_v29 = vsel %vm1983_vm14, %v7132_v52, 0.0 }
 0x7fe   :  { %v15325_v30 = vpop.f32.mrf.mxu3  ;;  %v7009_v35 = vadd.f32 %v7008_v7, %v7007_v47  ;;  %v7016_v47 = vsel %vm1983_vm14, %v17838_v45, 0.0 }
 0x7ff   :  { %v7202_v32 = vadd.f32 %v7201_v49, %v7200_v5  ;;  %17834 = vst [vmem:[#allocation55_spill] sm:$0xff] %v15325_v30  ;;  %v7134_v49 = vmul.f32 %v17836_v20, %v17836_v20  ;;  %v7209_v9 = vsel %vm1983_vm14, %v7133_v15, 0.0  ;;  %v7014_v30 = vsel %vm1983_vm14, %v17836_v20, 0.0 }
 0x800   :  { %v7011_v5 = vadd.f32 %v7010_v41, %v7009_v35  ;;  %v7136_v41 = vmul.f32 %v17839_v1, %v17839_v1  ;;  %v7018_v35 = vsel %vm1983_vm14, %v17839_v1, 0.0 }
 0x801   :  { %v7204_v18 = vadd.f32 %v7203_v57, %v7202_v32  ;;  %v7135_v57 = vmul.f32 %v17838_v45, %v17838_v45  ;;  %v7211_v32 = vsel %vm1983_vm14, %v7134_v49, 0.0 }
 0x802   :  { %v7013_v52 = vadd.f32 %v7012_v62, %v7011_v5  ;;  %v7215_v49 = vsel %vm1983_vm14, %v7136_v41, 0.0  ;;  %v7020_v5 = vsel %vm1983_vm14, %v17840_v51, 0.0 }
 0x803   :  { %v15289_v26 = vpop.f32.mrf.mxu0  ;;  %v7206_v6 = vadd.f32 %v7205_v23, %v7204_v18  ;;  %v7213_v15 = vsel %vm1983_vm14, %v7135_v57, 0.0 }
 0x804   :  { %v7015_v18 = vadd.f32 %v7014_v30, %v7013_v52  ;;  %v7138_v30 = vmul.f32 %v17842_v53, %v17842_v53  ;;  %v7217_v52 = vsel %vm1983_vm14, %v7137_v37, 0.0 }
 0x805   :  { %v7208_v7 = vadd.f32 %v7207_v29, %v7206_v6 }
 0x806   :  { %v7017_v62 = vadd.f32 %v7016_v47, %v7015_v18  ;;  %v15354_v6 = vpop.f32.mrf.mxu3  ;;  %v7139_v47 = vmul.f32 %v14764_v19, %v14764_v19  ;;  %v7219_v18 = vsel %vm1983_vm14, %v7138_v30, 0.0 }
 0x807   :  { %v7210_v23 = vadd.f32 %v7209_v9, %v7208_v7  ;;  %17841 = vst [vmem:[#allocation93_spill] sm:$0xff] %v15354_v6  ;;  %v7024_v6 = vsel %vm1983_vm14, %v14764_v19, 0.0 }
 0x808   :  { %v7019_v57 = vadd.f32 %v7018_v35, %v7017_v62  ;;  %v7221_v37 = vsel %vm1983_vm14, %v7139_v47, 0.0  ;;  %v7026_v62 = vsel %vm1983_vm14, %v14793_v63, 0.0 }
 0x809   :  { %v7212_v29 = vadd.f32 %v7211_v32, %v7210_v23  ;;  %v7022_v32 = vsel %vm1983_vm14, %v17842_v53, 0.0 }
 0x80a   :  { %v7021_v41 = vadd.f32 %v7020_v5, %v7019_v57  ;;  %v7142_v57 = vmul.f32 %v14861_v27, %v14861_v27 }
 0x80b   :  { %v15313_v28 = vpop.f32.mrf.mxu0  ;;  %v7214_v9 = vadd.f32 %v7213_v15, %v7212_v29  ;;  %v7140_v15 = vmul.f32 %v14793_v63, %v14793_v63 }
 0x80c   :  { %v7023_v29 = vadd.f32 %v7022_v32, %v7021_v41  ;;  %v7225_v41 = vsel %vm1983_vm14, %v7141_v17, 0.0 }
 0x80d   :  { %v7216_v23 = vadd.f32 %v7215_v49, %v7214_v9  ;;  %v7223_v30 = vsel %vm1983_vm14, %v7140_v15, 0.0  ;;  %v7028_v9 = vsel %vm1983_vm14, %v14827_v55, 0.0 }
 0x80e   :  { %v7025_v5 = vadd.f32 %v7024_v6, %v7023_v29  ;;  %v15385_v47 = vpop.f32.mrf.mxu3  ;;  %v7143_v6 = vmul.f32 %v14895_v44, %v14895_v44  ;;  %v7227_v29 = vsel %vm1983_vm14, %v7142_v57, 0.0 }
 0x80f   :  { %v7218_v35 = vadd.f32 %v7217_v52, %v7216_v23  ;;  %17845 = vst [vmem:[#allocation45_spill] sm:$0xff] %v15385_v47  ;;  %v7034_v47 = vsel %vm1983_vm14, %v14929_v22, 0.0 }
 0x810   :  { %v7027_v32 = vadd.f32 %v7026_v62, %v7025_v5  ;;  %v7144_v62 = vmul.f32 %v14929_v22, %v14929_v22  ;;  %v7229_v17 = vsel %vm1983_vm14, %v7143_v6, 0.0  ;;  %v7233_v6 = vsel %vm1983_vm14, %v7145_v46, 0.0 }
 0x811   :  { %v7220_v49 = vadd.f32 %v7219_v18, %v7218_v35  ;;  %v7030_v18 = vsel %vm1983_vm14, %v14861_v27, 0.0 }
 0x812   :  { %v7029_v35 = vadd.f32 %v7028_v9, %v7027_v32  ;;  %v7231_v57 = vsel %vm1983_vm14, %v7144_v62, 0.0  ;;  %v7146_v32 = vmul.f32 %v14989_v2, %v14989_v2 }
 0x813   :  { %v15337_v3 = vpop.f32.mrf.mxu0  ;;  %v7222_v52 = vadd.f32 %v7221_v37, %v7220_v49  ;;  %v7032_v37 = vsel %vm1983_vm14, %v14895_v44, 0.0 }
 0x814   :  { %17837 = vst [vmem:[#allocation23_spill] sm:$0xff] %v15337_v3  ;;  %v7031_v5 = vadd.f32 %v7030_v18, %v7029_v35  ;;  %v7038_v35 = vsel %vm1983_vm14, %v14989_v2, 0.0 }
 0x815   :  { %v7224_v15 = vadd.f32 %v7223_v30, %v7222_v52  ;;  %v7036_v52 = vsel %vm1983_vm14, %v14963_v31, 0.0 }
 0x816   :  { %v7033_v9 = vadd.f32 %v7032_v37, %v7031_v5  ;;  %v7235_v5 = vsel %vm1983_vm14, %v7146_v32, 0.0 }
 0x817   :  { %v7226_v49 = vadd.f32 %v7225_v41, %v7224_v15 }
 0x818   :  { %v7035_v18 = vadd.f32 %v7034_v47, %v7033_v9  ;;  %v7148_v47 = vmul.f32 %v15047_v43, %v15047_v43 }
 0x819   :  { %v7228_v30 = vadd.f32 %v7227_v29, %v7226_v49  ;;  %v7147_v29 = vmul.f32 %v15019_v36, %v15019_v36  ;;  %v15414_v49 = vpop.f32.mrf.mxu3 }
 0x81a   :  { %v7037_v62 = vadd.f32 %v7036_v52, %v7035_v18  ;;  %17847 = vst [vmem:[#allocation26_spill] sm:$0xff] %v15414_v49  ;;  %v7239_v32 = vsel %vm1983_vm14, %v7148_v47, 0.0  ;;  %v7044_v18 = vsel %vm1983_vm14, %v15070_v33, 0.0  ;;  %v7150_v49 = vmul.f32 %v15085_v56, %v15085_v56 }
 0x81b   :  { %v15361_v7 = vpop.f32.mrf.mxu0  ;;  %v7230_v41 = vadd.f32 %v7229_v17, %v7228_v30  ;;  %v7040_v17 = vsel %vm1983_vm14, %v15019_v36, 0.0  ;;  %v7237_v9 = vsel %vm1983_vm14, %v7147_v29, 0.0 }
 0x81c   :  { %17843 = vst [vmem:[#allocation92_spill] sm:$0xff] %v15361_v7  ;;  %v7039_v46 = vadd.f32 %v7038_v35, %v7037_v62  ;;  %v7046_v62 = vsel %vm1983_vm14, %v15085_v56, 0.0 }
 0x81d   :  { %v7232_v37 = vadd.f32 %v7231_v57, %v7230_v41  ;;  %v7149_v57 = vmul.f32 %v15070_v33, %v15070_v33 }
 0x81e   :  { %v7041_v41 = vadd.f32 %v7040_v17, %v7039_v46  ;;  %v7048_v46 = vsel %vm1983_vm14, %v15100_v21, 0.0 }
 0x81f   :  { %v7234_v30 = vadd.f32 %v7233_v6, %v7232_v37  ;;  %v7241_v29 = vsel %vm1983_vm14, %v7149_v57, 0.0 }
 0x820   :  { %v7043_v6 = vadd.f32 %v7042_v34, %v7041_v41  ;;  %v7152_v34 = vmul.f32 %v15109_v60, %v15109_v60 }
 0x821   :  { %v7236_v52 = vadd.f32 %v7235_v5, %v7234_v30  ;;  %v7151_v5 = vmul.f32 %v15100_v21, %v15100_v21  ;;  %v7243_v30 = vsel %vm1983_vm14, %v7150_v49, 0.0  ;;  %v15443_v41 = vpop.f32.mrf.mxu3 }
 0x822   :  { %v7045_v47 = vadd.f32 %v7044_v18, %v7043_v6  ;;  %17849 = vst [vmem:[#allocation91_spill] sm:$0xff] %v15443_v41  ;;  %v7247_v6 = vsel %vm1983_vm14, %v7152_v34, 0.0  ;;  %v7054_v41 = vsel %vm1983_vm14, %v15139_v58, 0.0 }
 0x823   :  { %v15383_v23 = vpop.f32.mrf.mxu0  ;;  %v7238_v35 = vadd.f32 %v7237_v9, %v7236_v52  ;;  %v7245_v57 = vsel %vm1983_vm14, %v7151_v5, 0.0 }
 0x824   :  { %17844 = vst [vmem:[#allocation34_spill] sm:$0xff] %v15383_v23  ;;  %v7047_v9 = vadd.f32 %v7046_v62, %v7045_v47 }
 0x825   :  { %v7240_v17 = vadd.f32 %v7239_v32, %v7238_v35  ;;  %v7153_v32 = vmul.f32 %v15125_v4, %v15125_v4  ;;  %v7052_v35 = vsel %vm1983_vm14, %v15125_v4, 0.0 }
 0x826   :  { %v7049_v49 = vadd.f32 %v7048_v46, %v7047_v9 }
 0x827   :  { %v7242_v52 = vadd.f32 %v7241_v29, %v7240_v17  ;;  %v7154_v29 = vmul.f32 %v15139_v58, %v15139_v58  ;;  %v7249_v5 = vsel %vm1983_vm14, %v7153_v32, 0.0  ;;  %v7157_v58 = vmul.f32 %v15175_v38, %v15175_v38 }
 0x828   :  { %v7051_v62 = vadd.f32 %v7050_v24, %v7049_v49  ;;  %v7156_v24 = vmul.f32 %v15166_v0, %v15166_v0  ;;  %v7058_v49 = vsel %vm1983_vm14, %v15166_v0, 0.0 }
 0x829   :  { %v7244_v18 = vadd.f32 %v7243_v30, %v7242_v52  ;;  %v7155_v30 = vmul.f32 %v15157_v11, %v15157_v11  ;;  %v7251_v9 = vsel %vm1983_vm14, %v7154_v29, 0.0  ;;  %v7056_v52 = vsel %vm1983_vm14, %v15157_v11, 0.0 }
 0x82a   :  { %v7053_v34 = vadd.f32 %v7052_v35, %v7051_v62  ;;  %v15472_v62 = vpop.f32.mrf.mxu3  ;;  %v7255_v29 = vsel %vm1983_vm14, %v7156_v24, 0.0 }
 0x82b   :  { %v15407_v15 = vpop.f32.mrf.mxu0  ;;  %v7246_v17 = vadd.f32 %v7245_v57, %v7244_v18  ;;  %v7253_v32 = vsel %vm1983_vm14, %v7155_v30, 0.0  ;;  %17851 = vst [vmem:[#allocation11_spill] sm:$0xff] %v15472_v62  ;;  %v7064_v62 = vsel %vm1983_vm14, %v15194_v25, 0.0 }
 0x82c   :  { %17846 = vst [vmem:[#allocation90_spill] sm:$0xff] %v15407_v15  ;;  %v7055_v57 = vadd.f32 %v7054_v41, %v7053_v34  ;;  %v7158_v41 = vmul.f32 %v15184_v61, %v15184_v61  ;;  %v7257_v34 = vsel %vm1983_vm14, %v7157_v58, 0.0 }
 0x82d   :  { %v7248_v46 = vadd.f32 %v7247_v6, %v7246_v17  ;;  %v7060_v17 = vsel %vm1983_vm14, %v15175_v38, 0.0 }
 0x82e   :  { %v7057_v35 = vadd.f32 %v7056_v52, %v7055_v57  ;;  %v7159_v52 = vmul.f32 %v15194_v25, %v15194_v25 }
 0x82f   :  { %v7250_v18 = vadd.f32 %v7249_v5, %v7248_v46 }
 0x830   :  { %v7059_v5 = vadd.f32 %v7058_v49, %v7057_v35  ;;  %v7261_v58 = vsel %vm1983_vm14, %v7159_v52, 0.0  ;;  %v7066_v35 = vsel %vm1983_vm14, %v15199_v50, 0.0 }
 0x831   :  { %v7252_v6 = vadd.f32 %v7251_v9, %v7250_v18  ;;  %v7062_v9 = vsel %vm1983_vm14, %v15184_v61, 0.0  ;;  %v7259_v18 = vsel %vm1983_vm14, %v7158_v41, 0.0  ;;  %v7161_v61 = vmul.f32 %v15213_v10, %v15213_v10 }
 0x832   :  { %v7061_v24 = vadd.f32 %v7060_v17, %v7059_v5  ;;  %v7068_v5 = vsel %vm1983_vm14, %v15213_v10, 0.0  ;;  %v15503_v52 = vpop.f32.mrf.mxu3 }
 0x833   :  { %v15431_v37 = vpop.f32.mrf.mxu0  ;;  %v7254_v30 = vadd.f32 %v7253_v32, %v7252_v6  ;;  %v7160_v32 = vmul.f32 %v15199_v50, %v15199_v50  ;;  %17854 = vst [vmem:[#allocation72_spill] sm:$0xff] %v15503_v52  ;;  %v7074_v52 = vsel %vm1983_vm14, %v15245_v40, 0.0 }
 0x834   :  { %17848 = vst [vmem:[#allocation95_spill] sm:$0xff] %v15431_v37  ;;  %v7063_v49 = vadd.f32 %v7062_v9, %v7061_v24  ;;  %v7265_v24 = vsel %vm1983_vm14, %v7161_v61, 0.0 }
 0x835   :  { %v7256_v57 = vadd.f32 %v7255_v29, %v7254_v30  ;;  %v7263_v41 = vsel %vm1983_vm14, %v7160_v32, 0.0  ;;  %v7162_v30 = vmul.f32 %v15222_v12, %v15222_v12 }
 0x836   :  { %v7065_v17 = vadd.f32 %v7064_v62, %v7063_v49  ;;  %v7163_v62 = vmul.f32 %v15236_v16, %v15236_v16 }
 0x837   :  { %v7258_v6 = vadd.f32 %v7257_v34, %v7256_v57 }
 0x838   :  { %v7067_v34 = vadd.f32 %v7066_v35, %v7065_v17  ;;  %v7164_v35 = vmul.f32 %v15245_v40, %v15245_v40  ;;  %v7269_v61 = vsel %vm1983_vm14, %v7163_v62, 0.0 }
 0x839   :  { %v7260_v29 = vadd.f32 %v7259_v18, %v7258_v6  ;;  %v7070_v18 = vsel %vm1983_vm14, %v15222_v12, 0.0  ;;  %v7267_v6 = vsel %vm1983_vm14, %v7162_v30, 0.0  ;;  %v7165_v12 = vmul.f32 %v15252_v42, %v15252_v42 }
 0x83a   :  { %v7069_v49 = vadd.f32 %v7068_v5, %v7067_v34  ;;  %v7271_v30 = vsel %vm1983_vm14, %v7164_v35, 0.0  ;;  %v7166_v34 = vmul.f32 %v15262_v14, %v15262_v14 }
 0x83b   :  { %v15455_v47 = vpop.f32.mrf.mxu0  ;;  %v7262_v9 = vadd.f32 %v7261_v58, %v7260_v29  ;;  %v7072_v58 = vsel %vm1983_vm14, %v15236_v16, 0.0  ;;  %v7273_v62 = vsel %vm1983_vm14, %v7165_v12, 0.0 }
 0x83c   :  { %17850 = vst [vmem:[#allocation57_spill] sm:$0xff] %v15455_v47  ;;  %v7071_v17 = vadd.f32 %v7070_v18, %v7069_v49  ;;  %v7078_v49 = vsel %vm1983_vm14, %v15262_v14, 0.0  ;;  %v7082_v14 = vsel %vm1983_vm14, %v15313_v28, 0.0 }
 0x83d   :  { %v7264_v32 = vadd.f32 %v7263_v41, %v7262_v9  ;;  %v7076_v9 = vsel %vm1983_vm14, %v15252_v42, 0.0 }
 0x83e   :  { %v7073_v5 = vadd.f32 %v7072_v58, %v7071_v17  ;;  %v7275_v17 = vsel %vm1983_vm14, %v7166_v34, 0.0 }
 0x83f   :  { %v7266_v29 = vadd.f32 %v7265_v24, %v7264_v32 }
 0x840   :  { %v7075_v18 = vadd.f32 %v7074_v52, %v7073_v5  ;;  %v7168_v52 = vmul.f32 %v15313_v28, %v15313_v28 }
 0x841   :  { %v7268_v41 = vadd.f32 %v7267_v6, %v7266_v29  ;;  %v7167_v6 = vmul.f32 %v15289_v26, %v15289_v26  ;;  %v15532_v29 = vpop.f32.mrf.mxu3 }
 0x842   :  { %v7077_v35 = vadd.f32 %v7076_v9, %v7075_v18  ;;  %17856 = vst [vmem:[#allocation82_spill] sm:$0xff] %v15532_v29  ;;  %v7279_v34 = vsel %vm1983_vm14, %v7168_v52, 0.0  ;;  %v7084_v18 = vsel %vm1983_vm14, %v15337_v3, 0.0  ;;  %v7170_v29 = vmul.f32 %v15361_v7, %v15361_v7 }
 0x843   :  { %v15479_v46 = vpop.f32.mrf.mxu0  ;;  %v7270_v24 = vadd.f32 %v7269_v61, %v7268_v41  ;;  %v7080_v61 = vsel %vm1983_vm14, %v15289_v26, 0.0  ;;  %v7277_v5 = vsel %vm1983_vm14, %v7167_v6, 0.0 }
 0x844   :  { %17852 = vst [vmem:[#allocation60_spill] sm:$0xff] %v15479_v46  ;;  %v7079_v12 = vadd.f32 %v7078_v49, %v7077_v35  ;;  %v7086_v35 = vsel %vm1983_vm14, %v15361_v7, 0.0  ;;  %v7090_v7 = vsel %vm1983_vm14, %v15407_v15, 0.0 }
 0x845   :  { %v7272_v58 = vadd.f32 %v7271_v30, %v7270_v24  ;;  %v7169_v30 = vmul.f32 %v15337_v3, %v15337_v3 }
 0x846   :  { %v7081_v24 = vadd.f32 %v7080_v61, %v7079_v12  ;;  %v7088_v12 = vsel %vm1983_vm14, %v15383_v23, 0.0 }
 0x847   :  { %v7274_v41 = vadd.f32 %v7273_v62, %v7272_v58  ;;  %v7281_v6 = vsel %vm1983_vm14, %v7169_v30, 0.0 }
 0x848   :  { %v7083_v49 = vadd.f32 %v7082_v14, %v7081_v24  ;;  %v7172_v14 = vmul.f32 %v15407_v15, %v15407_v15 }
 0x849   :  { %v7276_v9 = vadd.f32 %v7275_v17, %v7274_v41  ;;  %v7171_v17 = vmul.f32 %v15383_v23, %v15383_v23  ;;  %v7283_v41 = vsel %vm1983_vm14, %v7170_v29, 0.0  ;;  %v15561_v24 = vpop.f32.mrf.mxu3 }
 0x84a   :  { %v7085_v52 = vadd.f32 %v7084_v18, %v7083_v49  ;;  %17857 = vst [vmem:[#allocation18_spill] sm:$0xff] %v15561_v24  ;;  %v7092_v49 = vsel %vm1983_vm14, %v15431_v37, 0.0  ;;  %v7094_v24 = vsel %vm1983_vm14, %v15455_v47, 0.0 }
 0x84b   :  { %v15501_v57 = vpop.f32.mrf.mxu0  ;;  %v7278_v62 = vadd.f32 %v7277_v5, %v7276_v9  ;;  %v7285_v30 = vsel %vm1983_vm14, %v7171_v17, 0.0 }
 0x84c   :  { %17853 = vst [vmem:[#allocation53_spill] sm:$0xff] %v15501_v57  ;;  %v7087_v9 = vadd.f32 %v7086_v35, %v7085_v52 }
 0x84d   :  { %v7280_v61 = vadd.f32 %v7279_v34, %v7278_v62  ;;  %v7173_v34 = vmul.f32 %v15431_v37, %v15431_v37  ;;  %v7287_v62 = vsel %vm1983_vm14, %v7172_v14, 0.0 }
 0x84e   :  { %v7089_v29 = vadd.f32 %v7088_v12, %v7087_v9  ;;  %v7096_v9 = vsel %vm1983_vm14, %v15479_v46, 0.0 }
 0x84f   :  { %v7282_v5 = vadd.f32 %v7281_v6, %v7280_v61  ;;  %v7174_v6 = vmul.f32 %v15455_v47, %v15455_v47  ;;  %v7289_v17 = vsel %vm1983_vm14, %v7173_v34, 0.0 }
 0x850   :  { %v7091_v61 = vadd.f32 %v7090_v7, %v7089_v29  ;;  %v7176_v7 = vmul.f32 %v15501_v57, %v15501_v57  ;;  %v7098_v29 = vsel %vm1983_vm14, %v15501_v57, 0.0 }
 0x851   :  { %v7284_v18 = vadd.f32 %v7283_v41, %v7282_v5  ;;  %v7175_v41 = vmul.f32 %v15479_v46, %v15479_v46  ;;  %v7291_v5 = vsel %vm1983_vm14, %v7174_v6, 0.0 }
 0x852   :  { %v7093_v14 = vadd.f32 %v7092_v49, %v7091_v61  ;;  %v7295_v6 = vsel %vm1983_vm14, %v7176_v7, 0.0 }
 0x853   :  { %v15525_v32 = vpop.f32.mrf.mxu0  ;;  %v7286_v35 = vadd.f32 %v7285_v30, %v7284_v18  ;;  %v7293_v34 = vsel %vm1983_vm14, %v7175_v41, 0.0 }
 0x854   :  { %17855 = vst [vmem:[#allocation30_spill] sm:$0xff] %v15525_v32  ;;  %v7095_v18 = vadd.f32 %v7094_v24, %v7093_v14  ;;  %v7177_v47 = vmul.f32 %v15525_v32, %v15525_v32  ;;  %v7100_v61 = vsel %vm1983_vm14, %v15525_v32, 0.0 }
 0x855   :  { %v7288_v12 = vadd.f32 %v7287_v62, %v7286_v35 }
 0x856   :  { %v7097_v49 = vadd.f32 %v7096_v9, %v7095_v18  ;;  %v7297_v14 = vsel %vm1983_vm14, %v7177_v47, 0.0 }
 0x857   :  { %v7290_v30 = vadd.f32 %v7289_v17, %v7288_v12 }
 0x858   :  { %v7099_v41 = vadd.f32 %v7098_v29, %v7097_v49 }
 0x859   :  { %v7292_v62 = vadd.f32 %v7291_v5, %v7290_v30 }
 0x85a   :  { %v7101_v7 = vadd.f32 %v7100_v61, %v7099_v41 }
 0x85b   :  { %v15549_v58 = vpop.f32.mrf.mxu0  ;;  %v7294_v17 = vadd.f32 %v7293_v34, %v7292_v62 }
 0x85c   :  { %v7178_v24 = vmul.f32 %v15549_v58, %v15549_v58  ;;  %v7102_v5 = vsel %vm1983_vm14, %v15549_v58, 0.0 }
 0x85d   :  { %v7296_v30 = vadd.f32 %v7295_v6, %v7294_v17  ;;  %v7103_v62 = vadd.f32 %v7102_v5, %v7101_v7 }
 0x85e   :  { %v7299_v18 = vsel %vm1983_vm14, %v7178_v24, 0.0 }
 0x85f   :  { %v7298_v29 = vadd.f32 %v7297_v14, %v7296_v30 }
 0x861   :  { %v7300_v57 = vadd.f32 %v7299_v18, %v7298_v29 }
 0x863   :  { %v15573_v52 = vpop.f32.mrf.mxu0 }
 0x864   :  { %v7179_v9 = vmul.f32 %v15573_v52, %v15573_v52  ;;  %v7104_v32 = vsel %vm1983_vm14, %v15573_v52, 0.0 }
 0x865   :  { %v7105_v46 = vadd.f32 %v7104_v32, %v7103_v62 }
 0x866   :  { %v15590_v35 = vpop.f32.mrf.mxu3  ;;  %v7301_v47 = vsel %vm1983_vm14, %v7179_v9, 0.0 }
 0x867   :  { %17858 = vst [vmem:[#allocation94_spill] sm:$0xff] %v15590_v35  ;;  %v7302_v61 = vadd.f32 %v7301_v47, %v7300_v57  ;;  %v7182_v37 = vmul.f32 %v15590_v35, %v15590_v35  ;;  %v7110_v32 = vsel %vm1983_vm14, %v15590_v35, 0.0 }
 0x86b   :  { %v15597_v12 = vpop.f32.mrf.mxu0 }
 0x86c   :  { %v7180_v34 = vmul.f32 %v15597_v12, %v15597_v12  ;;  %v7106_v49 = vsel %vm1983_vm14, %v15597_v12, 0.0 }
 0x86d   :  { %v7107_v17 = vadd.f32 %v7106_v49, %v7105_v46 }
 0x86e   :  { %v7303_v6 = vsel %vm1983_vm14, %v7180_v34, 0.0  ;;  %v15613_v24 = vpop.f32.mrf.mxu3  ;;  %v7307_v34 = vsel %vm1983_vm14, %v7182_v37, 0.0 }
 0x86f   :  { %17859 = vst [vmem:[#allocation85_spill] sm:$0xff] %v15613_v24  ;;  %v7304_v9 = vadd.f32 %v7303_v6, %v7302_v61  ;;  %v7183_v46 = vmul.f32 %v15613_v24, %v15613_v24  ;;  %v7112_v29 = vsel %vm1983_vm14, %v15613_v24, 0.0 }
 0x871   :  { %v7309_v49 = vsel %vm1983_vm14, %v7183_v46, 0.0 }
 0x873   :  { %v15615_v41 = vpop.f32.mrf.mxu0 }
 0x874   :  { %v7108_v14 = vsel %vm1983_vm14, %v15615_v41, 0.0  ;;  %v7181_v5 = vmul.f32 %v15615_v41, %v15615_v41 }
 0x875   :  { %v7109_v30 = vadd.f32 %v7108_v14, %v7107_v17 }
 0x876   :  { %v7305_v57 = vsel %vm1983_vm14, %v7181_v5, 0.0 }
 0x877   :  { %v7111_v7 = vadd.f32 %v7110_v32, %v7109_v30  ;;  %v7306_v18 = vadd.f32 %v7305_v57, %v7304_v9 }
 0x879   :  { %v7113_v62 = vadd.f32 %v7112_v29, %v7111_v7  ;;  %v7308_v47 = vadd.f32 %v7307_v34, %v7306_v18 }
 0x87b   :  { %v7114_v6 = vrot.slane %v7113_v62, 4  ;;  %v7310_v61 = vadd.f32 %v7309_v49, %v7308_v47 }
 0x87d   :  { %v7115_v17 = vadd.f32 %v7114_v6, %v7113_v62  ;;  %v7311_v14 = vrot.slane %v7310_v61, 4 }
 0x87f   :  { %v7116_v35 = vrot.slane %v7115_v17, 2  ;;  %v7312_v15 = vadd.f32 %v7311_v14, %v7310_v61 }
 0x881   :  { %v7117_v23 = vadd.f32 %v7116_v35, %v7115_v17  ;;  %v7313_v3 = vrot.slane %v7312_v15, 2 }
 0x883   :  { %v7118_v5 = vrot.slane %v7117_v23, 1  ;;  %v7314_v30 = vadd.f32 %v7313_v3, %v7312_v15 }
 0x885   :  { %v7119_v9 = vadd.f32 %v7118_v5, %v7117_v23  ;;  %v7315_v32 = vrot.slane %v7314_v30, 1 }
 0x887   :  { %v7316_v37 = vadd.f32 %v7315_v32, %v7314_v30  ;;  %v15632_v57 = vmul.f32 0.001953125, %v7119_v9  ;;  %v17860_v30 = vld [vmem:[#allocation38_spill] sm:$0xff] }
 0x889   :  { %v7318_v24 = vmul.f32 0.001953125, %v7316_v37  ;;  %v7319_v7 = vmul.f32 %v15632_v57, %v15632_v57  ;;  %v7383_v46 = vsub.f32 %v15615_v41, %v15632_v57  ;;  %v7330_v35 = vsub.f32 %v17829_v59, %v15632_v57 }
 0x88a   :  { %v7331_v3 = vsub.f32 %v17830_v13, %v15632_v57  ;;  %v7332_v15 = vsub.f32 %v17831_v39, %v15632_v57  ;;  %v7333_v62 = vsub.f32 %v17832_v8, %v15632_v57  ;;  %v7334_v41 = vsub.f32 %v17833_v48, %v15632_v57 }
 0x88b   :  { %v7320_v18 = vsub.f32 %v7318_v24, %v7319_v7  ;;  %v7335_v24 = vsub.f32 %v17835_v54, %v15632_v57  ;;  %v7336_v59 = vsub.f32 %v17836_v20, %v15632_v57  ;;  %v7337_v13 = vsub.f32 %v17838_v45, %v15632_v57 }
 0x88c   :  { %v7338_v49 = vsub.f32 %v17839_v1, %v15632_v57  ;;  %v7339_v39 = vsub.f32 %v17840_v51, %v15632_v57  ;;  %v7340_v8 = vsub.f32 %v17842_v53, %v15632_v57  ;;  %v7341_v48 = vsub.f32 %v14764_v19, %v15632_v57 }
 0x88d   :  { %v7321_v34 = vmax.f32 %v7320_v18, 0.0  ;;  %v7342_v54 = vsub.f32 %v14793_v63, %v15632_v57  ;;  %v7380_v20 = vsub.f32 %v15549_v58, %v15632_v57  ;;  %v7343_v51 = vsub.f32 %v14827_v55, %v15632_v57  ;;  %v15923_v58 = vld [vmem:[%s16617_s9] ss:$0 sm:$0xff] }
 0x88e   :  { %v7344_v53 = vsub.f32 %v14861_v27, %v15632_v57  ;;  %v7345_v19 = vsub.f32 %v14895_v44, %v15632_v57  ;;  %v7346_v63 = vsub.f32 %v14929_v22, %v15632_v57  ;;  %v7347_v17 = vsub.f32 %v14963_v31, %v15632_v57 }
 0x88f   :  { %v7386_v29 = vadd.f32 1e-05, %v7321_v34  ;;  %v7348_v14 = vsub.f32 %v14989_v2, %v15632_v57  ;;  %v7349_v55 = vsub.f32 %v15019_v36, %v15632_v57  ;;  %v7350_v27 = vsub.f32 %v15047_v43, %v15632_v57 }
 0x890   :  { %v7351_v44 = vsub.f32 %v15070_v33, %v15632_v57  ;;  %v7352_v22 = vsub.f32 %v15085_v56, %v15632_v57  ;;  %v7353_v31 = vsub.f32 %v15100_v21, %v15632_v57  ;;  %v7354_v2 = vsub.f32 %v15109_v60, %v15632_v57  ;;  %v17861_v21 = vld [vmem:[#allocation52_spill] sm:$0xff] }
 0x891   :  { %9072 = vrsqrt.f32 %v7386_v29  ;;  %vm7393_vm0 = vweird.f32 %v7386_v29  ;;  %v7355_v36 = vsub.f32 %v15125_v4, %v15632_v57  ;;  %v7356_v43 = vsub.f32 %v17860_v30, %v15632_v57  ;;  %v17867_v30 = vld [vmem:[#allocation90_spill] sm:$0xff] }
 0x892   :  { %v7357_v33 = vsub.f32 %v15157_v11, %v15632_v57  ;;  %v7358_v56 = vsub.f32 %v15166_v0, %v15632_v57  ;;  %v7359_v32 = vsub.f32 %v15175_v38, %v15632_v57  ;;  %v7360_v37 = vsub.f32 %v17861_v21, %v15632_v57  ;;  %v17862_v0 = vld [vmem:[#allocation24_spill] sm:$0xff] }
 0x893   :  { %v7361_v60 = vsub.f32 %v15194_v25, %v15632_v57  ;;  %v7362_v4 = vsub.f32 %v15199_v50, %v15632_v57  ;;  %v7363_v11 = vsub.f32 %v15213_v10, %v15632_v57  ;;  %v7364_v7 = vsub.f32 %v17862_v0, %v15632_v57 }
 0x894   :  { %v7365_v38 = vsub.f32 %v15236_v16, %v15632_v57  ;;  %v7366_v34 = vsub.f32 %v15245_v40, %v15632_v57  ;;  %v7367_v25 = vsub.f32 %v15252_v42, %v15632_v57  ;;  %v7369_v10 = vsub.f32 %v15289_v26, %v15632_v57  ;;  %v17865_v40 = vld [vmem:[#allocation92_spill] sm:$0xff]  ;;  %v17866_v42 = vld [vmem:[#allocation34_spill] sm:$0xff]  ;;  %v17869_v26 = vld [vmem:[#allocation57_spill] sm:$0xff] }
 0x895   :  { %v7370_v16 = vsub.f32 %v15313_v28, %v15632_v57  ;;  %v7376_v0 = vsub.f32 %v17869_v26, %v15632_v57  ;;  %v17870_v28 = vld [vmem:[#allocation60_spill] sm:$0xff] }
 0x897   :  { %v9073_v23 = vpop.eup %9072 }
 0x898   :  { %v7388_v47 = vmul.f32 %v9073_v23, %v7386_v29  ;;  %vm7394_vm4 = vweird.f32 %v9073_v23  ;;  %v17863_v29 = vld [vmem:[#allocation7_spill] sm:$0xff] }
 0x899   :  { %vm7395_vm5 = vmor %vm7393_vm0, %vm7394_vm4  ;;  %v7368_v50 = vsub.f32 %v17863_v29, %v15632_v57  ;;  %v7377_v29 = vsub.f32 %v17870_v28, %v15632_v57  ;;  %v17871_v28 = vld [vmem:[#allocation53_spill] sm:$0xff] }
 0x89a   :  { %v7389_v6 = vmul.f32 %v9073_v23, %v7388_v47  ;;  %v7378_v1 = vsub.f32 %v17871_v28, %v15632_v57 }
 0x89c   :  { %v7390_v61 = vmul.f32 0.5, %v7389_v6 }
 0x89e   :  { %v7391_v5 = vsub.f32 1.5, %v7390_v61  ;;  %v7372_v61 = vsub.f32 %v17865_v40, %v15632_v57 }
 0x8a0   :  { %v7392_v9 = vmul.f32 %v9073_v23, %v7391_v5  ;;  %v7373_v5 = vsub.f32 %v17866_v42, %v15632_v57 }
 0x8a2   :  { %v15717_v18 = vsel %vm7395_vm5, %v9073_v23, %v7392_v9  ;;  %v17864_v23 = vld [vmem:[#allocation23_spill] sm:$0xff]  ;;  %v7374_v9 = vsub.f32 %v17867_v30, %v15632_v57 }
 0x8a3   :  { %v15726_v47 = vmul.f32 %v15717_v18, %v7383_v46  ;;  %v7371_v6 = vsub.f32 %v17864_v23, %v15632_v57  ;;  %v17868_v46 = vld [vmem:[#allocation95_spill] sm:$0xff]  ;;  %v15747_v23 = vmul.f32 %v15717_v18, %v7330_v35  ;;  %v15750_v40 = vmul.f32 %v15717_v18, %v7331_v3 }
 0x8a4   :  { %v7375_v21 = vsub.f32 %v17868_v46, %v15632_v57  ;;  %v15753_v42 = vmul.f32 %v15717_v18, %v7332_v15  ;;  %v15756_v30 = vmul.f32 %v15717_v18, %v7333_v62  ;;  %v15759_v46 = vmul.f32 %v15717_v18, %v7334_v41 }
 0x8a5   :  { %v15762_v26 = vmul.f32 %v15717_v18, %v7335_v24  ;;  %v15767_v35 = vmul.f32 %v15717_v18, %v7336_v59  ;;  %v15770_v3 = vmul.f32 %v15717_v18, %v7337_v13  ;;  %v15773_v15 = vmul.f32 %v15717_v18, %v7338_v49  ;;  %v17872_v59 = vld [vmem:[#allocation30_spill] sm:$0xff] }
 0x8a6   :  { %v15776_v62 = vmul.f32 %v15717_v18, %v7339_v39  ;;  %v15779_v41 = vmul.f32 %v15717_v18, %v7340_v8  ;;  %v15782_v24 = vmul.f32 %v15717_v18, %v7341_v48  ;;  %v15785_v28 = vmul.f32 %v15717_v18, %v7342_v54 }
 0x8a7   :  { %v7379_v45 = vsub.f32 %v17872_v59, %v15632_v57  ;;  %v15790_v13 = vmul.f32 %v15717_v18, %v7343_v51  ;;  %v15793_v49 = vmul.f32 %v15717_v18, %v7344_v53  ;;  %v15796_v39 = vmul.f32 %v15717_v18, %v7345_v19 }
 0x8a8   :  { %v15799_v8 = vmul.f32 %v15717_v18, %v7346_v63  ;;  %v15802_v48 = vmul.f32 %v15717_v18, %v7347_v17  ;;  %v15805_v54 = vmul.f32 %v15717_v18, %v7348_v14  ;;  %v15808_v59 = vmul.f32 %v15717_v18, %v7349_v55 }
 0x8a9   :  { %v15811_v51 = vmul.f32 %v15717_v18, %v7350_v27  ;;  %v15814_v53 = vmul.f32 %v15717_v18, %v7351_v44  ;;  %v15817_v19 = vmul.f32 %v15717_v18, %v7352_v22  ;;  %v15820_v63 = vmul.f32 %v15717_v18, %v7353_v31 }
 0x8aa   :  { %v15823_v17 = vmul.f32 %v15717_v18, %v7354_v2  ;;  %v15826_v14 = vmul.f32 %v15717_v18, %v7355_v36  ;;  %v15829_v55 = vmul.f32 %v15717_v18, %v7356_v43  ;;  %v15832_v27 = vmul.f32 %v15717_v18, %v7357_v33 }
 0x8ab   :  { %v15835_v44 = vmul.f32 %v15717_v18, %v7358_v56  ;;  %v15838_v22 = vmul.f32 %v15717_v18, %v7359_v32  ;;  %v15841_v31 = vmul.f32 %v15717_v18, %v7360_v37  ;;  %v15844_v2 = vmul.f32 %v15717_v18, %v7361_v60 }
 0x8ac   :  { %v15847_v36 = vmul.f32 %v15717_v18, %v7362_v4  ;;  %v15850_v43 = vmul.f32 %v15717_v18, %v7363_v11  ;;  %v15853_v33 = vmul.f32 %v15717_v18, %v7364_v7  ;;  %v15856_v56 = vmul.f32 %v15717_v18, %v7365_v38 }
 0x8ad   :  { %v15859_v32 = vmul.f32 %v15717_v18, %v7366_v34  ;;  %v15862_v37 = vmul.f32 %v15717_v18, %v7367_v25  ;;  %v15865_v60 = vmul.f32 %v15717_v18, %v7368_v50  ;;  %v15868_v4 = vmul.f32 %v15717_v18, %v7369_v10 }
 0x8ae   :  { %v15871_v11 = vmul.f32 %v15717_v18, %v7370_v16  ;;  %v15874_v7 = vmul.f32 %v15717_v18, %v7371_v6  ;;  %v15877_v38 = vmul.f32 %v15717_v18, %v7372_v61  ;;  %v15880_v34 = vmul.f32 %v15717_v18, %v7373_v5 }
 0x8af   :  { %v15883_v25 = vmul.f32 %v15717_v18, %v7374_v9  ;;  %v15886_v50 = vmul.f32 %v15717_v18, %v7375_v21  ;;  %v15889_v10 = vmul.f32 %v15717_v18, %v7376_v0  ;;  %v15892_v16 = vmul.f32 %v15717_v18, %v7377_v29 }
 0x8b0   :  { %17873 = vst [vmem:[#allocation8_spill] sm:$0xff] %v15874_v7  ;;  %v15895_v6 = vmul.f32 %v15717_v18, %v7378_v1  ;;  %v15898_v61 = vmul.f32 %v15717_v18, %v7379_v45  ;;  %v15904_v5 = vmul.f32 %v15717_v18, %v7380_v20  ;;  %v17883_v9 = vsub.f32 %v15573_v52, %v15632_v57  ;;  %v17887_v45 = vld [vmem:[#allocation31_spill] sm:$0xff]  ;;  %v17888_v52 = vld [vmem:[#allocation20_spill] sm:$0xff] }
 0x8b1   :  { %17874 = vst [vmem:[#allocation65_spill] sm:$0xff] %v15877_v38  ;;  %v17885_v0 = vsub.f32 %v15597_v12, %v15632_v57  ;;  %v7322_v29 = vsub.f32 %v17887_v45, %v15632_v57  ;;  %v17890_v12 = vld [vmem:[#allocation85_spill] sm:$0xff]  ;;  %v15935_v45 = vld [vmem:[%s16618_s10] ss:$0 sm:$0xff] }
 0x8b2   :  { %17875 = vst [vmem:[#allocation14_spill] sm:$0xff] %v15880_v34  ;;  %v15910_v21 = vmul.f32 %v15717_v18, %v17883_v9  ;;  %v7323_v9 = vsub.f32 %v17888_v52, %v15632_v57 }
 0x8b3   :  { %17876 = vst [vmem:[#allocation71_spill] sm:$0xff] %v15883_v25  ;;  %v15916_v1 = vmul.f32 %v15717_v18, %v17885_v0  ;;  %v7397_v20 = vmul.f32 %v15717_v18, %v7322_v29  ;;  %v7385_v0 = vsub.f32 %v17890_v12, %v15632_v57 }
 0x8b4   :  { %17877 = vst [vmem:[#allocation38_spill] sm:$0xff] %v15886_v50 }
 0x8b5   :  { %17878 = vst [vmem:[#allocation52_spill] sm:$0xff] %v15889_v10  ;;  %v7460_v29 = vmul.f32 %v15717_v18, %v7385_v0 }
 0x8b6   :  { %17879 = vst [vmem:[#allocation24_spill] sm:$0xff] %v15892_v16 }
 0x8b7   :  { %17880 = vst [vmem:[#allocation7_spill] sm:$0xff] %v15895_v6  ;;  %v7464_v6 = vmul.f32 %v15923_v58, %v7397_v20  ;;  %v7527_v16 = vmul.f32 %v15923_v58, %v7460_v29  ;;  %v17892_v20 = vld [vmem:[#allocation42_spill] sm:$0xff] }
 0x8b8   :  { %17881 = vst [vmem:[#allocation23_spill] sm:$0xff] %v15898_v61  ;;  %v7325_v34 = vsub.f32 %v17892_v20, %v15632_v57 }
 0x8b9   :  { %17882 = vst [vmem:[#allocation92_spill] sm:$0xff] %v15904_v5  ;;  %v7531_v12 = vadd.f32 %v15935_v45, %v7464_v6  ;;  %v7594_v50 = vadd.f32 %v15935_v45, %v7527_v16 }
 0x8ba   :  { %17884 = vst [vmem:[#allocation34_spill] sm:$0xff] %v15910_v21  ;;  %v17889_v21 = vld [vmem:[#allocation94_spill] sm:$0xff]  ;;  %v7400_v6 = vmul.f32 %v15717_v18, %v7325_v34 }
 0x8bb   :  { %17886 = vst [vmem:[#allocation90_spill] sm:$0xff] %v15916_v1  ;;  %v7384_v5 = vsub.f32 %v17889_v21, %v15632_v57  ;;  %v7398_v1 = vmul.f32 %v15717_v18, %v7323_v9  ;;  %v7595_v25 = vmax.f32 %v7531_v12, 0.0  ;;  %v7658_v38 = vmax.f32 %v7594_v50, 0.0 }
 0x8bd   :  { %v7459_v61 = vmul.f32 %v15717_v18, %v7384_v5  ;;  %v7465_v52 = vmul.f32 %v15923_v58, %v7398_v1  ;;  %v17891_v5 = vld [vmem:[#allocation80_spill] sm:$0xff] }
 0x8be   :  { %v7324_v0 = vsub.f32 %v17891_v5, %v15632_v57  ;;  %v17893_v5 = vld [vmem:[#allocation46_spill] sm:$0xff] }
 0x8bf   :  { %v7526_v21 = vmul.f32 %v15923_v58, %v7459_v61  ;;  %v7532_v9 = vadd.f32 %v15935_v45, %v7465_v52  ;;  %v7467_v52 = vmul.f32 %v15923_v58, %v7400_v6 }
 0x8c0   :  { %v7399_v29 = vmul.f32 %v15717_v18, %v7324_v0  ;;  %v7326_v0 = vsub.f32 %v17893_v5, %v15632_v57 }
 0x8c1   :  { %v7593_v10 = vadd.f32 %v15935_v45, %v7526_v21  ;;  %v7596_v61 = vmax.f32 %v7532_v9, 0.0 }
 0x8c2   :  { %v7466_v16 = vmul.f32 %v15923_v58, %v7399_v29 }
 0x8c3   :  { %v7657_v1 = vmax.f32 %v7593_v10, 0.0  ;;  %v7659_v21 = vpack.c.bf16 %v7596_v61, %v7595_v25  ;;  %v7534_v10 = vadd.f32 %v15935_v45, %v7467_v52  ;;  %v7472_v25 = vmul.f32 %v15923_v58, %v15747_v23 }
 0x8c4   :  { %v7533_v12 = vadd.f32 %v15935_v45, %v7466_v16  ;;  %v7473_v61 = vmul.f32 %v15923_v58, %v15750_v40 }
 0x8c5   :  { %v7690_v7 = vpack.c.bf16 %v7658_v38, %v7657_v1  ;;  %8733 = vmatmul.msk.bf16.vlgmr.msrb.gmra.mxu1 %vm1983_vm14, %v7659_v21  ;;  %v7598_v9 = vmax.f32 %v7534_v10, 0.0  ;;  %v17894_v38 = vld [vmem:[#allocation39_spill] sm:$0xff]  ;;  %v7539_v29 = vadd.f32 %v15935_v45, %v7472_v25  ;;  %v7474_v25 = vmul.f32 %v15923_v58, %v15753_v42 }
 0x8c6   :  { %v7597_v50 = vmax.f32 %v7533_v12, 0.0  ;;  %v7327_v34 = vsub.f32 %v17894_v38, %v15632_v57  ;;  %v7540_v16 = vadd.f32 %v15935_v45, %v7473_v61  ;;  %v17896_v38 = vld [vmem:[#allocation28_spill] sm:$0xff]  ;;  %v7475_v61 = vmul.f32 %v15923_v58, %v15756_v30 }
 0x8c7   :  { %8764 = vmatmul.msk.bf16.vlgmr.msra.gmra.mxu2 %vm1983_vm14, %v7690_v7  ;;  %v7401_v7 = vmul.f32 %v15717_v18, %v7326_v0  ;;  %v7603_v52 = vmax.f32 %v7539_v29, 0.0  ;;  %v17895_v0 = vld [vmem:[#allocation35_spill] sm:$0xff]  ;;  %v7541_v29 = vadd.f32 %v15935_v45, %v7474_v25  ;;  %v7476_v30 = vmul.f32 %v15923_v58, %v15759_v46 }
 0x8c8   :  { %v7402_v20 = vmul.f32 %v15717_v18, %v7327_v34  ;;  %v7660_v1 = vpack.c.bf16 %v7598_v9, %v7597_v50  ;;  %v7604_v23 = vmax.f32 %v7540_v16, 0.0  ;;  %v7328_v40 = vsub.f32 %v17895_v0, %v15632_v57 }
 0x8c9   :  { %v7468_v6 = vmul.f32 %v15923_v58, %v7401_v7  ;;  %v7329_v34 = vsub.f32 %v17896_v38, %v15632_v57  ;;  %v7542_v57 = vadd.f32 %v15935_v45, %v7475_v61  ;;  %v7605_v16 = vmax.f32 %v7541_v29, 0.0 }
 0x8ca   :  { %v7469_v21 = vmul.f32 %v15923_v58, %v7402_v20  ;;  %v7663_v50 = vpack.c.bf16 %v7604_v23, %v7603_v52  ;;  %v7403_v7 = vmul.f32 %v15717_v18, %v7328_v40  ;;  %v7543_v0 = vadd.f32 %v15935_v45, %v7476_v30 }
 0x8cb   :  { %v7535_v12 = vadd.f32 %v15935_v45, %v7468_v6  ;;  %v7404_v20 = vmul.f32 %v15717_v18, %v7329_v34  ;;  %v7606_v42 = vmax.f32 %v7542_v57, 0.0  ;;  %v7479_v46 = vmul.f32 %v15923_v58, %v15770_v3 }
 0x8cc   :  { %v7536_v10 = vadd.f32 %v15935_v45, %v7469_v21  ;;  %v7470_v6 = vmul.f32 %v15923_v58, %v7403_v7  ;;  %v7607_v38 = vmax.f32 %v7543_v0, 0.0  ;;  %v7478_v7 = vmul.f32 %v15923_v58, %v15767_v35 }
 0x8cd   :  { %v7599_v9 = vmax.f32 %v7535_v12, 0.0  ;;  %v7471_v21 = vmul.f32 %v15923_v58, %v7404_v20  ;;  %v7664_v23 = vpack.c.bf16 %v7606_v42, %v7605_v16  ;;  %v7480_v35 = vmul.f32 %v15923_v58, %v15773_v15 }
 0x8ce   :  { %v7600_v5 = vmax.f32 %v7536_v10, 0.0  ;;  %v7537_v52 = vadd.f32 %v15935_v45, %v7470_v6  ;;  %v7545_v20 = vadd.f32 %v15935_v45, %v7478_v7  ;;  %v17897_v6 = vld [vmem:[#allocation15_spill] sm:$0xff]  ;;  %v7481_v3 = vmul.f32 %v15923_v58, %v15776_v62 }
 0x8cf   :  { %v7538_v18 = vadd.f32 %v15935_v45, %v7471_v21  ;;  %v8228_v21 = vmul.f32 -1.442695, %v17897_v6  ;;  %v7483_v62 = vmul.f32 %v15923_v58, %v15782_v24  ;;  %v7484_v24 = vmul.f32 %v15923_v58, %v15785_v28 }
 0x8d0   :  { %v7601_v12 = vmax.f32 %v7537_v52, 0.0  ;;  %v7548_v52 = vadd.f32 %v15935_v45, %v7481_v3 }
 0x8d1   :  { %v7602_v10 = vmax.f32 %v7538_v18, 0.0  ;;  %9074 = vpow2.f32 %v8228_v21  ;;  %v17898_v21 = vld [vmem:[#allocation10_spill] sm:$0xff]  ;;  %v7551_v3 = vadd.f32 %v15935_v45, %v7484_v24 }
 0x8d5   :  { %8734 = vmatmul.msk.bf16.gmra.mxu1 %vm1983_vm14, %v7660_v1  ;;  %v7661_v1 = vpack.c.bf16 %v7600_v5, %v7599_v9  ;;  %v7662_v9 = vpack.c.bf16 %v7602_v10, %v7601_v12  ;;  %v7477_v5 = vmul.f32 %v15923_v58, %v15762_v26  ;;  %v7609_v26 = vmax.f32 %v7545_v20, 0.0 }
 0x8d6   :  { %v7612_v10 = vmax.f32 %v7548_v52, 0.0  ;;  %v7615_v52 = vmax.f32 %v7551_v3, 0.0  ;;  %v7489_v3 = vmul.f32 %v15923_v58, %v15802_v48 }
 0x8d7   :  { %v7544_v40 = vadd.f32 %v15935_v45, %v7477_v5  ;;  %v9075_v57 = vpop.eup %9074  ;;  %v7482_v5 = vmul.f32 %v15923_v58, %v15779_v41 }
 0x8d8   :  { %v873_v16 = vadd.f32 1.0, %v9075_v57 }
 0x8d9   :  { %v7608_v34 = vmax.f32 %v7544_v40, 0.0  ;;  %v7549_v0 = vadd.f32 %v15935_v45, %v7482_v5 }
 0x8da   :  { %9076 = vrcp.f32 %v873_v16  ;;  %v885_v40 = vand.u32 2147483648, %v873_v16  ;;  %vm879_vm6 = vweird.f32 %v873_v16 }
 0x8db   :  { %v7665_v25 = vpack.c.bf16 %v7608_v34, %v7607_v38  ;;  %v883_v38 = vand.u32 2147483647, %v873_v16  ;;  %v7550_v34 = vadd.f32 %v15935_v45, %v7483_v62 }
 0x8dc   :  { %v886_v20 = vor.u32 1.1754944e-38, %v885_v40 }
 0x8dd   :  { %vm884_vm8 = vcmp.eq.f32.partialorder %v883_v38, 8.507059e+37  ;;  %v7487_v38 = vmul.f32 %v15923_v58, %v15796_v39 }
 0x8df   :  { %v7554_v39 = vadd.f32 %v15935_v45, %v7487_v38 }
 0x8e0   :  { %v9077_v42 = vpop.eup %9076 }
 0x8e1   :  { %v875_v12 = vmul.f32 %v9077_v42, %v873_v16  ;;  %vm880_vm2 = vweird.f32 %v9077_v42 }
 0x8e2   :  { %vm881_vm7 = vmor %vm879_vm6, %vm880_vm2 }
 0x8e3   :  { %v876_v30 = vsub.f32 1.0, %v875_v12  ;;  %v17899_v12 = vld [vmem:[#allocation82_spill] sm:$0xff] }
 0x8e5   :  { %8735 = vmatmul.msk.bf16.gmra.mxu1 %vm1983_vm14, %v7661_v1  ;;  %v7546_v1 = vadd.f32 %v15935_v45, %v7479_v46  ;;  %v7614_v46 = vmax.f32 %v7550_v34, 0.0 }
 0x8e7   :  { %v7610_v61 = vmax.f32 %v7546_v1, 0.0 }
 0x8e9   :  { %v7666_v29 = vpack.c.bf16 %v7610_v61, %v7609_v26 }
 0x8f5   :  { %8736 = vmatmul.msk.bf16.gmra.mxu1 %vm1983_vm14, %v7662_v9  ;;  %v877_v9 = vmul.f32 %v9077_v42, %v876_v30 }
 0x8f7   :  { %v878_v15 = vadd.f32 %v9077_v42, %v877_v9 }
 0x8f9   :  { %v882_v7 = vsel %vm881_vm7, %v9077_v42, %v878_v15  ;;  %v7486_v15 = vmul.f32 %v15923_v58, %v15793_v49  ;;  %v17902_v49 = vld [vmem:[#allocation78_spill] sm:$0xff] }
 0x8fa   :  { %v887_v1 = vsel %vm884_vm8, %v886_v20, %v882_v7 }
 0x8fb   :  { %v16024_v26 = vperm.slane %v887_v1, 0  ;;  %v7553_v34 = vadd.f32 %v15935_v45, %v7486_v15  ;;  %v7491_v15 = vmul.f32 %v15923_v58, %v15808_v59 }
 0x905   :  { %8737 = vmatmul.msk.bf16.gmra.mxu1 %vm1983_vm14, %v7663_v50  ;;  %v7547_v50 = vadd.f32 %v15935_v45, %v7480_v35  ;;  %v7485_v35 = vmul.f32 %v15923_v58, %v15790_v13  ;;  %v17900_v13 = vld [vmem:[#allocation70_spill] sm:$0xff] }
 0x907   :  { %v7611_v18 = vmax.f32 %v7547_v50, 0.0  ;;  %v7552_v42 = vadd.f32 %v15935_v45, %v7485_v35  ;;  %v7488_v35 = vmul.f32 %v15923_v58, %v15799_v8  ;;  %v7556_v8 = vadd.f32 %v15935_v45, %v7489_v3 }
 0x909   :  { %v7616_v30 = vmax.f32 %v7552_v42, 0.0  ;;  %v17904_v42 = vld [vmem:[#allocation66_spill] sm:$0xff] }
 0x90b   :  { %v7669_v5 = vpack.c.bf16 %v7616_v30, %v7615_v52  ;;  %v17905_v30 = vld [vmem:[#allocation37_spill] sm:$0xff] }
 0x915   :  { %8738 = vmatmul.msk.bf16.gmra.mxu1 %vm1983_vm14, %v7664_v23  ;;  %v7667_v23 = vpack.c.bf16 %v7612_v10, %v7611_v18 }
 0x925   :  { %8739 = vmatmul.msk.bf16.gmra.mxu1 %vm1983_vm14, %v7665_v25  ;;  %v7613_v25 = vmax.f32 %v7549_v0, 0.0 }
 0x927   :  { %v7668_v41 = vpack.c.bf16 %v7614_v46, %v7613_v25  ;;  %v17901_v25 = vld [vmem:[#allocation18_spill] sm:$0xff] }
 0x935   :  { %8740 = vmatmul.msk.bf16.gmra.mxu1 %vm1983_vm14, %v7666_v29  ;;  %v7961_v29 = vrot.slane %v887_v1, 1  ;;  %v7617_v1 = vmax.f32 %v7553_v34, 0.0 }
 0x937   :  { %v16031_v16 = vperm.slane %v7961_v29, 0 }
 0x942   :  { %v7800_v61 = vpop.f32.mrf.mxu1 }
 0x943   :  { %v7966_v6 = vmul.f32 %v16024_v26, %v7800_v61  ;;  %v7618_v61 = vmax.f32 %v7554_v39, 0.0  ;;  %v7492_v39 = vmul.f32 %v15923_v58, %v15811_v51 }
 0x945   :  { %v8030_v57 = vadd.f32 %v7966_v6, %v17898_v21  ;;  %8741 = vmatmul.msk.bf16.gmra.mxu1 %vm1983_vm14, %v7667_v23  ;;  %v7670_v6 = vpack.c.bf16 %v7618_v61, %v7617_v1  ;;  %v17903_v21 = vld [vmem:[#allocation58_spill] sm:$0xff]  ;;  %v7493_v61 = vmul.f32 %v15923_v58, %v15814_v53 }
 0x947   :  { %8094 = vst.msk [vmem:[%s16621_s13] sm:$0xff] %vm669_vm3, %v8030_v57  ;;  %v7560_v51 = vadd.f32 %v15935_v45, %v7493_v61 }
 0x94a   :  { %v7955_v50 = vpop.f32.mrf.mxu2  ;;  %v7802_v18 = vpop.f32.mrf.mxu1 }
 0x94b   :  { %v8028_v28 = vmul.f32 %v16031_v16, %v7955_v50  ;;  %v7967_v23 = vmul.f32 %v16024_v26, %v7802_v18  ;;  %v7555_v50 = vadd.f32 %v15935_v45, %v7488_v35  ;;  %v7624_v35 = vmax.f32 %v7560_v51, 0.0 }
 0x94d   :  { %v8092_v10 = vadd.f32 %v8028_v28, %v17899_v12  ;;  %v8031_v9 = vadd.f32 %v7967_v23, %v17900_v13  ;;  %v7619_v18 = vmax.f32 %v7555_v50, 0.0  ;;  %v7620_v12 = vmax.f32 %v7556_v8, 0.0  ;;  %v17909_v50 = vld [vmem:[#allocation12_spill] sm:$0xff] }
 0x94e   :  { %v7495_v8 = vmul.f32 %v15923_v58, %v15820_v63 }
 0x94f   :  { %8156 = vst.msk [vmem:[%s16621_s13 + $0x1f0] sm:$0xff] %vm669_vm3, %v8092_v10  ;;  %v7671_v23 = vpack.c.bf16 %v7620_v12, %v7619_v18 }
 0x950   :  { %8095 = vst.msk [vmem:[%s16621_s13 + $0x8] sm:$0xff] %vm669_vm3, %v8031_v9  ;;  %v7490_v9 = vmul.f32 %v15923_v58, %v15805_v54  ;;  %v7558_v54 = vadd.f32 %v15935_v45, %v7491_v15  ;;  %v17911_v15 = vld [vmem:[#allocation87_spill] sm:$0xff] }
 0x952   :  { %v7957_v62 = vpop.f32.mrf.mxu2  ;;  %v7805_v40 = vpop.f32.mrf.mxu1 }
 0x953   :  { %v8029_v0 = vmul.f32 %v16031_v16, %v7957_v62  ;;  %v7968_v46 = vmul.f32 %v16024_v26, %v7805_v40  ;;  %v7557_v62 = vadd.f32 %v15935_v45, %v7490_v9  ;;  %v17906_v40 = vld [vmem:[#allocation41_spill] sm:$0xff] }
 0x955   :  { %v8093_v7 = vadd.f32 %v8029_v0, %v17901_v25  ;;  %v8032_v20 = vadd.f32 %v7968_v46, %v17902_v49  ;;  %8742 = vmatmul.msk.bf16.gmra.mxu1 %vm1983_vm14, %v7668_v41  ;;  %v7621_v34 = vmax.f32 %v7557_v62, 0.0  ;;  %v7622_v25 = vmax.f32 %v7558_v54, 0.0  ;;  %v17907_v49 = vld [vmem:[#allocation77_spill] sm:$0xff] }
 0x956   :  { %v7497_v54 = vmul.f32 %v15923_v58, %v15826_v14  ;;  %v7502_v14 = vmul.f32 %v15923_v58, %v15841_v31  ;;  %v7508_v31 = vmul.f32 %v15923_v58, %v15859_v32  ;;  %v7512_v32 = vmul.f32 %v15923_v58, %v15871_v11  ;;  %v17919_v11 = vld [vmem:[#allocation24_spill] sm:$0xff] }
 0x957   :  { %8157 = vst.msk [vmem:[%s16621_s13 + $0x1f8] sm:$0xff] %vm669_vm3, %v8093_v7  ;;  %v7672_v46 = vpack.c.bf16 %v7622_v25, %v7621_v34 }
 0x958   :  { %8096 = vst.msk [vmem:[%s16621_s13 + $0x10] sm:$0xff] %vm669_vm3, %v8032_v20 }
 0x95a   :  { %v7807_v29 = vpop.f32.mrf.mxu1 }
 0x95b   :  { %v7969_v24 = vmul.f32 %v16024_v26, %v7807_v29  ;;  %v7559_v29 = vadd.f32 %v15935_v45, %v7492_v39  ;;  %v7503_v39 = vmul.f32 %v15923_v58, %v15844_v2  ;;  %v7564_v2 = vadd.f32 %v15935_v45, %v7497_v54 }
 0x95d   :  { %v8033_v57 = vadd.f32 %v7969_v24, %v17903_v21  ;;  %v7628_v51 = vmax.f32 %v7564_v2, 0.0 }
 0x95f   :  { %8097 = vst.msk [vmem:[%s16621_s13 + $0x18] sm:$0xff] %vm669_vm3, %v8033_v57  ;;  %v7623_v57 = vmax.f32 %v7559_v29, 0.0  ;;  %v17914_v29 = vld [vmem:[#allocation65_spill] sm:$0xff] }
 0x961   :  { %v7673_v3 = vpack.c.bf16 %v7624_v35, %v7623_v57 }
 0x962   :  { %v7810_v41 = vpop.f32.mrf.mxu1 }
 0x963   :  { %v7970_v28 = vmul.f32 %v16024_v26, %v7810_v41 }
 0x965   :  { %v8034_v52 = vadd.f32 %v7970_v28, %v17904_v42  ;;  %8743 = vmatmul.msk.bf16.gmra.mxu1 %vm1983_vm14, %v7669_v5  ;;  %v7494_v42 = vmul.f32 %v15923_v58, %v15817_v19  ;;  %v7562_v19 = vadd.f32 %v15935_v45, %v7495_v8 }
 0x967   :  { %8098 = vst.msk [vmem:[%s16621_s13 + $0x20] sm:$0xff] %vm669_vm3, %v8034_v52  ;;  %v7561_v18 = vadd.f32 %v15935_v45, %v7494_v42  ;;  %v17921_v42 = vld [vmem:[#allocation23_spill] sm:$0xff] }
 0x96a   :  { %v7812_v10 = vpop.f32.mrf.mxu1 }
 0x96b   :  { %v7971_v48 = vmul.f32 %v16024_v26, %v7812_v10  ;;  %v17910_v10 = vld [vmem:[#allocation64_spill] sm:$0xff] }
 0x96d   :  { %v8035_v13 = vadd.f32 %v7971_v48, %v17905_v30  ;;  %v7626_v30 = vmax.f32 %v7562_v19, 0.0 }
 0x96f   :  { %8099 = vst.msk [vmem:[%s16621_s13 + $0x28] sm:$0xff] %vm669_vm3, %v8035_v13 }
 0x972   :  { %v7815_v5 = vpop.f32.mrf.mxu1 }
 0x973   :  { %v7972_v0 = vmul.f32 %v16024_v26, %v7815_v5  ;;  %v7525_v5 = vmul.f32 %v15923_v58, %v15726_v47 }
 0x975   :  { %v8036_v38 = vadd.f32 %v7972_v0, %v17906_v40  ;;  %8744 = vmatmul.msk.bf16.gmra.mxu1 %vm1983_vm14, %v7670_v6  ;;  %v17908_v6 = vld [vmem:[#allocation9_spill] sm:$0xff]  ;;  %v7496_v0 = vmul.f32 %v15923_v58, %v15823_v17  ;;  %v16161_v40 = vadd.f32 %v15935_v45, %v7525_v5  ;;  %v7498_v17 = vmul.f32 %v15923_v58, %v15829_v55 }
 0x976   :  { %v7504_v55 = vmul.f32 %v15923_v58, %v15847_v36  ;;  %v7569_v5 = vadd.f32 %v15935_v45, %v7502_v14 }
 0x977   :  { %8100 = vst.msk [vmem:[%s16621_s13 + $0x30] sm:$0xff] %vm669_vm3, %v8036_v38  ;;  %v7563_v34 = vadd.f32 %v15935_v45, %v7496_v0  ;;  %v7656_v25 = vmax.f32 %v16161_v40, 0.0 }
 0x979   :  { %v7627_v36 = vmax.f32 %v7563_v34, 0.0 }
 0x97a   :  { %v7817_v7 = vpop.f32.mrf.mxu1 }
 0x97b   :  { %v7973_v59 = vmul.f32 %v16024_v26, %v7817_v7  ;;  %v7499_v7 = vmul.f32 %v15923_v58, %v15832_v27  ;;  %v7505_v27 = vmul.f32 %v15923_v58, %v15850_v43  ;;  %v7509_v43 = vmul.f32 %v15923_v58, %v15862_v37  ;;  %v17916_v37 = vld [vmem:[#allocation71_spill] sm:$0xff] }
 0x97c   :  { %v7516_v57 = vmul.f32 %v15923_v58, %v17916_v37  ;;  %v17926_v37 = vld [vmem:[#allocation40_spill] sm:$0xff] }
 0x97d   :  { %v8037_v20 = vadd.f32 %v7973_v59, %v17907_v49  ;;  %v7500_v59 = vmul.f32 %v15923_v58, %v15835_v44  ;;  %v17912_v49 = vld [vmem:[#allocation61_spill] sm:$0xff]  ;;  %v7506_v44 = vmul.f32 %v15923_v58, %v15853_v33  ;;  %v7510_v33 = vmul.f32 %v15923_v58, %v15865_v60  ;;  %v17917_v60 = vld [vmem:[#allocation38_spill] sm:$0xff] }
 0x97e   :  { %v7517_v35 = vmul.f32 %v15923_v58, %v17917_v60  ;;  %v7572_v54 = vadd.f32 %v15935_v45, %v7505_v27  ;;  %v7583_v27 = vadd.f32 %v15935_v45, %v7516_v57 }
 0x97f   :  { %8101 = vst.msk [vmem:[%s16621_s13 + $0x38] sm:$0xff] %vm669_vm3, %v8037_v20  ;;  %v7573_v34 = vadd.f32 %v15935_v45, %v7506_v44 }
 0x980   :  { %v7584_v44 = vadd.f32 %v15935_v45, %v7517_v35 }
 0x982   :  { %v7820_v1 = vpop.f32.mrf.mxu1 }
 0x983   :  { %v7974_v24 = vmul.f32 %v16024_v26, %v7820_v1  ;;  %v17913_v1 = vld [vmem:[#allocation8_spill] sm:$0xff] }
 0x984   :  { %v7513_v61 = vmul.f32 %v15923_v58, %v17913_v1 }
 0x985   :  { %v8038_v21 = vadd.f32 %v7974_v24, %v17908_v6  ;;  %8745 = vmatmul.msk.bf16.gmra.mxu1 %vm1983_vm14, %v7671_v23  ;;  %v7625_v23 = vmax.f32 %v7561_v18, 0.0  ;;  %v7514_v24 = vmul.f32 %v15923_v58, %v17914_v29  ;;  %v17915_v6 = vld [vmem:[#allocation14_spill] sm:$0xff]  ;;  %v16224_v18 = vpack.c.bf16 %v7628_v51, %v7627_v36 }
 0x987   :  { %8102 = vst.msk [vmem:[%s16621_s13 + $0x40] sm:$0xff] %vm669_vm3, %v8038_v21  ;;  %v16149_v9 = vpack.c.bf16 %v7626_v30, %v7625_v23  ;;  %v7515_v21 = vmul.f32 %v15923_v58, %v17915_v6  ;;  %v17924_v23 = vld [vmem:[#allocation90_spill] sm:$0xff] }
 0x988   :  { %v7524_v30 = vmul.f32 %v15923_v58, %v17924_v23 }
 0x98a   :  { %v7822_v41 = vpop.f32.mrf.mxu1 }
 0x98b   :  { %v7975_v53 = vmul.f32 %v16024_v26, %v7822_v41 }
 0x98d   :  { %v8039_v28 = vadd.f32 %v7975_v53, %v17909_v50  ;;  %v7519_v53 = vmul.f32 %v15923_v58, %v17919_v11  ;;  %v17920_v50 = vld [vmem:[#allocation7_spill] sm:$0xff]  ;;  %v7637_v11 = vmax.f32 %v7573_v34, 0.0 }
 0x98f   :  { %8103 = vst.msk [vmem:[%s16621_s13 + $0x48] sm:$0xff] %vm669_vm3, %v8039_v28  ;;  %v7520_v28 = vmul.f32 %v15923_v58, %v17920_v50 }
 0x991   :  { %v7587_v2 = vadd.f32 %v15935_v45, %v7520_v28 }
 0x992   :  { %v7825_v52 = vpop.f32.mrf.mxu1 }
 0x993   :  { %v7976_v12 = vmul.f32 %v16024_v26, %v7825_v52  ;;  %v7521_v52 = vmul.f32 %v15923_v58, %v17921_v42  ;;  %v7651_v34 = vmax.f32 %v7587_v2, 0.0 }
 0x995   :  { %v8040_v48 = vadd.f32 %v7976_v12, %v17910_v10  ;;  %8746 = vmatmul.msk.bf16.gmra.mxu1 %vm1983_vm14, %v7672_v46  ;;  %v7501_v46 = vmul.f32 %v15923_v58, %v15838_v22  ;;  %v7507_v22 = vmul.f32 %v15923_v58, %v15856_v56  ;;  %v7511_v56 = vmul.f32 %v15923_v58, %v15868_v4  ;;  %v17918_v4 = vld [vmem:[#allocation52_spill] sm:$0xff] }
 0x996   :  { %v7518_v41 = vmul.f32 %v15923_v58, %v17918_v4  ;;  %v17922_v12 = vld [vmem:[#allocation92_spill] sm:$0xff]  ;;  %v7588_v36 = vadd.f32 %v15935_v45, %v7521_v52 }
 0x997   :  { %8104 = vst.msk [vmem:[%s16621_s13 + $0x50] sm:$0xff] %vm669_vm3, %v8040_v48  ;;  %v7522_v10 = vmul.f32 %v15923_v58, %v17922_v12  ;;  %v17923_v48 = vld [vmem:[#allocation34_spill] sm:$0xff]  ;;  %v7578_v14 = vadd.f32 %v15935_v45, %v7511_v56  ;;  %v7568_v56 = vadd.f32 %v15935_v45, %v7501_v46 }
 0x998   :  { %v7523_v19 = vmul.f32 %v15923_v58, %v17923_v48  ;;  %v7575_v58 = vadd.f32 %v15935_v45, %v7508_v31  ;;  %v7586_v31 = vadd.f32 %v15935_v45, %v7519_v53 }
 0x999   :  { %v7632_v51 = vmax.f32 %v7568_v56, 0.0  ;;  %v7642_v42 = vmax.f32 %v7578_v14, 0.0 }
 0x99a   :  { %v7827_v13 = vpop.f32.mrf.mxu1  ;;  %v7590_v1 = vadd.f32 %v15935_v45, %v7523_v19 }
 0x99b   :  { %v7977_v63 = vmul.f32 %v16024_v26, %v7827_v13  ;;  %v7565_v13 = vadd.f32 %v15935_v45, %v7498_v17  ;;  %v7576_v17 = vadd.f32 %v15935_v45, %v7509_v43 }
 0x99d   :  { %v8041_v62 = vadd.f32 %v7977_v63, %v17911_v15  ;;  %v7567_v63 = vadd.f32 %v15935_v45, %v7500_v59  ;;  %v7570_v15 = vadd.f32 %v15935_v45, %v7503_v39  ;;  %v7577_v59 = vadd.f32 %v15935_v45, %v7510_v33 }
 0x99e   :  { %v7581_v39 = vadd.f32 %v15935_v45, %v7514_v24  ;;  %v7566_v33 = vadd.f32 %v15935_v45, %v7499_v7  ;;  %v7629_v24 = vmax.f32 %v7565_v13, 0.0  ;;  %v7633_v7 = vmax.f32 %v7569_v5, 0.0 }
 0x99f   :  { %8105 = vst.msk [vmem:[%s16621_s13 + $0x58] sm:$0xff] %vm669_vm3, %v8041_v62  ;;  %v17925_v62 = vld [vmem:[#allocation84_spill] sm:$0xff]  ;;  %v7634_v60 = vmax.f32 %v7570_v15, 0.0  ;;  %v7640_v50 = vmax.f32 %v7576_v17, 0.0  ;;  %v7647_v13 = vmax.f32 %v7583_v27, 0.0 }
 0x9a0   :  { %v7630_v6 = vmax.f32 %v7566_v33, 0.0  ;;  %v7645_v48 = vmax.f32 %v7581_v39, 0.0  ;;  %v17929_v33 = vld [vmem:[#allocation62_spill] sm:$0xff] }
 0x9a2   :  { %v7830_v38 = vpop.f32.mrf.mxu1  ;;  %v7676_v35 = vpack.c.bf16 %v7630_v6, %v7629_v24 }
 0x9a3   :  { %v7978_v47 = vmul.f32 %v16024_v26, %v7830_v38  ;;  %v7571_v38 = vadd.f32 %v15935_v45, %v7504_v55  ;;  %v7582_v55 = vadd.f32 %v15935_v45, %v7515_v21  ;;  %v7631_v21 = vmax.f32 %v7567_v63, 0.0 }
 0x9a4   :  { %v7648_v63 = vmax.f32 %v7584_v44, 0.0 }
 0x9a5   :  { %v8042_v20 = vadd.f32 %v7978_v47, %v17912_v49  ;;  %8747 = vmatmul.msk.bf16.gmra.mxu1 %vm1983_vm14, %v7673_v3  ;;  %v7574_v47 = vadd.f32 %v15935_v45, %v7507_v22  ;;  %v7579_v49 = vadd.f32 %v15935_v45, %v7512_v32  ;;  %v7585_v22 = vadd.f32 %v15935_v45, %v7518_v41 }
 0x9a6   :  { %v7589_v32 = vadd.f32 %v15935_v45, %v7522_v10  ;;  %v7635_v46 = vmax.f32 %v7571_v38, 0.0  ;;  %v7677_v4 = vpack.c.bf16 %v7632_v51, %v7631_v21  ;;  %v7636_v41 = vmax.f32 %v7572_v54, 0.0  ;;  %v17932_v51 = vld [vmem:[#allocation47_spill] sm:$0xff] }
 0x9a7   :  { %8106 = vst.msk [vmem:[%s16621_s13 + $0x60] sm:$0xff] %vm669_vm3, %v8042_v20  ;;  %v7580_v20 = vadd.f32 %v15935_v45, %v7513_v61  ;;  %v7591_v61 = vadd.f32 %v15935_v45, %v7524_v30  ;;  %v16272_v45 = vpack.c.bf16 %v7634_v60, %v7633_v7  ;;  %v7638_v53 = vmax.f32 %v7574_v47, 0.0  ;;  %v17933_v60 = vld [vmem:[#allocation33_spill] sm:$0xff] }
 0x9a8   :  { %v16274_v28 = vpack.c.bf16 %v7636_v41, %v7635_v46  ;;  %v7643_v52 = vmax.f32 %v7579_v49, 0.0  ;;  %v7646_v30 = vmax.f32 %v7582_v55, 0.0  ;;  %v16287_v54 = vpack.c.bf16 %v7648_v63, %v7647_v13 }
 0x9a9   :  { %v7644_v10 = vmax.f32 %v7580_v20, 0.0  ;;  %v7652_v47 = vmax.f32 %v7588_v36, 0.0  ;;  %v7653_v14 = vmax.f32 %v7589_v32, 0.0  ;;  %v7654_v49 = vmax.f32 %v7590_v1, 0.0  ;;  %v17930_v32 = vld [vmem:[#allocation49_spill] sm:$0xff] }
 0x9aa   :  { %v7832_v3 = vpop.f32.mrf.mxu1  ;;  %v16285_v38 = vpack.c.bf16 %v7646_v30, %v7645_v48  ;;  %v7655_v39 = vmax.f32 %v7591_v61, 0.0  ;;  %v17937_v30 = vld [vmem:[#allocation13_spill] sm:$0xff] }
 0x9ab   :  { %v7979_v8 = vmul.f32 %v16024_v26, %v7832_v3  ;;  %v7639_v3 = vmax.f32 %v7575_v58, 0.0  ;;  %v16283_v15 = vpack.c.bf16 %v7644_v10, %v7643_v52  ;;  %v17927_v58 = vld [vmem:[#allocation44_spill] sm:$0xff]  ;;  %v16292_v20 = vpack.c.bf16 %v7652_v47, %v7651_v34  ;;  %v17936_v10 = vld [vmem:[#allocation97_spill] sm:$0xff] }
 0x9ac   :  { %v16298_v55 = vpack.c.bf16 %v7654_v49, %v7653_v14  ;;  %v16302_v27 = vpack.c.bf16 %v7656_v25, %v7655_v39  ;;  %v17939_v47 = vld [vmem:[#allocation48_spill] sm:$0xff]  ;;  %v17940_v49 = vld [vmem:[#allocation86_spill] sm:$0xff] }
 0x9ad   :  { %v8043_v0 = vadd.f32 %v7979_v8, %v17925_v62  ;;  %v16276_v8 = vpack.c.bf16 %v7638_v53, %v7637_v11  ;;  %v16278_v12 = vpack.c.bf16 %v7640_v50, %v7639_v3  ;;  %v7649_v62 = vmax.f32 %v7585_v22, 0.0  ;;  %v17934_v11 = vld [vmem:[#allocation96_spill] sm:$0xff]  ;;  %v17935_v50 = vld [vmem:[#allocation29_spill] sm:$0xff] }
 0x9af   :  { %8107 = vst.msk [vmem:[%s16621_s13 + $0x68] sm:$0xff] %vm669_vm3, %v8043_v0  ;;  %v7650_v0 = vmax.f32 %v7586_v31, 0.0  ;;  %v17928_v31 = vld [vmem:[#allocation22_spill] sm:$0xff] }
 0x9b2   :  { %v7835_v43 = vpop.f32.mrf.mxu1 }
 0x9b3   :  { %v7980_v29 = vmul.f32 %v16024_v26, %v7835_v43 }
 0x9b5   :  { %v8044_v57 = vadd.f32 %v7980_v29, %v17926_v37  ;;  %8748 = vmatmul.msk.bf16.gmra.mxu1 %vm1983_vm14, %v16149_v9  ;;  %v7641_v9 = vmax.f32 %v7577_v59, 0.0  ;;  %v16290_v59 = vpack.c.bf16 %v7650_v0, %v7649_v62  ;;  %v17931_v29 = vld [vmem:[#allocation67_spill] sm:$0xff] }
 0x9b6   :  { %v17938_v62 = vld [vmem:[#allocation19_spill] sm:$0xff] }
 0x9b7   :  { %8108 = vst.msk [vmem:[%s16621_s13 + $0x70] sm:$0xff] %vm669_vm3, %v8044_v57  ;;  %v16280_v23 = vpack.c.bf16 %v7642_v42, %v7641_v9 }
 0x9ba   :  { %v7837_v19 = vpop.f32.mrf.mxu1 }
 0x9bb   :  { %v7981_v5 = vmul.f32 %v16024_v26, %v7837_v19 }
 0x9bd   :  { %v8045_v17 = vadd.f32 %v7981_v5, %v17927_v58 }
 0x9bf   :  { %8109 = vst.msk [vmem:[%s16621_s13 + $0x78] sm:$0xff] %vm669_vm3, %v8045_v17 }
 0x9c2   :  { %v7840_v44 = vpop.f32.mrf.mxu1 }
 0x9c3   :  { %v7982_v22 = vmul.f32 %v16024_v26, %v7840_v44 }
 0x9c5   :  { %v8046_v2 = vadd.f32 %v7982_v22, %v17928_v31  ;;  %8749 = vmatmul.msk.bf16.gmra.mxu1 %vm1983_vm14, %v16224_v18  ;;  %v17941_v22 = vld [vmem:[#allocation54_spill] sm:$0xff] }
 0x9c7   :  { %8110 = vst.msk [vmem:[%s16621_s13 + $0x80] sm:$0xff] %vm669_vm3, %v8046_v2 }
 0x9ca   :  { %v7842_v36 = vpop.f32.mrf.mxu1 }
 0x9cb   :  { %v7983_v43 = vmul.f32 %v16024_v26, %v7842_v36 }
 0x9cd   :  { %v8047_v40 = vadd.f32 %v7983_v43, %v17929_v33  ;;  %v17942_v43 = vld [vmem:[#allocation79_spill] sm:$0xff] }
 0x9cf   :  { %8111 = vst.msk [vmem:[%s16621_s13 + $0x88] sm:$0xff] %vm669_vm3, %v8047_v40 }
 0x9d2   :  { %v7845_v25 = vpop.f32.mrf.mxu1 }
 0x9d3   :  { %v7984_v56 = vmul.f32 %v16024_v26, %v7845_v25  ;;  %v17943_v25 = vld [vmem:[#allocation81_spill] sm:$0xff] }
 0x9d5   :  { %v8048_v18 = vadd.f32 %v7984_v56, %v17930_v32  ;;  %8750 = vmatmul.msk.bf16.gmra.mxu1 %vm1983_vm14, %v7676_v35 }
 0x9d7   :  { %8112 = vst.msk [vmem:[%s16621_s13 + $0x90] sm:$0xff] %vm669_vm3, %v8048_v18 }
 0x9da   :  { %v7847_v1 = vpop.f32.mrf.mxu1 }
 0x9db   :  { %v7985_v61 = vmul.f32 %v16024_v26, %v7847_v1  ;;  %v17944_v1 = vld [vmem:[#allocation69_spill] sm:$0xff] }
 0x9dd   :  { %v8049_v24 = vadd.f32 %v7985_v61, %v17931_v29  ;;  %v17945_v29 = vld [vmem:[#allocation75_spill] sm:$0xff] }
 0x9df   :  { %8113 = vst.msk [vmem:[%s16621_s13 + $0x98] sm:$0xff] %vm669_vm3, %v8049_v24 }
 0x9e2   :  { %v7850_v6 = vpop.f32.mrf.mxu1 }
 0x9e3   :  { %v7986_v21 = vmul.f32 %v16024_v26, %v7850_v6 }
 0x9e5   :  { %v8050_v37 = vadd.f32 %v7986_v21, %v17932_v51  ;;  %8751 = vmatmul.msk.bf16.gmra.mxu1 %vm1983_vm14, %v7677_v4  ;;  %v17946_v51 = vld [vmem:[#allocation74_spill] sm:$0xff] }
 0x9e7   :  { %8114 = vst.msk [vmem:[%s16621_s13 + $0xa0] sm:$0xff] %vm669_vm3, %v8050_v37 }
 0x9ea   :  { %v7852_v57 = vpop.f32.mrf.mxu1 }
 0x9eb   :  { %v7987_v7 = vmul.f32 %v16024_v26, %v7852_v57 }
 0x9ed   :  { %v8051_v46 = vadd.f32 %v7987_v7, %v17933_v60  ;;  %v17947_v7 = vld [vmem:[#allocation83_spill] sm:$0xff] }
 0x9ef   :  { %8115 = vst.msk [vmem:[%s16621_s13 + $0xa8] sm:$0xff] %vm669_vm3, %v8051_v46 }
 0x9f2   :  { %v7855_v35 = vpop.f32.mrf.mxu1 }
 0x9f3   :  { %v7988_v41 = vmul.f32 %v16024_v26, %v7855_v35 }
 0x9f5   :  { %v8052_v4 = vadd.f32 %v7988_v41, %v17934_v11  ;;  %8752 = vmatmul.msk.bf16.gmra.mxu1 %vm1983_vm14, %v16272_v45  ;;  %v17948_v41 = vld [vmem:[#allocation17_spill] sm:$0xff] }
 0x9f7   :  { %8116 = vst.msk [vmem:[%s16621_s13 + $0xb0] sm:$0xff] %vm669_vm3, %v8052_v4 }
 0x9fa   :  { %v7857_v53 = vpop.f32.mrf.mxu1 }
 0x9fb   :  { %v7989_v3 = vmul.f32 %v16024_v26, %v7857_v53  ;;  %v17949_v53 = vld [vmem:[#allocation32_spill] sm:$0xff] }
 0x9fd   :  { %v8053_v9 = vadd.f32 %v7989_v3, %v17935_v50 }
 0x9ff   :  { %8117 = vst.msk [vmem:[%s16621_s13 + $0xb8] sm:$0xff] %vm669_vm3, %v8053_v9 }
 0xa02   :  { %v7860_v42 = vpop.f32.mrf.mxu1 }
 0xa03   :  { %v7990_v52 = vmul.f32 %v16024_v26, %v7860_v42  ;;  %v17950_v42 = vld [vmem:[#allocation36_spill] sm:$0xff] }
 0xa05   :  { %v8054_v45 = vadd.f32 %v7990_v52, %v17936_v10  ;;  %8753 = vmatmul.msk.bf16.gmra.mxu1 %vm1983_vm14, %v16274_v28 }
 0xa07   :  { %8118 = vst.msk [vmem:[%s16621_s13 + $0xc0] sm:$0xff] %vm669_vm3, %v8054_v45  ;;  %v17951_v45 = vld [vmem:[#allocation76_spill] sm:$0xff] }
 0xa0a   :  { %v7862_v48 = vpop.f32.mrf.mxu1 }
 0xa0b   :  { %v7991_v19 = vmul.f32 %v16024_v26, %v7862_v48 }
 0xa0d   :  { %v8055_v13 = vadd.f32 %v7991_v19, %v17937_v30 }
 0xa0f   :  { %8119 = vst.msk [vmem:[%s16621_s13 + $0xc8] sm:$0xff] %vm669_vm3, %v8055_v13  ;;  %v17952_v13 = vld [vmem:[#allocation73_spill] sm:$0xff] }
 0xa12   :  { %v7865_v63 = vpop.f32.mrf.mxu1 }
 0xa13   :  { %v7992_v5 = vmul.f32 %v16024_v26, %v7865_v63 }
 0xa15   :  { %v8056_v28 = vadd.f32 %v7992_v5, %v17938_v62  ;;  %8754 = vmatmul.msk.bf16.gmra.mxu1 %vm1983_vm14, %v16276_v8  ;;  %v17953_v62 = vld [vmem:[#allocation21_spill] sm:$0xff] }
 0xa17   :  { %8120 = vst.msk [vmem:[%s16621_s13 + $0xd0] sm:$0xff] %vm669_vm3, %v8056_v28 }
 0xa1a   :  { %v7867_v0 = vpop.f32.mrf.mxu1 }
 0xa1b   :  { %v7993_v34 = vmul.f32 %v16024_v26, %v7867_v0 }
 0xa1d   :  { %v8057_v58 = vadd.f32 %v7993_v34, %v17939_v47  ;;  %v17954_v47 = vld [vmem:[#allocation89_spill] sm:$0xff] }
 0xa1f   :  { %8121 = vst.msk [vmem:[%s16621_s13 + $0xd8] sm:$0xff] %vm669_vm3, %v8057_v58 }
 0xa22   :  { %v7870_v17 = vpop.f32.mrf.mxu1 }
 0xa23   :  { %v7994_v14 = vmul.f32 %v16024_v26, %v7870_v17 }
 0xa25   :  { %v8058_v8 = vadd.f32 %v7994_v14, %v17940_v49  ;;  %8755 = vmatmul.msk.bf16.gmra.mxu1 %vm1983_vm14, %v16278_v12  ;;  %v17955_v14 = vld [vmem:[#allocation43_spill] sm:$0xff] }
 0xa27   :  { %8122 = vst.msk [vmem:[%s16621_s13 + $0xe0] sm:$0xff] %vm669_vm3, %v8058_v8 }
 0xa2a   :  { %v7872_v39 = vpop.f32.mrf.mxu1 }
 0xa2b   :  { %v7995_v44 = vmul.f32 %v16024_v26, %v7872_v39 }
 0xa2d   :  { %v8059_v31 = vadd.f32 %v7995_v44, %v17941_v22  ;;  %v17956_v44 = vld [vmem:[#allocation6_spill] sm:$0xff] }
 0xa2f   :  { %8123 = vst.msk [vmem:[%s16621_s13 + $0xe8] sm:$0xff] %vm669_vm3, %v8059_v31 }
 0xa32   :  { %v7875_v2 = vpop.f32.mrf.mxu1 }
 0xa33   :  { %v7996_v36 = vmul.f32 %v16024_v26, %v7875_v2  ;;  %v17957_v2 = vld [vmem:[#allocation16_spill] sm:$0xff] }
 0xa35   :  { %v8060_v12 = vadd.f32 %v7996_v36, %v17942_v43  ;;  %8756 = vmatmul.msk.bf16.gmra.mxu1 %vm1983_vm14, %v16280_v23 }
 0xa37   :  { %8124 = vst.msk [vmem:[%s16621_s13 + $0xf0] sm:$0xff] %vm669_vm3, %v8060_v12 }
 0xa3a   :  { %v7877_v33 = vpop.f32.mrf.mxu1 }
 0xa3b   :  { %v7997_v40 = vmul.f32 %v16024_v26, %v7877_v33  ;;  %v17958_v33 = vld [vmem:[#allocation50_spill] sm:$0xff] }
 0xa3d   :  { %v8061_v56 = vadd.f32 %v7997_v40, %v17943_v25 }
 0xa3f   :  { %8125 = vst.msk [vmem:[%s16621_s13 + $0xf8] sm:$0xff] %vm669_vm3, %v8061_v56  ;;  %v17959_v56 = vld [vmem:[#allocation59_spill] sm:$0xff] }
 0xa42   :  { %v7880_v32 = vpop.f32.mrf.mxu1 }
 0xa43   :  { %v7998_v18 = vmul.f32 %v16031_v16, %v7880_v32 }
 0xa45   :  { %v8062_v23 = vadd.f32 %v7998_v18, %v17944_v1  ;;  %8757 = vmatmul.msk.bf16.gmra.mxu1 %vm1983_vm14, %v16283_v15 }
 0xa47   :  { %8126 = vst.msk [vmem:[%s16621_s13 + $0x100] sm:$0xff] %vm669_vm3, %v8062_v23  ;;  %v17960_v23 = vld [vmem:[#allocation51_spill] sm:$0xff] }
 0xa4a   :  { %v7882_v26 = vpop.f32.mrf.mxu1 }
 0xa4b   :  { %v7999_v61 = vmul.f32 %v16031_v16, %v7882_v26 }
 0xa4d   :  { %v8063_v24 = vadd.f32 %v7999_v61, %v17945_v29 }
 0xa4f   :  { %8127 = vst.msk [vmem:[%s16621_s13 + $0x108] sm:$0xff] %vm669_vm3, %v8063_v24  ;;  %v17961_v24 = vld [vmem:[#allocation88_spill] sm:$0xff] }
 0xa52   :  { %v7885_v6 = vpop.f32.mrf.mxu1 }
 0xa53   :  { %v8000_v21 = vmul.f32 %v16031_v16, %v7885_v6 }
 0xa55   :  { %v8064_v15 = vadd.f32 %v8000_v21, %v17946_v51  ;;  %8758 = vmatmul.msk.bf16.gmra.mxu1 %vm1983_vm14, %v16285_v38 }
 0xa57   :  { %8128 = vst.msk [vmem:[%s16621_s13 + $0x110] sm:$0xff] %vm669_vm3, %v8064_v15  ;;  %v17962_v15 = vld [vmem:[#allocation56_spill] sm:$0xff] }
 0xa5a   :  { %v7887_v37 = vpop.f32.mrf.mxu1 }
 0xa5b   :  { %v8001_v57 = vmul.f32 %v16031_v16, %v7887_v37 }
 0xa5d   :  { %v8065_v60 = vadd.f32 %v8001_v57, %v17947_v7 }
 0xa5f   :  { %8129 = vst.msk [vmem:[%s16621_s13 + $0x118] sm:$0xff] %vm669_vm3, %v8065_v60  ;;  %v17963_v60 = vld [vmem:[#allocation27_spill] sm:$0xff] }
 0xa62   :  { %v7890_v46 = vpop.f32.mrf.mxu1 }
 0xa63   :  { %v8002_v35 = vmul.f32 %v16031_v16, %v7890_v46 }
 0xa65   :  { %v8066_v38 = vadd.f32 %v8002_v35, %v17948_v41  ;;  %8759 = vmatmul.msk.bf16.gmra.mxu1 %vm1983_vm14, %v16287_v54 }
 0xa67   :  { %8130 = vst.msk [vmem:[%s16621_s13 + $0x120] sm:$0xff] %vm669_vm3, %v8066_v38  ;;  %v17964_v38 = vld [vmem:[#allocation68_spill] sm:$0xff] }
 0xa6a   :  { %v7892_v11 = vpop.f32.mrf.mxu1 }
 0xa6b   :  { %v8003_v4 = vmul.f32 %v16031_v16, %v7892_v11 }
 0xa6d   :  { %v8067_v3 = vadd.f32 %v8003_v4, %v17949_v53 }
 0xa6f   :  { %8131 = vst.msk [vmem:[%s16621_s13 + $0x128] sm:$0xff] %vm669_vm3, %v8067_v3  ;;  %v17965_v3 = vld [vmem:[#allocation25_spill] sm:$0xff] }
 0xa72   :  { %v7895_v50 = vpop.f32.mrf.mxu1 }
 0xa73   :  { %v8004_v9 = vmul.f32 %v16031_v16, %v7895_v50 }
 0xa75   :  { %v8068_v54 = vadd.f32 %v8004_v9, %v17950_v42  ;;  %8760 = vmatmul.msk.bf16.gmra.mxu1 %vm1983_vm14, %v16290_v59 }
 0xa77   :  { %8132 = vst.msk [vmem:[%s16621_s13 + $0x130] sm:$0xff] %vm669_vm3, %v8068_v54  ;;  %v17966_v54 = vld [vmem:[#allocation63_spill] sm:$0xff] }
 0xa7a   :  { %v7897_v52 = vpop.f32.mrf.mxu1 }
 0xa7b   :  { %v8005_v10 = vmul.f32 %v16031_v16, %v7897_v52 }
 0xa7d   :  { %v8069_v48 = vadd.f32 %v8005_v10, %v17951_v45 }
 0xa7f   :  { %8133 = vst.msk [vmem:[%s16621_s13 + $0x138] sm:$0xff] %vm669_vm3, %v8069_v48  ;;  %v17967_v48 = vld [vmem:[#allocation55_spill] sm:$0xff] }
 0xa82   :  { %v7900_v19 = vpop.f32.mrf.mxu1 }
 0xa83   :  { %v8006_v30 = vmul.f32 %v16031_v16, %v7900_v19 }
 0xa85   :  { %v8070_v59 = vadd.f32 %v8006_v30, %v17952_v13  ;;  %8761 = vmatmul.msk.bf16.gmra.mxu1 %vm1983_vm14, %v16292_v20 }
 0xa87   :  { %8134 = vst.msk [vmem:[%s16621_s13 + $0x140] sm:$0xff] %vm669_vm3, %v8070_v59  ;;  %v17968_v59 = vld [vmem:[#allocation93_spill] sm:$0xff] }
 0xa8a   :  { %v7902_v63 = vpop.f32.mrf.mxu1 }
 0xa8b   :  { %v8007_v5 = vmul.f32 %v16031_v16, %v7902_v63 }
 0xa8d   :  { %v8071_v28 = vadd.f32 %v8007_v5, %v17953_v62 }
 0xa8f   :  { %8135 = vst.msk [vmem:[%s16621_s13 + $0x148] sm:$0xff] %vm669_vm3, %v8071_v28  ;;  %v17969_v28 = vld [vmem:[#allocation45_spill] sm:$0xff] }
 0xa92   :  { %v7905_v0 = vpop.f32.mrf.mxu1 }
 0xa93   :  { %v8008_v34 = vmul.f32 %v16031_v16, %v7905_v0 }
 0xa95   :  { %v8072_v20 = vadd.f32 %v8008_v34, %v17954_v47  ;;  %8762 = vmatmul.msk.bf16.gmra.mxu1 %vm1983_vm14, %v16298_v55 }
 0xa97   :  { %8136 = vst.msk [vmem:[%s16621_s13 + $0x150] sm:$0xff] %vm669_vm3, %v8072_v20  ;;  %v17970_v20 = vld [vmem:[#allocation26_spill] sm:$0xff] }
 0xa9a   :  { %v7907_v58 = vpop.f32.mrf.mxu1 }
 0xa9b   :  { %v8009_v17 = vmul.f32 %v16031_v16, %v7907_v58 }
 0xa9d   :  { %v8073_v49 = vadd.f32 %v8009_v17, %v17955_v14 }
 0xa9f   :  { %8137 = vst.msk [vmem:[%s16621_s13 + $0x158] sm:$0xff] %vm669_vm3, %v8073_v49  ;;  %v17971_v49 = vld [vmem:[#allocation91_spill] sm:$0xff] }
 0xaa2   :  { %v7910_v8 = vpop.f32.mrf.mxu1 }
 0xaa3   :  { %v8010_v39 = vmul.f32 %v16031_v16, %v7910_v8 }
 0xaa5   :  { %v8074_v55 = vadd.f32 %v8010_v39, %v17956_v44  ;;  %8763 = vmatmul.msk.bf16.gmra.mxu1 %vm1983_vm14, %v16302_v27 }
 0xaa7   :  { %8138 = vst.msk [vmem:[%s16621_s13 + $0x160] sm:$0xff] %vm669_vm3, %v8074_v55  ;;  %v17972_v55 = vld [vmem:[#allocation11_spill] sm:$0xff] }
 0xaaa   :  { %v7912_v22 = vpop.f32.mrf.mxu1 }
 0xaab   :  { %v8011_v31 = vmul.f32 %v16031_v16, %v7912_v22 }
 0xaad   :  { %v8075_v36 = vadd.f32 %v8011_v31, %v17957_v2 }
 0xaaf   :  { %8139 = vst.msk [vmem:[%s16621_s13 + $0x168] sm:$0xff] %vm669_vm3, %v8075_v36  ;;  %v17973_v36 = vld [vmem:[#allocation72_spill] sm:$0xff] }
 0xab2   :  { %v7915_v43 = vpop.f32.mrf.mxu1 }
 0xab3   :  { %v8012_v12 = vmul.f32 %v16031_v16, %v7915_v43 }
 0xab5   :  { %v8076_v27 = vadd.f32 %v8012_v12, %v17958_v33 }
 0xab7   :  { %8140 = vst.msk [vmem:[%s16621_s13 + $0x170] sm:$0xff] %vm669_vm3, %v8076_v27 }
 0xaba   :  { %v7917_v40 = vpop.f32.mrf.mxu1 }
 0xabb   :  { %v8013_v25 = vmul.f32 %v16031_v16, %v7917_v40 }
 0xabd   :  { %v8077_v32 = vadd.f32 %v8013_v25, %v17959_v56 }
 0xabf   :  { %8141 = vst.msk [vmem:[%s16621_s13 + $0x178] sm:$0xff] %vm669_vm3, %v8077_v32 }
 0xac2   :  { %v7920_v18 = vpop.f32.mrf.mxu1 }
 0xac3   :  { %v8014_v1 = vmul.f32 %v16031_v16, %v7920_v18 }
 0xac5   :  { %v8078_v26 = vadd.f32 %v8014_v1, %v17960_v23 }
 0xac7   :  { %8142 = vst.msk [vmem:[%s16621_s13 + $0x180] sm:$0xff] %vm669_vm3, %v8078_v26 }
 0xaca   :  { %v7922_v61 = vpop.f32.mrf.mxu1 }
 0xacb   :  { %v8015_v29 = vmul.f32 %v16031_v16, %v7922_v61 }
 0xacd   :  { %v8079_v6 = vadd.f32 %v8015_v29, %v17961_v24 }
 0xacf   :  { %8143 = vst.msk [vmem:[%s16621_s13 + $0x188] sm:$0xff] %vm669_vm3, %v8079_v6 }
 0xad2   :  { %v7925_v21 = vpop.f32.mrf.mxu1 }
 0xad3   :  { %v8016_v51 = vmul.f32 %v16031_v16, %v7925_v21 }
 0xad5   :  { %v8080_v37 = vadd.f32 %v8016_v51, %v17962_v15 }
 0xad7   :  { %8144 = vst.msk [vmem:[%s16621_s13 + $0x190] sm:$0xff] %vm669_vm3, %v8080_v37 }
 0xada   :  { %v7927_v57 = vpop.f32.mrf.mxu1 }
 0xadb   :  { %v8017_v7 = vmul.f32 %v16031_v16, %v7927_v57 }
 0xadd   :  { %v8081_v46 = vadd.f32 %v8017_v7, %v17963_v60 }
 0xadf   :  { %8145 = vst.msk [vmem:[%s16621_s13 + $0x198] sm:$0xff] %vm669_vm3, %v8081_v46 }
 0xae2   :  { %v7930_v35 = vpop.f32.mrf.mxu1 }
 0xae3   :  { %v8018_v41 = vmul.f32 %v16031_v16, %v7930_v35 }
 0xae5   :  { %v8082_v11 = vadd.f32 %v8018_v41, %v17964_v38 }
 0xae7   :  { %8146 = vst.msk [vmem:[%s16621_s13 + $0x1a0] sm:$0xff] %vm669_vm3, %v8082_v11 }
 0xaea   :  { %v7932_v4 = vpop.f32.mrf.mxu1 }
 0xaeb   :  { %v8019_v53 = vmul.f32 %v16031_v16, %v7932_v4 }
 0xaed   :  { %v8083_v50 = vadd.f32 %v8019_v53, %v17965_v3 }
 0xaef   :  { %8147 = vst.msk [vmem:[%s16621_s13 + $0x1a8] sm:$0xff] %vm669_vm3, %v8083_v50 }
 0xaf2   :  { %v7935_v9 = vpop.f32.mrf.mxu1 }
 0xaf3   :  { %v8020_v42 = vmul.f32 %v16031_v16, %v7935_v9 }
 0xaf5   :  { %v8084_v52 = vadd.f32 %v8020_v42, %v17966_v54 }
 0xaf7   :  { %8148 = vst.msk [vmem:[%s16621_s13 + $0x1b0] sm:$0xff] %vm669_vm3, %v8084_v52 }
 0xafa   :  { %v7937_v10 = vpop.f32.mrf.mxu1 }
 0xafb   :  { %v8021_v45 = vmul.f32 %v16031_v16, %v7937_v10 }
 0xafd   :  { %v8085_v19 = vadd.f32 %v8021_v45, %v17967_v48 }
 0xaff   :  { %8149 = vst.msk [vmem:[%s16621_s13 + $0x1b8] sm:$0xff] %vm669_vm3, %v8085_v19 }
 0xb02   :  { %v7940_v30 = vpop.f32.mrf.mxu1 }
 0xb03   :  { %v8022_v13 = vmul.f32 %v16031_v16, %v7940_v30 }
 0xb05   :  { %v8086_v63 = vadd.f32 %v8022_v13, %v17968_v59 }
 0xb07   :  { %8150 = vst.msk [vmem:[%s16621_s13 + $0x1c0] sm:$0xff] %vm669_vm3, %v8086_v63 }
 0xb0a   :  { %v7942_v5 = vpop.f32.mrf.mxu1 }
 0xb0b   :  { %v8023_v62 = vmul.f32 %v16031_v16, %v7942_v5 }
 0xb0d   :  { %v8087_v0 = vadd.f32 %v8023_v62, %v17969_v28 }
 0xb0f   :  { %8151 = vst.msk [vmem:[%s16621_s13 + $0x1c8] sm:$0xff] %vm669_vm3, %v8087_v0 }
 0xb12   :  { %v7945_v34 = vpop.f32.mrf.mxu1 }
 0xb13   :  { %v8024_v47 = vmul.f32 %v16031_v16, %v7945_v34 }
 0xb15   :  { %v8088_v58 = vadd.f32 %v8024_v47, %v17970_v20 }
 0xb17   :  { %8152 = vst.msk [vmem:[%s16621_s13 + $0x1d0] sm:$0xff] %vm669_vm3, %v8088_v58 }
 0xb1a   :  { %v7947_v17 = vpop.f32.mrf.mxu1 }
 0xb1b   :  { %v8025_v14 = vmul.f32 %v16031_v16, %v7947_v17 }
 0xb1d   :  { %v8089_v8 = vadd.f32 %v8025_v14, %v17971_v49 }
 0xb1f   :  { %8153 = vst.msk [vmem:[%s16621_s13 + $0x1d8] sm:$0xff] %vm669_vm3, %v8089_v8 }
 0xb22   :  { %v7950_v39 = vpop.f32.mrf.mxu1 }
 0xb23   :  { %v8026_v44 = vmul.f32 %v16031_v16, %v7950_v39 }
 0xb25   :  { %v8090_v22 = vadd.f32 %v8026_v44, %v17972_v55 }
 0xb27   :  { %8154 = vst.msk [vmem:[%s16621_s13 + $0x1e0] sm:$0xff] %vm669_vm3, %v8090_v22 }
 0xb2a   :  { %v7952_v31 = vpop.f32.mrf.mxu1 }
 0xb2b   :  { %v8027_v2 = vmul.f32 %v16031_v16, %v7952_v31 }
 0xb2d   :  { %v8091_v43 = vadd.f32 %v8027_v2, %v17973_v36 }
 0xb2f   :  { %8155 = vst.msk [vmem:[%s16621_s13 + $0x1e8] sm:$0xff] %vm669_vm3, %v8091_v43 }
 0xb30   :  { %8162 = vsyncpa [#allocation4], 1 }

</bundles_post_ra>
